<compile_context>
chip_gen: v6e
topology: v6e:2x2x1
jax: 0.10.0
libtpu: 0.0.40
codegen_flags: <defaults>
</compile_context>

<pallas_src>
import math

import jax
import jax.numpy as jnp
from jax.experimental import pallas as pl
from jax.experimental.pallas import tpu as pltpu


F_IN_PAD = 128    # input feature dim padded 20 -> 128 (lane-dense layer-0 load)
F_OUT_PAD = 128   # output dim padded 61 -> 128 (unmasked lane-dense stores)


def _round_up(x, m):
    return ((x + m - 1) // m) * m


def _doanet_kernel(x_ref,
                   w0, b0, w1, b1, w2, b2, w3, b3, w4, b4, w5, b5,
                   o_ref):
    """Fused MLP for one batch tile: 5x (Linear + ReLU) then Linear + Sigmoid."""

    def layer(h, w_ref, b_ref):
        # bf16 x bf16 on the MXU with f32 accumulation; bias-add + ReLU in f32
        # (VPU), then carry the activation in bf16 to the next matmul.
        y = jnp.dot(h, w_ref[...], preferred_element_type=jnp.float32)
        return jnp.maximum(y + b_ref[...], 0.0).astype(jnp.bfloat16)

    h = x_ref[...].astype(jnp.bfloat16)
    h = layer(h, w0, b0)
    h = layer(h, w1, b1)
    h = layer(h, w2, b2)
    h = layer(h, w3, b3)
    h = layer(h, w4, b4)
    z = jnp.dot(h, w5[...], preferred_element_type=jnp.float32) + b5[...]
    # Sigmoid: exp on the EUP, divide via the EUP's approximate reciprocal
    # (keeps VALU slots free). Finite for all f32 z (exp->inf gives 0).
    o_ref[...] = pl.reciprocal(1.0 + jnp.exp(-z), approx=True)


def _choose_tb(batch, *, max_tb=256, min_tiles=2):
    """Batch-tile height: multiple of 8, <= max_tb, >= min_tiles tiles when possible,
    and never rounds the batch up by (nearly) a whole large tile."""
    b8 = _round_up(batch, 8)
    if b8 <= 8:
        return 8
    return min(max_tb, _round_up(pl.cdiv(b8, min_tiles), 8))


def _vmem_limit_bytes(weight_bytes, tb):
    """Explicit scoped-VMEM budget, clamped to half the physical VMEM."""
    need = weight_bytes
    need += 2 * tb * F_IN_PAD * 4           # double-buffered input tiles
    need += 2 * tb * F_OUT_PAD * 4          # double-buffered output tiles
    need += 2 * tb * 2048 * 4               # widest live intermediate + headroom
    need += 4 * 1024 * 1024                 # compiler scratch / spill slack
    cap = 64 * 1024 * 1024                  # conservative (v7x physical VMEM)
    try:
        cap = int(getattr(pltpu.get_tpu_info(), "vmem_capacity_bytes", cap))
    except Exception:
        pass
    return min(max(need, 32 * 1024 * 1024), cap // 2)


def prepare_doanet_params(params):
    """Pad layer-0 rows to F_IN_PAD and last-layer cols to F_OUT_PAD (zeros),
    reshape biases to (1, fo), and cast weights to bf16 for the MXU."""
    prepared = []
    n = len(params)
    for idx, (w, b) in enumerate(params):
        w = jnp.asarray(w, jnp.float32)
        b = jnp.asarray(b, jnp.float32).reshape(1, -1)
        if idx == 0 and w.shape[0] < F_IN_PAD:
            w = jnp.pad(w, ((0, F_IN_PAD - w.shape[0]), (0, 0)))
        if idx == n - 1 and w.shape[1] < F_OUT_PAD:
            pad = F_OUT_PAD - w.shape[1]
            w = jnp.pad(w, ((0, 0), (0, pad)))
            b = jnp.pad(b, ((0, 0), (0, pad)))
        prepared.append((w.astype(jnp.bfloat16), b))
    return prepared


def doanet_forward(x, prepared_params, *, output_size=61, max_tb=256):
    """x: (B, input_size) f32; prepared_params: output of prepare_doanet_params."""
    B, in_size = x.shape

    # Zero-pad the feature dim so the layer-0 tile loads unmasked.
    if in_size < F_IN_PAD:
        x = jnp.pad(x, ((0, 0), (0, F_IN_PAD - in_size)))

    # Adaptive batch tiling (multiple of 8, bounded waste, >=2 tiles when possible).
    tb = _choose_tb(B, max_tb=max_tb)
    b_pad = _round_up(B, tb)
    if b_pad != B:
        x = jnp.pad(x, ((0, b_pad - B), (0, 0)))
    grid = (b_pad // tb,)

    # Activations: pipelined per batch tile. Weights/biases: whole arrays kept
    # resident in VMEM (single copy, no per-step DMA, no double buffering).
    weight_spec = pl.BlockSpec(memory_space=pltpu.MemorySpace.VMEM)
    in_specs = [pl.BlockSpec((tb, F_IN_PAD), lambda i: (i, 0))]
    flat_args = [x]
    weight_bytes = 0
    for (w, b) in prepared_params:
        flat_args += [w, b]
        in_specs += [weight_spec, weight_spec]
        weight_bytes += w.size * w.dtype.itemsize + b.size * b.dtype.itemsize

    flops = 2 * b_pad * sum(int(w.shape[0]) * int(w.shape[1])
                            for w, _ in prepared_params)
    bytes_accessed = (weight_bytes
                      + x.size * x.dtype.itemsize
                      + b_pad * F_OUT_PAD * 4)

    out = pl.pallas_call(
        _doanet_kernel,
        out_shape=jax.ShapeDtypeStruct((b_pad, F_OUT_PAD), jnp.float32),
        grid=grid,
        in_specs=in_specs,
        out_specs=pl.BlockSpec((tb, F_OUT_PAD), lambda i: (i, 0)),
        compiler_params=pltpu.CompilerParams(
            dimension_semantics=("parallel",),   # batch tiles shard across TCs
            vmem_limit_bytes=_vmem_limit_bytes(weight_bytes, tb),
        ),
        cost_estimate=pl.CostEstimate(
            flops=int(flops),
            transcendentals=int(2 * b_pad * F_OUT_PAD),   # exp + recip
            bytes_accessed=int(bytes_accessed),
        ),
    )(*flat_args)
    return out[:B, :output_size]


def init_doanet_params(key, input_size=20,
                       hidden_sizes=(2048, 1024, 512, 256, 128),
                       output_size=61):
    """nn.Linear-style U(-1/sqrt(fan_in), +1/sqrt(fan_in)) init, f32."""
    sizes = [input_size] + list(hidden_sizes) + [output_size]
    params = []
    for fan_in, fan_out in zip(sizes[:-1], sizes[1:]):
        key, kw, kb = jax.random.split(key, 3)
        bound = 1.0 / math.sqrt(fan_in)
        w = jax.random.uniform(kw, (fan_in, fan_out), jnp.float32, -bound, bound)
        b = jax.random.uniform(kb, (fan_out,), jnp.float32, -bound, bound)
        params.append((w, b))
    return params


if __name__ == "__main__":
    key = jax.random.PRNGKey(0)
    k_params, k_x = jax.random.split(key)

    NUMBER_ELEMENT = 20   # input_size of DOANet
    OUTPUT_SIZE = 61
    BATCH = 8

    params = init_doanet_params(k_params, input_size=NUMBER_ELEMENT,
                                output_size=OUTPUT_SIZE)
    prepared = prepare_doanet_params(params)
    x = jax.random.normal(k_x, (BATCH, NUMBER_ELEMENT), dtype=jnp.float32)

    out = doanet_forward(x, prepared, output_size=OUTPUT_SIZE)
    out = jax.block_until_ready(out)

    # Pure-JAX reference with matching numerics (bf16 weights & matmul inputs,
    # f32 accumulation, f32 bias/ReLU/sigmoid) on the original, unpadded params.
    h = x
    for (w, b) in params[:-1]:
        h = jnp.maximum(
            jnp.dot(h.astype(jnp.bfloat16), w.astype(jnp.bfloat16),
                    preferred_element_type=jnp.float32) + b, 0.0)
    w, b = params[-1]
    ref = jax.nn.sigmoid(
        jnp.dot(h.astype(jnp.bfloat16), w.astype(jnp.bfloat16),
                preferred_element_type=jnp.float32) + b)

    assert out.shape == (BATCH, OUTPUT_SIZE)
    assert bool(jnp.all(jnp.isfinite(out)))
    assert bool(jnp.max(jnp.abs(out - ref)) < 1e-2)

    print("KERNEL_OK")
</pallas_src>

<mosaic_0001>
module attributes {stable_mosaic.version = 11 : i64} {
  func.func @_doanet_kernel(%arg0: i32, %arg1: memref<8x128xf32, #tpu.memory_space<vmem>>, %arg2: memref<128x2048xbf16, #tpu.memory_space<vmem>>, %arg3: memref<1x2048xf32, #tpu.memory_space<vmem>>, %arg4: memref<2048x1024xbf16, #tpu.memory_space<vmem>>, %arg5: memref<1x1024xf32, #tpu.memory_space<vmem>>, %arg6: memref<1024x512xbf16, #tpu.memory_space<vmem>>, %arg7: memref<1x512xf32, #tpu.memory_space<vmem>>, %arg8: memref<512x256xbf16, #tpu.memory_space<vmem>>, %arg9: memref<1x256xf32, #tpu.memory_space<vmem>>, %arg10: memref<256x128xbf16, #tpu.memory_space<vmem>>, %arg11: memref<1x128xf32, #tpu.memory_space<vmem>>, %arg12: memref<128x128xbf16, #tpu.memory_space<vmem>>, %arg13: memref<1x128xf32, #tpu.memory_space<vmem>>, %arg14: memref<8x128xf32, #tpu.memory_space<vmem>>) attributes {dimension_semantics = [#tpu.dimension_semantics<parallel>], iteration_bounds = array<i64: 1>, scalar_prefetch = 0 : i64, scratch_operands = 0 : i64, tpu.core_type = #tpu.core_type<tc>, window_params = [{transform_indices = @transform_0, window_bounds = array<i64: 8, 128>}, {pipeline_mode = #tpu.pipeline_mode<synchronous>, transform_indices = @transform_1, window_bounds = array<i64: 128, 2048>}, {pipeline_mode = #tpu.pipeline_mode<synchronous>, transform_indices = @transform_2, window_bounds = array<i64: 1, 2048>}, {pipeline_mode = #tpu.pipeline_mode<synchronous>, transform_indices = @transform_3, window_bounds = array<i64: 2048, 1024>}, {pipeline_mode = #tpu.pipeline_mode<synchronous>, transform_indices = @transform_4, window_bounds = array<i64: 1, 1024>}, {pipeline_mode = #tpu.pipeline_mode<synchronous>, transform_indices = @transform_5, window_bounds = array<i64: 1024, 512>}, {pipeline_mode = #tpu.pipeline_mode<synchronous>, transform_indices = @transform_6, window_bounds = array<i64: 1, 512>}, {pipeline_mode = #tpu.pipeline_mode<synchronous>, transform_indices = @transform_7, window_bounds = array<i64: 512, 256>}, {pipeline_mode = #tpu.pipeline_mode<synchronous>, transform_indices = @transform_8, window_bounds = array<i64: 1, 256>}, {pipeline_mode = #tpu.pipeline_mode<synchronous>, transform_indices = @transform_9, window_bounds = array<i64: 256, 128>}, {pipeline_mode = #tpu.pipeline_mode<synchronous>, transform_indices = @transform_10, window_bounds = array<i64: 1, 128>}, {pipeline_mode = #tpu.pipeline_mode<synchronous>, transform_indices = @transform_11, window_bounds = array<i64: 128, 128>}, {pipeline_mode = #tpu.pipeline_mode<synchronous>, transform_indices = @transform_12, window_bounds = array<i64: 1, 128>}, {transform_indices = @transform_13, window_bounds = array<i64: 8, 128>}]} {
    %c0 = arith.constant 0 : index
    %c0_0 = arith.constant 0 : index
    %0 = vector.load %arg1[%c0, %c0_0] : memref<8x128xf32, #tpu.memory_space<vmem>>, vector<8x128xf32>
    %1 = arith.truncf %0 : vector<8x128xf32> to vector<8x128xbf16>
    %c0_1 = arith.constant 0 : index
    %c0_2 = arith.constant 0 : index
    %2 = vector.load %arg2[%c0_1, %c0_2] : memref<128x2048xbf16, #tpu.memory_space<vmem>>, vector<128x2048xbf16>
    %cst = arith.constant dense<0.000000e+00> : vector<8x2048xf32>
    %3 = tpu.matmul %1, %2, %cst {dimension_numbers = #tpu.dot_dimension_numbers<[1], [0], [0], [1], [0, 0, 1, 1], [], []>} : vector<8x128xbf16>, vector<128x2048xbf16>, vector<8x2048xf32> -> vector<8x2048xf32>
    %c0_3 = arith.constant 0 : index
    %c0_4 = arith.constant 0 : index
    %4 = vector.load %arg3[%c0_3, %c0_4] : memref<1x2048xf32, #tpu.memory_space<vmem>>, vector<1x2048xf32>
    %5 = vector.broadcast %4 : vector<1x2048xf32> to vector<8x2048xf32>
    %6 = arith.addf %3, %5 : vector<8x2048xf32>
    %cst_5 = arith.constant 0.000000e+00 : f32
    %7 = vector.broadcast %cst_5 : f32 to vector<8x2048xf32>
    %8 = arith.maximumf %6, %7 : vector<8x2048xf32>
    %9 = arith.truncf %8 : vector<8x2048xf32> to vector<8x2048xbf16>
    %c0_6 = arith.constant 0 : index
    %c0_7 = arith.constant 0 : index
    %10 = vector.load %arg4[%c0_6, %c0_7] : memref<2048x1024xbf16, #tpu.memory_space<vmem>>, vector<2048x1024xbf16>
    %cst_8 = arith.constant dense<0.000000e+00> : vector<8x1024xf32>
    %11 = tpu.matmul %9, %10, %cst_8 {dimension_numbers = #tpu.dot_dimension_numbers<[1], [0], [0], [1], [0, 0, 1, 1], [], []>} : vector<8x2048xbf16>, vector<2048x1024xbf16>, vector<8x1024xf32> -> vector<8x1024xf32>
    %c0_9 = arith.constant 0 : index
    %c0_10 = arith.constant 0 : index
    %12 = vector.load %arg5[%c0_9, %c0_10] : memref<1x1024xf32, #tpu.memory_space<vmem>>, vector<1x1024xf32>
    %13 = vector.broadcast %12 : vector<1x1024xf32> to vector<8x1024xf32>
    %14 = arith.addf %11, %13 : vector<8x1024xf32>
    %cst_11 = arith.constant 0.000000e+00 : f32
    %15 = vector.broadcast %cst_11 : f32 to vector<8x1024xf32>
    %16 = arith.maximumf %14, %15 : vector<8x1024xf32>
    %17 = arith.truncf %16 : vector<8x1024xf32> to vector<8x1024xbf16>
    %c0_12 = arith.constant 0 : index
    %c0_13 = arith.constant 0 : index
    %18 = vector.load %arg6[%c0_12, %c0_13] : memref<1024x512xbf16, #tpu.memory_space<vmem>>, vector<1024x512xbf16>
    %cst_14 = arith.constant dense<0.000000e+00> : vector<8x512xf32>
    %19 = tpu.matmul %17, %18, %cst_14 {dimension_numbers = #tpu.dot_dimension_numbers<[1], [0], [0], [1], [0, 0, 1, 1], [], []>} : vector<8x1024xbf16>, vector<1024x512xbf16>, vector<8x512xf32> -> vector<8x512xf32>
    %c0_15 = arith.constant 0 : index
    %c0_16 = arith.constant 0 : index
    %20 = vector.load %arg7[%c0_15, %c0_16] : memref<1x512xf32, #tpu.memory_space<vmem>>, vector<1x512xf32>
    %21 = vector.broadcast %20 : vector<1x512xf32> to vector<8x512xf32>
    %22 = arith.addf %19, %21 : vector<8x512xf32>
    %cst_17 = arith.constant 0.000000e+00 : f32
    %23 = vector.broadcast %cst_17 : f32 to vector<8x512xf32>
    %24 = arith.maximumf %22, %23 : vector<8x512xf32>
    %25 = arith.truncf %24 : vector<8x512xf32> to vector<8x512xbf16>
    %c0_18 = arith.constant 0 : index
    %c0_19 = arith.constant 0 : index
    %26 = vector.load %arg8[%c0_18, %c0_19] : memref<512x256xbf16, #tpu.memory_space<vmem>>, vector<512x256xbf16>
    %cst_20 = arith.constant dense<0.000000e+00> : vector<8x256xf32>
    %27 = tpu.matmul %25, %26, %cst_20 {dimension_numbers = #tpu.dot_dimension_numbers<[1], [0], [0], [1], [0, 0, 1, 1], [], []>} : vector<8x512xbf16>, vector<512x256xbf16>, vector<8x256xf32> -> vector<8x256xf32>
    %c0_21 = arith.constant 0 : index
    %c0_22 = arith.constant 0 : index
    %28 = vector.load %arg9[%c0_21, %c0_22] : memref<1x256xf32, #tpu.memory_space<vmem>>, vector<1x256xf32>
    %29 = vector.broadcast %28 : vector<1x256xf32> to vector<8x256xf32>
    %30 = arith.addf %27, %29 : vector<8x256xf32>
    %cst_23 = arith.constant 0.000000e+00 : f32
    %31 = vector.broadcast %cst_23 : f32 to vector<8x256xf32>
    %32 = arith.maximumf %30, %31 : vector<8x256xf32>
    %33 = arith.truncf %32 : vector<8x256xf32> to vector<8x256xbf16>
    %c0_24 = arith.constant 0 : index
    %c0_25 = arith.constant 0 : index
    %34 = vector.load %arg10[%c0_24, %c0_25] : memref<256x128xbf16, #tpu.memory_space<vmem>>, vector<256x128xbf16>
    %cst_26 = arith.constant dense<0.000000e+00> : vector<8x128xf32>
    %35 = tpu.matmul %33, %34, %cst_26 {dimension_numbers = #tpu.dot_dimension_numbers<[1], [0], [0], [1], [0, 0, 1, 1], [], []>} : vector<8x256xbf16>, vector<256x128xbf16>, vector<8x128xf32> -> vector<8x128xf32>
    %c0_27 = arith.constant 0 : index
    %c0_28 = arith.constant 0 : index
    %36 = vector.load %arg11[%c0_27, %c0_28] : memref<1x128xf32, #tpu.memory_space<vmem>>, vector<1x128xf32>
    %37 = vector.broadcast %36 : vector<1x128xf32> to vector<8x128xf32>
    %38 = arith.addf %35, %37 : vector<8x128xf32>
    %cst_29 = arith.constant 0.000000e+00 : f32
    %39 = vector.broadcast %cst_29 : f32 to vector<8x128xf32>
    %40 = arith.maximumf %38, %39 : vector<8x128xf32>
    %41 = arith.truncf %40 : vector<8x128xf32> to vector<8x128xbf16>
    %c0_30 = arith.constant 0 : index
    %c0_31 = arith.constant 0 : index
    %42 = vector.load %arg12[%c0_30, %c0_31] : memref<128x128xbf16, #tpu.memory_space<vmem>>, vector<128x128xbf16>
    %cst_32 = arith.constant dense<0.000000e+00> : vector<8x128xf32>
    %43 = tpu.matmul %41, %42, %cst_32 {dimension_numbers = #tpu.dot_dimension_numbers<[1], [0], [0], [1], [0, 0, 1, 1], [], []>} : vector<8x128xbf16>, vector<128x128xbf16>, vector<8x128xf32> -> vector<8x128xf32>
    %c0_33 = arith.constant 0 : index
    %c0_34 = arith.constant 0 : index
    %44 = vector.load %arg13[%c0_33, %c0_34] : memref<1x128xf32, #tpu.memory_space<vmem>>, vector<1x128xf32>
    %45 = vector.broadcast %44 : vector<1x128xf32> to vector<8x128xf32>
    %46 = arith.addf %43, %45 : vector<8x128xf32>
    %cst_35 = arith.constant 0.000000e+00 : f32
    %47 = vector.broadcast %cst_35 : f32 to vector<8x128xf32>
    %48 = arith.subf %47, %46 : vector<8x128xf32>
    %49 = math.exp %48 : vector<8x128xf32>
    %cst_36 = arith.constant 1.000000e+00 : f32
    %50 = vector.broadcast %cst_36 : f32 to vector<8x128xf32>
    %51 = arith.addf %50, %49 : vector<8x128xf32>
    %52 = tpu.reciprocal %51 {approx = true} : vector<8x128xf32> -> vector<8x128xf32>
    %c0_37 = arith.constant 0 : index
    %c0_38 = arith.constant 0 : index
    %53 = vector.load %arg14[%c0_37, %c0_38] : memref<8x128xf32, #tpu.memory_space<vmem>>, vector<8x128xf32>
    tpu.vector_store %arg14[%c0_37, %c0_38], %52 {strides = array<i32>} : memref<8x128xf32, #tpu.memory_space<vmem>>, vector<8x128xf32>,
    return
  }
  func.func @transform_0(%arg0: i32) -> (i32, i32) {
    %c0_i32 = arith.constant 0 : i32
    %c0_i32_0 = arith.constant 0 : i32
    return %arg0, %c0_i32 : i32, i32
  }
  func.func @transform_1(%arg0: i32) -> (i32, i32) {
    %c0_i32 = arith.constant 0 : i32
    %c0_i32_0 = arith.constant 0 : i32
    %c0_i32_1 = arith.constant 0 : i32
    return %c0_i32, %c0_i32_0 : i32, i32
  }
  func.func @transform_2(%arg0: i32) -> (i32, i32) {
    %c0_i32 = arith.constant 0 : i32
    %c0_i32_0 = arith.constant 0 : i32
    %c0_i32_1 = arith.constant 0 : i32
    return %c0_i32, %c0_i32_0 : i32, i32
  }
  func.func @transform_3(%arg0: i32) -> (i32, i32) {
    %c0_i32 = arith.constant 0 : i32
    %c0_i32_0 = arith.constant 0 : i32
    %c0_i32_1 = arith.constant 0 : i32
    return %c0_i32, %c0_i32_0 : i32, i32
  }
  func.func @transform_4(%arg0: i32) -> (i32, i32) {
    %c0_i32 = arith.constant 0 : i32
    %c0_i32_0 = arith.constant 0 : i32
    %c0_i32_1 = arith.constant 0 : i32
    return %c0_i32, %c0_i32_0 : i32, i32
  }
  func.func @transform_5(%arg0: i32) -> (i32, i32) {
    %c0_i32 = arith.constant 0 : i32
    %c0_i32_0 = arith.constant 0 : i32
    %c0_i32_1 = arith.constant 0 : i32
    return %c0_i32, %c0_i32_0 : i32, i32
  }
  func.func @transform_6(%arg0: i32) -> (i32, i32) {
    %c0_i32 = arith.constant 0 : i32
    %c0_i32_0 = arith.constant 0 : i32
    %c0_i32_1 = arith.constant 0 : i32
    return %c0_i32, %c0_i32_0 : i32, i32
  }
  func.func @transform_7(%arg0: i32) -> (i32, i32) {
    %c0_i32 = arith.constant 0 : i32
    %c0_i32_0 = arith.constant 0 : i32
    %c0_i32_1 = arith.constant 0 : i32
    return %c0_i32, %c0_i32_0 : i32, i32
  }
  func.func @transform_8(%arg0: i32) -> (i32, i32) {
    %c0_i32 = arith.constant 0 : i32
    %c0_i32_0 = arith.constant 0 : i32
    %c0_i32_1 = arith.constant 0 : i32
    return %c0_i32, %c0_i32_0 : i32, i32
  }
  func.func @transform_9(%arg0: i32) -> (i32, i32) {
    %c0_i32 = arith.constant 0 : i32
    %c0_i32_0 = arith.constant 0 : i32
    %c0_i32_1 = arith.constant 0 : i32
    return %c0_i32, %c0_i32_0 : i32, i32
  }
  func.func @transform_10(%arg0: i32) -> (i32, i32) {
    %c0_i32 = arith.constant 0 : i32
    %c0_i32_0 = arith.constant 0 : i32
    %c0_i32_1 = arith.constant 0 : i32
    return %c0_i32, %c0_i32_0 : i32, i32
  }
  func.func @transform_11(%arg0: i32) -> (i32, i32) {
    %c0_i32 = arith.constant 0 : i32
    %c0_i32_0 = arith.constant 0 : i32
    %c0_i32_1 = arith.constant 0 : i32
    return %c0_i32, %c0_i32_0 : i32, i32
  }
  func.func @transform_12(%arg0: i32) -> (i32, i32) {
    %c0_i32 = arith.constant 0 : i32
    %c0_i32_0 = arith.constant 0 : i32
    %c0_i32_1 = arith.constant 0 : i32
    return %c0_i32, %c0_i32_0 : i32, i32
  }
  func.func @transform_13(%arg0: i32) -> (i32, i32) {
    %c0_i32 = arith.constant 0 : i32
    %c0_i32_0 = arith.constant 0 : i32
    return %arg0, %c0_i32 : i32, i32
  }
}

</mosaic_0001>

<bundles_post_ra>
// kernel: tpu_custom_call.1
= control target key start
LH: loop header
LB: loop body
LE: loop exit
PB: predicated region body
PF: predicated region fallthrough
CT: control target
= control target key end

     0   :  { %18 = vsyncpa [#allocation3], 0  ;;  %s14521_s0 = inlined_call_operand.hbm [shape: f32[8,128], index: 0, kind: input, shape index: {}]   ;;  %s14522_s1 = inlined_call_operand.hbm [shape: bf16[128,2048], index: 1, kind: input, shape index: {}]   ;;  %s14523_s2 = inlined_call_operand.hbm [shape: f32[1,2048], index: 2, kind: input, shape index: {}]   ;;  %s14524_s3 = inlined_call_operand.hbm [shape: bf16[2048,1024], index: 3, kind: input, shape index: {}]   ;;  %s14525_s4 = inlined_call_operand.hbm [shape: f32[1,1024], index: 4, kind: input, shape index: {}]   ;;  %s14526_s5 = inlined_call_operand.hbm [shape: bf16[1024,512], index: 5, kind: input, shape index: {}]   ;;  %s14527_s6 = inlined_call_operand.hbm [shape: f32[1,512], index: 6, kind: input, shape index: {}]   ;;  %s14528_s7 = inlined_call_operand.hbm [shape: bf16[512,256], index: 7, kind: input, shape index: {}]   ;;  %s14529_s8 = inlined_call_operand.hbm [shape: f32[1,256], index: 8, kind: input, shape index: {}]   ;;  %s14530_s9 = inlined_call_operand.hbm [shape: bf16[256,128], index: 9, kind: input, shape index: {}]   ;;  %s14531_s10 = inlined_call_operand.hbm [shape: f32[1,128], index: 10, kind: input, shape index: {}]   ;;  %s14532_s11 = inlined_call_operand.hbm [shape: bf16[128,128], index: 11, kind: input, shape index: {}]   ;;  %s14533_s12 = inlined_call_operand.hbm [shape: f32[1,128], index: 12, kind: input, shape index: {}]   ;;  %s14534_s13 = inlined_call_operand.hbm [shape: f32[8,128], index: 13, kind: output, shape index: {}]  }
   0x1   :  { %19 = vsyncpa [#allocation6], 0 }
   0x2   :  { %20 = vsyncpa [#allocation9], 0 }
   0x3   :  { %21 = vsyncpa [#allocation12], 0 }
   0x4   :  { %22 = vsyncpa [#allocation15], 0 }
   0x5   :  { %23 = vsyncpa [#allocation18], 0 }
   0x6   :  { %24 = vsyncpa [#allocation21], 0 }
   0x7   :  { %25 = vsyncpa [#allocation4], 0  ;;  %s14009_s25 = smov [#allocation5]  }
   0x8   :  { %s41_s26 = sshll.u32 %s14009_s25, 4  ;;  %s42_s26 = int_to_ptr.vmem [resolvable:$true] %s41_s26 }
   0x9   :  { %s13721_s27 = scalar_lea.vmem %s42_s26, 16384  ;;  %p13726_p1 = scmp.lt.s32.totalorder %s42_s26, %s42_s26 }
   0xa   :  { %p13722_p0 = scmp.ne.s32.totalorder %s42_s26, %s13721_s27  ;;  %p13727_p2 = scmp.lt.s32.totalorder %s13721_s27, %s13721_s27 }
   0xc   :  { %p13728_p3 = por %p13727_p2, %p13726_p1 }
   0xe   :  { %p13729_p4 = pnand %p13728_p3, %p13722_p0 }
  0x10   :  { %13732 = shalt.err (!%p13729_p4)
}
  0x11   :  { %s14010_s28 = smov 1024   ;;  %s14011_s29 = smov 64  }
  0x12   :  { %47 = dma.hbm_to_vmem [thread:$0]  %s14522_s1, 16384, %s42_s26, [#allocation6], %s14010_s28, %s14010_s28, %s14011_s29  }
  0x13   :  { %s14012_s15 = smov [#allocation8]  }
  0x14   :  { %s63_s16 = sshll.u32 %s14012_s15, 4  ;;  %s64_s16 = int_to_ptr.vmem [resolvable:$true] %s63_s16 }
  0x15   :  { %s13741_s17 = scalar_lea.vmem %s64_s16, 131072  ;;  %p13746_p6 = scmp.lt.s32.totalorder %s64_s16, %s64_s16 }
  0x16   :  { %p13742_p5 = scmp.ne.s32.totalorder %s64_s16, %s13741_s17  ;;  %p13747_p7 = scmp.lt.s32.totalorder %s13741_s17, %s13741_s17 }
  0x18   :  { %p13748_p8 = por %p13747_p7, %p13746_p6 }
  0x1a   :  { %p13749_p9 = pnand %p13748_p8, %p13742_p5 }
  0x1c   :  { %13752 = shalt.err (!%p13749_p9)
}
  0x1d   :  { %s14013_s18 = smov 512   ;;  %s14014_s19 = smov 32  }
  0x1e   :  { %69 = dma.hbm_to_vmem [thread:$0]  %s14524_s3, 131072, %s64_s16, [#allocation9], %s14013_s18, %s14013_s18, %s14014_s19  }
  0x1f   :  { %s14015_s22 = smov [#allocation11]  }
  0x20   :  { %s85_s23 = sshll.u32 %s14015_s22, 4  ;;  %s86_s23 = int_to_ptr.vmem [resolvable:$true] %s85_s23 }
  0x21   :  { %s13761_s1 = scalar_lea.vmem %s86_s23, 32768  ;;  %p13766_p11 = scmp.lt.s32.totalorder %s86_s23, %s86_s23 }
  0x22   :  { %p13762_p10 = scmp.ne.s32.totalorder %s86_s23, %s13761_s1  ;;  %p13767_p12 = scmp.lt.s32.totalorder %s13761_s1, %s13761_s1 }
  0x24   :  { %p13768_p13 = por %p13767_p12, %p13766_p11 }
  0x26   :  { %p13769_p0 = pnand %p13768_p13, %p13762_p10 }
  0x28   :  { %13772 = shalt.err (!%p13769_p0)
}
  0x29   :  { %s14016_s24 = smov 256   ;;  %s14017_s25 = smov 16  }
  0x2a   :  { %91 = dma.hbm_to_vmem [thread:$0]  %s14526_s5, 32768, %s86_s23, [#allocation12], %s14016_s24, %s14016_s24, %s14017_s25  }
  0x2b   :  { %s14018_s28 = smov [#allocation14]  }
  0x2c   :  { %s107_s30 = sshll.u32 %s14018_s28, 4  ;;  %s108_s30 = int_to_ptr.vmem [resolvable:$true] %s107_s30 }
  0x2d   :  { %s13781_s3 = scalar_lea.vmem %s108_s30, 8192  ;;  %p13786_p2 = scmp.lt.s32.totalorder %s108_s30, %s108_s30 }
  0x2e   :  { %p13782_p1 = scmp.ne.s32.totalorder %s108_s30, %s13781_s3  ;;  %p13787_p3 = scmp.lt.s32.totalorder %s13781_s3, %s13781_s3 }
  0x30   :  { %p13788_p4 = por %p13787_p3, %p13786_p2 }
  0x32   :  { %p13789_p5 = pnand %p13788_p4, %p13782_p1 }
  0x34   :  { %13792 = shalt.err (!%p13789_p5)
}
  0x35   :  { %s14019_s14 = smov 128   ;;  %s14020_s15 = smov 8  }
  0x36   :  { %113 = dma.hbm_to_vmem [thread:$0]  %s14528_s7, 8192, %s108_s30, [#allocation15], %s14019_s14, %s14019_s14, %s14020_s15  }
  0x37   :  { %s14021_s18 = smov [#allocation17]   ;;  %s14022_s5 = smov [#allocation20]  }
  0x38   :  { %s129_s19 = sshll.u32 %s14021_s18, 4  ;;  %s151_s20 = sshll.u32 %s14022_s5, 4  ;;  %s130_s19 = int_to_ptr.vmem [resolvable:$true] %s129_s19  ;;  %s152_s20 = int_to_ptr.vmem [resolvable:$true] %s151_s20 }
  0x39   :  { %s13801_s21 = scalar_lea.vmem %s130_s19, 2048  ;;  %p13806_p7 = scmp.lt.s32.totalorder %s130_s19, %s130_s19 }
  0x3a   :  { %p13802_p6 = scmp.ne.s32.totalorder %s130_s19, %s13801_s21  ;;  %p13807_p8 = scmp.lt.s32.totalorder %s13801_s21, %s13801_s21 }
  0x3c   :  { %p13808_p9 = por %p13807_p8, %p13806_p7 }
  0x3e   :  { %p13809_p10 = pnand %p13808_p9, %p13802_p6 }
  0x40   :  { %13812 = shalt.err (!%p13809_p10)
}
  0x41   :  { %s14023_s22 = smov 4   ;;  %s13821_s7 = scalar_lea.vmem %s152_s20, 1024 }
  0x42   :  { %135 = dma.hbm_to_vmem [thread:$0]  %s14530_s9, 2048, %s130_s19, [#allocation18], %s14011_s29, %s14011_s29, %s14023_s22  }
  0x43   :  { %p13822_p11 = scmp.ne.s32.totalorder %s152_s20, %s13821_s7  ;;  %p13826_p12 = scmp.lt.s32.totalorder %s152_s20, %s152_s20 }
  0x44   :  { %p13827_p13 = scmp.lt.s32.totalorder %s13821_s7, %s13821_s7 }
  0x46   :  { %p13828_p0 = por %p13827_p13, %p13826_p12 }
  0x48   :  { %p13829_p1 = pnand %p13828_p0, %p13822_p11 }
  0x4a   :  { %13832 = shalt.err (!%p13829_p1)
}
  0x4b   :  { %157 = dma.hbm_to_vmem [thread:$0]  %s14532_s11, 1024, %s152_s20, [#allocation21], %s14011_s29, %s14011_s29, %s14023_s22  }
  0x4c   :  { %s14024_s26 = smov [#allocation2]   ;;  %s14025_s28 = smov [#allocation7]  }
  0x4d   :  { %s32_s27 = sshll.u32 %s14024_s26, 4  ;;  %s54_s30 = sshll.u32 %s14025_s28, 4  ;;  %s33_s27 = int_to_ptr.vmem [resolvable:$true] %s32_s27  ;;  %s55_s30 = int_to_ptr.vmem [resolvable:$true] %s54_s30 }
  0x4e   :  { %s13841_s9 = scalar_lea.vmem %s33_s27, 128  ;;  %p13846_p3 = scmp.lt.s32.totalorder %s33_s27, %s33_s27 }
  0x4f   :  { %p13842_p2 = scmp.ne.s32.totalorder %s33_s27, %s13841_s9  ;;  %p13847_p4 = scmp.lt.s32.totalorder %s13841_s9, %s13841_s9 }
  0x51   :  { %p13848_p5 = por %p13847_p4, %p13846_p3 }
  0x53   :  { %p13849_p6 = pnand %p13848_p5, %p13842_p2 }
  0x55   :  { %13852 = shalt.err (!%p13849_p6)
}
  0x56   :  { %35 = dma.hbm_to_vmem [thread:$0]  %s14521_s0, 128, %s33_s27, [#allocation3]  }
  0x57   :  { %s13861_s15 = scalar_lea.vmem %s55_s30, 256  ;;  %p13866_p8 = scmp.lt.s32.totalorder %s55_s30, %s55_s30 }
  0x58   :  { %p13862_p7 = scmp.ne.s32.totalorder %s55_s30, %s13861_s15  ;;  %p13867_p9 = scmp.lt.s32.totalorder %s13861_s15, %s13861_s15 }
  0x5a   :  { %p13868_p10 = por %p13867_p9, %p13866_p8 }
  0x5c   :  { %p13869_p11 = pnand %p13868_p10, %p13862_p7 }
  0x5e   :  { %13872 = shalt.err (!%p13869_p11)
}
  0x5f   :  { %57 = dma.hbm_to_vmem [thread:$0]  %s14523_s2, 256, %s55_s30, [#allocation6]  }
  0x60   :  { %s14026_s16 = smov [#allocation10]   ;;  %s14027_s18 = smov [#allocation13]  }
  0x61   :  { %s76_s17 = sshll.u32 %s14026_s16, 4  ;;  %s98_s19 = sshll.u32 %s14027_s18, 4  ;;  %s77_s17 = int_to_ptr.vmem [resolvable:$true] %s76_s17  ;;  %s99_s19 = int_to_ptr.vmem [resolvable:$true] %s98_s19 }
  0x62   :  { %s13881_s5 = scalar_lea.vmem %s77_s17, 128  ;;  %p13886_p13 = scmp.lt.s32.totalorder %s77_s17, %s77_s17 }
  0x63   :  { %p13882_p12 = scmp.ne.s32.totalorder %s77_s17, %s13881_s5  ;;  %p13887_p0 = scmp.lt.s32.totalorder %s13881_s5, %s13881_s5 }
  0x65   :  { %p13888_p1 = por %p13887_p0, %p13886_p13 }
  0x67   :  { %p13889_p2 = pnand %p13888_p1, %p13882_p12 }
  0x69   :  { %13892 = shalt.err (!%p13889_p2)
}
  0x6a   :  { %79 = dma.hbm_to_vmem [thread:$0]  %s14525_s4, 128, %s77_s17, [#allocation9]  }
  0x6b   :  { %s13901_s21 = scalar_lea.vmem %s99_s19, 64  ;;  %p13906_p4 = scmp.lt.s32.totalorder %s99_s19, %s99_s19 }
  0x6c   :  { %p13902_p3 = scmp.ne.s32.totalorder %s99_s19, %s13901_s21  ;;  %p13907_p5 = scmp.lt.s32.totalorder %s13901_s21, %s13901_s21 }
  0x6e   :  { %p13908_p6 = por %p13907_p5, %p13906_p4 }
  0x70   :  { %p13909_p7 = pnand %p13908_p6, %p13902_p3 }
  0x72   :  { %13912 = shalt.err (!%p13909_p7)
}
  0x73   :  { %101 = dma.hbm_to_vmem [thread:$0]  %s14527_s6, 64, %s99_s19, [#allocation12]  }
  0x74   :  { %s14028_s23 = smov [#allocation16]   ;;  %s14029_s7 = smov [#allocation19]  }
  0x75   :  { %s120_s1 = sshll.u32 %s14028_s23, 4  ;;  %s142_s24 = sshll.u32 %s14029_s7, 4  ;;  %s121_s1 = int_to_ptr.vmem [resolvable:$true] %s120_s1  ;;  %s143_s24 = int_to_ptr.vmem [resolvable:$true] %s142_s24 }
  0x76   :  { %s13921_s25 = scalar_lea.vmem %s121_s1, 32  ;;  %p13926_p9 = scmp.lt.s32.totalorder %s121_s1, %s121_s1 }
  0x77   :  { %p13922_p8 = scmp.ne.s32.totalorder %s121_s1, %s13921_s25  ;;  %p13927_p10 = scmp.lt.s32.totalorder %s13921_s25, %s13921_s25 }
  0x79   :  { %p13928_p11 = por %p13927_p10, %p13926_p9 }
  0x7b   :  { %p13929_p12 = pnand %p13928_p11, %p13922_p8 }
  0x7d   :  { %13932 = shalt.err (!%p13929_p12)
}
  0x7e   :  { %123 = dma.hbm_to_vmem [thread:$0]  %s14529_s8, 32, %s121_s1, [#allocation15]  }
  0x7f   :  { %s13941_s27 = scalar_lea.vmem %s143_s24, 16  ;;  %s13945_s6 = scalar_lea.vmem %s143_s24, 32 }
  0x80   :  { %p13942_p13 = scmp.ne.s32.totalorder %s143_s24, %s13941_s27  ;;  %p13946_p0 = scmp.lt.s32.totalorder %s143_s24, %s143_s24 }
  0x81   :  { %p13947_p1 = scmp.lt.s32.totalorder %s13945_s6, %s13941_s27 }
  0x83   :  { %p13948_p2 = por %p13947_p1, %p13946_p0 }
  0x85   :  { %p13949_p3 = pnand %p13948_p2, %p13942_p13 }
  0x87   :  { %13952 = shalt.err (!%p13949_p3)
}
  0x88   :  { %145 = dma.hbm_to_vmem [thread:$0]  %s14531_s10, 16, %s143_s24, [#allocation18]  }
  0x89   :  { %s14030_s9 = smov [#allocation22]  }
  0x8a   :  { %s164_s3 = sshll.u32 %s14030_s9, 4  ;;  %s165_s3 = int_to_ptr.vmem [resolvable:$true] %s164_s3 }
  0x8b   :  { %s13961_s14 = scalar_lea.vmem %s165_s3, 16  ;;  %s13965_s15 = scalar_lea.vmem %s165_s3, 32 }
  0x8c   :  { %p13962_p4 = scmp.ne.s32.totalorder %s165_s3, %s13961_s14  ;;  %p13966_p5 = scmp.lt.s32.totalorder %s165_s3, %s165_s3 }
  0x8d   :  { %p13967_p6 = scmp.lt.s32.totalorder %s13965_s15, %s13961_s14 }
  0x8f   :  { %p13968_p7 = por %p13967_p6, %p13966_p5 }
  0x91   :  { %p13969_p8 = pnand %p13968_p7, %p13962_p4 }
  0x93   :  { %13972 = shalt.err (!%p13969_p8)
}
  0x94   :  { %167 = dma.hbm_to_vmem [thread:$0]  %s14533_s12, 16, %s165_s3, [#allocation21]  }
  0x95   :  { %13993 = dma.done.wait [#allocation3], 128  }
  0x96   :  { %13994 = vsyncadd [#allocation3], 4294967168 }
  0x97   :  { %13995 = dma.done.wait [#allocation6], 16640  }
  0x98   :  { %13996 = vsyncadd [#allocation6], 4294950656 }
  0x99   :  { %13997 = dma.done.wait [#allocation9], 131200  }
  0x9a   :  { %13998 = vsyncadd [#allocation9], 4294836096 }
  0x9b   :  { %13999 = dma.done.wait [#allocation12], 32832  }
  0x9c   :  { %14000 = vsyncadd [#allocation12], 4294934464 }
  0x9d   :  { %14001 = dma.done.wait [#allocation15], 8224  }
  0x9e   :  { %14002 = vsyncadd [#allocation15], 4294959072 }
  0x9f   :  { %14003 = dma.done.wait [#allocation18], 2064  }
  0xa0   :  { %14004 = vsyncadd [#allocation18], 4294965232 }
  0xa1   :  { %14005 = dma.done.wait [#allocation21], 1040  }
  0xa2   :  { %14006 = vsyncadd [#allocation21], 4294966256  ;;  %v14031_v0 = vmov 0   ;;  %v322_v1 = vld [vmem:[#allocation5 + $0x380] sm:$0xff]  ;;  %v323_v3 = vld [vmem:[#allocation5 + $0x388] sm:$0xff]  ;;  %vm14033_vm0 = vmmov 0  }
  0xa3   :  { %1094 = vmatprep.mubr.bf16.mxu0 %v14031_v0  ;;  %1135 = vmatprep.mubr.bf16.mxu1 %v14031_v0  ;;  %v330_v2 = vld [vmem:[#allocation5 + $0x3c0] sm:$0xff]  ;;  %v331_v5 = vld [vmem:[#allocation5 + $0x3c8] sm:$0xff]  ;;  %v324_v63 = vld [vmem:[#allocation5 + $0x390] sm:$0xff]  ;;  %s14034_s10 = smov [#allocation23]  }
  0xa4   :  { %v11740_v4 = vcombine.high %v322_v1, %v330_v2  ;;  %v11739_v6 = vcombine.low %v322_v1, %v330_v2  ;;  %v306_v7 = vld [vmem:[#allocation5 + $0x300] sm:$0xff]  ;;  %v11742_v9 = vcombine.high %v323_v3, %v331_v5  ;;  %v11741_v10 = vcombine.low %v323_v3, %v331_v5  ;;  %v307_v12 = vld [vmem:[#allocation5 + $0x308] sm:$0xff]  ;;  %v332_v1 = vld [vmem:[#allocation5 + $0x3d0] sm:$0xff]  ;;  %s11612_s12 = sshll.u32 %s14034_s10, 4  ;;  %s11613_s12 = int_to_ptr.vmem [resolvable:$true] %s11612_s12 }
  0xa5   :  { %v314_v8 = vld [vmem:[#allocation5 + $0x340] sm:$0xff]  ;;  %v315_v13 = vld [vmem:[#allocation5 + $0x348] sm:$0xff]  ;;  %v325_v2 = vld [vmem:[#allocation5 + $0x398] sm:$0xff]  ;;  %s13973_s29 = scalar_lea.vmem %s11613_s12, 128  ;;  %p13978_p10 = scmp.lt.s32.totalorder %s11613_s12, %s11613_s12 }
  0xa6   :  { %v11724_v11 = vcombine.high %v306_v7, %v314_v8  ;;  %v290_v14 = vld [vmem:[#allocation5 + $0x280] sm:$0xff]  ;;  %1062 = vmatprep.subr.bf16.mxu0 %v11740_v4  ;;  %v11726_v15 = vcombine.high %v307_v12, %v315_v13  ;;  %v291_v17 = vld [vmem:[#allocation5 + $0x288] sm:$0xff]  ;;  %1103 = vmatprep.subr.bf16.mxu1 %v11742_v9  ;;  %v11723_v19 = vcombine.low %v306_v7, %v314_v8  ;;  %v333_v3 = vld [vmem:[#allocation5 + $0x3d8] sm:$0xff]  ;;  %p13974_p9 = scmp.ne.s32.totalorder %s11613_s12, %s13973_s29  ;;  %p13979_p11 = scmp.lt.s32.totalorder %s13973_s29, %s13973_s29 }
  0xa7   :  { %v298_v16 = vld [vmem:[#allocation5 + $0x2c0] sm:$0xff]  ;;  %v299_v18 = vld [vmem:[#allocation5 + $0x2c8] sm:$0xff]  ;;  %1063 = vmatpush1.bf16.msra.mxu0 %v11739_v6  ;;  %1104 = vmatpush1.bf16.msra.mxu1 %v11741_v10  ;;  %v11725_v20 = vcombine.low %v307_v12, %v315_v13  ;;  %v208_v5 = vld [vmem:[#allocation2] sm:$0xff]  ;;  %v11744_v7 = vcombine.high %v324_v63, %v332_v1  ;;  %v11746_v8 = vcombine.high %v325_v2, %v333_v3 }
  0xa8   :  { %1064 = vmatprep.subr.bf16.mxu0 %v11724_v11  ;;  %v11708_v21 = vcombine.high %v290_v14, %v298_v16  ;;  %1105 = vmatprep.subr.bf16.mxu1 %v11726_v15  ;;  %v11710_v22 = vcombine.high %v291_v17, %v299_v18  ;;  %v274_v23 = vld [vmem:[#allocation5 + $0x200] sm:$0xff]  ;;  %v275_v25 = vld [vmem:[#allocation5 + $0x208] sm:$0xff]  ;;  %v11707_v27 = vcombine.low %v290_v14, %v298_v16  ;;  %v308_v9 = vld [vmem:[#allocation5 + $0x310] sm:$0xff]  ;;  %p13980_p12 = por %p13979_p11, %p13978_p10 }
  0xa9   :  { %v282_v24 = vld [vmem:[#allocation5 + $0x240] sm:$0xff]  ;;  %v283_v26 = vld [vmem:[#allocation5 + $0x248] sm:$0xff]  ;;  %v11709_v28 = vcombine.low %v291_v17, %v299_v18  ;;  %v316_v10 = vld [vmem:[#allocation5 + $0x350] sm:$0xff]  ;;  %v14151_v11 = vpack.c.bf16 %v208_v5, %v208_v5  ;;  %v11743_v14 = vcombine.low %v324_v63, %v332_v1  ;;  %v11745_v15 = vcombine.low %v325_v2, %v333_v3 }
  0xaa   :  { %v11692_v29 = vcombine.high %v274_v23, %v282_v24  ;;  %v11694_v30 = vcombine.high %v275_v25, %v283_v26  ;;  %v258_v31 = vld [vmem:[#allocation5 + $0x180] sm:$0xff]  ;;  %v259_v33 = vld [vmem:[#allocation5 + $0x188] sm:$0xff]  ;;  %v11691_v35 = vcombine.low %v274_v23, %v282_v24  ;;  %v11693_v36 = vcombine.low %v275_v25, %v283_v26  ;;  %v309_v12 = vld [vmem:[#allocation5 + $0x318] sm:$0xff]  ;;  %p13981_p13 = pnand %p13980_p12, %p13974_p9 }
  0xab   :  { %1065 = vmatpush1.bf16.msra.mxu0 %v11723_v19  ;;  %1106 = vmatpush1.bf16.msra.mxu1 %v11725_v20  ;;  %v266_v32 = vld [vmem:[#allocation5 + $0x1c0] sm:$0xff]  ;;  %v267_v34 = vld [vmem:[#allocation5 + $0x1c8] sm:$0xff]  ;;  %v317_v13 = vld [vmem:[#allocation5 + $0x358] sm:$0xff]  ;;  %v11728_v16 = vcombine.high %v308_v9, %v316_v10 }
  0xac   :  { %1066 = vmatprep.subr.bf16.mxu0 %v11708_v21  ;;  %1107 = vmatprep.subr.bf16.mxu1 %v11710_v22  ;;  %v11676_v37 = vcombine.high %v258_v31, %v266_v32  ;;  %v11678_v38 = vcombine.high %v259_v33, %v267_v34  ;;  %v242_v39 = vld [vmem:[#allocation5 + $0x100] sm:$0xff]  ;;  %v243_v41 = vld [vmem:[#allocation5 + $0x108] sm:$0xff]  ;;  %v11675_v43 = vcombine.low %v258_v31, %v266_v32  ;;  %v292_v18 = vld [vmem:[#allocation5 + $0x290] sm:$0xff] }
  0xad   :  { %v250_v40 = vld [vmem:[#allocation5 + $0x140] sm:$0xff]  ;;  %v251_v42 = vld [vmem:[#allocation5 + $0x148] sm:$0xff]  ;;  %v11677_v44 = vcombine.low %v259_v33, %v267_v34  ;;  %v11730_v17 = vcombine.high %v309_v12, %v317_v13  ;;  %v300_v19 = vld [vmem:[#allocation5 + $0x2d0] sm:$0xff]  ;;  %v11727_v22 = vcombine.low %v308_v9, %v316_v10  ;;  %v11729_v23 = vcombine.low %v309_v12, %v317_v13 }
  0xae   :  { %v11660_v45 = vcombine.high %v242_v39, %v250_v40  ;;  %v11662_v46 = vcombine.high %v243_v41, %v251_v42  ;;  %v226_v47 = vld [vmem:[#allocation5 + $0x80] sm:$0xff]  ;;  %v227_v49 = vld [vmem:[#allocation5 + $0x88] sm:$0xff]  ;;  %v11659_v51 = vcombine.low %v242_v39, %v250_v40  ;;  %v11661_v52 = vcombine.low %v243_v41, %v251_v42  ;;  %v293_v20 = vld [vmem:[#allocation5 + $0x298] sm:$0xff] }
  0xaf   :  { %1067 = vmatpush1.bf16.msra.mxu0 %v11707_v27  ;;  %1108 = vmatpush1.bf16.msra.mxu1 %v11709_v28  ;;  %v234_v48 = vld [vmem:[#allocation5 + $0xc0] sm:$0xff]  ;;  %v235_v50 = vld [vmem:[#allocation5 + $0xc8] sm:$0xff]  ;;  %v301_v21 = vld [vmem:[#allocation5 + $0x2d8] sm:$0xff]  ;;  %v11712_v24 = vcombine.high %v292_v18, %v300_v19 }
  0xb0   :  { %1068 = vmatprep.subr.bf16.mxu0 %v11692_v29  ;;  %1109 = vmatprep.subr.bf16.mxu1 %v11694_v30  ;;  %v11644_v53 = vcombine.high %v226_v47, %v234_v48  ;;  %v11646_v54 = vcombine.high %v227_v49, %v235_v50  ;;  %v210_v55 = vld [vmem:[#allocation5] sm:$0xff]  ;;  %v211_v57 = vld [vmem:[#allocation5 + $0x8] sm:$0xff]  ;;  %v11643_v59 = vcombine.low %v226_v47, %v234_v48  ;;  %v276_v26 = vld [vmem:[#allocation5 + $0x210] sm:$0xff] }
  0xb1   :  { %v218_v56 = vld [vmem:[#allocation5 + $0x40] sm:$0xff]  ;;  %v219_v58 = vld [vmem:[#allocation5 + $0x48] sm:$0xff]  ;;  %v11645_v60 = vcombine.low %v227_v49, %v235_v50  ;;  %v11714_v25 = vcombine.high %v293_v20, %v301_v21  ;;  %v284_v27 = vld [vmem:[#allocation5 + $0x250] sm:$0xff]  ;;  %v11711_v30 = vcombine.low %v292_v18, %v300_v19  ;;  %v11713_v31 = vcombine.low %v293_v20, %v301_v21 }
  0xb2   :  { %v11628_v61 = vcombine.high %v210_v55, %v218_v56  ;;  %v11630_v62 = vcombine.high %v211_v57, %v219_v58  ;;  %v11627_v4 = vcombine.low %v210_v55, %v218_v56  ;;  %v11629_v6 = vcombine.low %v211_v57, %v219_v58  ;;  %v277_v28 = vld [vmem:[#allocation5 + $0x218] sm:$0xff]  ;;  %v260_v34 = vld [vmem:[#allocation5 + $0x190] sm:$0xff]  ;;  %v326_v3 = vld [vmem:[#allocation5 + $0x3a0] sm:$0xff] }
  0xb3   :  { %1069 = vmatpush1.bf16.msra.mxu0 %v11691_v35  ;;  %1110 = vmatpush1.bf16.msra.mxu1 %v11693_v36  ;;  %v285_v29 = vld [vmem:[#allocation5 + $0x258] sm:$0xff]  ;;  %v11696_v32 = vcombine.high %v276_v26, %v284_v27  ;;  %v268_v35 = vld [vmem:[#allocation5 + $0x1d0] sm:$0xff]  ;;  %v327_v5 = vld [vmem:[#allocation5 + $0x3a8] sm:$0xff] }
  0xb4   :  { %1070 = vmatprep.subr.bf16.mxu0 %v11676_v37  ;;  %1111 = vmatprep.subr.bf16.mxu1 %v11678_v38  ;;  %v11698_v33 = vcombine.high %v277_v28, %v285_v29  ;;  %v261_v36 = vld [vmem:[#allocation5 + $0x198] sm:$0xff]  ;;  %v11695_v38 = vcombine.low %v276_v26, %v284_v27  ;;  %v11697_v39 = vcombine.low %v277_v28, %v285_v29  ;;  %v244_v42 = vld [vmem:[#allocation5 + $0x110] sm:$0xff]  ;;  %v318_v12 = vld [vmem:[#allocation5 + $0x360] sm:$0xff] }
  0xb5   :  { %v269_v37 = vld [vmem:[#allocation5 + $0x1d8] sm:$0xff]  ;;  %v11680_v40 = vcombine.high %v260_v34, %v268_v35  ;;  %v228_v50 = vld [vmem:[#allocation5 + $0x90] sm:$0xff]  ;;  %v311_v13 = vld [vmem:[#allocation5 + $0x328] sm:$0xff] }
  0xb6   :  { %v11682_v41 = vcombine.high %v261_v36, %v269_v37  ;;  %v11681_v47 = vcombine.low %v261_v36, %v269_v37  ;;  %v212_v58 = vld [vmem:[#allocation5 + $0x10] sm:$0xff]  ;;  %v302_v18 = vld [vmem:[#allocation5 + $0x2e0] sm:$0xff]  ;;  %v295_v21 = vld [vmem:[#allocation5 + $0x2a8] sm:$0xff] }
  0xb7   :  { %1071 = vmatpush1.bf16.msra.mxu0 %v11675_v43  ;;  %1112 = vmatpush1.bf16.msra.mxu1 %v11677_v44  ;;  %v252_v43 = vld [vmem:[#allocation5 + $0x150] sm:$0xff]  ;;  %v245_v44 = vld [vmem:[#allocation5 + $0x118] sm:$0xff]  ;;  %v286_v26 = vld [vmem:[#allocation5 + $0x260] sm:$0xff] }
  0xb8   :  { %1072 = vmatprep.subr.bf16.mxu0 %v11660_v45  ;;  %1113 = vmatprep.subr.bf16.mxu1 %v11662_v46  ;;  %v253_v45 = vld [vmem:[#allocation5 + $0x158] sm:$0xff]  ;;  %v11679_v46 = vcombine.low %v260_v34, %v268_v35  ;;  %v11664_v48 = vcombine.high %v244_v42, %v252_v43  ;;  %v279_v29 = vld [vmem:[#allocation5 + $0x228] sm:$0xff]  ;;  %v270_v34 = vld [vmem:[#allocation5 + $0x1e0] sm:$0xff] }
  0xb9   :  { %v11666_v49 = vcombine.high %v245_v44, %v253_v45  ;;  %v11665_v55 = vcombine.low %v245_v44, %v253_v45  ;;  %v263_v37 = vld [vmem:[#allocation5 + $0x1a8] sm:$0xff] }
  0xba   :  { %v247_v45 = vld [vmem:[#allocation5 + $0x128] sm:$0xff] }
  0xbb   :  { %1073 = vmatpush1.bf16.msra.mxu0 %v11659_v51  ;;  %1114 = vmatpush1.bf16.msra.mxu1 %v11661_v52  ;;  %v236_v51 = vld [vmem:[#allocation5 + $0xd0] sm:$0xff]  ;;  %v229_v52 = vld [vmem:[#allocation5 + $0x98] sm:$0xff] }
  0xbc   :  { %1074 = vmatprep.subr.bf16.mxu0 %v11644_v53  ;;  %1115 = vmatprep.subr.bf16.mxu1 %v11646_v54  ;;  %v237_v53 = vld [vmem:[#allocation5 + $0xd8] sm:$0xff]  ;;  %v11663_v54 = vcombine.low %v244_v42, %v252_v43  ;;  %v11648_v56 = vcombine.high %v228_v50, %v236_v51  ;;  %v254_v42 = vld [vmem:[#allocation5 + $0x160] sm:$0xff] }
  0xbd   :  { %v11650_v57 = vcombine.high %v229_v52, %v237_v53  ;;  %v11649_v63 = vcombine.low %v229_v52, %v237_v53  ;;  %v231_v53 = vld [vmem:[#allocation5 + $0xa8] sm:$0xff] }
  0xbf   :  { %1075 = vmatpush1.bf16.msra.mxu0 %v11643_v59  ;;  %1116 = vmatpush1.bf16.msra.mxu1 %v11645_v60  ;;  %v220_v59 = vld [vmem:[#allocation5 + $0x50] sm:$0xff]  ;;  %v213_v60 = vld [vmem:[#allocation5 + $0x18] sm:$0xff] }
  0xc0   :  { %1076 = vmatprep.subr.bf16.mxu0 %v11628_v61  ;;  %1117 = vmatprep.subr.bf16.mxu1 %v11630_v62  ;;  %v221_v61 = vld [vmem:[#allocation5 + $0x58] sm:$0xff]  ;;  %v11647_v62 = vcombine.low %v228_v50, %v236_v51  ;;  %v11632_v1 = vcombine.high %v212_v58, %v220_v59  ;;  %v238_v50 = vld [vmem:[#allocation5 + $0xe0] sm:$0xff] }
  0xc1   :  { %v11634_v2 = vcombine.high %v213_v60, %v221_v61  ;;  %v11633_v9 = vcombine.low %v213_v60, %v221_v61  ;;  %v215_v61 = vld [vmem:[#allocation5 + $0x28] sm:$0xff] }
  0xc3   :  { %1077 = vmatpush1.bf16.msra.mxu0 %v11627_v4  ;;  %1118 = vmatpush1.bf16.msra.mxu1 %v11629_v6  ;;  %v334_v4 = vld [vmem:[#allocation5 + $0x3e0] sm:$0xff]  ;;  %v335_v6 = vld [vmem:[#allocation5 + $0x3e8] sm:$0xff] }
  0xc4   :  { %1144 = vmatprep.subr.bf16.mxu0 %v11744_v7  ;;  %1185 = vmatprep.subr.bf16.mxu1 %v11746_v8  ;;  %v11631_v7 = vcombine.low %v212_v58, %v220_v59  ;;  %v310_v8 = vld [vmem:[#allocation5 + $0x320] sm:$0xff]  ;;  %v11748_v10 = vcombine.high %v326_v3, %v334_v4  ;;  %v11749_v19 = vcombine.low %v327_v5, %v335_v6 }
  0xc5   :  { %v11732_v20 = vcombine.high %v310_v8, %v318_v12  ;;  %v222_v58 = vld [vmem:[#allocation5 + $0x60] sm:$0xff] }
  0xc6   :  { %1095 = vmatmul.mubr.bf16.vlgmr.msra.gmra.mxu0 %v14151_v11  ;;  %1136 = vmatmul.mubr.bf16.vlgmr.msra.gmra.mxu1 %v14151_v11 }
  0xc7   :  { %1145 = vmatpush1.bf16.msra.mxu0 %v11743_v14  ;;  %1186 = vmatpush1.bf16.msra.mxu1 %v11745_v15  ;;  %v319_v14 = vld [vmem:[#allocation5 + $0x368] sm:$0xff]  ;;  %v11750_v15 = vcombine.high %v327_v5, %v335_v6  ;;  %v329_v6 = vld [vmem:[#allocation5 + $0x3b8] sm:$0xff] }
  0xc8   :  { %1146 = vmatprep.subr.bf16.mxu0 %v11728_v16  ;;  %1187 = vmatprep.subr.bf16.mxu1 %v11730_v17  ;;  %v11747_v16 = vcombine.low %v326_v3, %v334_v4  ;;  %v294_v17 = vld [vmem:[#allocation5 + $0x2a0] sm:$0xff]  ;;  %v11733_v27 = vcombine.low %v311_v13, %v319_v14  ;;  %v336_v3 = vld [vmem:[#allocation5 + $0x3f0] sm:$0xff] }
  0xc9   :  { %1176 = vmatprep.mubr.bf16.mxu0 %v14031_v0  ;;  %1217 = vmatprep.mubr.bf16.mxu1 %v14031_v0  ;;  %v11716_v28 = vcombine.high %v294_v17, %v302_v18 }
  0xcb   :  { %1147 = vmatpush1.bf16.msra.mxu0 %v11727_v22  ;;  %1188 = vmatpush1.bf16.msra.mxu1 %v11729_v23  ;;  %v303_v22 = vld [vmem:[#allocation5 + $0x2e8] sm:$0xff]  ;;  %v11734_v23 = vcombine.high %v311_v13, %v319_v14 }
  0xcc   :  { %1148 = vmatprep.subr.bf16.mxu0 %v11712_v24  ;;  %1189 = vmatprep.subr.bf16.mxu1 %v11714_v25  ;;  %v11731_v24 = vcombine.low %v310_v8, %v318_v12  ;;  %v278_v25 = vld [vmem:[#allocation5 + $0x220] sm:$0xff]  ;;  %v11717_v35 = vcombine.low %v295_v21, %v303_v22  ;;  %v320_v12 = vld [vmem:[#allocation5 + $0x370] sm:$0xff] }
  0xcd   :  { %v11700_v36 = vcombine.high %v278_v25, %v286_v26 }
  0xcf   :  { %1149 = vmatpush1.bf16.msra.mxu0 %v11711_v30  ;;  %1190 = vmatpush1.bf16.msra.mxu1 %v11713_v31  ;;  %v287_v30 = vld [vmem:[#allocation5 + $0x268] sm:$0xff]  ;;  %v11718_v31 = vcombine.high %v295_v21, %v303_v22  ;;  %v296_v22 = vld [vmem:[#allocation5 + $0x2b0] sm:$0xff] }
  0xd0   :  { %1150 = vmatprep.subr.bf16.mxu0 %v11696_v32  ;;  %1191 = vmatprep.subr.bf16.mxu1 %v11698_v33  ;;  %v11715_v32 = vcombine.low %v294_v17, %v302_v18  ;;  %v262_v33 = vld [vmem:[#allocation5 + $0x1a0] sm:$0xff]  ;;  %v11701_v43 = vcombine.low %v279_v29, %v287_v30 }
  0xd1   :  { %v11684_v44 = vcombine.high %v262_v33, %v270_v34 }
  0xd3   :  { %1151 = vmatpush1.bf16.msra.mxu0 %v11695_v38  ;;  %1192 = vmatpush1.bf16.msra.mxu1 %v11697_v39  ;;  %v271_v38 = vld [vmem:[#allocation5 + $0x1e8] sm:$0xff]  ;;  %v11702_v39 = vcombine.high %v279_v29, %v287_v30  ;;  %v280_v30 = vld [vmem:[#allocation5 + $0x230] sm:$0xff] }
  0xd4   :  { %1152 = vmatprep.subr.bf16.mxu0 %v11680_v40  ;;  %1193 = vmatprep.subr.bf16.mxu1 %v11682_v41  ;;  %v11699_v40 = vcombine.low %v278_v25, %v286_v26  ;;  %v246_v41 = vld [vmem:[#allocation5 + $0x120] sm:$0xff]  ;;  %v11685_v51 = vcombine.low %v263_v37, %v271_v38  ;;  %v305_v25 = vld [vmem:[#allocation5 + $0x2f8] sm:$0xff] }
  0xd5   :  { %v11668_v52 = vcombine.high %v246_v41, %v254_v42 }
  0xd7   :  { %1153 = vmatpush1.bf16.msra.mxu0 %v11679_v46  ;;  %1194 = vmatpush1.bf16.msra.mxu1 %v11681_v47  ;;  %v255_v46 = vld [vmem:[#allocation5 + $0x168] sm:$0xff]  ;;  %v11686_v47 = vcombine.high %v263_v37, %v271_v38  ;;  %v264_v38 = vld [vmem:[#allocation5 + $0x1b0] sm:$0xff] }
  0xd8   :  { %1154 = vmatprep.subr.bf16.mxu0 %v11664_v48  ;;  %1195 = vmatprep.subr.bf16.mxu1 %v11666_v49  ;;  %v11683_v48 = vcombine.low %v262_v33, %v270_v34  ;;  %v230_v49 = vld [vmem:[#allocation5 + $0xa0] sm:$0xff]  ;;  %v11669_v59 = vcombine.low %v247_v45, %v255_v46  ;;  %v289_v33 = vld [vmem:[#allocation5 + $0x278] sm:$0xff] }
  0xd9   :  { %v11652_v60 = vcombine.high %v230_v49, %v238_v50 }
  0xdb   :  { %1155 = vmatpush1.bf16.msra.mxu0 %v11663_v54  ;;  %1196 = vmatpush1.bf16.msra.mxu1 %v11665_v55  ;;  %v239_v54 = vld [vmem:[#allocation5 + $0xe8] sm:$0xff]  ;;  %v11670_v55 = vcombine.high %v247_v45, %v255_v46 }
  0xdc   :  { %1156 = vmatprep.subr.bf16.mxu0 %v11648_v56  ;;  %1197 = vmatprep.subr.bf16.mxu1 %v11650_v57  ;;  %v11667_v56 = vcombine.low %v246_v41, %v254_v42  ;;  %v214_v57 = vld [vmem:[#allocation5 + $0x20] sm:$0xff]  ;;  %v11653_v4 = vcombine.low %v231_v53, %v239_v54  ;;  %v273_v41 = vld [vmem:[#allocation5 + $0x1f8] sm:$0xff] }
  0xdd   :  { %v11636_v5 = vcombine.high %v214_v57, %v222_v58 }
  0xdf   :  { %1157 = vmatpush1.bf16.msra.mxu0 %v11647_v62  ;;  %1198 = vmatpush1.bf16.msra.mxu1 %v11649_v63  ;;  %v223_v62 = vld [vmem:[#allocation5 + $0x68] sm:$0xff]  ;;  %v11654_v63 = vcombine.high %v231_v53, %v239_v54 }
  0xe0   :  { %1158 = vmatprep.subr.bf16.mxu0 %v11632_v1  ;;  %1199 = vmatprep.subr.bf16.mxu1 %v11634_v2  ;;  %v11651_v1 = vcombine.low %v230_v49, %v238_v50  ;;  %v328_v2 = vld [vmem:[#allocation5 + $0x3b0] sm:$0xff]  ;;  %v11638_v8 = vcombine.high %v215_v61, %v223_v62  ;;  %v11637_v13 = vcombine.low %v215_v61, %v223_v62 }
  0xe1   :  { %v11752_v14 = vcombine.high %v328_v2, %v336_v3  ;;  %v11751_v18 = vcombine.low %v328_v2, %v336_v3  ;;  %v232_v50 = vld [vmem:[#allocation5 + $0xb0] sm:$0xff] }
  0xe2   :  { %v1478_v3 = vld [vmem:[#allocation8 + $0x1c0] sm:$0xff] }
  0xe3   :  { %1159 = vmatpush1.bf16.msra.mxu0 %v11631_v7  ;;  %1200 = vmatpush1.bf16.msra.mxu1 %v11633_v9  ;;  %v337_v7 = vld [vmem:[#allocation5 + $0x3f8] sm:$0xff]  ;;  %v11635_v9 = vcombine.low %v214_v57, %v222_v58  ;;  %v216_v58 = vld [vmem:[#allocation5 + $0x30] sm:$0xff] }
  0xe4   :  { %1226 = vmatprep.subr.bf16.mxu0 %v11748_v10  ;;  %1267 = vmatprep.subr.bf16.mxu1 %v11750_v15  ;;  %v312_v10 = vld [vmem:[#allocation5 + $0x330] sm:$0xff]  ;;  %v313_v15 = vld [vmem:[#allocation5 + $0x338] sm:$0xff]  ;;  %v11754_v17 = vcombine.high %v329_v6, %v337_v7 }
  0xe5   :  { %v11735_v26 = vcombine.low %v312_v10, %v320_v12 }
  0xe6   :  { %1177 = vmatmul.mubr.bf16.vlgmr.msra.gmra.mxu0 %v14151_v11  ;;  %1218 = vmatmul.mubr.bf16.vlgmr.msra.gmra.mxu1 %v14151_v11 }
  0xe7   :  { %1227 = vmatpush1.bf16.msra.mxu0 %v11747_v16  ;;  %1268 = vmatpush1.bf16.msra.mxu1 %v11749_v19  ;;  %v321_v16 = vld [vmem:[#allocation5 + $0x378] sm:$0xff]  ;;  %v11753_v19 = vcombine.low %v329_v6, %v337_v7 }
  0xe8   :  { %1228 = vmatprep.subr.bf16.mxu0 %v11732_v20  ;;  %1269 = vmatprep.subr.bf16.mxu1 %v11734_v23  ;;  %v11736_v20 = vcombine.high %v312_v10, %v320_v12  ;;  %v11738_v21 = vcombine.high %v313_v15, %v321_v16  ;;  %v304_v23 = vld [vmem:[#allocation5 + $0x2f0] sm:$0xff] }
  0xe9   :  { %1258 = vmatprep.mubr.bf16.mxu0 %v14031_v0  ;;  %1299 = vmatprep.mubr.bf16.mxu1 %v14031_v0  ;;  %v11719_v34 = vcombine.low %v296_v22, %v304_v23  ;;  %v1470_v12 = vld [vmem:[#allocation8 + $0x180] sm:$0xff] }
  0xeb   :  { %1229 = vmatpush1.bf16.msra.mxu0 %v11731_v24  ;;  %1270 = vmatpush1.bf16.msra.mxu1 %v11733_v27  ;;  %v297_v24 = vld [vmem:[#allocation5 + $0x2b8] sm:$0xff]  ;;  %v11737_v27 = vcombine.low %v313_v15, %v321_v16 }
  0xec   :  { %1230 = vmatprep.subr.bf16.mxu0 %v11716_v28  ;;  %1271 = vmatprep.subr.bf16.mxu1 %v11718_v31  ;;  %v11720_v28 = vcombine.high %v296_v22, %v304_v23  ;;  %v11722_v29 = vcombine.high %v297_v24, %v305_v25  ;;  %v288_v31 = vld [vmem:[#allocation5 + $0x270] sm:$0xff] }
  0xed   :  { %v11703_v42 = vcombine.low %v280_v30, %v288_v31 }
  0xef   :  { %1231 = vmatpush1.bf16.msra.mxu0 %v11715_v32  ;;  %1272 = vmatpush1.bf16.msra.mxu1 %v11717_v35  ;;  %v281_v32 = vld [vmem:[#allocation5 + $0x238] sm:$0xff]  ;;  %v11721_v35 = vcombine.low %v297_v24, %v305_v25  ;;  %v1590_v25 = vld [vmem:[#allocation8 + $0x540] sm:$0xff] }
  0xf0   :  { %1232 = vmatprep.subr.bf16.mxu0 %v11700_v36  ;;  %1273 = vmatprep.subr.bf16.mxu1 %v11702_v39  ;;  %v11704_v36 = vcombine.high %v280_v30, %v288_v31  ;;  %v11706_v37 = vcombine.high %v281_v32, %v289_v33  ;;  %v272_v39 = vld [vmem:[#allocation5 + $0x1f0] sm:$0xff]  ;;  %v11705_v45 = vcombine.low %v281_v32, %v289_v33 }
  0xf1   :  { %v11687_v49 = vcombine.low %v264_v38, %v272_v39  ;;  %v1582_v33 = vld [vmem:[#allocation8 + $0x500] sm:$0xff] }
  0xf3   :  { %1233 = vmatpush1.bf16.msra.mxu0 %v11699_v40  ;;  %1274 = vmatpush1.bf16.msra.mxu1 %v11701_v43  ;;  %v265_v40 = vld [vmem:[#allocation5 + $0x1b8] sm:$0xff]  ;;  %v248_v43 = vld [vmem:[#allocation5 + $0x130] sm:$0xff] }
  0xf4   :  { %1234 = vmatprep.subr.bf16.mxu0 %v11684_v44  ;;  %1275 = vmatprep.subr.bf16.mxu1 %v11686_v47  ;;  %v256_v44 = vld [vmem:[#allocation5 + $0x170] sm:$0xff]  ;;  %v11690_v46 = vcombine.high %v265_v40, %v273_v41  ;;  %v249_v47 = vld [vmem:[#allocation5 + $0x138] sm:$0xff] }
  0xf5   :  { %v11672_v53 = vcombine.high %v248_v43, %v256_v44  ;;  %v11671_v57 = vcombine.low %v248_v43, %v256_v44  ;;  %v1438_v43 = vld [vmem:[#allocation8 + $0x80] sm:$0xff] }
  0xf6   :  { %v1442_v44 = vld [vmem:[#allocation8 + $0xa0] sm:$0xff] }
  0xf7   :  { %1235 = vmatpush1.bf16.msra.mxu0 %v11683_v48  ;;  %1276 = vmatpush1.bf16.msra.mxu1 %v11685_v51  ;;  %v257_v48 = vld [vmem:[#allocation5 + $0x178] sm:$0xff]  ;;  %v240_v51 = vld [vmem:[#allocation5 + $0xf0] sm:$0xff] }
  0xf8   :  { %1236 = vmatprep.subr.bf16.mxu0 %v11668_v52  ;;  %1277 = vmatprep.subr.bf16.mxu1 %v11670_v55  ;;  %v11689_v52 = vcombine.low %v265_v40, %v273_v41  ;;  %v11674_v54 = vcombine.high %v249_v47, %v257_v48  ;;  %v233_v55 = vld [vmem:[#allocation5 + $0xb8] sm:$0xff]  ;;  %v11656_v61 = vcombine.high %v232_v50, %v240_v51  ;;  %v1574_v40 = vld [vmem:[#allocation8 + $0x4c0] sm:$0xff] }
  0xf9   :  { %v11655_v2 = vcombine.low %v232_v50, %v240_v51  ;;  %v1578_v41 = vld [vmem:[#allocation8 + $0x4e0] sm:$0xff] }
  0xfa   :  { %v1430_v50 = vld [vmem:[#allocation8 + $0x40] sm:$0xff] }
  0xfb   :  { %1237 = vmatpush1.bf16.msra.mxu0 %v11667_v56  ;;  %1278 = vmatpush1.bf16.msra.mxu1 %v11669_v59  ;;  %v241_v56 = vld [vmem:[#allocation5 + $0xf8] sm:$0xff]  ;;  %v224_v59 = vld [vmem:[#allocation5 + $0x70] sm:$0xff] }
  0xfc   :  { %1238 = vmatprep.subr.bf16.mxu0 %v11652_v60  ;;  %1279 = vmatprep.subr.bf16.mxu1 %v11654_v63  ;;  %v11673_v60 = vcombine.low %v249_v47, %v257_v48  ;;  %v11658_v62 = vcombine.high %v233_v55, %v241_v56  ;;  %v217_v63 = vld [vmem:[#allocation5 + $0x38] sm:$0xff]  ;;  %v11640_v6 = vcombine.high %v216_v58, %v224_v59  ;;  %v1566_v47 = vld [vmem:[#allocation8 + $0x480] sm:$0xff] }
  0xfd   :  { %v11639_v10 = vcombine.low %v216_v58, %v224_v59  ;;  %v1570_v48 = vld [vmem:[#allocation8 + $0x4a0] sm:$0xff] }
  0xfe   :  { %v1434_v51 = vld [vmem:[#allocation8 + $0x60] sm:$0xff] }
  0xff   :  { %1239 = vmatpush1.bf16.msra.mxu0 %v11651_v1  ;;  %1280 = vmatpush1.bf16.msra.mxu1 %v11653_v4  ;;  %v225_v1 = vld [vmem:[#allocation5 + $0x78] sm:$0xff]  ;;  %v1482_v4 = vld [vmem:[#allocation8 + $0x1e0] sm:$0xff] }
 0x100   :  { %1240 = vmatprep.subr.bf16.mxu0 %v11636_v5  ;;  %1281 = vmatprep.subr.bf16.mxu1 %v11638_v8  ;;  %v11657_v5 = vcombine.low %v233_v55, %v241_v56  ;;  %v11642_v7 = vcombine.high %v217_v63, %v225_v1  ;;  %v1606_v8 = vld [vmem:[#allocation8 + $0x5c0] sm:$0xff]  ;;  %v11812_v15 = vcombine.high %v1478_v3, %v1482_v4 }
 0x101   :  { %v1558_v55 = vld [vmem:[#allocation8 + $0x440] sm:$0xff] }
 0x102   :  { %v1562_v56 = vld [vmem:[#allocation8 + $0x460] sm:$0xff] }
 0x103   :  { %1241 = vmatpush1.bf16.msra.mxu0 %v11635_v9  ;;  %1282 = vmatpush1.bf16.msra.mxu1 %v11637_v13  ;;  %v1610_v9 = vld [vmem:[#allocation8 + $0x5e0] sm:$0xff] }
 0x104   :  { %1308 = vmatprep.subr.bf16.mxu0 %v11752_v14  ;;  %1349 = vmatprep.subr.bf16.mxu1 %v11754_v17  ;;  %v1474_v13 = vld [vmem:[#allocation8 + $0x1a0] sm:$0xff]  ;;  %v11641_v14 = vcombine.low %v217_v63, %v225_v1  ;;  %v11940_v16 = vcombine.high %v1606_v8, %v1610_v9  ;;  %v11939_v22 = vcombine.low %v1606_v8, %v1610_v9 }
 0x105   :  { %v1598_v17 = vld [vmem:[#allocation8 + $0x580] sm:$0xff]  ;;  %v11804_v23 = vcombine.high %v1470_v12, %v1474_v13 }
 0x106   :  { %1259 = vmatmul.mubr.bf16.vlgmr.msra.gmra.mxu0 %v14151_v11  ;;  %1300 = vmatmul.mubr.bf16.vlgmr.msra.gmra.mxu1 %v14151_v11  ;;  %v1422_v58 = vld [vmem:[#allocation8] sm:$0xff] }
 0x107   :  { %1309 = vmatpush1.bf16.msra.mxu0 %v11751_v18  ;;  %1350 = vmatpush1.bf16.msra.mxu1 %v11753_v19  ;;  %v1602_v18 = vld [vmem:[#allocation8 + $0x5a0] sm:$0xff]  ;;  %v11811_v19 = vcombine.low %v1478_v3, %v1482_v4 }
 0x108   :  { %1310 = vmatprep.subr.bf16.mxu0 %v11736_v20  ;;  %1351 = vmatprep.subr.bf16.mxu1 %v11738_v21  ;;  %v1462_v20 = vld [vmem:[#allocation8 + $0x140] sm:$0xff]  ;;  %v11932_v24 = vcombine.high %v1598_v17, %v1602_v18  ;;  %v11931_v30 = vcombine.low %v1598_v17, %v1602_v18 }
 0x109   :  { %1340 = vmatprep.mubr.bf16.mxu0 %v14031_v0  ;;  %1381 = vmatprep.mubr.bf16.mxu1 %v14031_v0  ;;  %v11688_v0 = vcombine.high %v264_v38, %v272_v39  ;;  %v1466_v21 = vld [vmem:[#allocation8 + $0x160] sm:$0xff] }
 0x10a   :  { %v11796_v31 = vcombine.high %v1462_v20, %v1466_v21  ;;  %v1426_v59 = vld [vmem:[#allocation8 + $0x20] sm:$0xff] }
 0x10b   :  { %1311 = vmatpush1.bf16.msra.mxu0 %v11735_v26  ;;  %1352 = vmatpush1.bf16.msra.mxu1 %v11737_v27  ;;  %v1594_v26 = vld [vmem:[#allocation8 + $0x560] sm:$0xff]  ;;  %v11803_v27 = vcombine.low %v1470_v12, %v1474_v13 }
 0x10c   :  { %1312 = vmatprep.subr.bf16.mxu0 %v11720_v28  ;;  %1353 = vmatprep.subr.bf16.mxu1 %v11722_v29  ;;  %v1454_v28 = vld [vmem:[#allocation8 + $0x100] sm:$0xff]  ;;  %v11924_v32 = vcombine.high %v1590_v25, %v1594_v26  ;;  %v11923_v38 = vcombine.low %v1590_v25, %v1594_v26 }
 0x10d   :  { %v1458_v29 = vld [vmem:[#allocation8 + $0x120] sm:$0xff] }
 0x10e   :  { %v1550_v63 = vld [vmem:[#allocation8 + $0x400] sm:$0xff] }
 0x10f   :  { %1313 = vmatpush1.bf16.msra.mxu0 %v11719_v34  ;;  %1354 = vmatpush1.bf16.msra.mxu1 %v11721_v35  ;;  %v1586_v34 = vld [vmem:[#allocation8 + $0x520] sm:$0xff]  ;;  %v11795_v35 = vcombine.low %v1462_v20, %v1466_v21 }
 0x110   :  { %1314 = vmatprep.subr.bf16.mxu0 %v11704_v36  ;;  %1355 = vmatprep.subr.bf16.mxu1 %v11706_v37  ;;  %v1446_v36 = vld [vmem:[#allocation8 + $0xc0] sm:$0xff]  ;;  %v11916_v39 = vcombine.high %v1582_v33, %v1586_v34 }
 0x111   :  { %v1450_v37 = vld [vmem:[#allocation8 + $0xe0] sm:$0xff] }
 0x112   :  { %v1554_v1 = vld [vmem:[#allocation8 + $0x420] sm:$0xff] }
 0x113   :  { %1315 = vmatpush1.bf16.msra.mxu0 %v11703_v42  ;;  %1356 = vmatpush1.bf16.msra.mxu1 %v11705_v45  ;;  %v11787_v42 = vcombine.low %v1454_v28, %v1458_v29  ;;  %v11915_v45 = vcombine.low %v1582_v33, %v1586_v34  ;;  %v1542_v3 = vld [vmem:[#allocation8 + $0x3c0] sm:$0xff] }
 0x114   :  { %1316 = vmatprep.subr.bf16.mxu0 %v11688_v0  ;;  %1357 = vmatprep.subr.bf16.mxu1 %v11690_v46  ;;  %v11780_v0 = vcombine.high %v1446_v36, %v1450_v37  ;;  %v11908_v46 = vcombine.high %v1574_v40, %v1578_v41  ;;  %v1546_v4 = vld [vmem:[#allocation8 + $0x3e0] sm:$0xff] }
 0x115   :  { %v1670_v8 = vld [vmem:[#allocation8 + $0x7c0] sm:$0xff] }
 0x116   :  { %v1674_v9 = vld [vmem:[#allocation8 + $0x7e0] sm:$0xff] }
 0x117   :  { %1317 = vmatpush1.bf16.msra.mxu0 %v11687_v49  ;;  %1358 = vmatpush1.bf16.msra.mxu1 %v11689_v52  ;;  %v11779_v49 = vcombine.low %v1446_v36, %v1450_v37  ;;  %v11907_v52 = vcombine.low %v1574_v40, %v1578_v41  ;;  %v1534_v12 = vld [vmem:[#allocation8 + $0x380] sm:$0xff] }
 0x118   :  { %1318 = vmatprep.subr.bf16.mxu0 %v11672_v53  ;;  %1359 = vmatprep.subr.bf16.mxu1 %v11674_v54  ;;  %v11772_v53 = vcombine.high %v1438_v43, %v1442_v44  ;;  %v11900_v54 = vcombine.high %v1566_v47, %v1570_v48  ;;  %v1538_v13 = vld [vmem:[#allocation8 + $0x3a0] sm:$0xff] }
 0x119   :  { %v1662_v17 = vld [vmem:[#allocation8 + $0x780] sm:$0xff] }
 0x11a   :  { %v1666_v18 = vld [vmem:[#allocation8 + $0x7a0] sm:$0xff] }
 0x11b   :  { %1319 = vmatpush1.bf16.msra.mxu0 %v11671_v57  ;;  %1360 = vmatpush1.bf16.msra.mxu1 %v11673_v60  ;;  %v11771_v57 = vcombine.low %v1438_v43, %v1442_v44  ;;  %v11899_v60 = vcombine.low %v1566_v47, %v1570_v48  ;;  %v1526_v20 = vld [vmem:[#allocation8 + $0x340] sm:$0xff] }
 0x11c   :  { %1320 = vmatprep.subr.bf16.mxu0 %v11656_v61  ;;  %1361 = vmatprep.subr.bf16.mxu1 %v11658_v62  ;;  %v11764_v61 = vcombine.high %v1430_v50, %v1434_v51  ;;  %v11892_v62 = vcombine.high %v1558_v55, %v1562_v56  ;;  %v1530_v21 = vld [vmem:[#allocation8 + $0x360] sm:$0xff] }
 0x11d   :  { %v1654_v25 = vld [vmem:[#allocation8 + $0x740] sm:$0xff] }
 0x11e   :  { %v1658_v26 = vld [vmem:[#allocation8 + $0x760] sm:$0xff] }
 0x11f   :  { %1321 = vmatpush1.bf16.msra.mxu0 %v11655_v2  ;;  %1362 = vmatpush1.bf16.msra.mxu1 %v11657_v5  ;;  %v11763_v2 = vcombine.low %v1430_v50, %v1434_v51  ;;  %v11891_v5 = vcombine.low %v1558_v55, %v1562_v56  ;;  %v1646_v33 = vld [vmem:[#allocation8 + $0x700] sm:$0xff] }
 0x120   :  { %1322 = vmatprep.subr.bf16.mxu0 %v11640_v6  ;;  %1363 = vmatprep.subr.bf16.mxu1 %v11642_v7  ;;  %v11756_v6 = vcombine.high %v1422_v58, %v1426_v59  ;;  %v11884_v7 = vcombine.high %v1550_v63, %v1554_v1  ;;  %v1650_v34 = vld [vmem:[#allocation8 + $0x720] sm:$0xff] }
 0x121   :  { %v1510_v36 = vld [vmem:[#allocation8 + $0x2c0] sm:$0xff] }
 0x122   :  { %v1514_v37 = vld [vmem:[#allocation8 + $0x2e0] sm:$0xff] }
 0x123   :  { %1323 = vmatpush1.bf16.msra.mxu0 %v11639_v10  ;;  %1364 = vmatpush1.bf16.msra.mxu1 %v11641_v14  ;;  %v11755_v10 = vcombine.low %v1422_v58, %v1426_v59  ;;  %v11883_v14 = vcombine.low %v1550_v63, %v1554_v1  ;;  %v1638_v40 = vld [vmem:[#allocation8 + $0x6c0] sm:$0xff] }
 0x124   :  { %7608 = vmatprep.subr.bf16.mxu0 %v11812_v15  ;;  %7649 = vmatprep.subr.bf16.mxu1 %v11940_v16  ;;  %v11876_v15 = vcombine.high %v1542_v3, %v1546_v4  ;;  %v12004_v16 = vcombine.high %v1670_v8, %v1674_v9  ;;  %v1642_v41 = vld [vmem:[#allocation8 + $0x6e0] sm:$0xff] }
 0x125   :  { %v1502_v43 = vld [vmem:[#allocation8 + $0x280] sm:$0xff] }
 0x126   :  { %1341 = vmatmul.mubr.bf16.vlgmr.msra.gmra.mxu0 %v14151_v11  ;;  %1382 = vmatmul.mubr.bf16.vlgmr.msra.gmra.mxu1 %v14151_v11  ;;  %v11788_v11 = vcombine.high %v1454_v28, %v1458_v29  ;;  %v1518_v28 = vld [vmem:[#allocation8 + $0x300] sm:$0xff] }
 0x127   :  { %7609 = vmatpush1.bf16.msra.mxu0 %v11811_v19  ;;  %7650 = vmatpush1.bf16.msra.mxu1 %v11939_v22  ;;  %v11875_v19 = vcombine.low %v1542_v3, %v1546_v4  ;;  %v12003_v22 = vcombine.low %v1670_v8, %v1674_v9  ;;  %v1522_v29 = vld [vmem:[#allocation8 + $0x320] sm:$0xff] }
 0x128   :  { %7610 = vmatprep.subr.bf16.mxu0 %v11804_v23  ;;  %7651 = vmatprep.subr.bf16.mxu1 %v11932_v24  ;;  %v11868_v23 = vcombine.high %v1534_v12, %v1538_v13  ;;  %v11996_v24 = vcombine.high %v1662_v17, %v1666_v18  ;;  %v1506_v44 = vld [vmem:[#allocation8 + $0x2a0] sm:$0xff] }
 0x129   :  { %v1630_v47 = vld [vmem:[#allocation8 + $0x680] sm:$0xff] }
 0x12a   :  { %v1634_v48 = vld [vmem:[#allocation8 + $0x6a0] sm:$0xff] }
 0x12b   :  { %7611 = vmatpush1.bf16.msra.mxu0 %v11803_v27  ;;  %7652 = vmatpush1.bf16.msra.mxu1 %v11931_v30  ;;  %v11867_v27 = vcombine.low %v1534_v12, %v1538_v13  ;;  %v11995_v30 = vcombine.low %v1662_v17, %v1666_v18  ;;  %v1494_v50 = vld [vmem:[#allocation8 + $0x240] sm:$0xff]  ;;  %v14178_v17 = vld [vmem:[#allocation7] sm:$0xff] }
 0x12c   :  { %7612 = vmatprep.subr.bf16.mxu0 %v11796_v31  ;;  %7653 = vmatprep.subr.bf16.mxu1 %v11924_v32  ;;  %v11860_v31 = vcombine.high %v1526_v20, %v1530_v21  ;;  %v11988_v32 = vcombine.high %v1654_v25, %v1658_v26  ;;  %v1498_v51 = vld [vmem:[#allocation8 + $0x260] sm:$0xff] }
 0x12d   :  { %v1622_v55 = vld [vmem:[#allocation8 + $0x640] sm:$0xff] }
 0x12e   :  { %v1626_v56 = vld [vmem:[#allocation8 + $0x660] sm:$0xff] }
 0x12f   :  { %7613 = vmatpush1.bf16.msra.mxu0 %v11795_v35  ;;  %7654 = vmatpush1.bf16.msra.mxu1 %v11923_v38  ;;  %v11859_v35 = vcombine.low %v1526_v20, %v1530_v21  ;;  %v11987_v38 = vcombine.low %v1654_v25, %v1658_v26  ;;  %v1486_v58 = vld [vmem:[#allocation8 + $0x200] sm:$0xff] }
 0x130   :  { %7614 = vmatprep.subr.bf16.mxu0 %v11788_v11  ;;  %7655 = vmatprep.subr.bf16.mxu1 %v11916_v39  ;;  %v11852_v11 = vcombine.high %v1518_v28, %v1522_v29  ;;  %v11980_v39 = vcombine.high %v1646_v33, %v1650_v34  ;;  %v1490_v59 = vld [vmem:[#allocation8 + $0x220] sm:$0xff] }
 0x131   :  { %v1614_v63 = vld [vmem:[#allocation8 + $0x600] sm:$0xff] }
 0x132   :  { %v1618_v1 = vld [vmem:[#allocation8 + $0x620] sm:$0xff] }
 0x133   :  { %7615 = vmatpush1.bf16.msra.mxu0 %v11787_v42  ;;  %7656 = vmatpush1.bf16.msra.mxu1 %v11915_v45  ;;  %v11851_v42 = vcombine.low %v1518_v28, %v1522_v29  ;;  %v11979_v45 = vcombine.low %v1646_v33, %v1650_v34  ;;  %v14167_v3 = vld [vmem:[#allocation8 + $0x9c0] sm:$0xff]  ;;  %v11947_v12 = vcombine.low %v1614_v63, %v1618_v1 }
 0x134   :  { %7616 = vmatprep.subr.bf16.mxu0 %v11780_v0  ;;  %7657 = vmatprep.subr.bf16.mxu1 %v11908_v46  ;;  %v11844_v0 = vcombine.high %v1510_v36, %v1514_v37  ;;  %v11972_v46 = vcombine.high %v1638_v40, %v1642_v41  ;;  %v14169_v4 = vld [vmem:[#allocation8 + $0x9e0] sm:$0xff] }
 0x135   :  { %v14171_v8 = vld [vmem:[#allocation8 + $0xdc0] sm:$0xff]  ;;  %v12068_v13 = vcombine.high %v14167_v3, %v14169_v4 }
 0x136   :  { %v1866_v9 = vld [vmem:[#allocation8 + $0xde0] sm:$0xff] }
 0x137   :  { %7617 = vmatpush1.bf16.msra.mxu0 %v11779_v49  ;;  %7658 = vmatpush1.bf16.msra.mxu1 %v11907_v52  ;;  %v11843_v49 = vcombine.low %v1510_v36, %v1514_v37  ;;  %v11971_v52 = vcombine.low %v1638_v40, %v1642_v41 }
 0x138   :  { %7618 = vmatprep.subr.bf16.mxu0 %v11772_v53  ;;  %7659 = vmatprep.subr.bf16.mxu1 %v11900_v54  ;;  %v11836_v53 = vcombine.high %v1502_v43, %v1506_v44  ;;  %v11964_v54 = vcombine.high %v1630_v47, %v1634_v48 }
 0x13b   :  { %7619 = vmatpush1.bf16.msra.mxu0 %v11771_v57  ;;  %7660 = vmatpush1.bf16.msra.mxu1 %v11899_v60  ;;  %v11835_v57 = vcombine.low %v1502_v43, %v1506_v44  ;;  %v11963_v60 = vcombine.low %v1630_v47, %v1634_v48  ;;  %v1858_v43 = vld [vmem:[#allocation8 + $0xda0] sm:$0xff] }
 0x13c   :  { %7620 = vmatprep.subr.bf16.mxu0 %v11764_v61  ;;  %7661 = vmatprep.subr.bf16.mxu1 %v11892_v62  ;;  %v11828_v61 = vcombine.high %v1494_v50, %v1498_v51  ;;  %v11956_v62 = vcombine.high %v1622_v55, %v1626_v56 }
 0x13f   :  { %7621 = vmatpush1.bf16.msra.mxu0 %v11763_v2  ;;  %7662 = vmatpush1.bf16.msra.mxu1 %v11891_v5  ;;  %v11827_v2 = vcombine.low %v1494_v50, %v1498_v51  ;;  %v11955_v5 = vcombine.low %v1622_v55, %v1626_v56  ;;  %v1850_v55 = vld [vmem:[#allocation8 + $0xd60] sm:$0xff] }
 0x140   :  { %7622 = vmatprep.subr.bf16.mxu0 %v11756_v6  ;;  %7663 = vmatprep.subr.bf16.mxu1 %v11884_v7  ;;  %v11820_v6 = vcombine.high %v1486_v58, %v1490_v59  ;;  %v11948_v7 = vcombine.high %v1614_v63, %v1618_v1  ;;  %v1842_v63 = vld [vmem:[#allocation8 + $0xd20] sm:$0xff] }
 0x143   :  { %7623 = vmatpush1.bf16.msra.mxu0 %v11755_v10  ;;  %7664 = vmatpush1.bf16.msra.mxu1 %v11883_v14  ;;  %v11819_v10 = vcombine.low %v1486_v58, %v1490_v59  ;;  %v12196_v14 = vcombine.high %v14171_v8, %v1866_v9 }
 0x144   :  { %7624 = vmatprep.subr.bf16.mxu0 %v11876_v15  ;;  %7665 = vmatprep.subr.bf16.mxu1 %v12004_v16  ;;  %v342_v15 = vlaneseq }
 0x146   :  { %v14176_v16 = vshrl.u32 %v342_v15, 7  ;;  %v1698_v15 = vld [vmem:[#allocation8 + $0x8a0] sm:$0xff] }
 0x147   :  { %7625 = vmatpush2.bf16.msra.mxu0 %v11875_v19  ;;  %7666 = vmatpush2.bf16.msra.mxu1 %v12003_v22 }
 0x148   :  { %7626 = vmatprep.subr.bf16.mxu0 %v11868_v23  ;;  %7667 = vmatprep.subr.bf16.mxu1 %v11996_v24  ;;  %v14181_v18 = vsub.s32 0, %v14176_v16  ;;  %v14184_v19 = vsub.s32 2, %v14176_v16  ;;  %v14187_v20 = vsub.s32 1, %v14176_v16  ;;  %v14190_v21 = vsub.s32 3, %v14176_v16 }
 0x14a   :  { %v345_v22 = vrot.slane %v14178_v17, %v14181_v18  ;;  %v353_v23 = vrot.slane %v14178_v17, %v14184_v19  ;;  %v349_v24 = vrot.slane %v14178_v17, %v14187_v20  ;;  %v357_v26 = vrot.slane %v14178_v17, %v14190_v21 }
 0x14b   :  { %7627 = vmatpush2.bf16.msra.mxu0 %v11867_v27  ;;  %7668 = vmatpush2.bf16.msra.mxu1 %v11995_v30 }
 0x14c   :  { %7628 = vmatprep.subr.bf16.mxu0 %v11860_v31  ;;  %7669 = vmatprep.subr.bf16.mxu1 %v11988_v32 }
 0x14f   :  { %7629 = vmatpush2.bf16.msra.mxu0 %v11859_v35  ;;  %7670 = vmatpush2.bf16.msra.mxu1 %v11987_v38 }
 0x150   :  { %7630 = vmatprep.subr.bf16.mxu0 %v11852_v11  ;;  %7671 = vmatprep.subr.bf16.mxu1 %v11980_v39  ;;  %v1726_v11 = vld [vmem:[#allocation8 + $0x980] sm:$0xff] }
 0x151   :  { %v1730_v39 = vld [vmem:[#allocation8 + $0x9a0] sm:$0xff] }
 0x152   :  { %v12060_v50 = vcombine.high %v1726_v11, %v1730_v39  ;;  %v12059_v56 = vcombine.low %v1726_v11, %v1730_v39  ;;  %v1682_v11 = vld [vmem:[#allocation8 + $0x820] sm:$0xff] }
 0x153   :  { %7631 = vmatpush2.bf16.msra.mxu0 %v11851_v42  ;;  %7672 = vmatpush2.bf16.msra.mxu1 %v11979_v45  ;;  %v1854_v42 = vld [vmem:[#allocation8 + $0xd80] sm:$0xff] }
 0x154   :  { %7632 = vmatprep.subr.bf16.mxu0 %v11844_v0  ;;  %7673 = vmatprep.subr.bf16.mxu1 %v11972_v46  ;;  %v12067_v46 = vcombine.low %v14167_v3, %v14169_v4  ;;  %v12188_v51 = vcombine.high %v1854_v42, %v1858_v43  ;;  %v1806_v39 = vld [vmem:[#allocation8 + $0xc00] sm:$0xff] }
 0x157   :  { %7633 = vmatpush2.bf16.msra.mxu0 %v11843_v49  ;;  %7674 = vmatpush2.bf16.msra.mxu1 %v11971_v52  ;;  %v12195_v49 = vcombine.low %v14171_v8, %v1866_v9  ;;  %v1718_v52 = vld [vmem:[#allocation8 + $0x940] sm:$0xff] }
 0x158   :  { %7634 = vmatprep.subr.bf16.mxu0 %v11836_v53  ;;  %7675 = vmatprep.subr.bf16.mxu1 %v11964_v54  ;;  %v1722_v53 = vld [vmem:[#allocation8 + $0x960] sm:$0xff] }
 0x159   :  { %v1846_v54 = vld [vmem:[#allocation8 + $0xd40] sm:$0xff]  ;;  %v12052_v58 = vcombine.high %v1718_v52, %v1722_v53  ;;  %v12051_v1 = vcombine.low %v1718_v52, %v1722_v53 }
 0x15a   :  { %v12180_v59 = vcombine.high %v1846_v54, %v1850_v55  ;;  %v1834_v8 = vld [vmem:[#allocation8 + $0xce0] sm:$0xff] }
 0x15b   :  { %7635 = vmatpush2.bf16.msra.mxu0 %v11835_v57  ;;  %7676 = vmatpush2.bf16.msra.mxu1 %v11963_v60  ;;  %v12187_v57 = vcombine.low %v1854_v42, %v1858_v43  ;;  %v1710_v60 = vld [vmem:[#allocation8 + $0x900] sm:$0xff] }
 0x15c   :  { %7636 = vmatprep.subr.bf16.mxu0 %v11828_v61  ;;  %7677 = vmatprep.subr.bf16.mxu1 %v11956_v62  ;;  %v1714_v61 = vld [vmem:[#allocation8 + $0x920] sm:$0xff] }
 0x15d   :  { %v1838_v62 = vld [vmem:[#allocation8 + $0xd00] sm:$0xff]  ;;  %v12044_v3 = vcombine.high %v1710_v60, %v1714_v61  ;;  %v12043_v9 = vcombine.low %v1710_v60, %v1714_v61 }
 0x15e   :  { %v12172_v4 = vcombine.high %v1838_v62, %v1842_v63  ;;  %v1802_v52 = vld [vmem:[#allocation8 + $0xbe0] sm:$0xff] }
 0x15f   :  { %7637 = vmatpush2.bf16.msra.mxu0 %v11827_v2  ;;  %7678 = vmatpush2.bf16.msra.mxu1 %v11955_v5  ;;  %v12179_v2 = vcombine.low %v1846_v54, %v1850_v55  ;;  %v1702_v5 = vld [vmem:[#allocation8 + $0x8c0] sm:$0xff] }
 0x160   :  { %7638 = vmatprep.subr.bf16.mxu0 %v11820_v6  ;;  %7679 = vmatprep.subr.bf16.mxu1 %v11948_v7  ;;  %v1706_v6 = vld [vmem:[#allocation8 + $0x8e0] sm:$0xff] }
 0x161   :  { %v1830_v7 = vld [vmem:[#allocation8 + $0xcc0] sm:$0xff] }
 0x162   :  { %v1926_v54 = vld [vmem:[#allocation8 + $0xfc0] sm:$0xff] }
 0x163   :  { %7639 = vmatpush2.bf16.msra.mxu0 %v11819_v10  ;;  %7680 = vmatpush2.bf16.msra.mxu1 %v11947_v12  ;;  %v12171_v10 = vcombine.low %v1838_v62, %v1842_v63  ;;  %v12036_v12 = vcombine.high %v1702_v5, %v1706_v6  ;;  %v1930_v55 = vld [vmem:[#allocation8 + $0xfe0] sm:$0xff] }
 0x164   :  { %7690 = vmatprep.subr.bf16.mxu0 %v12068_v13  ;;  %7731 = vmatprep.subr.bf16.mxu1 %v12196_v14  ;;  %v12164_v13 = vcombine.high %v1830_v7, %v1834_v8  ;;  %v1694_v14 = vld [vmem:[#allocation8 + $0x880] sm:$0xff] }
 0x186   :  { %v1096_v25 = vpop.f32.mrf.mxu0  ;;  %v1137_v28 = vpop.f32.mrf.mxu1 }
 0x187   :  { %v1097_v27 = vadd.f32 %v1096_v25, %v345_v22  ;;  %v1138_v29 = vadd.f32 %v1137_v28, %v353_v23  ;;  %v1822_v22 = vld [vmem:[#allocation8 + $0xc80] sm:$0xff]  ;;  %v12163_v25 = vcombine.low %v1830_v7, %v1834_v8 }
 0x188   :  { %v1098_v30 = vpop.f32.mrf.mxu0  ;;  %v1139_v32 = vpop.f32.mrf.mxu1  ;;  %v1826_v23 = vld [vmem:[#allocation8 + $0xca0] sm:$0xff] }
 0x189   :  { %v1099_v31 = vadd.f32 %v1098_v30, %v349_v24  ;;  %v1390_v33 = vmax.f32 %v1097_v27, 0.0  ;;  %v1392_v34 = vmax.f32 %v1138_v29, 0.0  ;;  %v1140_v35 = vadd.f32 %v1139_v32, %v357_v26  ;;  %v1686_v28 = vld [vmem:[#allocation8 + $0x840] sm:$0xff] }
 0x18a   :  { %v1100_v36 = vpop.f32.mrf.mxu0  ;;  %v1141_v38 = vpop.f32.mrf.mxu1  ;;  %v12035_v24 = vcombine.low %v1702_v5, %v1706_v6  ;;  %v12028_v26 = vcombine.high %v1694_v14, %v1698_v15  ;;  %v12156_v27 = vcombine.high %v1822_v22, %v1826_v23  ;;  %v1690_v29 = vld [vmem:[#allocation8 + $0x860] sm:$0xff]  ;;  %v12027_v32 = vcombine.low %v1694_v14, %v1698_v15 }
 0x18b   :  { %v1391_v37 = vmax.f32 %v1099_v31, 0.0  ;;  %v1393_v40 = vmax.f32 %v1140_v35, 0.0  ;;  %v14200_v44 = vpack.c.bf16 %v1392_v34, %v1392_v34  ;;  %v14206_v47 = vpack.c.bf16 %v1390_v33, %v1390_v33  ;;  %v1814_v30 = vld [vmem:[#allocation8 + $0xc40] sm:$0xff] }
 0x18c   :  { %v1101_v41 = vpop.f32.mrf.mxu0  ;;  %v1142_v0 = vpop.f32.mrf.mxu1  ;;  %v1818_v31 = vld [vmem:[#allocation8 + $0xc60] sm:$0xff]  ;;  %v14216_v33 = vsub.s32 5, %v14176_v16  ;;  %v12155_v34 = vcombine.low %v1822_v22, %v1826_v23  ;;  %v12020_v35 = vcombine.high %v1686_v28, %v1690_v29  ;;  %v14219_v36 = vsub.s32 7, %v14176_v16 }
 0x18d   :  { %v14202_v45 = vpack.c.bf16 %v1391_v37, %v1391_v37  ;;  %v14208_v48 = vpack.c.bf16 %v1393_v40, %v1393_v40  ;;  %v12148_v37 = vcombine.high %v1814_v30, %v1818_v31  ;;  %v1678_v38 = vld [vmem:[#allocation8 + $0x800] sm:$0xff]  ;;  %v12019_v41 = vcombine.low %v1686_v28, %v1690_v29 }
 0x18e   :  { %v1810_v40 = vld [vmem:[#allocation8 + $0xc20] sm:$0xff]  ;;  %v365_v42 = vrot.slane %v14178_v17, %v14216_v33  ;;  %v12147_v43 = vcombine.low %v1814_v30, %v1818_v31  ;;  %v12012_v0 = vcombine.high %v1678_v38, %v1682_v11  ;;  %v12259_v14 = vcombine.low %v1926_v54, %v1930_v55 }
 0x18f   :  { %7640 = vmatprep.mubr.bf16.mxu0 %v14202_v45  ;;  %7681 = vmatprep.mubr.bf16.mxu1 %v14208_v48  ;;  %v12139_v60 = vcombine.low %v1806_v39, %v1810_v40  ;;  %v1918_v6 = vld [vmem:[#allocation8 + $0xf80] sm:$0xff] }
 0x190   :  { %7641 = vmatmul.mubr.bf16.vlgmr.msra.gmra.mxu0 %v14206_v47  ;;  %7682 = vmatmul.mubr.bf16.vlgmr.msra.gmra.mxu1 %v14200_v44  ;;  %v1922_v7 = vld [vmem:[#allocation8 + $0xfa0] sm:$0xff] }
 0x191   :  { %7691 = vmatpush1.bf16.msra.mxu0 %v12067_v46  ;;  %7732 = vmatpush1.bf16.msra.mxu1 %v12195_v49  ;;  %v373_v49 = vrot.slane %v14178_v17, %v14219_v36  ;;  %v12252_v23 = vcombine.high %v1918_v6, %v1922_v7  ;;  %v12251_v29 = vcombine.low %v1918_v6, %v1922_v7 }
 0x192   :  { %7692 = vmatprep.subr.bf16.mxu0 %v12060_v50  ;;  %7733 = vmatprep.subr.bf16.mxu1 %v12188_v51  ;;  %v12140_v50 = vcombine.high %v1806_v39, %v1810_v40  ;;  %v1798_v51 = vld [vmem:[#allocation8 + $0xbc0] sm:$0xff] }
 0x193   :  { %v12132_v61 = vcombine.high %v1798_v51, %v1802_v52 }
 0x195   :  { %7693 = vmatpush1.bf16.msra.mxu0 %v12059_v56  ;;  %7734 = vmatpush1.bf16.msra.mxu1 %v12187_v57  ;;  %v12011_v57 = vcombine.low %v1678_v38, %v1682_v11 }
 0x196   :  { %7694 = vmatprep.subr.bf16.mxu0 %v12052_v58  ;;  %7735 = vmatprep.subr.bf16.mxu1 %v12180_v59 }
 0x199   :  { %7695 = vmatpush1.bf16.msra.mxu0 %v12051_v1  ;;  %7736 = vmatpush1.bf16.msra.mxu1 %v12179_v2  ;;  %v12260_v1 = vcombine.high %v1926_v54, %v1930_v55  ;;  %v1790_v2 = vld [vmem:[#allocation8 + $0xb80] sm:$0xff] }
 0x19a   :  { %7696 = vmatprep.subr.bf16.mxu0 %v12044_v3  ;;  %7737 = vmatprep.subr.bf16.mxu1 %v12172_v4  ;;  %v1794_v3 = vld [vmem:[#allocation8 + $0xba0] sm:$0xff] }
 0x19b   :  { %v12124_v15 = vcombine.high %v1790_v2, %v1794_v3  ;;  %v12123_v28 = vcombine.low %v1790_v2, %v1794_v3  ;;  %v1758_v54 = vld [vmem:[#allocation8 + $0xa80] sm:$0xff] }
 0x19c   :  { %v1762_v55 = vld [vmem:[#allocation8 + $0xaa0] sm:$0xff] }
 0x19d   :  { %7697 = vmatpush1.bf16.msra.mxu0 %v12043_v9  ;;  %7738 = vmatpush1.bf16.msra.mxu1 %v12171_v10  ;;  %v12131_v10 = vcombine.low %v1798_v51, %v1802_v52  ;;  %v1754_v2 = vld [vmem:[#allocation8 + $0xa60] sm:$0xff]  ;;  %v12091_v6 = vcombine.low %v1758_v54, %v1762_v55 }
 0x19e   :  { %7698 = vmatprep.subr.bf16.mxu0 %v12036_v12  ;;  %7739 = vmatprep.subr.bf16.mxu1 %v12164_v13  ;;  %v1878_v3 = vld [vmem:[#allocation8 + $0xe40] sm:$0xff] }
 0x1a1   :  { %7699 = vmatpush1.bf16.msra.mxu0 %v12035_v24  ;;  %7740 = vmatpush1.bf16.msra.mxu1 %v12163_v25  ;;  %v1782_v24 = vld [vmem:[#allocation8 + $0xb40] sm:$0xff] }
 0x1a2   :  { %7700 = vmatprep.subr.bf16.mxu0 %v12028_v26  ;;  %7741 = vmatprep.subr.bf16.mxu1 %v12156_v27  ;;  %v1786_v25 = vld [vmem:[#allocation8 + $0xb60] sm:$0xff] }
 0x1a3   :  { %v1910_v26 = vld [vmem:[#allocation8 + $0xf40] sm:$0xff]  ;;  %v12116_v30 = vcombine.high %v1782_v24, %v1786_v25  ;;  %v12115_v38 = vcombine.low %v1782_v24, %v1786_v25 }
 0x1a4   :  { %v1914_v27 = vld [vmem:[#allocation8 + $0xf60] sm:$0xff] }
 0x1a5   :  { %7701 = vmatpush1.bf16.msra.mxu0 %v12027_v32  ;;  %7742 = vmatpush1.bf16.msra.mxu1 %v12155_v34  ;;  %v12244_v31 = vcombine.high %v1910_v26, %v1914_v27  ;;  %v1774_v32 = vld [vmem:[#allocation8 + $0xb00] sm:$0xff]  ;;  %v12243_v11 = vcombine.low %v1910_v26, %v1914_v27 }
 0x1a6   :  { %7702 = vmatprep.subr.bf16.mxu0 %v12020_v35  ;;  %v14223_v46 = vpop.f32.mrf.mxu0  ;;  %7743 = vmatprep.subr.bf16.mxu1 %v12148_v37  ;;  %v14227_v53 = vpop.f32.mrf.mxu1  ;;  %v1778_v34 = vld [vmem:[#allocation8 + $0xb20] sm:$0xff] }
 0x1a7   :  { %v1902_v35 = vld [vmem:[#allocation8 + $0xf00] sm:$0xff]  ;;  %v12108_v39 = vcombine.high %v1774_v32, %v1778_v34 }
 0x1a8   :  { %v1180_v56 = vpop.f32.mrf.mxu0  ;;  %v1221_v59 = vpop.f32.mrf.mxu1  ;;  %v1906_v37 = vld [vmem:[#allocation8 + $0xf20] sm:$0xff] }
 0x1a9   :  { %7703 = vmatpush1.bf16.msra.mxu0 %v12019_v41  ;;  %v1181_v58 = vadd.f32 %v1180_v56, %v365_v42  ;;  %7744 = vmatpush1.bf16.msra.mxu1 %v12147_v43  ;;  %v1222_v63 = vadd.f32 %v1221_v59, %v373_v49  ;;  %v12236_v40 = vcombine.high %v1902_v35, %v1906_v37  ;;  %v1766_v41 = vld [vmem:[#allocation8 + $0xac0] sm:$0xff]  ;;  %v14236_v59 = vsub.s32 6, %v14176_v16 }
 0x1aa   :  { %7704 = vmatprep.subr.bf16.mxu0 %v12012_v0  ;;  %v1182_v62 = vpop.f32.mrf.mxu0  ;;  %7745 = vmatprep.subr.bf16.mxu1 %v12140_v50  ;;  %v1223_v5 = vpop.f32.mrf.mxu1  ;;  %v1770_v42 = vld [vmem:[#allocation8 + $0xae0] sm:$0xff]  ;;  %v12107_v49 = vcombine.low %v1774_v32, %v1778_v34  ;;  %v12235_v50 = vcombine.low %v1902_v35, %v1906_v37 }
 0x1ab   :  { %v1395_v4 = vmax.f32 %v1181_v58, 0.0  ;;  %v1397_v8 = vmax.f32 %v1222_v63, 0.0  ;;  %v1894_v43 = vld [vmem:[#allocation8 + $0xec0] sm:$0xff]  ;;  %v12100_v51 = vcombine.high %v1766_v41, %v1770_v42  ;;  %v12099_v58 = vcombine.low %v1766_v41, %v1770_v42 }
 0x1ac   :  { %v1183_v9 = vpop.f32.mrf.mxu0  ;;  %v1224_v13 = vpop.f32.mrf.mxu1  ;;  %v1898_v0 = vld [vmem:[#allocation8 + $0xee0] sm:$0xff]  ;;  %v12092_v62 = vcombine.high %v1758_v54, %v1762_v55  ;;  %v369_v5 = vrot.slane %v14178_v17, %v14236_v59 }
 0x1ad   :  { %7705 = vmatpush1.bf16.msra.mxu0 %v12011_v57  ;;  %v14229_v12 = vpack.c.bf16 %v1395_v4, %v1395_v4  ;;  %7746 = vmatpush1.bf16.msra.mxu1 %v12139_v60  ;;  %v14231_v22 = vpack.c.bf16 %v1397_v8, %v1397_v8  ;;  %v12228_v52 = vcombine.high %v1894_v43, %v1898_v0  ;;  %v1886_v56 = vld [vmem:[#allocation8 + $0xe80] sm:$0xff]  ;;  %v14245_v9 = vld [vmem:[#allocation7 + $0x8] sm:$0xff] }
 0x1ae   :  { %7706 = vmatprep.subr.bf16.mxu0 %v12132_v61  ;;  %7747 = vmatprep.subr.bf16.mxu1 %v12260_v1  ;;  %v1890_v57 = vld [vmem:[#allocation8 + $0xea0] sm:$0xff]  ;;  %v12227_v60 = vcombine.low %v1894_v43, %v1898_v0  ;;  %v14239_v61 = vsub.s32 4, %v14176_v16  ;;  %v1220_v24 = vadd.f32 %v14227_v53, %v369_v5 }
 0x1af   :  { %7722 = vmatprep.mubr.bf16.mxu0 %v14229_v12  ;;  %7763 = vmatprep.mubr.bf16.mxu1 %v14231_v22  ;;  %v12220_v63 = vcombine.high %v1886_v56, %v1890_v57  ;;  %v1750_v1 = vld [vmem:[#allocation8 + $0xa40] sm:$0xff]  ;;  %v12219_v8 = vcombine.low %v1886_v56, %v1890_v57 }
 0x1b0   :  { %v1882_v4 = vld [vmem:[#allocation8 + $0xe60] sm:$0xff]  ;;  %v361_v7 = vrot.slane %v14178_v17, %v14239_v61  ;;  %v12084_v16 = vcombine.high %v1750_v1, %v1754_v2  ;;  %v12083_v25 = vcombine.low %v1750_v1, %v1754_v2  ;;  %v381_v17 = vrot.slane %v14245_v9, %v14187_v20 }
 0x1b1   :  { %7707 = vmatpush2.bf16.msra.mxu0 %v12131_v10  ;;  %7748 = vmatpush2.bf16.msra.mxu1 %v12259_v14  ;;  %v12212_v10 = vcombine.high %v1878_v3, %v1882_v4  ;;  %v1742_v13 = vld [vmem:[#allocation8 + $0xa00] sm:$0xff]  ;;  %v12211_v26 = vcombine.low %v1878_v3, %v1882_v4 }
 0x1b2   :  { %7708 = vmatprep.subr.bf16.mxu0 %v12124_v15  ;;  %7749 = vmatprep.subr.bf16.mxu1 %v12252_v23  ;;  %v1746_v14 = vld [vmem:[#allocation8 + $0xa20] sm:$0xff]  ;;  %v1179_v27 = vadd.f32 %v14223_v46, %v361_v7 }
 0x1b3   :  { %v1870_v15 = vld [vmem:[#allocation8 + $0xe00] sm:$0xff]  ;;  %v12075_v46 = vcombine.low %v1742_v13, %v1746_v14 }
 0x1b4   :  { %v1874_v23 = vld [vmem:[#allocation8 + $0xe20] sm:$0xff]  ;;  %v1394_v41 = vmax.f32 %v1179_v27, 0.0 }
 0x1b5   :  { %7709 = vmatpush2.bf16.msra.mxu0 %v12123_v28  ;;  %7750 = vmatpush2.bf16.msra.mxu1 %v12251_v29  ;;  %v12076_v28 = vcombine.high %v1742_v13, %v1746_v14  ;;  %v1990_v32 = vld [vmem:[#allocation8 + $0x11c0] sm:$0xff]  ;;  %v12203_v42 = vcombine.low %v1870_v15, %v1874_v23 }
 0x1b6   :  { %7710 = vmatprep.subr.bf16.mxu0 %v12116_v30  ;;  %7751 = vmatprep.subr.bf16.mxu1 %v12244_v31  ;;  %v389_v30 = vrot.slane %v14245_v9, %v14190_v21  ;;  %v12204_v31 = vcombine.high %v1870_v15, %v1874_v23  ;;  %v1994_v53 = vld [vmem:[#allocation8 + $0x11e0] sm:$0xff]  ;;  %v14259_v2 = vpack.c.bf16 %v1394_v41, %v1394_v41 }
 0x1b7   :  { %v2118_v35 = vld [vmem:[#allocation8 + $0x15c0] sm:$0xff]  ;;  %v12324_v43 = vcombine.high %v1990_v32, %v1994_v53 }
 0x1b8   :  { %v2122_v37 = vld [vmem:[#allocation8 + $0x15e0] sm:$0xff] }
 0x1b9   :  { %7711 = vmatpush2.bf16.msra.mxu0 %v12115_v38  ;;  %7752 = vmatpush2.bf16.msra.mxu1 %v12243_v11  ;;  %v1396_v11 = vmax.f32 %v1220_v24, 0.0  ;;  %v2110_v56 = vld [vmem:[#allocation8 + $0x1580] sm:$0xff]  ;;  %v12451_v3 = vcombine.low %v2118_v35, %v2122_v37 }
 0x1ba   :  { %7712 = vmatprep.subr.bf16.mxu0 %v12108_v39  ;;  %7753 = vmatprep.subr.bf16.mxu1 %v12236_v40  ;;  %v2114_v57 = vld [vmem:[#allocation8 + $0x15a0] sm:$0xff] }
 0x1bb   :  { %v12444_v5 = vcombine.high %v2110_v56, %v2114_v57  ;;  %v1978_v7 = vld [vmem:[#allocation8 + $0x1160] sm:$0xff]  ;;  %v12443_v15 = vcombine.low %v2110_v56, %v2114_v57 }
 0x1bc   :  { %v2098_v27 = vld [vmem:[#allocation8 + $0x1520] sm:$0xff] }
 0x1bd   :  { %7713 = vmatpush2.bf16.msra.mxu0 %v12107_v49  ;;  %7754 = vmatpush2.bf16.msra.mxu1 %v12235_v50  ;;  %v12452_v50 = vcombine.high %v2118_v35, %v2122_v37  ;;  %v1962_v35 = vld [vmem:[#allocation8 + $0x10e0] sm:$0xff] }
 0x1be   :  { %7714 = vmatprep.subr.bf16.mxu0 %v12100_v51  ;;  %7755 = vmatprep.subr.bf16.mxu1 %v12228_v52  ;;  %v1982_v51 = vld [vmem:[#allocation8 + $0x1180] sm:$0xff] }
 0x1bf   :  { %v1986_v52 = vld [vmem:[#allocation8 + $0x11a0] sm:$0xff] }
 0x1c0   :  { %v12316_v4 = vcombine.high %v1982_v51, %v1986_v52  ;;  %v12315_v14 = vcombine.low %v1982_v51, %v1986_v52  ;;  %v2086_v37 = vld [vmem:[#allocation8 + $0x14c0] sm:$0xff] }
 0x1c1   :  { %7715 = vmatpush2.bf16.msra.mxu0 %v12099_v58  ;;  %7756 = vmatpush2.bf16.msra.mxu1 %v12227_v60  ;;  %v1950_v41 = vld [vmem:[#allocation8 + $0x1080] sm:$0xff] }
 0x1c2   :  { %7716 = vmatprep.subr.bf16.mxu0 %v12092_v62  ;;  %7757 = vmatprep.subr.bf16.mxu1 %v12220_v63  ;;  %v14257_v62 = vpack.c.bf16 %v1396_v11, %v1396_v11  ;;  %v12323_v63 = vcombine.low %v1990_v32, %v1994_v53  ;;  %v1958_v53 = vld [vmem:[#allocation8 + $0x10c0] sm:$0xff] }
 0x1c3   :  { %v2070_v56 = vld [vmem:[#allocation8 + $0x1440] sm:$0xff] }
 0x1c4   :  { %v2074_v57 = vld [vmem:[#allocation8 + $0x1460] sm:$0xff] }
 0x1c5   :  { %7717 = vmatpush2.bf16.msra.mxu0 %v12091_v6  ;;  %7758 = vmatpush2.bf16.msra.mxu1 %v12219_v8  ;;  %v1974_v6 = vld [vmem:[#allocation8 + $0x1140] sm:$0xff] }
 0x1c6   :  { %7718 = vmatprep.subr.bf16.mxu0 %v12084_v16  ;;  %v14251_v29 = vpop.f32.mrf.mxu0  ;;  %7759 = vmatprep.subr.bf16.mxu1 %v12212_v10  ;;  %v14255_v34 = vpop.f32.mrf.mxu1  ;;  %v2102_v16 = vld [vmem:[#allocation8 + $0x1540] sm:$0xff]  ;;  %v12308_v23 = vcombine.high %v1974_v6, %v1978_v7 }
 0x1c7   :  { %v2106_v10 = vld [vmem:[#allocation8 + $0x1560] sm:$0xff] }
 0x1c8   :  { %v1262_v38 = vpop.f32.mrf.mxu0  ;;  %v1303_v40 = vpop.f32.mrf.mxu1  ;;  %v12436_v24 = vcombine.high %v2102_v16, %v2106_v10 }
 0x1c9   :  { %7719 = vmatpush2.bf16.msra.mxu0 %v12083_v25  ;;  %v1263_v39 = vadd.f32 %v1262_v38, %v381_v17  ;;  %7760 = vmatpush2.bf16.msra.mxu1 %v12211_v26  ;;  %v1304_v49 = vadd.f32 %v1303_v40, %v389_v30  ;;  %v1966_v25 = vld [vmem:[#allocation8 + $0x1100] sm:$0xff]  ;;  %v12435_v30 = vcombine.low %v2102_v16, %v2106_v10 }
 0x1ca   :  { %7720 = vmatprep.subr.bf16.mxu0 %v12076_v28  ;;  %v1264_v0 = vpop.f32.mrf.mxu0  ;;  %7761 = vmatprep.subr.bf16.mxu1 %v12204_v31  ;;  %v1305_v55 = vpop.f32.mrf.mxu1  ;;  %v1970_v26 = vld [vmem:[#allocation8 + $0x1120] sm:$0xff]  ;;  %v12307_v28 = vcombine.low %v1974_v6, %v1978_v7  ;;  %v401_v16 = vrot.slane %v14245_v9, %v14236_v59 }
 0x1cb   :  { %v1399_v54 = vmax.f32 %v1263_v39, 0.0  ;;  %v1401_v58 = vmax.f32 %v1304_v49, 0.0  ;;  %v2094_v17 = vld [vmem:[#allocation8 + $0x1500] sm:$0xff]  ;;  %v12300_v31 = vcombine.high %v1966_v25, %v1970_v26  ;;  %v12299_v11 = vcombine.low %v1966_v25, %v1970_v26 }
 0x1cc   :  { %v1265_v60 = vpop.f32.mrf.mxu0  ;;  %v1306_v1 = vpop.f32.mrf.mxu1  ;;  %v12428_v32 = vcombine.high %v2094_v17, %v2098_v27  ;;  %v2090_v38 = vld [vmem:[#allocation8 + $0x14e0] sm:$0xff]  ;;  %v12292_v39 = vcombine.high %v1958_v53, %v1962_v35  ;;  %v12291_v49 = vcombine.low %v1958_v53, %v1962_v35 }
 0x1cd   :  { %7721 = vmatpush2.bf16.msra.mxu0 %v12075_v46  ;;  %7762 = vmatpush2.bf16.msra.mxu1 %v12203_v42  ;;  %v14261_v8 = vpack.c.bf16 %v1399_v54, %v1399_v54  ;;  %v14264_v13 = vpack.c.bf16 %v1401_v58, %v1401_v58  ;;  %v12427_v46 = vcombine.low %v2094_v17, %v2098_v27  ;;  %v1954_v42 = vld [vmem:[#allocation8 + $0x10a0] sm:$0xff] }
 0x1ce   :  { %7772 = vmatprep.subr.bf16.mxu0 %v12324_v43  ;;  %7813 = vmatprep.subr.bf16.mxu1 %v12452_v50  ;;  %v12420_v40 = vcombine.high %v2086_v37, %v2090_v38  ;;  %v2078_v43 = vld [vmem:[#allocation8 + $0x1480] sm:$0xff]  ;;  %v12419_v50 = vcombine.low %v2086_v37, %v2090_v38  ;;  %v12284_v51 = vcombine.high %v1950_v41, %v1954_v42 }
 0x1cf   :  { %v2082_v0 = vld [vmem:[#allocation8 + $0x14a0] sm:$0xff]  ;;  %v12283_v58 = vcombine.low %v1950_v41, %v1954_v42  ;;  %v12404_v1 = vcombine.high %v2070_v56, %v2074_v57 }
 0x1d0   :  { %7723 = vmatmul.mubr.bf16.vlgmr.msra.gmra.mxu0 %v14259_v2  ;;  %7764 = vmatmul.mubr.bf16.vlgmr.msra.gmra.mxu1 %v14257_v62  ;;  %v12412_v52 = vcombine.high %v2078_v43, %v2082_v0  ;;  %v1942_v54 = vld [vmem:[#allocation8 + $0x1040] sm:$0xff]  ;;  %v12411_v60 = vcombine.low %v2078_v43, %v2082_v0 }
 0x1d1   :  { %7773 = vmatpush1.bf16.msra.mxu0 %v12323_v63  ;;  %7814 = vmatpush1.bf16.msra.mxu1 %v12451_v3  ;;  %v1946_v55 = vld [vmem:[#allocation8 + $0x1060] sm:$0xff] }
 0x1d2   :  { %7774 = vmatprep.subr.bf16.mxu0 %v12316_v4  ;;  %7815 = vmatprep.subr.bf16.mxu1 %v12444_v5  ;;  %v12276_v63 = vcombine.high %v1942_v54, %v1946_v55  ;;  %v1934_v3 = vld [vmem:[#allocation8 + $0x1000] sm:$0xff]  ;;  %v393_v5 = vrot.slane %v14245_v9, %v14239_v61  ;;  %v12275_v10 = vcombine.low %v1942_v54, %v1946_v55 }
 0x1d3   :  { %7804 = vmatprep.mubr.bf16.mxu0 %v14261_v8  ;;  %7845 = vmatprep.mubr.bf16.mxu1 %v14264_v13  ;;  %v1938_v4 = vld [vmem:[#allocation8 + $0x1020] sm:$0xff] }
 0x1d4   :  { %v2062_v6 = vld [vmem:[#allocation8 + $0x1400] sm:$0xff]  ;;  %v12267_v53 = vcombine.low %v1934_v3, %v1938_v4 }
 0x1d5   :  { %7775 = vmatpush1.bf16.msra.mxu0 %v12315_v14  ;;  %7816 = vmatpush1.bf16.msra.mxu1 %v12443_v15  ;;  %v2066_v7 = vld [vmem:[#allocation8 + $0x1420] sm:$0xff]  ;;  %v12403_v14 = vcombine.low %v2070_v56, %v2074_v57  ;;  %v12268_v15 = vcombine.high %v1934_v3, %v1938_v4 }
 0x1d6   :  { %7776 = vmatprep.subr.bf16.mxu0 %v12308_v23  ;;  %7817 = vmatprep.subr.bf16.mxu1 %v12436_v24  ;;  %v12396_v24 = vcombine.high %v2062_v6, %v2066_v7  ;;  %v2054_v25 = vld [vmem:[#allocation8 + $0x13c0] sm:$0xff]  ;;  %v12395_v37 = vcombine.low %v2062_v6, %v2066_v7 }
 0x1d7   :  { %v2058_v26 = vld [vmem:[#allocation8 + $0x13e0] sm:$0xff] }
 0x1d8   :  { %v12388_v38 = vcombine.high %v2054_v25, %v2058_v26  ;;  %v2174_v42 = vld [vmem:[#allocation8 + $0x1780] sm:$0xff] }
 0x1d9   :  { %7777 = vmatpush1.bf16.msra.mxu0 %v12307_v28  ;;  %7818 = vmatpush1.bf16.msra.mxu1 %v12435_v30  ;;  %v2182_v28 = vld [vmem:[#allocation8 + $0x17c0] sm:$0xff] }
 0x1da   :  { %7778 = vmatprep.subr.bf16.mxu0 %v12300_v31  ;;  %7819 = vmatprep.subr.bf16.mxu1 %v12428_v32  ;;  %v2186_v30 = vld [vmem:[#allocation8 + $0x17e0] sm:$0xff] }
 0x1db   :  { %v2178_v43 = vld [vmem:[#allocation8 + $0x17a0] sm:$0xff] }
 0x1dc   :  { %v12508_v54 = vcombine.high %v2174_v42, %v2178_v43  ;;  %v2038_v55 = vld [vmem:[#allocation8 + $0x1340] sm:$0xff] }
 0x1dd   :  { %7779 = vmatpush1.bf16.msra.mxu0 %v12299_v11  ;;  %7820 = vmatpush1.bf16.msra.mxu1 %v12427_v46  ;;  %v12516_v46 = vcombine.high %v2182_v28, %v2186_v30  ;;  %v2042_v56 = vld [vmem:[#allocation8 + $0x1360] sm:$0xff] }
 0x1de   :  { %7780 = vmatprep.subr.bf16.mxu0 %v12292_v39  ;;  %7821 = vmatprep.subr.bf16.mxu1 %v12420_v40  ;;  %v2046_v39 = vld [vmem:[#allocation8 + $0x1380] sm:$0xff] }
 0x1df   :  { %v2050_v40 = vld [vmem:[#allocation8 + $0x13a0] sm:$0xff] }
 0x1e0   :  { %v2166_v57 = vld [vmem:[#allocation8 + $0x1740] sm:$0xff] }
 0x1e1   :  { %7781 = vmatpush1.bf16.msra.mxu0 %v12291_v49  ;;  %7822 = vmatpush1.bf16.msra.mxu1 %v12419_v50  ;;  %v12387_v49 = vcombine.low %v2054_v25, %v2058_v26  ;;  %v2030_v4 = vld [vmem:[#allocation8 + $0x1300] sm:$0xff] }
 0x1e2   :  { %7782 = vmatprep.subr.bf16.mxu0 %v12284_v51  ;;  %7823 = vmatprep.subr.bf16.mxu1 %v12412_v52  ;;  %v12515_v51 = vcombine.low %v2182_v28, %v2186_v30  ;;  %v12380_v52 = vcombine.high %v2046_v39, %v2050_v40  ;;  %v2158_v6 = vld [vmem:[#allocation8 + $0x1700] sm:$0xff] }
 0x1e3   :  { %v2162_v7 = vld [vmem:[#allocation8 + $0x1720] sm:$0xff] }
 0x1e4   :  { %v2150_v25 = vld [vmem:[#allocation8 + $0x16c0] sm:$0xff]  ;;  %v12491_v28 = vcombine.low %v2158_v6, %v2162_v7 }
 0x1e5   :  { %7783 = vmatpush1.bf16.msra.mxu0 %v12283_v58  ;;  %7824 = vmatpush1.bf16.msra.mxu1 %v12411_v60  ;;  %v2170_v58 = vld [vmem:[#allocation8 + $0x1760] sm:$0xff]  ;;  %v12379_v60 = vcombine.low %v2046_v39, %v2050_v40 }
 0x1e6   :  { %7784 = vmatprep.subr.bf16.mxu0 %v12276_v63  ;;  %v1342_v23 = vpop.f32.mrf.mxu0  ;;  %7825 = vmatprep.subr.bf16.mxu1 %v12404_v1  ;;  %v1383_v27 = vpop.f32.mrf.mxu1  ;;  %v12507_v63 = vcombine.low %v2174_v42, %v2178_v43  ;;  %v12372_v1 = vcombine.high %v2038_v55, %v2042_v56  ;;  %v12500_v3 = vcombine.high %v2166_v57, %v2170_v58  ;;  %v2154_v26 = vld [vmem:[#allocation8 + $0x16e0] sm:$0xff] }
 0x1e7   :  { %v14273_v17 = vadd.f32 %v1342_v23, %v393_v5  ;;  %v14277_v32 = vadd.f32 %v1383_v27, %v401_v16  ;;  %v2034_v5 = vld [vmem:[#allocation8 + $0x1320] sm:$0xff]  ;;  %v12371_v16 = vcombine.low %v2038_v55, %v2042_v56  ;;  %v12483_v40 = vcombine.low %v2150_v25, %v2154_v26 }
 0x1e8   :  { %v14275_v31 = vpop.f32.mrf.mxu0  ;;  %v14279_v35 = vpop.f32.mrf.mxu1  ;;  %v2022_v23 = vld [vmem:[#allocation8 + $0x12c0] sm:$0xff]  ;;  %v12363_v27 = vcombine.low %v2030_v4, %v2034_v5  ;;  %v385_v56 = vrot.slane %v14245_v9, %v14184_v19 }
 0x1e9   :  { %7785 = vmatpush1.bf16.msra.mxu0 %v12275_v10  ;;  %7826 = vmatpush1.bf16.msra.mxu1 %v12403_v14  ;;  %v12499_v10 = vcombine.low %v2166_v57, %v2170_v58  ;;  %v12364_v14 = vcombine.high %v2030_v4, %v2034_v5  ;;  %v2006_v43 = vld [vmem:[#allocation8 + $0x1240] sm:$0xff]  ;;  %v405_v4 = vrot.slane %v14245_v9, %v14219_v36 }
 0x1ea   :  { %7786 = vmatprep.subr.bf16.mxu0 %v12268_v15  ;;  %v1346_v11 = vpop.f32.mrf.mxu0  ;;  %7827 = vmatprep.subr.bf16.mxu1 %v12396_v24  ;;  %v1387_v41 = vpop.f32.mrf.mxu1  ;;  %v12492_v15 = vcombine.high %v2158_v6, %v2162_v7  ;;  %v2026_v24 = vld [vmem:[#allocation8 + $0x12e0] sm:$0xff] }
 0x1eb   :  { %v12356_v30 = vcombine.high %v2022_v23, %v2026_v24  ;;  %v2142_v11 = vld [vmem:[#allocation8 + $0x1680] sm:$0xff]  ;;  %v12355_v39 = vcombine.low %v2022_v23, %v2026_v24 }
 0x1ec   :  { %v1347_v0 = vpop.f32.mrf.mxu0  ;;  %v1388_v50 = vpop.f32.mrf.mxu1  ;;  %v1998_v58 = vld [vmem:[#allocation8 + $0x1200] sm:$0xff] }
 0x1ed   :  { %7787 = vmatpush1.bf16.msra.mxu0 %v12267_v53  ;;  %7828 = vmatpush1.bf16.msra.mxu1 %v12395_v37  ;;  %v12484_v53 = vcombine.high %v2150_v25, %v2154_v26  ;;  %v2014_v37 = vld [vmem:[#allocation8 + $0x1280] sm:$0xff]  ;;  %v1386_v25 = vadd.f32 %v14279_v35, %v405_v4 }
 0x1ee   :  { %7788 = vmatprep.subr.bf16.mxu0 %v12388_v38  ;;  %7829 = vmatprep.subr.bf16.mxu1 %v12516_v46  ;;  %v2018_v38 = vld [vmem:[#allocation8 + $0x12a0] sm:$0xff] }
 0x1ef   :  { %v2146_v46 = vld [vmem:[#allocation8 + $0x16a0] sm:$0xff]  ;;  %v12348_v41 = vcombine.high %v2014_v37, %v2018_v38 }
 0x1f0   :  { %v12476_v42 = vcombine.high %v2142_v11, %v2146_v46  ;;  %v2010_v0 = vld [vmem:[#allocation8 + $0x1260] sm:$0xff] }
 0x1f1   :  { %7789 = vmatpush2.bf16.msra.mxu0 %v12387_v49  ;;  %7830 = vmatpush2.bf16.msra.mxu1 %v12515_v51  ;;  %v2134_v49 = vld [vmem:[#allocation8 + $0x1640] sm:$0xff]  ;;  %v12347_v51 = vcombine.low %v2014_v37, %v2018_v38  ;;  %v12340_v55 = vcombine.high %v2006_v43, %v2010_v0  ;;  %v12339_v5 = vcombine.low %v2006_v43, %v2010_v0 }
 0x1f2   :  { %7790 = vmatprep.subr.bf16.mxu0 %v12380_v52  ;;  %7831 = vmatprep.subr.bf16.mxu1 %v12508_v54  ;;  %v2138_v50 = vld [vmem:[#allocation8 + $0x1660] sm:$0xff]  ;;  %v377_v52 = vrot.slane %v14245_v9, %v14181_v18  ;;  %v12475_v54 = vcombine.low %v2142_v11, %v2146_v46 }
 0x1f3   :  { %v12468_v57 = vcombine.high %v2134_v49, %v2138_v50  ;;  %v12467_v7 = vcombine.low %v2134_v49, %v2138_v50  ;;  %v2246_v23 = vld [vmem:[#allocation8 + $0x19c0] sm:$0xff] }
 0x1f4   :  { %v1261_v6 = vadd.f32 %v14251_v29, %v377_v52  ;;  %v2250_v24 = vld [vmem:[#allocation8 + $0x19e0] sm:$0xff] }
 0x1f5   :  { %7791 = vmatpush2.bf16.msra.mxu0 %v12379_v60  ;;  %7832 = vmatpush2.bf16.msra.mxu1 %v12507_v63  ;;  %v2002_v60 = vld [vmem:[#allocation8 + $0x1220] sm:$0xff]  ;;  %v397_v63 = vrot.slane %v14245_v9, %v14216_v33  ;;  %v12579_v35 = vcombine.low %v2246_v23, %v2250_v24 }
 0x1f6   :  { %7792 = vmatprep.subr.bf16.mxu0 %v12372_v1  ;;  %7833 = vmatprep.subr.bf16.mxu1 %v12500_v3  ;;  %v2126_v1 = vld [vmem:[#allocation8 + $0x1600] sm:$0xff] }
 0x1f7   :  { %v2130_v3 = vld [vmem:[#allocation8 + $0x1620] sm:$0xff] }
 0x1f8   :  { %v2374_v26 = vld [vmem:[#allocation8 + $0x1dc0] sm:$0xff]  ;;  %v12459_v29 = vcombine.low %v2126_v1, %v2130_v3 }
 0x1f9   :  { %7793 = vmatpush2.bf16.msra.mxu0 %v12371_v16  ;;  %7834 = vmatpush2.bf16.msra.mxu1 %v12499_v10  ;;  %v12332_v16 = vcombine.high %v1998_v58, %v2002_v60  ;;  %v1302_v10 = vadd.f32 %v14255_v34, %v385_v56  ;;  %v2378_v9 = vld [vmem:[#allocation8 + $0x1de0] sm:$0xff] }
 0x1fa   :  { %7794 = vmatprep.subr.bf16.mxu0 %v12364_v14  ;;  %7835 = vmatprep.subr.bf16.mxu1 %v12492_v15  ;;  %v12460_v14 = vcombine.high %v2126_v1, %v2130_v3  ;;  %v1345_v15 = vadd.f32 %v14275_v31, %v397_v63  ;;  %v12708_v37 = vcombine.high %v2374_v26, %v2378_v9  ;;  %v2238_v38 = vld [vmem:[#allocation8 + $0x1980] sm:$0xff]  ;;  %v1405_v31 = vmax.f32 %v1386_v25, 0.0 }
 0x1fb   :  { %v2242_v11 = vld [vmem:[#allocation8 + $0x19a0] sm:$0xff] }
 0x1fc   :  { %v1403_v34 = vmax.f32 %v1345_v15, 0.0  ;;  %v2366_v46 = vld [vmem:[#allocation8 + $0x1d80] sm:$0xff]  ;;  %v14299_v52 = vpack.c.bf16 %v1405_v31, %v1405_v31  ;;  %v12571_v56 = vcombine.low %v2238_v38, %v2242_v11 }
 0x1fd   :  { %7795 = vmatpush2.bf16.msra.mxu0 %v12363_v27  ;;  %7836 = vmatpush2.bf16.msra.mxu1 %v12491_v28  ;;  %v12331_v27 = vcombine.low %v1998_v58, %v2002_v60  ;;  %v1398_v28 = vmax.f32 %v1261_v6, 0.0  ;;  %v2230_v50 = vld [vmem:[#allocation8 + $0x1940] sm:$0xff] }
 0x1fe   :  { %7796 = vmatprep.subr.bf16.mxu0 %v12356_v30  ;;  %7837 = vmatprep.subr.bf16.mxu1 %v12484_v53  ;;  %v12580_v30 = vcombine.high %v2246_v23, %v2250_v24  ;;  %v1400_v53 = vmax.f32 %v1302_v10, 0.0  ;;  %v14297_v0 = vpack.c.bf16 %v1403_v34, %v1403_v34  ;;  %v2222_v63 = vld [vmem:[#allocation8 + $0x1900] sm:$0xff] }
 0x1ff   :  { %v2226_v1 = vld [vmem:[#allocation8 + $0x1920] sm:$0xff] }
 0x200   :  { %v14295_v43 = vpack.c.bf16 %v1400_v53, %v1400_v53  ;;  %v2350_v3 = vld [vmem:[#allocation8 + $0x1d00] sm:$0xff]  ;;  %v12555_v24 = vcombine.low %v2222_v63, %v2226_v1 }
 0x201   :  { %7797 = vmatpush2.bf16.msra.mxu0 %v12355_v39  ;;  %7838 = vmatpush2.bf16.msra.mxu1 %v12483_v40  ;;  %v2370_v39 = vld [vmem:[#allocation8 + $0x1da0] sm:$0xff]  ;;  %v14293_v40 = vpack.c.bf16 %v1398_v28, %v1398_v28 }
 0x202   :  { %7798 = vmatprep.subr.bf16.mxu0 %v12348_v41  ;;  %7839 = vmatprep.subr.bf16.mxu1 %v12476_v42  ;;  %v12707_v41 = vcombine.low %v2374_v26, %v2378_v9  ;;  %v12572_v42 = vcombine.high %v2238_v38, %v2242_v11  ;;  %v12700_v49 = vcombine.high %v2366_v46, %v2370_v39  ;;  %v2354_v4 = vld [vmem:[#allocation8 + $0x1d20] sm:$0xff] }
 0x203   :  { %v2214_v10 = vld [vmem:[#allocation8 + $0x18c0] sm:$0xff]  ;;  %v12683_v25 = vcombine.low %v2350_v3, %v2354_v4 }
 0x204   :  { %v2342_v15 = vld [vmem:[#allocation8 + $0x1cc0] sm:$0xff] }
 0x205   :  { %7799 = vmatpush2.bf16.msra.mxu0 %v12347_v51  ;;  %7840 = vmatpush2.bf16.msra.mxu1 %v12475_v54  ;;  %v2234_v51 = vld [vmem:[#allocation8 + $0x1960] sm:$0xff] }
 0x206   :  { %7800 = vmatprep.subr.bf16.mxu0 %v12340_v55  ;;  %7841 = vmatprep.subr.bf16.mxu1 %v12468_v57  ;;  %v2358_v54 = vld [vmem:[#allocation8 + $0x1d40] sm:$0xff]  ;;  %v12699_v57 = vcombine.low %v2366_v46, %v2370_v39  ;;  %v12564_v58 = vcombine.high %v2230_v50, %v2234_v51 }
 0x207   :  { %v2362_v55 = vld [vmem:[#allocation8 + $0x1d60] sm:$0xff] }
 0x208   :  { %v12692_v60 = vcombine.high %v2358_v54, %v2362_v55  ;;  %v12691_v6 = vcombine.low %v2358_v54, %v2362_v55  ;;  %v2346_v23 = vld [vmem:[#allocation8 + $0x1ce0] sm:$0xff] }
 0x209   :  { %7801 = vmatpush2.bf16.msra.mxu0 %v12339_v5  ;;  %7842 = vmatpush2.bf16.msra.mxu1 %v12467_v7  ;;  %v12563_v5 = vcombine.low %v2230_v50, %v2234_v51  ;;  %v12556_v7 = vcombine.high %v2222_v63, %v2226_v1  ;;  %v12676_v9 = vcombine.high %v2342_v15, %v2346_v23  ;;  %v2210_v28 = vld [vmem:[#allocation8 + $0x18a0] sm:$0xff] }
 0x20a   :  { %7802 = vmatprep.subr.bf16.mxu0 %v12332_v16  ;;  %7843 = vmatprep.subr.bf16.mxu1 %v12460_v14  ;;  %v12684_v16 = vcombine.high %v2350_v3, %v2354_v4  ;;  %v2218_v14 = vld [vmem:[#allocation8 + $0x18e0] sm:$0xff]  ;;  %v12675_v34 = vcombine.low %v2342_v15, %v2346_v23 }
 0x20b   :  { %v12548_v26 = vcombine.high %v2214_v10, %v2218_v14  ;;  %v12547_v53 = vcombine.low %v2214_v10, %v2218_v14  ;;  %v2198_v11 = vld [vmem:[#allocation8 + $0x1840] sm:$0xff] }
 0x20c   :  { %v2202_v31 = vld [vmem:[#allocation8 + $0x1860] sm:$0xff] }
 0x20d   :  { %7803 = vmatpush2.bf16.msra.mxu0 %v12331_v27  ;;  %7844 = vmatpush2.bf16.msra.mxu1 %v12459_v29  ;;  %v2206_v27 = vld [vmem:[#allocation8 + $0x1880] sm:$0xff] }
 0x20e   :  { %7854 = vmatprep.subr.bf16.mxu0 %v12580_v30  ;;  %7895 = vmatprep.subr.bf16.mxu1 %v12708_v37  ;;  %v2334_v29 = vld [vmem:[#allocation8 + $0x1c80] sm:$0xff]  ;;  %v12540_v37 = vcombine.high %v2206_v27, %v2210_v28 }
 0x20f   :  { %v2338_v30 = vld [vmem:[#allocation8 + $0x1ca0] sm:$0xff] }
 0x210   :  { %7805 = vmatmul.mubr.bf16.vlgmr.msra.gmra.mxu0 %v14293_v40  ;;  %7846 = vmatmul.mubr.bf16.vlgmr.msra.gmra.mxu1 %v14295_v43  ;;  %v12668_v38 = vcombine.high %v2334_v29, %v2338_v30  ;;  %v2326_v46 = vld [vmem:[#allocation8 + $0x1c40] sm:$0xff] }
 0x211   :  { %7855 = vmatpush1.bf16.msra.mxu0 %v12579_v35  ;;  %7896 = vmatpush1.bf16.msra.mxu1 %v12707_v41  ;;  %v2330_v39 = vld [vmem:[#allocation8 + $0x1c60] sm:$0xff]  ;;  %v12539_v35 = vcombine.low %v2206_v27, %v2210_v28  ;;  %v12667_v41 = vcombine.low %v2334_v29, %v2338_v30 }
 0x212   :  { %7856 = vmatprep.subr.bf16.mxu0 %v12572_v42  ;;  %7897 = vmatprep.subr.bf16.mxu1 %v12700_v49  ;;  %v12532_v42 = vcombine.high %v2198_v11, %v2202_v31  ;;  %v12660_v49 = vcombine.high %v2326_v46, %v2330_v39  ;;  %v2190_v50 = vld [vmem:[#allocation8 + $0x1800] sm:$0xff] }
 0x213   :  { %7886 = vmatprep.mubr.bf16.mxu0 %v14297_v0  ;;  %7927 = vmatprep.mubr.bf16.mxu1 %v14299_v52  ;;  %v2194_v51 = vld [vmem:[#allocation8 + $0x1820] sm:$0xff] }
 0x214   :  { %v2318_v54 = vld [vmem:[#allocation8 + $0x1c00] sm:$0xff] }
 0x215   :  { %7857 = vmatpush1.bf16.msra.mxu0 %v12571_v56  ;;  %7898 = vmatpush1.bf16.msra.mxu1 %v12699_v57  ;;  %v2322_v55 = vld [vmem:[#allocation8 + $0x1c20] sm:$0xff]  ;;  %v12531_v56 = vcombine.low %v2198_v11, %v2202_v31  ;;  %v12659_v57 = vcombine.low %v2326_v46, %v2330_v39 }
 0x216   :  { %7858 = vmatprep.subr.bf16.mxu0 %v12564_v58  ;;  %7899 = vmatprep.subr.bf16.mxu1 %v12692_v60  ;;  %v12524_v58 = vcombine.high %v2190_v50, %v2194_v51  ;;  %v12652_v60 = vcombine.high %v2318_v54, %v2322_v55  ;;  %v2310_v63 = vld [vmem:[#allocation8 + $0x1bc0] sm:$0xff] }
 0x217   :  { %v2314_v1 = vld [vmem:[#allocation8 + $0x1be0] sm:$0xff] }
 0x218   :  { %v2438_v3 = vld [vmem:[#allocation8 + $0x1fc0] sm:$0xff] }
 0x219   :  { %7859 = vmatpush1.bf16.msra.mxu0 %v12563_v5  ;;  %7900 = vmatpush1.bf16.msra.mxu1 %v12691_v6  ;;  %v2442_v4 = vld [vmem:[#allocation8 + $0x1fe0] sm:$0xff]  ;;  %v12523_v5 = vcombine.low %v2190_v50, %v2194_v51  ;;  %v12651_v6 = vcombine.low %v2318_v54, %v2322_v55 }
 0x21a   :  { %7860 = vmatprep.subr.bf16.mxu0 %v12556_v7  ;;  %7901 = vmatprep.subr.bf16.mxu1 %v12684_v16  ;;  %v12644_v7 = vcombine.high %v2310_v63, %v2314_v1  ;;  %v12772_v16 = vcombine.high %v2438_v3, %v2442_v4  ;;  %v2302_v10 = vld [vmem:[#allocation8 + $0x1b80] sm:$0xff] }
 0x21b   :  { %v2306_v14 = vld [vmem:[#allocation8 + $0x1ba0] sm:$0xff] }
 0x21c   :  { %v2430_v15 = vld [vmem:[#allocation8 + $0x1f80] sm:$0xff] }
 0x21d   :  { %7861 = vmatpush1.bf16.msra.mxu0 %v12555_v24  ;;  %7902 = vmatpush1.bf16.msra.mxu1 %v12683_v25  ;;  %v2434_v23 = vld [vmem:[#allocation8 + $0x1fa0] sm:$0xff]  ;;  %v12643_v24 = vcombine.low %v2310_v63, %v2314_v1  ;;  %v12771_v25 = vcombine.low %v2438_v3, %v2442_v4 }
 0x21e   :  { %7862 = vmatprep.subr.bf16.mxu0 %v12548_v26  ;;  %7903 = vmatprep.subr.bf16.mxu1 %v12676_v9  ;;  %v12636_v26 = vcombine.high %v2302_v10, %v2306_v14  ;;  %v12764_v9 = vcombine.high %v2430_v15, %v2434_v23  ;;  %v2294_v27 = vld [vmem:[#allocation8 + $0x1b40] sm:$0xff] }
 0x21f   :  { %v2298_v28 = vld [vmem:[#allocation8 + $0x1b60] sm:$0xff] }
 0x220   :  { %v2422_v29 = vld [vmem:[#allocation8 + $0x1f40] sm:$0xff] }
 0x221   :  { %7863 = vmatpush1.bf16.msra.mxu0 %v12547_v53  ;;  %7904 = vmatpush1.bf16.msra.mxu1 %v12675_v34  ;;  %v2426_v30 = vld [vmem:[#allocation8 + $0x1f60] sm:$0xff]  ;;  %v12635_v53 = vcombine.low %v2302_v10, %v2306_v14  ;;  %v12763_v34 = vcombine.low %v2430_v15, %v2434_v23 }
 0x222   :  { %7864 = vmatprep.subr.bf16.mxu0 %v12540_v37  ;;  %7905 = vmatprep.subr.bf16.mxu1 %v12668_v38  ;;  %v12628_v37 = vcombine.high %v2294_v27, %v2298_v28  ;;  %v12756_v38 = vcombine.high %v2422_v29, %v2426_v30  ;;  %v2286_v11 = vld [vmem:[#allocation8 + $0x1b00] sm:$0xff] }
 0x223   :  { %v2290_v31 = vld [vmem:[#allocation8 + $0x1b20] sm:$0xff] }
 0x224   :  { %v2414_v46 = vld [vmem:[#allocation8 + $0x1f00] sm:$0xff] }
 0x225   :  { %7865 = vmatpush1.bf16.msra.mxu0 %v12539_v35  ;;  %7906 = vmatpush1.bf16.msra.mxu1 %v12667_v41  ;;  %v2418_v39 = vld [vmem:[#allocation8 + $0x1f20] sm:$0xff]  ;;  %v12627_v35 = vcombine.low %v2294_v27, %v2298_v28  ;;  %v12755_v41 = vcombine.low %v2422_v29, %v2426_v30 }
 0x226   :  { %7866 = vmatprep.subr.bf16.mxu0 %v12532_v42  ;;  %7907 = vmatprep.subr.bf16.mxu1 %v12660_v49  ;;  %v12620_v42 = vcombine.high %v2286_v11, %v2290_v31  ;;  %v12748_v49 = vcombine.high %v2414_v46, %v2418_v39  ;;  %v2278_v50 = vld [vmem:[#allocation8 + $0x1ac0] sm:$0xff] }
 0x227   :  { %v2282_v51 = vld [vmem:[#allocation8 + $0x1ae0] sm:$0xff] }
 0x228   :  { %v2406_v54 = vld [vmem:[#allocation8 + $0x1ec0] sm:$0xff] }
 0x229   :  { %7867 = vmatpush1.bf16.msra.mxu0 %v12531_v56  ;;  %7908 = vmatpush1.bf16.msra.mxu1 %v12659_v57  ;;  %v2410_v55 = vld [vmem:[#allocation8 + $0x1ee0] sm:$0xff]  ;;  %v12619_v56 = vcombine.low %v2286_v11, %v2290_v31  ;;  %v12747_v57 = vcombine.low %v2414_v46, %v2418_v39  ;;  %v1479_v11 = vld [vmem:[#allocation8 + $0x1c8] sm:$0xff] }
 0x22a   :  { %7868 = vmatprep.subr.bf16.mxu0 %v12524_v58  ;;  %7909 = vmatprep.subr.bf16.mxu1 %v12652_v60  ;;  %v12612_v58 = vcombine.high %v2278_v50, %v2282_v51  ;;  %v12740_v60 = vcombine.high %v2406_v54, %v2410_v55  ;;  %v2270_v63 = vld [vmem:[#allocation8 + $0x1a80] sm:$0xff]  ;;  %v1483_v31 = vld [vmem:[#allocation8 + $0x1e8] sm:$0xff] }
 0x22b   :  { %v2274_v1 = vld [vmem:[#allocation8 + $0x1aa0] sm:$0xff]  ;;  %v1607_v46 = vld [vmem:[#allocation8 + $0x5c8] sm:$0xff] }
 0x22c   :  { %v2398_v3 = vld [vmem:[#allocation8 + $0x1e80] sm:$0xff]  ;;  %v1611_v39 = vld [vmem:[#allocation8 + $0x5e8] sm:$0xff] }
 0x22d   :  { %7869 = vmatpush1.bf16.msra.mxu0 %v12523_v5  ;;  %7910 = vmatpush1.bf16.msra.mxu1 %v12651_v6  ;;  %v2402_v4 = vld [vmem:[#allocation8 + $0x1ea0] sm:$0xff]  ;;  %v12611_v5 = vcombine.low %v2278_v50, %v2282_v51  ;;  %v12739_v6 = vcombine.low %v2406_v54, %v2410_v55  ;;  %v1404_v51 = vmax.f32 %v14277_v32, 0.0  ;;  %v11942_v54 = vcombine.high %v1607_v46, %v1611_v39  ;;  %v1471_v55 = vld [vmem:[#allocation8 + $0x188] sm:$0xff] }
 0x22e   :  { %7870 = vmatprep.subr.bf16.mxu0 %v12644_v7  ;;  %7911 = vmatprep.subr.bf16.mxu1 %v12772_v16  ;;  %v12604_v7 = vcombine.high %v2270_v63, %v2274_v1  ;;  %v12732_v16 = vcombine.high %v2398_v3, %v2402_v4  ;;  %v2262_v10 = vld [vmem:[#allocation8 + $0x1a40] sm:$0xff] }
 0x22f   :  { %v2266_v14 = vld [vmem:[#allocation8 + $0x1a60] sm:$0xff] }
 0x230   :  { %v2390_v15 = vld [vmem:[#allocation8 + $0x1e40] sm:$0xff] }
 0x231   :  { %7871 = vmatpush2.bf16.msra.mxu0 %v12643_v24  ;;  %7912 = vmatpush2.bf16.msra.mxu1 %v12771_v25  ;;  %v2394_v23 = vld [vmem:[#allocation8 + $0x1e60] sm:$0xff]  ;;  %v12603_v24 = vcombine.low %v2270_v63, %v2274_v1  ;;  %v12731_v25 = vcombine.low %v2398_v3, %v2402_v4  ;;  %v1603_v63 = vld [vmem:[#allocation8 + $0x5a8] sm:$0xff]  ;;  %v14310_v3 = vpack.c.bf16 %v1404_v51, %v1404_v51 }
 0x232   :  { %7872 = vmatprep.subr.bf16.mxu0 %v12636_v26  ;;  %7913 = vmatprep.subr.bf16.mxu1 %v12764_v9  ;;  %v12596_v26 = vcombine.high %v2262_v10, %v2266_v14  ;;  %v12724_v9 = vcombine.high %v2390_v15, %v2394_v23  ;;  %v2254_v27 = vld [vmem:[#allocation8 + $0x1a00] sm:$0xff]  ;;  %v1447_v51 = vld [vmem:[#allocation8 + $0xc8] sm:$0xff] }
 0x233   :  { %v2258_v28 = vld [vmem:[#allocation8 + $0x1a20] sm:$0xff] }
 0x234   :  { %v2382_v29 = vld [vmem:[#allocation8 + $0x1e00] sm:$0xff] }
 0x235   :  { %7873 = vmatpush2.bf16.msra.mxu0 %v12635_v53  ;;  %7914 = vmatpush2.bf16.msra.mxu1 %v12763_v34  ;;  %v2386_v30 = vld [vmem:[#allocation8 + $0x1e20] sm:$0xff]  ;;  %v12595_v53 = vcombine.low %v2262_v10, %v2266_v14  ;;  %v12723_v34 = vcombine.low %v2390_v15, %v2394_v23  ;;  %v1591_v10 = vld [vmem:[#allocation8 + $0x548] sm:$0xff] }
 0x236   :  { %7874 = vmatprep.subr.bf16.mxu0 %v12628_v37  ;;  %7915 = vmatprep.subr.bf16.mxu1 %v12756_v38  ;;  %v12588_v37 = vcombine.high %v2254_v27, %v2258_v28  ;;  %v12716_v38 = vcombine.high %v2382_v29, %v2386_v30  ;;  %v2446_v50 = vld [vmem:[#allocation10] sm:$0xff]  ;;  %v1595_v14 = vld [vmem:[#allocation8 + $0x568] sm:$0xff] }
 0x237   :  { %v2455_v32 = vrot.slane %v2446_v50, %v14187_v20 }
 0x239   :  { %7875 = vmatpush2.bf16.msra.mxu0 %v12627_v35  ;;  %7916 = vmatpush2.bf16.msra.mxu1 %v12755_v41  ;;  %v12587_v35 = vcombine.low %v2254_v27, %v2258_v28  ;;  %v1402_v41 = vmax.f32 %v14273_v17, 0.0  ;;  %v11941_v17 = vcombine.low %v1607_v46, %v1611_v39 }
 0x23a   :  { %7876 = vmatprep.subr.bf16.mxu0 %v12620_v42  ;;  %7917 = vmatprep.subr.bf16.mxu1 %v12748_v49  ;;  %v12715_v42 = vcombine.low %v2382_v29, %v2386_v30  ;;  %v11814_v49 = vcombine.high %v1479_v11, %v1483_v31  ;;  %v11926_v30 = vcombine.high %v1591_v10, %v1595_v14 }
 0x23b   :  { %v14308_v1 = vpack.c.bf16 %v1402_v41, %v1402_v41  ;;  %v11925_v41 = vcombine.low %v1591_v10, %v1595_v14  ;;  %v1431_v14 = vld [vmem:[#allocation8 + $0x48] sm:$0xff] }
 0x23d   :  { %7877 = vmatpush2.bf16.msra.mxu0 %v12619_v56  ;;  %7918 = vmatpush2.bf16.msra.mxu1 %v12747_v57  ;;  %v1475_v56 = vld [vmem:[#allocation8 + $0x1a8] sm:$0xff]  ;;  %v11813_v57 = vcombine.low %v1479_v11, %v1483_v31 }
 0x23e   :  { %7878 = vmatprep.subr.bf16.mxu0 %v12612_v58  ;;  %7919 = vmatprep.subr.bf16.mxu1 %v12740_v60  ;;  %v2451_v58 = vrot.slane %v2446_v50, %v14181_v18  ;;  %v1599_v60 = vld [vmem:[#allocation8 + $0x588] sm:$0xff]  ;;  %v11806_v4 = vcombine.high %v1471_v55, %v1475_v56 }
 0x23f   :  { %v1587_v11 = vld [vmem:[#allocation8 + $0x528] sm:$0xff] }
 0x241   :  { %7879 = vmatpush2.bf16.msra.mxu0 %v12611_v5  ;;  %7920 = vmatpush2.bf16.msra.mxu1 %v12739_v6  ;;  %v1463_v5 = vld [vmem:[#allocation8 + $0x148] sm:$0xff] }
 0x242   :  { %7880 = vmatprep.subr.bf16.mxu0 %v12604_v7  ;;  %7921 = vmatprep.subr.bf16.mxu1 %v12732_v16  ;;  %v1467_v6 = vld [vmem:[#allocation8 + $0x168] sm:$0xff]  ;;  %v11934_v16 = vcombine.high %v1599_v60, %v1603_v63 }
 0x243   :  { %v11797_v39 = vcombine.low %v1463_v5, %v1467_v6 }
 0x245   :  { %7881 = vmatpush2.bf16.msra.mxu0 %v12603_v24  ;;  %7922 = vmatpush2.bf16.msra.mxu1 %v12731_v25  ;;  %v11805_v24 = vcombine.low %v1471_v55, %v1475_v56  ;;  %v1575_v55 = vld [vmem:[#allocation8 + $0x4c8] sm:$0xff] }
 0x246   :  { %7882 = vmatprep.subr.bf16.mxu0 %v12596_v26  ;;  %7923 = vmatprep.subr.bf16.mxu1 %v12724_v9  ;;  %v11933_v26 = vcombine.low %v1599_v60, %v1603_v63  ;;  %v11798_v9 = vcombine.high %v1463_v5, %v1467_v6  ;;  %v1579_v56 = vld [vmem:[#allocation8 + $0x4e8] sm:$0xff] }
 0x247   :  { %v11910_v63 = vcombine.high %v1575_v55, %v1579_v56  ;;  %v1571_v5 = vld [vmem:[#allocation8 + $0x4a8] sm:$0xff] }
 0x249   :  { %7883 = vmatpush2.bf16.msra.mxu0 %v12595_v53  ;;  %7924 = vmatpush2.bf16.msra.mxu1 %v12723_v34  ;;  %v1455_v53 = vld [vmem:[#allocation8 + $0x108] sm:$0xff] }
 0x24a   :  { %7884 = vmatprep.subr.bf16.mxu0 %v12588_v37  ;;  %7925 = vmatprep.subr.bf16.mxu1 %v12716_v38  ;;  %v1459_v34 = vld [vmem:[#allocation8 + $0x128] sm:$0xff] }
 0x24b   :  { %v1583_v38 = vld [vmem:[#allocation8 + $0x508] sm:$0xff] }
 0x24c   :  { %v11918_v50 = vcombine.high %v1583_v38, %v1587_v11 }
 0x24d   :  { %7885 = vmatpush2.bf16.msra.mxu0 %v12587_v35  ;;  %7926 = vmatpush2.bf16.msra.mxu1 %v12715_v42  ;;  %v11790_v42 = vcombine.high %v1455_v53, %v1459_v34 }
 0x24e   :  { %7936 = vmatprep.subr.bf16.mxu0 %v11814_v49  ;;  %7977 = vmatprep.subr.bf16.mxu1 %v11942_v54  ;;  %v1451_v54 = vld [vmem:[#allocation8 + $0xe8] sm:$0xff] }
 0x24f   :  { %v11782_v60 = vcombine.high %v1447_v51, %v1451_v54  ;;  %v11781_v6 = vcombine.low %v1447_v51, %v1451_v54 }
 0x250   :  { %7887 = vmatmul.mubr.bf16.vlgmr.msra.gmra.mxu0 %v14308_v1  ;;  %v7642_v7 = vpop.f32.mrf.mxu0  ;;  %7928 = vmatmul.mubr.bf16.vlgmr.msra.gmra.mxu1 %v14310_v3  ;;  %v7683_v23 = vpop.f32.mrf.mxu1 }
 0x251   :  { %v7643_v15 = vadd.f32 %v7642_v7, %v2451_v58  ;;  %7937 = vmatpush1.bf16.msra.mxu0 %v11813_v57  ;;  %7968 = vmatprep.mubr.bf16.mxu0 %v14202_v45  ;;  %v11789_v57 = vcombine.low %v1455_v53, %v1459_v34  ;;  %v11917_v58 = vcombine.low %v1583_v38, %v1587_v11  ;;  %v1551_v53 = vld [vmem:[#allocation8 + $0x408] sm:$0xff] }
 0x252   :  { %7978 = vmatpush1.bf16.msra.mxu1 %v11941_v17  ;;  %v7644_v25 = vpop.f32.mrf.mxu0  ;;  %8009 = vmatprep.mubr.bf16.mxu1 %v14208_v48  ;;  %v7685_v29 = vpop.f32.mrf.mxu1  ;;  %v1439_v17 = vld [vmem:[#allocation8 + $0x88] sm:$0xff]  ;;  %v11909_v7 = vcombine.low %v1575_v55, %v1579_v56 }
 0x253   :  { %v14316_v27 = vadd.f32 %v7683_v23, %v7643_v15  ;;  %v7645_v28 = vadd.f32 %v7644_v25, %v2455_v32  ;;  %7938 = vmatprep.subr.bf16.mxu0 %v11806_v4  ;;  %7979 = vmatprep.subr.bf16.mxu1 %v11934_v16  ;;  %v1443_v32 = vld [vmem:[#allocation8 + $0xa8] sm:$0xff] }
 0x254   :  { %v7646_v37 = vpop.f32.mrf.mxu0  ;;  %v7687_v46 = vpop.f32.mrf.mxu1  ;;  %v1567_v4 = vld [vmem:[#allocation8 + $0x488] sm:$0xff]  ;;  %v11774_v16 = vcombine.high %v1439_v17, %v1443_v32  ;;  %v11773_v25 = vcombine.low %v1439_v17, %v1443_v32 }
 0x255   :  { %v14319_v31 = vadd.f32 %v7685_v29, %v7645_v28  ;;  %7939 = vmatpush1.bf16.msra.mxu0 %v11805_v24  ;;  %v11902_v10 = vcombine.high %v1567_v4, %v1571_v5  ;;  %v1435_v15 = vld [vmem:[#allocation8 + $0x68] sm:$0xff] }
 0x256   :  { %7980 = vmatpush1.bf16.msra.mxu1 %v11933_v26  ;;  %v7647_v35 = vpop.f32.mrf.mxu0  ;;  %7940 = vmatprep.subr.bf16.mxu0 %v11798_v9  ;;  %v7688_v49 = vpop.f32.mrf.mxu1  ;;  %v1559_v23 = vld [vmem:[#allocation8 + $0x448] sm:$0xff]  ;;  %v11901_v26 = vcombine.low %v1567_v4, %v1571_v5  ;;  %v11766_v9 = vcombine.high %v1431_v14, %v1435_v15  ;;  %v11765_v37 = vcombine.low %v1431_v14, %v1435_v15 }
 0x257   :  { %7981 = vmatprep.subr.bf16.mxu1 %v11926_v30  ;;  %v1563_v24 = vld [vmem:[#allocation8 + $0x468] sm:$0xff] }
 0x258   :  { %v11894_v28 = vcombine.high %v1559_v23, %v1563_v24  ;;  %v1423_v29 = vld [vmem:[#allocation8 + $0x8] sm:$0xff]  ;;  %v11893_v38 = vcombine.low %v1559_v23, %v1563_v24 }
 0x259   :  { %7941 = vmatpush1.bf16.msra.mxu0 %v11797_v39  ;;  %v1427_v30 = vld [vmem:[#allocation8 + $0x28] sm:$0xff] }
 0x25a   :  { %7982 = vmatpush1.bf16.msra.mxu1 %v11925_v41  ;;  %7942 = vmatprep.subr.bf16.mxu0 %v11790_v42  ;;  %v1555_v34 = vld [vmem:[#allocation8 + $0x428] sm:$0xff]  ;;  %v11758_v11 = vcombine.high %v1423_v29, %v1427_v30  ;;  %v11757_v49 = vcombine.low %v1423_v29, %v1427_v30 }
 0x25b   :  { %7983 = vmatprep.subr.bf16.mxu1 %v11918_v50  ;;  %v11886_v46 = vcombine.high %v1551_v53, %v1555_v34  ;;  %v1543_v39 = vld [vmem:[#allocation8 + $0x3c8] sm:$0xff]  ;;  %v11885_v50 = vcombine.low %v1551_v53, %v1555_v34 }
 0x25c   :  { %v1547_v35 = vld [vmem:[#allocation8 + $0x3e8] sm:$0xff] }
 0x25d   :  { %7943 = vmatpush1.bf16.msra.mxu0 %v11789_v57  ;;  %v1671_v41 = vld [vmem:[#allocation8 + $0x7c8] sm:$0xff]  ;;  %v11878_v51 = vcombine.high %v1543_v39, %v1547_v35 }
 0x25e   :  { %7984 = vmatpush1.bf16.msra.mxu1 %v11917_v58  ;;  %7944 = vmatprep.subr.bf16.mxu0 %v11782_v60  ;;  %v1675_v42 = vld [vmem:[#allocation8 + $0x7e8] sm:$0xff]  ;;  %v11877_v60 = vcombine.low %v1543_v39, %v1547_v35 }
 0x25f   :  { %7985 = vmatprep.subr.bf16.mxu1 %v11910_v63  ;;  %v12006_v54 = vcombine.high %v1671_v41, %v1675_v42  ;;  %v1535_v55 = vld [vmem:[#allocation8 + $0x388] sm:$0xff]  ;;  %v12005_v63 = vcombine.low %v1671_v41, %v1675_v42 }
 0x260   :  { %v1539_v56 = vld [vmem:[#allocation8 + $0x3a8] sm:$0xff] }
 0x261   :  { %7945 = vmatpush1.bf16.msra.mxu0 %v11781_v6  ;;  %v1663_v57 = vld [vmem:[#allocation8 + $0x788] sm:$0xff]  ;;  %v11870_v17 = vcombine.high %v1535_v55, %v1539_v56 }
 0x262   :  { %7986 = vmatpush1.bf16.msra.mxu1 %v11909_v7  ;;  %7946 = vmatprep.subr.bf16.mxu0 %v11774_v16  ;;  %v1667_v58 = vld [vmem:[#allocation8 + $0x7a8] sm:$0xff]  ;;  %v11869_v16 = vcombine.low %v1535_v55, %v1539_v56 }
 0x263   :  { %7987 = vmatprep.subr.bf16.mxu1 %v11902_v10  ;;  %v11998_v32 = vcombine.high %v1663_v57, %v1667_v58  ;;  %v1527_v4 = vld [vmem:[#allocation8 + $0x348] sm:$0xff]  ;;  %v11997_v10 = vcombine.low %v1663_v57, %v1667_v58 }
 0x264   :  { %v1531_v5 = vld [vmem:[#allocation8 + $0x368] sm:$0xff] }
 0x265   :  { %7947 = vmatpush1.bf16.msra.mxu0 %v11773_v25  ;;  %v1655_v6 = vld [vmem:[#allocation8 + $0x748] sm:$0xff]  ;;  %v11862_v14 = vcombine.high %v1527_v4, %v1531_v5 }
 0x266   :  { %7988 = vmatpush1.bf16.msra.mxu1 %v11901_v26  ;;  %7948 = vmatprep.subr.bf16.mxu0 %v11766_v9  ;;  %v1659_v7 = vld [vmem:[#allocation8 + $0x768] sm:$0xff]  ;;  %v11861_v9 = vcombine.low %v1527_v4, %v1531_v5 }
 0x267   :  { %7989 = vmatprep.subr.bf16.mxu1 %v11894_v28  ;;  %v11990_v15 = vcombine.high %v1655_v6, %v1659_v7  ;;  %v1519_v23 = vld [vmem:[#allocation8 + $0x308] sm:$0xff]  ;;  %v11989_v28 = vcombine.low %v1655_v6, %v1659_v7 }
 0x268   :  { %v1523_v24 = vld [vmem:[#allocation8 + $0x328] sm:$0xff] }
 0x269   :  { %7949 = vmatpush1.bf16.msra.mxu0 %v11765_v37  ;;  %v1647_v25 = vld [vmem:[#allocation8 + $0x708] sm:$0xff]  ;;  %v11854_v29 = vcombine.high %v1519_v23, %v1523_v24 }
 0x26a   :  { %7990 = vmatpush1.bf16.msra.mxu1 %v11893_v38  ;;  %7950 = vmatprep.subr.bf16.mxu0 %v11758_v11  ;;  %v1651_v26 = vld [vmem:[#allocation8 + $0x728] sm:$0xff]  ;;  %v11853_v11 = vcombine.low %v1519_v23, %v1523_v24 }
 0x26b   :  { %7991 = vmatprep.subr.bf16.mxu1 %v11886_v46  ;;  %v11982_v30 = vcombine.high %v1647_v25, %v1651_v26  ;;  %v1511_v53 = vld [vmem:[#allocation8 + $0x2c8] sm:$0xff]  ;;  %v11981_v46 = vcombine.low %v1647_v25, %v1651_v26 }
 0x26c   :  { %v1515_v34 = vld [vmem:[#allocation8 + $0x2e8] sm:$0xff] }
 0x26d   :  { %7951 = vmatpush1.bf16.msra.mxu0 %v11757_v49  ;;  %v1639_v37 = vld [vmem:[#allocation8 + $0x6c8] sm:$0xff]  ;;  %v11846_v39 = vcombine.high %v1511_v53, %v1515_v34 }
 0x26e   :  { %7992 = vmatpush1.bf16.msra.mxu1 %v11885_v50  ;;  %7952 = vmatprep.subr.bf16.mxu0 %v11878_v51  ;;  %v1643_v38 = vld [vmem:[#allocation8 + $0x6e8] sm:$0xff]  ;;  %v11845_v51 = vcombine.low %v1511_v53, %v1515_v34 }
 0x26f   :  { %7993 = vmatprep.subr.bf16.mxu1 %v12006_v54  ;;  %v11974_v35 = vcombine.high %v1639_v37, %v1643_v38  ;;  %v1503_v41 = vld [vmem:[#allocation8 + $0x288] sm:$0xff]  ;;  %v11973_v54 = vcombine.low %v1639_v37, %v1643_v38 }
 0x270   :  { %v1507_v42 = vld [vmem:[#allocation8 + $0x2a8] sm:$0xff] }
 0x271   :  { %7953 = vmatpush2.bf16.msra.mxu0 %v11877_v60  ;;  %v1631_v49 = vld [vmem:[#allocation8 + $0x688] sm:$0xff]  ;;  %v11838_v55 = vcombine.high %v1503_v41, %v1507_v42 }
 0x272   :  { %7994 = vmatpush2.bf16.msra.mxu1 %v12005_v63  ;;  %7954 = vmatprep.subr.bf16.mxu0 %v11870_v17  ;;  %v1635_v50 = vld [vmem:[#allocation8 + $0x6a8] sm:$0xff]  ;;  %v11837_v17 = vcombine.low %v1503_v41, %v1507_v42 }
 0x273   :  { %7995 = vmatprep.subr.bf16.mxu1 %v11998_v32  ;;  %v11966_v56 = vcombine.high %v1631_v49, %v1635_v50  ;;  %v1495_v57 = vld [vmem:[#allocation8 + $0x248] sm:$0xff]  ;;  %v11965_v32 = vcombine.low %v1631_v49, %v1635_v50 }
 0x274   :  { %v1499_v58 = vld [vmem:[#allocation8 + $0x268] sm:$0xff] }
 0x275   :  { %7955 = vmatpush2.bf16.msra.mxu0 %v11869_v16  ;;  %v1623_v60 = vld [vmem:[#allocation8 + $0x648] sm:$0xff]  ;;  %v11830_v4 = vcombine.high %v1495_v57, %v1499_v58 }
 0x276   :  { %7996 = vmatpush2.bf16.msra.mxu1 %v11997_v10  ;;  %7956 = vmatprep.subr.bf16.mxu0 %v11862_v14  ;;  %v1627_v63 = vld [vmem:[#allocation8 + $0x668] sm:$0xff]  ;;  %v11829_v14 = vcombine.low %v1495_v57, %v1499_v58 }
 0x277   :  { %7997 = vmatprep.subr.bf16.mxu1 %v11990_v15  ;;  %v11958_v5 = vcombine.high %v1623_v60, %v1627_v63  ;;  %v1487_v6 = vld [vmem:[#allocation8 + $0x208] sm:$0xff]  ;;  %v11957_v15 = vcombine.low %v1623_v60, %v1627_v63 }
 0x278   :  { %v1491_v7 = vld [vmem:[#allocation8 + $0x228] sm:$0xff] }
 0x279   :  { %7957 = vmatpush2.bf16.msra.mxu0 %v11861_v9  ;;  %v1615_v16 = vld [vmem:[#allocation8 + $0x608] sm:$0xff]  ;;  %v11822_v23 = vcombine.high %v1487_v6, %v1491_v7 }
 0x27a   :  { %7998 = vmatpush2.bf16.msra.mxu1 %v11989_v28  ;;  %7958 = vmatprep.subr.bf16.mxu0 %v11854_v29  ;;  %v1619_v10 = vld [vmem:[#allocation8 + $0x628] sm:$0xff]  ;;  %v11821_v29 = vcombine.low %v1487_v6, %v1491_v7 }
 0x27b   :  { %7999 = vmatprep.subr.bf16.mxu1 %v11982_v30  ;;  %v11950_v24 = vcombine.high %v1615_v16, %v1619_v10  ;;  %v1735_v25 = vld [vmem:[#allocation8 + $0x9c8] sm:$0xff]  ;;  %v11949_v30 = vcombine.low %v1615_v16, %v1619_v10 }
 0x27c   :  { %v1739_v26 = vld [vmem:[#allocation8 + $0x9e8] sm:$0xff] }
 0x27d   :  { %7959 = vmatpush2.bf16.msra.mxu0 %v11853_v11  ;;  %v1863_v9 = vld [vmem:[#allocation8 + $0xdc8] sm:$0xff]  ;;  %v12070_v53 = vcombine.high %v1735_v25, %v1739_v26  ;;  %v12069_v11 = vcombine.low %v1735_v25, %v1739_v26 }
 0x27e   :  { %8000 = vmatpush2.bf16.msra.mxu1 %v11981_v46  ;;  %7960 = vmatprep.subr.bf16.mxu0 %v11846_v39  ;;  %v1867_v28 = vld [vmem:[#allocation8 + $0xde8] sm:$0xff] }
 0x27f   :  { %8001 = vmatprep.subr.bf16.mxu1 %v11974_v35  ;;  %v12198_v34 = vcombine.high %v1863_v9, %v1867_v28  ;;  %v1727_v37 = vld [vmem:[#allocation8 + $0x988] sm:$0xff]  ;;  %v12197_v35 = vcombine.low %v1863_v9, %v1867_v28 }
 0x280   :  { %v1731_v38 = vld [vmem:[#allocation8 + $0x9a8] sm:$0xff] }
 0x281   :  { %7961 = vmatpush2.bf16.msra.mxu0 %v11845_v51  ;;  %v1855_v46 = vld [vmem:[#allocation8 + $0xd88] sm:$0xff]  ;;  %v12062_v41 = vcombine.high %v1727_v37, %v1731_v38  ;;  %v12061_v58 = vcombine.low %v1727_v37, %v1731_v38 }
 0x282   :  { %8002 = vmatpush2.bf16.msra.mxu1 %v11973_v54  ;;  %7962 = vmatprep.subr.bf16.mxu0 %v11838_v55  ;;  %v1859_v39 = vld [vmem:[#allocation8 + $0xda8] sm:$0xff] }
 0x283   :  { %8003 = vmatprep.subr.bf16.mxu1 %v11966_v56  ;;  %v1719_v42 = vld [vmem:[#allocation8 + $0x948] sm:$0xff]  ;;  %v12190_v51 = vcombine.high %v1855_v46, %v1859_v39  ;;  %v12189_v63 = vcombine.low %v1855_v46, %v1859_v39 }
 0x284   :  { %v1723_v49 = vld [vmem:[#allocation8 + $0x968] sm:$0xff] }
 0x285   :  { %7963 = vmatpush2.bf16.msra.mxu0 %v11837_v17  ;;  %v1847_v54 = vld [vmem:[#allocation8 + $0xd48] sm:$0xff]  ;;  %v12054_v17 = vcombine.high %v1719_v42, %v1723_v49 }
 0x286   :  { %8004 = vmatpush2.bf16.msra.mxu1 %v11965_v32  ;;  %7964 = vmatprep.subr.bf16.mxu0 %v11830_v4  ;;  %v1851_v55 = vld [vmem:[#allocation8 + $0xd68] sm:$0xff] }
 0x287   :  { %8005 = vmatprep.subr.bf16.mxu1 %v11958_v5  ;;  %v1711_v6 = vld [vmem:[#allocation8 + $0x908] sm:$0xff]  ;;  %v12181_v26 = vcombine.low %v1847_v54, %v1851_v55 }
 0x288   :  { %v1715_v7 = vld [vmem:[#allocation8 + $0x928] sm:$0xff] }
 0x289   :  { %7965 = vmatpush2.bf16.msra.mxu0 %v11829_v14  ;;  %v1839_v10 = vld [vmem:[#allocation8 + $0xd08] sm:$0xff]  ;;  %v12046_v9 = vcombine.high %v1711_v6, %v1715_v7  ;;  %v12045_v37 = vcombine.low %v1711_v6, %v1715_v7 }
 0x28a   :  { %8006 = vmatpush2.bf16.msra.mxu1 %v11957_v15  ;;  %7966 = vmatprep.subr.bf16.mxu0 %v11822_v23  ;;  %v1843_v14 = vld [vmem:[#allocation8 + $0xd28] sm:$0xff] }
 0x28b   :  { %8007 = vmatprep.subr.bf16.mxu1 %v11950_v24  ;;  %v12053_v24 = vcombine.low %v1719_v42, %v1723_v49  ;;  %v12174_v28 = vcombine.high %v1839_v10, %v1843_v14  ;;  %v12173_v38 = vcombine.low %v1839_v10, %v1843_v14  ;;  %v1695_v39 = vld [vmem:[#allocation8 + $0x888] sm:$0xff] }
 0x28c   :  { %v1827_v42 = vld [vmem:[#allocation8 + $0xca8] sm:$0xff] }
 0x28d   :  { %7967 = vmatpush2.bf16.msra.mxu0 %v11821_v29  ;;  %v1703_v29 = vld [vmem:[#allocation8 + $0x8c8] sm:$0xff] }
 0x28e   :  { %8008 = vmatpush2.bf16.msra.mxu1 %v11949_v30  ;;  %8018 = vmatprep.subr.bf16.mxu0 %v12070_v53  ;;  %v1707_v30 = vld [vmem:[#allocation8 + $0x8e8] sm:$0xff] }
 0x28f   :  { %8059 = vmatprep.subr.bf16.mxu1 %v12198_v34  ;;  %v1831_v53 = vld [vmem:[#allocation8 + $0xcc8] sm:$0xff]  ;;  %v12037_v49 = vcombine.low %v1703_v29, %v1707_v30 }
 0x290   :  { %v7724_v50 = vpop.f32.mrf.mxu0  ;;  %7969 = vmatmul.mubr.bf16.vlgmr.msra.gmra.mxu0 %v14206_v47  ;;  %v7765_v57 = vpop.f32.mrf.mxu1  ;;  %v1835_v34 = vld [vmem:[#allocation8 + $0xce8] sm:$0xff] }
 0x291   :  { %v7725_v56 = vadd.f32 %v7724_v50, %v14316_v27  ;;  %8010 = vmatmul.mubr.bf16.vlgmr.msra.gmra.mxu1 %v14200_v44  ;;  %8019 = vmatpush1.bf16.msra.mxu0 %v12069_v11  ;;  %v12182_v27 = vcombine.high %v1847_v54, %v1851_v55  ;;  %v12038_v11 = vcombine.high %v1703_v29, %v1707_v30  ;;  %v1687_v55 = vld [vmem:[#allocation8 + $0x848] sm:$0xff] }
 0x292   :  { %8050 = vmatprep.mubr.bf16.mxu0 %v14229_v12  ;;  %8060 = vmatpush1.bf16.msra.mxu1 %v12197_v35  ;;  %v7726_v60 = vpop.f32.mrf.mxu0  ;;  %v7767_v5 = vpop.f32.mrf.mxu1  ;;  %v12166_v46 = vcombine.high %v1831_v53, %v1835_v34  ;;  %v1699_v35 = vld [vmem:[#allocation8 + $0x8a8] sm:$0xff]  ;;  %v12165_v50 = vcombine.low %v1831_v53, %v1835_v34 }
 0x293   :  { %v14325_v32 = vadd.f32 %v7765_v57, %v7725_v56  ;;  %8091 = vmatprep.mubr.bf16.mxu1 %v14231_v22  ;;  %v7727_v4 = vadd.f32 %v7726_v60, %v14319_v31  ;;  %8020 = vmatprep.subr.bf16.mxu0 %v12062_v41  ;;  %v1823_v41 = vld [vmem:[#allocation8 + $0xc88] sm:$0xff]  ;;  %v12029_v60 = vcombine.low %v1695_v39, %v1699_v35 }
 0x294   :  { %v7728_v16 = vpop.f32.mrf.mxu0  ;;  %8061 = vmatprep.subr.bf16.mxu1 %v12190_v51  ;;  %v7769_v23 = vpop.f32.mrf.mxu1  ;;  %v12030_v51 = vcombine.high %v1695_v39, %v1699_v35  ;;  %v12158_v54 = vcombine.high %v1823_v41, %v1827_v42  ;;  %v1691_v56 = vld [vmem:[#allocation8 + $0x868] sm:$0xff] }
 0x295   :  { %v14329_v15 = vadd.f32 %v7767_v5, %v7727_v4  ;;  %8021 = vmatpush1.bf16.msra.mxu0 %v12061_v58  ;;  %v1815_v57 = vld [vmem:[#allocation8 + $0xc48] sm:$0xff]  ;;  %v12021_v16 = vcombine.low %v1687_v55, %v1691_v56 }
 0x296   :  { %8062 = vmatpush1.bf16.msra.mxu1 %v12189_v63  ;;  %v7729_v25 = vpop.f32.mrf.mxu0  ;;  %8022 = vmatprep.subr.bf16.mxu0 %v12054_v17  ;;  %v7770_v31 = vpop.f32.mrf.mxu1  ;;  %v1819_v58 = vld [vmem:[#allocation8 + $0xc68] sm:$0xff]  ;;  %v12157_v63 = vcombine.low %v1823_v41, %v1827_v42  ;;  %v12022_v17 = vcombine.high %v1687_v55, %v1691_v56 }
 0x297   :  { %8063 = vmatprep.subr.bf16.mxu1 %v12182_v27  ;;  %v12150_v4 = vcombine.high %v1815_v57, %v1819_v58  ;;  %v1679_v5 = vld [vmem:[#allocation8 + $0x808] sm:$0xff]  ;;  %v12149_v10 = vcombine.low %v1815_v57, %v1819_v58 }
 0x298   :  { %v1683_v27 = vld [vmem:[#allocation8 + $0x828] sm:$0xff] }
 0x299   :  { %8023 = vmatpush1.bf16.msra.mxu0 %v12053_v24  ;;  %v1807_v6 = vld [vmem:[#allocation8 + $0xc08] sm:$0xff]  ;;  %v12014_v14 = vcombine.high %v1679_v5, %v1683_v27  ;;  %v12013_v31 = vcombine.low %v1679_v5, %v1683_v27 }
 0x29a   :  { %8064 = vmatpush1.bf16.msra.mxu1 %v12181_v26  ;;  %8024 = vmatprep.subr.bf16.mxu0 %v12046_v9  ;;  %v1811_v7 = vld [vmem:[#allocation8 + $0xc28] sm:$0xff] }
 0x29b   :  { %8065 = vmatprep.subr.bf16.mxu1 %v12174_v28  ;;  %v12142_v23 = vcombine.high %v1807_v6, %v1811_v7  ;;  %v1799_v24 = vld [vmem:[#allocation8 + $0xbc8] sm:$0xff]  ;;  %v12141_v28 = vcombine.low %v1807_v6, %v1811_v7 }
 0x29c   :  { %v1803_v25 = vld [vmem:[#allocation8 + $0xbe8] sm:$0xff] }
 0x29d   :  { %8025 = vmatpush1.bf16.msra.mxu0 %v12045_v37  ;;  %v1927_v26 = vld [vmem:[#allocation8 + $0xfc8] sm:$0xff]  ;;  %v12134_v29 = vcombine.high %v1799_v24, %v1803_v25 }
 0x29e   :  { %8066 = vmatpush1.bf16.msra.mxu1 %v12173_v38  ;;  %8026 = vmatprep.subr.bf16.mxu0 %v12038_v11  ;;  %v1931_v9 = vld [vmem:[#allocation8 + $0xfe8] sm:$0xff]  ;;  %v12133_v11 = vcombine.low %v1799_v24, %v1803_v25 }
 0x29f   :  { %8067 = vmatprep.subr.bf16.mxu1 %v12166_v46  ;;  %v12262_v30 = vcombine.high %v1927_v26, %v1931_v9  ;;  %v1791_v53 = vld [vmem:[#allocation8 + $0xb88] sm:$0xff]  ;;  %v12261_v46 = vcombine.low %v1927_v26, %v1931_v9 }
 0x2a0   :  { %v1795_v34 = vld [vmem:[#allocation8 + $0xba8] sm:$0xff] }
 0x2a1   :  { %8027 = vmatpush1.bf16.msra.mxu0 %v12037_v49  ;;  %v1919_v37 = vld [vmem:[#allocation8 + $0xf88] sm:$0xff]  ;;  %v12126_v39 = vcombine.high %v1791_v53, %v1795_v34 }
 0x2a2   :  { %8068 = vmatpush1.bf16.msra.mxu1 %v12165_v50  ;;  %8028 = vmatprep.subr.bf16.mxu0 %v12030_v51  ;;  %v1923_v38 = vld [vmem:[#allocation8 + $0xfa8] sm:$0xff]  ;;  %v12125_v51 = vcombine.low %v1791_v53, %v1795_v34 }
 0x2a3   :  { %8069 = vmatprep.subr.bf16.mxu1 %v12158_v54  ;;  %v12254_v35 = vcombine.high %v1919_v37, %v1923_v38  ;;  %v1783_v41 = vld [vmem:[#allocation8 + $0xb48] sm:$0xff]  ;;  %v12253_v54 = vcombine.low %v1919_v37, %v1923_v38 }
 0x2a4   :  { %v1787_v42 = vld [vmem:[#allocation8 + $0xb68] sm:$0xff] }
 0x2a5   :  { %8029 = vmatpush1.bf16.msra.mxu0 %v12029_v60  ;;  %v1911_v49 = vld [vmem:[#allocation8 + $0xf48] sm:$0xff]  ;;  %v12118_v55 = vcombine.high %v1783_v41, %v1787_v42 }
 0x2a6   :  { %8070 = vmatpush1.bf16.msra.mxu1 %v12157_v63  ;;  %8030 = vmatprep.subr.bf16.mxu0 %v12022_v17  ;;  %v1915_v50 = vld [vmem:[#allocation8 + $0xf68] sm:$0xff]  ;;  %v12117_v17 = vcombine.low %v1783_v41, %v1787_v42 }
 0x2a7   :  { %8071 = vmatprep.subr.bf16.mxu1 %v12150_v4  ;;  %v12246_v56 = vcombine.high %v1911_v49, %v1915_v50  ;;  %v1775_v57 = vld [vmem:[#allocation8 + $0xb08] sm:$0xff]  ;;  %v12245_v4 = vcombine.low %v1911_v49, %v1915_v50 }
 0x2a8   :  { %v1779_v58 = vld [vmem:[#allocation8 + $0xb28] sm:$0xff] }
 0x2a9   :  { %8031 = vmatpush1.bf16.msra.mxu0 %v12021_v16  ;;  %v1903_v60 = vld [vmem:[#allocation8 + $0xf08] sm:$0xff]  ;;  %v12110_v5 = vcombine.high %v1775_v57, %v1779_v58 }
 0x2aa   :  { %8072 = vmatpush1.bf16.msra.mxu1 %v12149_v10  ;;  %8032 = vmatprep.subr.bf16.mxu0 %v12014_v14  ;;  %v1907_v63 = vld [vmem:[#allocation8 + $0xf28] sm:$0xff]  ;;  %v12109_v14 = vcombine.low %v1775_v57, %v1779_v58 }
 0x2ab   :  { %8073 = vmatprep.subr.bf16.mxu1 %v12142_v23  ;;  %v12238_v27 = vcombine.high %v1903_v60, %v1907_v63  ;;  %v1767_v6 = vld [vmem:[#allocation8 + $0xac8] sm:$0xff]  ;;  %v12237_v23 = vcombine.low %v1903_v60, %v1907_v63 }
 0x2ac   :  { %v1771_v7 = vld [vmem:[#allocation8 + $0xae8] sm:$0xff] }
 0x2ad   :  { %8033 = vmatpush1.bf16.msra.mxu0 %v12013_v31  ;;  %v1895_v16 = vld [vmem:[#allocation8 + $0xec8] sm:$0xff]  ;;  %v12102_v24 = vcombine.high %v1767_v6, %v1771_v7 }
 0x2ae   :  { %8074 = vmatpush1.bf16.msra.mxu1 %v12141_v28  ;;  %8034 = vmatprep.subr.bf16.mxu0 %v12134_v29  ;;  %v1899_v10 = vld [vmem:[#allocation8 + $0xee8] sm:$0xff]  ;;  %v12101_v29 = vcombine.low %v1767_v6, %v1771_v7 }
 0x2af   :  { %8075 = vmatprep.subr.bf16.mxu1 %v12262_v30  ;;  %v12230_v25 = vcombine.high %v1895_v16, %v1899_v10  ;;  %v1759_v26 = vld [vmem:[#allocation8 + $0xa88] sm:$0xff]  ;;  %v12229_v30 = vcombine.low %v1895_v16, %v1899_v10 }
 0x2b0   :  { %v1763_v9 = vld [vmem:[#allocation8 + $0xaa8] sm:$0xff] }
 0x2b1   :  { %8035 = vmatpush2.bf16.msra.mxu0 %v12133_v11  ;;  %v1887_v31 = vld [vmem:[#allocation8 + $0xe88] sm:$0xff]  ;;  %v12094_v53 = vcombine.high %v1759_v26, %v1763_v9 }
 0x2b2   :  { %8076 = vmatpush2.bf16.msra.mxu1 %v12261_v46  ;;  %8036 = vmatprep.subr.bf16.mxu0 %v12126_v39  ;;  %v1891_v28 = vld [vmem:[#allocation8 + $0xea8] sm:$0xff]  ;;  %v12093_v39 = vcombine.low %v1759_v26, %v1763_v9 }
 0x2b3   :  { %8077 = vmatprep.subr.bf16.mxu1 %v12254_v35  ;;  %v12222_v34 = vcombine.high %v1887_v31, %v1891_v28  ;;  %v1751_v37 = vld [vmem:[#allocation8 + $0xa48] sm:$0xff]  ;;  %v12221_v35 = vcombine.low %v1887_v31, %v1891_v28 }
 0x2b4   :  { %v1755_v38 = vld [vmem:[#allocation8 + $0xa68] sm:$0xff] }
 0x2b5   :  { %8037 = vmatpush2.bf16.msra.mxu0 %v12125_v51  ;;  %v1879_v11 = vld [vmem:[#allocation8 + $0xe48] sm:$0xff]  ;;  %v12086_v41 = vcombine.high %v1751_v37, %v1755_v38 }
 0x2b6   :  { %8078 = vmatpush2.bf16.msra.mxu1 %v12253_v54  ;;  %8038 = vmatprep.subr.bf16.mxu0 %v12118_v55  ;;  %v1883_v46 = vld [vmem:[#allocation8 + $0xe68] sm:$0xff]  ;;  %v12085_v55 = vcombine.low %v1751_v37, %v1755_v38 }
 0x2b7   :  { %8079 = vmatprep.subr.bf16.mxu1 %v12246_v56  ;;  %v12214_v42 = vcombine.high %v1879_v11, %v1883_v46  ;;  %v1743_v49 = vld [vmem:[#allocation8 + $0xa08] sm:$0xff]  ;;  %v12213_v56 = vcombine.low %v1879_v11, %v1883_v46 }
 0x2b8   :  { %v1747_v50 = vld [vmem:[#allocation8 + $0xa28] sm:$0xff] }
 0x2b9   :  { %8039 = vmatpush2.bf16.msra.mxu0 %v12117_v17  ;;  %v1871_v51 = vld [vmem:[#allocation8 + $0xe08] sm:$0xff]  ;;  %v12078_v57 = vcombine.high %v1743_v49, %v1747_v50 }
 0x2ba   :  { %8080 = vmatpush2.bf16.msra.mxu1 %v12245_v4  ;;  %8040 = vmatprep.subr.bf16.mxu0 %v12110_v5  ;;  %v1875_v54 = vld [vmem:[#allocation8 + $0xe28] sm:$0xff]  ;;  %v12077_v5 = vcombine.low %v1743_v49, %v1747_v50 }
 0x2bb   :  { %8081 = vmatprep.subr.bf16.mxu1 %v12238_v27  ;;  %v12206_v58 = vcombine.high %v1871_v51, %v1875_v54  ;;  %v1991_v60 = vld [vmem:[#allocation8 + $0x11c8] sm:$0xff]  ;;  %v12205_v27 = vcombine.low %v1871_v51, %v1875_v54 }
 0x2bc   :  { %v1995_v63 = vld [vmem:[#allocation8 + $0x11e8] sm:$0xff] }
 0x2bd   :  { %8041 = vmatpush2.bf16.msra.mxu0 %v12109_v14  ;;  %v2119_v17 = vld [vmem:[#allocation8 + $0x15c8] sm:$0xff]  ;;  %v12326_v6 = vcombine.high %v1991_v60, %v1995_v63  ;;  %v12325_v14 = vcombine.low %v1991_v60, %v1995_v63 }
 0x2be   :  { %8082 = vmatpush2.bf16.msra.mxu1 %v12237_v23  ;;  %8042 = vmatprep.subr.bf16.mxu0 %v12102_v24  ;;  %v2123_v4 = vld [vmem:[#allocation8 + $0x15e8] sm:$0xff] }
 0x2bf   :  { %8083 = vmatprep.subr.bf16.mxu1 %v12230_v25  ;;  %v12454_v7 = vcombine.high %v2119_v17, %v2123_v4  ;;  %v1983_v16 = vld [vmem:[#allocation8 + $0x1188] sm:$0xff]  ;;  %v12453_v25 = vcombine.low %v2119_v17, %v2123_v4 }
 0x2c0   :  { %v1987_v10 = vld [vmem:[#allocation8 + $0x11a8] sm:$0xff] }
 0x2c1   :  { %8043 = vmatpush2.bf16.msra.mxu0 %v12101_v29  ;;  %v2111_v23 = vld [vmem:[#allocation8 + $0x1588] sm:$0xff]  ;;  %v12318_v26 = vcombine.high %v1983_v16, %v1987_v10  ;;  %v12317_v38 = vcombine.low %v1983_v16, %v1987_v10 }
 0x2c2   :  { %8084 = vmatpush2.bf16.msra.mxu1 %v12229_v30  ;;  %8044 = vmatprep.subr.bf16.mxu0 %v12094_v53  ;;  %v2115_v24 = vld [vmem:[#allocation8 + $0x15a8] sm:$0xff] }
 0x2c3   :  { %8085 = vmatprep.subr.bf16.mxu1 %v12222_v34  ;;  %v1975_v9 = vld [vmem:[#allocation8 + $0x1148] sm:$0xff]  ;;  %v12446_v29 = vcombine.high %v2111_v23, %v2115_v24  ;;  %v12445_v46 = vcombine.low %v2111_v23, %v2115_v24 }
 0x2c4   :  { %v1979_v31 = vld [vmem:[#allocation8 + $0x1168] sm:$0xff] }
 0x2c5   :  { %8045 = vmatpush2.bf16.msra.mxu0 %v12093_v39  ;;  %v2103_v30 = vld [vmem:[#allocation8 + $0x1548] sm:$0xff]  ;;  %v12310_v39 = vcombine.high %v1975_v9, %v1979_v31 }
 0x2c6   :  { %8086 = vmatpush2.bf16.msra.mxu1 %v12221_v35  ;;  %8046 = vmatprep.subr.bf16.mxu0 %v12086_v41  ;;  %v2107_v53 = vld [vmem:[#allocation8 + $0x1568] sm:$0xff] }
 0x2c7   :  { %8087 = vmatprep.subr.bf16.mxu1 %v12214_v42  ;;  %v1967_v49 = vld [vmem:[#allocation8 + $0x1108] sm:$0xff]  ;;  %v12437_v63 = vcombine.low %v2103_v30, %v2107_v53 }
 0x2c8   :  { %v1971_v50 = vld [vmem:[#allocation8 + $0x1128] sm:$0xff] }
 0x2c9   :  { %8047 = vmatpush2.bf16.msra.mxu0 %v12085_v55  ;;  %v2095_v54 = vld [vmem:[#allocation8 + $0x1508] sm:$0xff]  ;;  %v12302_v17 = vcombine.high %v1967_v49, %v1971_v50  ;;  %v12301_v16 = vcombine.low %v1967_v49, %v1971_v50 }
 0x2ca   :  { %8088 = vmatpush2.bf16.msra.mxu1 %v12213_v56  ;;  %8048 = vmatprep.subr.bf16.mxu0 %v12078_v57  ;;  %v2099_v55 = vld [vmem:[#allocation8 + $0x1528] sm:$0xff] }
 0x2cb   :  { %8089 = vmatprep.subr.bf16.mxu1 %v12206_v58  ;;  %v12309_v58 = vcombine.low %v1975_v9, %v1979_v31  ;;  %v12430_v4 = vcombine.high %v2095_v54, %v2099_v55  ;;  %v12429_v10 = vcombine.low %v2095_v54, %v2099_v55  ;;  %v1951_v24 = vld [vmem:[#allocation8 + $0x1088] sm:$0xff] }
 0x2cc   :  { %v2083_v9 = vld [vmem:[#allocation8 + $0x14a8] sm:$0xff] }
 0x2cd   :  { %8049 = vmatpush2.bf16.msra.mxu0 %v12077_v5  ;;  %v1959_v5 = vld [vmem:[#allocation8 + $0x10c8] sm:$0xff] }
 0x2ce   :  { %8090 = vmatpush2.bf16.msra.mxu1 %v12205_v27  ;;  %8100 = vmatprep.subr.bf16.mxu0 %v12326_v6  ;;  %v1963_v27 = vld [vmem:[#allocation8 + $0x10e8] sm:$0xff] }
 0x2cf   :  { %8141 = vmatprep.subr.bf16.mxu1 %v12454_v7  ;;  %v2087_v6 = vld [vmem:[#allocation8 + $0x14c8] sm:$0xff]  ;;  %v12293_v31 = vcombine.low %v1959_v5, %v1963_v27 }
 0x2d0   :  { %v7806_v28 = vpop.f32.mrf.mxu0  ;;  %8051 = vmatmul.mubr.bf16.vlgmr.msra.gmra.mxu0 %v14259_v2  ;;  %v7847_v37 = vpop.f32.mrf.mxu1  ;;  %v2091_v7 = vld [vmem:[#allocation8 + $0x14e8] sm:$0xff] }
 0x2d1   :  { %v7807_v34 = vadd.f32 %v7806_v28, %v14325_v32  ;;  %8092 = vmatmul.mubr.bf16.vlgmr.msra.gmra.mxu1 %v14257_v62  ;;  %8101 = vmatpush1.bf16.msra.mxu0 %v12325_v14  ;;  %v12438_v32 = vcombine.high %v2103_v30, %v2107_v53  ;;  %v12294_v14 = vcombine.high %v1959_v5, %v1963_v27  ;;  %v1943_v53 = vld [vmem:[#allocation8 + $0x1048] sm:$0xff] }
 0x2d2   :  { %8132 = vmatprep.mubr.bf16.mxu0 %v14261_v8  ;;  %8142 = vmatpush1.bf16.msra.mxu1 %v12453_v25  ;;  %v7808_v11 = vpop.f32.mrf.mxu0  ;;  %v7849_v42 = vpop.f32.mrf.mxu1  ;;  %v12422_v23 = vcombine.high %v2087_v6, %v2091_v7  ;;  %v1955_v25 = vld [vmem:[#allocation8 + $0x10a8] sm:$0xff]  ;;  %v12421_v28 = vcombine.low %v2087_v6, %v2091_v7 }
 0x2d3   :  { %v14335_v35 = vadd.f32 %v7847_v37, %v7807_v34  ;;  %8173 = vmatprep.mubr.bf16.mxu1 %v14264_v13  ;;  %v7809_v41 = vadd.f32 %v7808_v11, %v14329_v15  ;;  %8102 = vmatprep.subr.bf16.mxu0 %v12318_v26  ;;  %v2079_v26 = vld [vmem:[#allocation8 + $0x1488] sm:$0xff]  ;;  %v12285_v11 = vcombine.low %v1951_v24, %v1955_v25 }
 0x2d4   :  { %v7810_v51 = vpop.f32.mrf.mxu0  ;;  %8143 = vmatprep.subr.bf16.mxu1 %v12446_v29  ;;  %v7851_v57 = vpop.f32.mrf.mxu1  ;;  %v12286_v29 = vcombine.high %v1951_v24, %v1955_v25  ;;  %v12414_v30 = vcombine.high %v2079_v26, %v2083_v9  ;;  %v1947_v34 = vld [vmem:[#allocation8 + $0x1068] sm:$0xff] }
 0x2d5   :  { %v14339_v56 = vadd.f32 %v7849_v42, %v7809_v41  ;;  %8103 = vmatpush1.bf16.msra.mxu0 %v12317_v38  ;;  %v2071_v37 = vld [vmem:[#allocation8 + $0x1448] sm:$0xff]  ;;  %v12277_v51 = vcombine.low %v1943_v53, %v1947_v34 }
 0x2d6   :  { %8144 = vmatpush1.bf16.msra.mxu1 %v12445_v46  ;;  %v7811_v60 = vpop.f32.mrf.mxu0  ;;  %8104 = vmatprep.subr.bf16.mxu0 %v12310_v39  ;;  %v7852_v15 = vpop.f32.mrf.mxu1  ;;  %v2075_v38 = vld [vmem:[#allocation8 + $0x1468] sm:$0xff]  ;;  %v12413_v46 = vcombine.low %v2079_v26, %v2083_v9  ;;  %v12278_v39 = vcombine.high %v1943_v53, %v1947_v34 }
 0x2d7   :  { %8145 = vmatprep.subr.bf16.mxu1 %v12438_v32  ;;  %v12406_v41 = vcombine.high %v2071_v37, %v2075_v38  ;;  %v1935_v42 = vld [vmem:[#allocation8 + $0x1008] sm:$0xff]  ;;  %v12405_v54 = vcombine.low %v2071_v37, %v2075_v38 }
 0x2d8   :  { %v1939_v32 = vld [vmem:[#allocation8 + $0x1028] sm:$0xff] }
 0x2d9   :  { %8105 = vmatpush1.bf16.msra.mxu0 %v12309_v58  ;;  %v2063_v49 = vld [vmem:[#allocation8 + $0x1408] sm:$0xff]  ;;  %v12270_v55 = vcombine.high %v1935_v42, %v1939_v32  ;;  %v12269_v15 = vcombine.low %v1935_v42, %v1939_v32 }
 0x2da   :  { %8146 = vmatpush1.bf16.msra.mxu1 %v12437_v63  ;;  %8106 = vmatprep.subr.bf16.mxu0 %v12302_v17  ;;  %v2067_v50 = vld [vmem:[#allocation8 + $0x1428] sm:$0xff] }
 0x2db   :  { %8147 = vmatprep.subr.bf16.mxu1 %v12430_v4  ;;  %v12398_v57 = vcombine.high %v2063_v49, %v2067_v50  ;;  %v2055_v58 = vld [vmem:[#allocation8 + $0x13c8] sm:$0xff]  ;;  %v12397_v4 = vcombine.low %v2063_v49, %v2067_v50 }
 0x2dc   :  { %v2059_v60 = vld [vmem:[#allocation8 + $0x13e8] sm:$0xff] }
 0x2dd   :  { %8107 = vmatpush1.bf16.msra.mxu0 %v12301_v16  ;;  %v2183_v63 = vld [vmem:[#allocation8 + $0x17c8] sm:$0xff]  ;;  %v12390_v5 = vcombine.high %v2055_v58, %v2059_v60 }
 0x2de   :  { %8148 = vmatpush1.bf16.msra.mxu1 %v12429_v10  ;;  %8108 = vmatprep.subr.bf16.mxu0 %v12294_v14  ;;  %v2187_v17 = vld [vmem:[#allocation8 + $0x17e8] sm:$0xff]  ;;  %v12389_v14 = vcombine.low %v2055_v58, %v2059_v60 }
 0x2df   :  { %8149 = vmatprep.subr.bf16.mxu1 %v12422_v23  ;;  %v12518_v27 = vcombine.high %v2183_v63, %v2187_v17  ;;  %v2047_v6 = vld [vmem:[#allocation8 + $0x1388] sm:$0xff]  ;;  %v12517_v23 = vcombine.low %v2183_v63, %v2187_v17 }
 0x2e0   :  { %v2051_v7 = vld [vmem:[#allocation8 + $0x13a8] sm:$0xff] }
 0x2e1   :  { %8109 = vmatpush1.bf16.msra.mxu0 %v12293_v31  ;;  %v2175_v16 = vld [vmem:[#allocation8 + $0x1788] sm:$0xff]  ;;  %v12382_v24 = vcombine.high %v2047_v6, %v2051_v7 }
 0x2e2   :  { %8150 = vmatpush1.bf16.msra.mxu1 %v12421_v28  ;;  %8110 = vmatprep.subr.bf16.mxu0 %v12286_v29  ;;  %v2179_v10 = vld [vmem:[#allocation8 + $0x17a8] sm:$0xff]  ;;  %v12381_v29 = vcombine.low %v2047_v6, %v2051_v7 }
 0x2e3   :  { %8151 = vmatprep.subr.bf16.mxu1 %v12414_v30  ;;  %v12510_v25 = vcombine.high %v2175_v16, %v2179_v10  ;;  %v2039_v26 = vld [vmem:[#allocation8 + $0x1348] sm:$0xff]  ;;  %v12509_v30 = vcombine.low %v2175_v16, %v2179_v10 }
 0x2e4   :  { %v2043_v9 = vld [vmem:[#allocation8 + $0x1368] sm:$0xff] }
 0x2e5   :  { %8111 = vmatpush1.bf16.msra.mxu0 %v12285_v11  ;;  %v2167_v31 = vld [vmem:[#allocation8 + $0x1748] sm:$0xff]  ;;  %v12374_v53 = vcombine.high %v2039_v26, %v2043_v9 }
 0x2e6   :  { %8152 = vmatpush1.bf16.msra.mxu1 %v12413_v46  ;;  %8112 = vmatprep.subr.bf16.mxu0 %v12278_v39  ;;  %v2171_v28 = vld [vmem:[#allocation8 + $0x1768] sm:$0xff]  ;;  %v12373_v39 = vcombine.low %v2039_v26, %v2043_v9 }
 0x2e7   :  { %8153 = vmatprep.subr.bf16.mxu1 %v12406_v41  ;;  %v12502_v34 = vcombine.high %v2167_v31, %v2171_v28  ;;  %v2031_v37 = vld [vmem:[#allocation8 + $0x1308] sm:$0xff]  ;;  %v12501_v41 = vcombine.low %v2167_v31, %v2171_v28 }
 0x2e8   :  { %v2035_v38 = vld [vmem:[#allocation8 + $0x1328] sm:$0xff] }
 0x2e9   :  { %8113 = vmatpush1.bf16.msra.mxu0 %v12277_v51  ;;  %v2159_v11 = vld [vmem:[#allocation8 + $0x1708] sm:$0xff]  ;;  %v12366_v42 = vcombine.high %v2031_v37, %v2035_v38 }
 0x2ea   :  { %8154 = vmatpush1.bf16.msra.mxu1 %v12405_v54  ;;  %8114 = vmatprep.subr.bf16.mxu0 %v12270_v55  ;;  %v2163_v46 = vld [vmem:[#allocation8 + $0x1728] sm:$0xff]  ;;  %v12365_v55 = vcombine.low %v2031_v37, %v2035_v38 }
 0x2eb   :  { %8155 = vmatprep.subr.bf16.mxu1 %v12398_v57  ;;  %v12494_v32 = vcombine.high %v2159_v11, %v2163_v46  ;;  %v2023_v49 = vld [vmem:[#allocation8 + $0x12c8] sm:$0xff]  ;;  %v12493_v57 = vcombine.low %v2159_v11, %v2163_v46 }
 0x2ec   :  { %v2027_v50 = vld [vmem:[#allocation8 + $0x12e8] sm:$0xff] }
 0x2ed   :  { %8115 = vmatpush1.bf16.msra.mxu0 %v12269_v15  ;;  %v2151_v51 = vld [vmem:[#allocation8 + $0x16c8] sm:$0xff]  ;;  %v12358_v58 = vcombine.high %v2023_v49, %v2027_v50 }
 0x2ee   :  { %8156 = vmatpush1.bf16.msra.mxu1 %v12397_v4  ;;  %8116 = vmatprep.subr.bf16.mxu0 %v12390_v5  ;;  %v2155_v54 = vld [vmem:[#allocation8 + $0x16e8] sm:$0xff]  ;;  %v12357_v5 = vcombine.low %v2023_v49, %v2027_v50 }
 0x2ef   :  { %8157 = vmatprep.subr.bf16.mxu1 %v12518_v27  ;;  %v12486_v60 = vcombine.high %v2151_v51, %v2155_v54  ;;  %v2015_v63 = vld [vmem:[#allocation8 + $0x1288] sm:$0xff]  ;;  %v12485_v27 = vcombine.low %v2151_v51, %v2155_v54 }
 0x2f0   :  { %v2019_v17 = vld [vmem:[#allocation8 + $0x12a8] sm:$0xff] }
 0x2f1   :  { %8117 = vmatpush2.bf16.msra.mxu0 %v12389_v14  ;;  %v2143_v15 = vld [vmem:[#allocation8 + $0x1688] sm:$0xff]  ;;  %v12350_v6 = vcombine.high %v2015_v63, %v2019_v17 }
 0x2f2   :  { %8158 = vmatpush2.bf16.msra.mxu1 %v12517_v23  ;;  %8118 = vmatprep.subr.bf16.mxu0 %v12382_v24  ;;  %v2147_v4 = vld [vmem:[#allocation8 + $0x16a8] sm:$0xff]  ;;  %v12349_v24 = vcombine.low %v2015_v63, %v2019_v17 }
 0x2f3   :  { %8159 = vmatprep.subr.bf16.mxu1 %v12510_v25  ;;  %v12478_v7 = vcombine.high %v2143_v15, %v2147_v4  ;;  %v2007_v16 = vld [vmem:[#allocation8 + $0x1248] sm:$0xff]  ;;  %v12477_v25 = vcombine.low %v2143_v15, %v2147_v4 }
 0x2f4   :  { %v2011_v10 = vld [vmem:[#allocation8 + $0x1268] sm:$0xff] }
 0x2f5   :  { %8119 = vmatpush2.bf16.msra.mxu0 %v12381_v29  ;;  %v2135_v14 = vld [vmem:[#allocation8 + $0x1648] sm:$0xff]  ;;  %v12342_v26 = vcombine.high %v2007_v16, %v2011_v10 }
 0x2f6   :  { %8160 = vmatpush2.bf16.msra.mxu1 %v12509_v30  ;;  %8120 = vmatprep.subr.bf16.mxu0 %v12374_v53  ;;  %v2139_v23 = vld [vmem:[#allocation8 + $0x1668] sm:$0xff]  ;;  %v12341_v53 = vcombine.low %v2007_v16, %v2011_v10 }
 0x2f7   :  { %8161 = vmatprep.subr.bf16.mxu1 %v12502_v34  ;;  %v12470_v9 = vcombine.high %v2135_v14, %v2139_v23  ;;  %v1999_v31 = vld [vmem:[#allocation8 + $0x1208] sm:$0xff]  ;;  %v12469_v34 = vcombine.low %v2135_v14, %v2139_v23 }
 0x2f8   :  { %v2003_v28 = vld [vmem:[#allocation8 + $0x1228] sm:$0xff] }
 0x2f9   :  { %8121 = vmatpush2.bf16.msra.mxu0 %v12373_v39  ;;  %v2127_v29 = vld [vmem:[#allocation8 + $0x1608] sm:$0xff]  ;;  %v12334_v37 = vcombine.high %v1999_v31, %v2003_v28 }
 0x2fa   :  { %8162 = vmatpush2.bf16.msra.mxu1 %v12501_v41  ;;  %8122 = vmatprep.subr.bf16.mxu0 %v12366_v42  ;;  %v2131_v30 = vld [vmem:[#allocation8 + $0x1628] sm:$0xff]  ;;  %v12333_v42 = vcombine.low %v1999_v31, %v2003_v28 }
 0x2fb   :  { %8163 = vmatprep.subr.bf16.mxu1 %v12494_v32  ;;  %v12462_v38 = vcombine.high %v2127_v29, %v2131_v30  ;;  %v2247_v11 = vld [vmem:[#allocation8 + $0x19c8] sm:$0xff]  ;;  %v12461_v32 = vcombine.low %v2127_v29, %v2131_v30 }
 0x2fc   :  { %v2251_v46 = vld [vmem:[#allocation8 + $0x19e8] sm:$0xff] }
 0x2fd   :  { %8123 = vmatpush2.bf16.msra.mxu0 %v12365_v55  ;;  %v2375_v39 = vld [vmem:[#allocation8 + $0x1dc8] sm:$0xff]  ;;  %v12582_v49 = vcombine.high %v2247_v11, %v2251_v46  ;;  %v12581_v55 = vcombine.low %v2247_v11, %v2251_v46 }
 0x2fe   :  { %8164 = vmatpush2.bf16.msra.mxu1 %v12493_v57  ;;  %8124 = vmatprep.subr.bf16.mxu0 %v12358_v58  ;;  %v2379_v41 = vld [vmem:[#allocation8 + $0x1de8] sm:$0xff] }
 0x2ff   :  { %8165 = vmatprep.subr.bf16.mxu1 %v12486_v60  ;;  %v12710_v50 = vcombine.high %v2375_v39, %v2379_v41  ;;  %v2239_v51 = vld [vmem:[#allocation8 + $0x1988] sm:$0xff]  ;;  %v12709_v60 = vcombine.low %v2375_v39, %v2379_v41 }
 0x300   :  { %v2243_v54 = vld [vmem:[#allocation8 + $0x19a8] sm:$0xff] }
 0x301   :  { %8125 = vmatpush2.bf16.msra.mxu0 %v12357_v5  ;;  %v2367_v57 = vld [vmem:[#allocation8 + $0x1d88] sm:$0xff]  ;;  %v12574_v63 = vcombine.high %v2239_v51, %v2243_v54  ;;  %v12573_v10 = vcombine.low %v2239_v51, %v2243_v54 }
 0x302   :  { %8166 = vmatpush2.bf16.msra.mxu1 %v12485_v27  ;;  %8126 = vmatprep.subr.bf16.mxu0 %v12350_v6  ;;  %v2371_v58 = vld [vmem:[#allocation8 + $0x1da8] sm:$0xff] }
 0x303   :  { %8167 = vmatprep.subr.bf16.mxu1 %v12478_v7  ;;  %v2231_v17 = vld [vmem:[#allocation8 + $0x1948] sm:$0xff]  ;;  %v12702_v5 = vcombine.high %v2367_v57, %v2371_v58  ;;  %v12701_v23 = vcombine.low %v2367_v57, %v2371_v58 }
 0x304   :  { %v2235_v15 = vld [vmem:[#allocation8 + $0x1968] sm:$0xff] }
 0x305   :  { %8127 = vmatpush2.bf16.msra.mxu0 %v12349_v24  ;;  %v2359_v27 = vld [vmem:[#allocation8 + $0x1d48] sm:$0xff]  ;;  %v12566_v24 = vcombine.high %v2231_v17, %v2235_v15 }
 0x306   :  { %8168 = vmatpush2.bf16.msra.mxu1 %v12477_v25  ;;  %8128 = vmatprep.subr.bf16.mxu0 %v12342_v26  ;;  %v2363_v6 = vld [vmem:[#allocation8 + $0x1d68] sm:$0xff] }
 0x307   :  { %8169 = vmatprep.subr.bf16.mxu1 %v12470_v9  ;;  %v2223_v31 = vld [vmem:[#allocation8 + $0x1908] sm:$0xff]  ;;  %v12693_v46 = vcombine.low %v2359_v27, %v2363_v6 }
 0x308   :  { %v2227_v28 = vld [vmem:[#allocation8 + $0x1928] sm:$0xff] }
 0x309   :  { %8129 = vmatpush2.bf16.msra.mxu0 %v12341_v53  ;;  %v2351_v30 = vld [vmem:[#allocation8 + $0x1d08] sm:$0xff]  ;;  %v12558_v39 = vcombine.high %v2223_v31, %v2227_v28  ;;  %v12557_v51 = vcombine.low %v2223_v31, %v2227_v28 }
 0x30a   :  { %8170 = vmatpush2.bf16.msra.mxu1 %v12469_v34  ;;  %8130 = vmatprep.subr.bf16.mxu0 %v12334_v37  ;;  %v2355_v53 = vld [vmem:[#allocation8 + $0x1d28] sm:$0xff] }
 0x30b   :  { %8171 = vmatprep.subr.bf16.mxu1 %v12462_v38  ;;  %v12565_v38 = vcombine.low %v2231_v17, %v2235_v15  ;;  %v12686_v41 = vcombine.high %v2351_v30, %v2355_v53  ;;  %v12685_v54 = vcombine.low %v2351_v30, %v2355_v53  ;;  %v2207_v58 = vld [vmem:[#allocation8 + $0x1888] sm:$0xff] }
 0x30c   :  { %v2339_v17 = vld [vmem:[#allocation8 + $0x1ca8] sm:$0xff] }
 0x30d   :  { %8131 = vmatpush2.bf16.msra.mxu0 %v12333_v42  ;;  %v2215_v42 = vld [vmem:[#allocation8 + $0x18c8] sm:$0xff] }
 0x30e   :  { %8172 = vmatpush2.bf16.msra.mxu1 %v12461_v32  ;;  %8182 = vmatprep.subr.bf16.mxu0 %v12582_v49  ;;  %v2219_v32 = vld [vmem:[#allocation8 + $0x18e8] sm:$0xff] }
 0x30f   :  { %8223 = vmatprep.subr.bf16.mxu1 %v12710_v50  ;;  %v2343_v49 = vld [vmem:[#allocation8 + $0x1cc8] sm:$0xff]  ;;  %v12549_v15 = vcombine.low %v2215_v42, %v2219_v32 }
 0x310   :  { %v7888_v4 = vpop.f32.mrf.mxu0  ;;  %8133 = vmatmul.mubr.bf16.vlgmr.msra.gmra.mxu0 %v14293_v40  ;;  %v7929_v16 = vpop.f32.mrf.mxu1  ;;  %v2347_v50 = vld [vmem:[#allocation8 + $0x1ce8] sm:$0xff] }
 0x311   :  { %v7889_v7 = vadd.f32 %v7888_v4, %v14335_v35  ;;  %8174 = vmatmul.mubr.bf16.vlgmr.msra.gmra.mxu1 %v14295_v43  ;;  %8183 = vmatpush1.bf16.msra.mxu0 %v12581_v55  ;;  %v12694_v35 = vcombine.high %v2359_v27, %v2363_v6  ;;  %v12550_v55 = vcombine.high %v2215_v42, %v2219_v32  ;;  %v2199_v6 = vld [vmem:[#allocation8 + $0x1848] sm:$0xff] }
 0x312   :  { %8214 = vmatprep.mubr.bf16.mxu0 %v14297_v0  ;;  %8224 = vmatpush1.bf16.msra.mxu1 %v12709_v60  ;;  %v7890_v14 = vpop.f32.mrf.mxu0  ;;  %v7931_v9 = vpop.f32.mrf.mxu1  ;;  %v12678_v57 = vcombine.high %v2343_v49, %v2347_v50  ;;  %v2211_v60 = vld [vmem:[#allocation8 + $0x18a8] sm:$0xff]  ;;  %v12677_v4 = vcombine.low %v2343_v49, %v2347_v50 }
 0x313   :  { %v14345_v25 = vadd.f32 %v7929_v16, %v7889_v7  ;;  %8255 = vmatprep.mubr.bf16.mxu1 %v14299_v52  ;;  %v7891_v26 = vadd.f32 %v7890_v14, %v14339_v56  ;;  %8184 = vmatprep.subr.bf16.mxu0 %v12574_v63  ;;  %v2335_v63 = vld [vmem:[#allocation8 + $0x1c88] sm:$0xff]  ;;  %v12541_v14 = vcombine.low %v2207_v58, %v2211_v60 }
 0x314   :  { %v7892_v29 = vpop.f32.mrf.mxu0  ;;  %8225 = vmatprep.subr.bf16.mxu1 %v12702_v5  ;;  %v7933_v37 = vpop.f32.mrf.mxu1  ;;  %v12542_v5 = vcombine.high %v2207_v58, %v2211_v60  ;;  %v12670_v27 = vcombine.high %v2335_v63, %v2339_v17  ;;  %v2203_v7 = vld [vmem:[#allocation8 + $0x1868] sm:$0xff] }
 0x315   :  { %v14349_v34 = vadd.f32 %v7931_v9, %v7891_v26  ;;  %8185 = vmatpush1.bf16.msra.mxu0 %v12573_v10  ;;  %v2327_v16 = vld [vmem:[#allocation8 + $0x1c48] sm:$0xff]  ;;  %v12533_v29 = vcombine.low %v2199_v6, %v2203_v7 }
 0x316   :  { %8226 = vmatpush1.bf16.msra.mxu1 %v12701_v23  ;;  %v7893_v11 = vpop.f32.mrf.mxu0  ;;  %8186 = vmatprep.subr.bf16.mxu0 %v12566_v24  ;;  %v7934_v56 = vpop.f32.mrf.mxu1  ;;  %v2331_v10 = vld [vmem:[#allocation8 + $0x1c68] sm:$0xff]  ;;  %v12669_v23 = vcombine.low %v2335_v63, %v2339_v17  ;;  %v12534_v24 = vcombine.high %v2199_v6, %v2203_v7 }
 0x317   :  { %8227 = vmatprep.subr.bf16.mxu1 %v12694_v35  ;;  %v12662_v26 = vcombine.high %v2327_v16, %v2331_v10  ;;  %v2191_v9 = vld [vmem:[#allocation8 + $0x1808] sm:$0xff]  ;;  %v12661_v30 = vcombine.low %v2327_v16, %v2331_v10 }
 0x318   :  { %v2195_v35 = vld [vmem:[#allocation8 + $0x1828] sm:$0xff] }
 0x319   :  { %8187 = vmatpush1.bf16.msra.mxu0 %v12565_v38  ;;  %v2319_v31 = vld [vmem:[#allocation8 + $0x1c08] sm:$0xff]  ;;  %v12526_v53 = vcombine.high %v2191_v9, %v2195_v35  ;;  %v12525_v56 = vcombine.low %v2191_v9, %v2195_v35 }
 0x31a   :  { %8228 = vmatpush1.bf16.msra.mxu1 %v12693_v46  ;;  %8188 = vmatprep.subr.bf16.mxu0 %v12558_v39  ;;  %v2323_v28 = vld [vmem:[#allocation8 + $0x1c28] sm:$0xff] }
 0x31b   :  { %8229 = vmatprep.subr.bf16.mxu1 %v12686_v41  ;;  %v12654_v37 = vcombine.high %v2319_v31, %v2323_v28  ;;  %v2311_v38 = vld [vmem:[#allocation8 + $0x1bc8] sm:$0xff]  ;;  %v12653_v41 = vcombine.low %v2319_v31, %v2323_v28 }
 0x31c   :  { %v2315_v11 = vld [vmem:[#allocation8 + $0x1be8] sm:$0xff] }
 0x31d   :  { %8189 = vmatpush1.bf16.msra.mxu0 %v12557_v51  ;;  %v2439_v46 = vld [vmem:[#allocation8 + $0x1fc8] sm:$0xff]  ;;  %v12646_v42 = vcombine.high %v2311_v38, %v2315_v11 }
 0x31e   :  { %8230 = vmatpush1.bf16.msra.mxu1 %v12685_v54  ;;  %8190 = vmatprep.subr.bf16.mxu0 %v12550_v55  ;;  %v2443_v39 = vld [vmem:[#allocation8 + $0x1fe8] sm:$0xff]  ;;  %v12645_v55 = vcombine.low %v2311_v38, %v2315_v11 }
 0x31f   :  { %8231 = vmatprep.subr.bf16.mxu1 %v12678_v57  ;;  %v12774_v32 = vcombine.high %v2439_v46, %v2443_v39  ;;  %v2303_v49 = vld [vmem:[#allocation8 + $0x1b88] sm:$0xff]  ;;  %v12773_v57 = vcombine.low %v2439_v46, %v2443_v39 }
 0x320   :  { %v2307_v50 = vld [vmem:[#allocation8 + $0x1ba8] sm:$0xff] }
 0x321   :  { %8191 = vmatpush1.bf16.msra.mxu0 %v12549_v15  ;;  %v2431_v51 = vld [vmem:[#allocation8 + $0x1f88] sm:$0xff]  ;;  %v12638_v58 = vcombine.high %v2303_v49, %v2307_v50 }
 0x322   :  { %8232 = vmatpush1.bf16.msra.mxu1 %v12677_v4  ;;  %8192 = vmatprep.subr.bf16.mxu0 %v12542_v5  ;;  %v2435_v54 = vld [vmem:[#allocation8 + $0x1fa8] sm:$0xff]  ;;  %v12637_v5 = vcombine.low %v2303_v49, %v2307_v50 }
 0x323   :  { %8233 = vmatprep.subr.bf16.mxu1 %v12670_v27  ;;  %v12766_v60 = vcombine.high %v2431_v51, %v2435_v54  ;;  %v2295_v63 = vld [vmem:[#allocation8 + $0x1b48] sm:$0xff]  ;;  %v12765_v27 = vcombine.low %v2431_v51, %v2435_v54 }
 0x324   :  { %v2299_v17 = vld [vmem:[#allocation8 + $0x1b68] sm:$0xff] }
 0x325   :  { %8193 = vmatpush1.bf16.msra.mxu0 %v12541_v14  ;;  %v2423_v15 = vld [vmem:[#allocation8 + $0x1f48] sm:$0xff]  ;;  %v12630_v6 = vcombine.high %v2295_v63, %v2299_v17 }
 0x326   :  { %8234 = vmatpush1.bf16.msra.mxu1 %v12669_v23  ;;  %8194 = vmatprep.subr.bf16.mxu0 %v12534_v24  ;;  %v2427_v4 = vld [vmem:[#allocation8 + $0x1f68] sm:$0xff]  ;;  %v12629_v24 = vcombine.low %v2295_v63, %v2299_v17 }
 0x327   :  { %8235 = vmatprep.subr.bf16.mxu1 %v12662_v26  ;;  %v12758_v7 = vcombine.high %v2423_v15, %v2427_v4  ;;  %v2287_v16 = vld [vmem:[#allocation8 + $0x1b08] sm:$0xff]  ;;  %v12757_v26 = vcombine.low %v2423_v15, %v2427_v4 }
 0x328   :  { %v2291_v10 = vld [vmem:[#allocation8 + $0x1b28] sm:$0xff] }
 0x329   :  { %8195 = vmatpush1.bf16.msra.mxu0 %v12533_v29  ;;  %v2415_v14 = vld [vmem:[#allocation8 + $0x1f08] sm:$0xff]  ;;  %v12622_v9 = vcombine.high %v2287_v16, %v2291_v10 }
 0x32a   :  { %8236 = vmatpush1.bf16.msra.mxu1 %v12661_v30  ;;  %8196 = vmatprep.subr.bf16.mxu0 %v12526_v53  ;;  %v2419_v23 = vld [vmem:[#allocation8 + $0x1f28] sm:$0xff]  ;;  %v12621_v53 = vcombine.low %v2287_v16, %v2291_v10 }
 0x32b   :  { %8237 = vmatprep.subr.bf16.mxu1 %v12654_v37  ;;  %v12750_v35 = vcombine.high %v2415_v14, %v2419_v23  ;;  %v2279_v31 = vld [vmem:[#allocation8 + $0x1ac8] sm:$0xff]  ;;  %v12749_v37 = vcombine.low %v2415_v14, %v2419_v23  ;;  %v1480_v14 = vld [vmem:[#allocation8 + $0x1d0] sm:$0xff] }
 0x32c   :  { %v2283_v28 = vld [vmem:[#allocation8 + $0x1ae8] sm:$0xff]  ;;  %v1484_v23 = vld [vmem:[#allocation8 + $0x1f0] sm:$0xff] }
 0x32d   :  { %8197 = vmatpush1.bf16.msra.mxu0 %v12525_v56  ;;  %v2407_v29 = vld [vmem:[#allocation8 + $0x1ec8] sm:$0xff]  ;;  %v12614_v38 = vcombine.high %v2279_v31, %v2283_v28 }
 0x32e   :  { %8238 = vmatpush1.bf16.msra.mxu1 %v12653_v41  ;;  %8198 = vmatprep.subr.bf16.mxu0 %v12646_v42  ;;  %v2411_v30 = vld [vmem:[#allocation8 + $0x1ee8] sm:$0xff]  ;;  %v12613_v42 = vcombine.low %v2279_v31, %v2283_v28  ;;  %v11816_v31 = vcombine.high %v1480_v14, %v1484_v23 }
 0x32f   :  { %8239 = vmatprep.subr.bf16.mxu1 %v12774_v32  ;;  %v12742_v11 = vcombine.high %v2407_v29, %v2411_v30  ;;  %v2271_v46 = vld [vmem:[#allocation8 + $0x1a88] sm:$0xff]  ;;  %v12741_v32 = vcombine.low %v2407_v29, %v2411_v30  ;;  %v1472_v29 = vld [vmem:[#allocation8 + $0x190] sm:$0xff] }
 0x330   :  { %v2275_v39 = vld [vmem:[#allocation8 + $0x1aa8] sm:$0xff]  ;;  %v1476_v30 = vld [vmem:[#allocation8 + $0x1b0] sm:$0xff] }
 0x331   :  { %8199 = vmatpush2.bf16.msra.mxu0 %v12645_v55  ;;  %v2399_v56 = vld [vmem:[#allocation8 + $0x1e88] sm:$0xff]  ;;  %v12606_v49 = vcombine.high %v2271_v46, %v2275_v39 }
 0x332   :  { %8240 = vmatpush2.bf16.msra.mxu1 %v12773_v57  ;;  %8200 = vmatprep.subr.bf16.mxu0 %v12638_v58  ;;  %v2403_v41 = vld [vmem:[#allocation8 + $0x1ea8] sm:$0xff]  ;;  %v12605_v58 = vcombine.low %v2271_v46, %v2275_v39  ;;  %v1604_v46 = vld [vmem:[#allocation8 + $0x5b0] sm:$0xff] }
 0x333   :  { %8241 = vmatprep.subr.bf16.mxu1 %v12766_v60  ;;  %v12734_v50 = vcombine.high %v2399_v56, %v2403_v41  ;;  %v2263_v51 = vld [vmem:[#allocation8 + $0x1a48] sm:$0xff]  ;;  %v12733_v60 = vcombine.low %v2399_v56, %v2403_v41  ;;  %v11808_v41 = vcombine.high %v1472_v29, %v1476_v30 }
 0x334   :  { %v2267_v54 = vld [vmem:[#allocation8 + $0x1a68] sm:$0xff] }
 0x335   :  { %8201 = vmatpush2.bf16.msra.mxu0 %v12637_v5  ;;  %v2391_v55 = vld [vmem:[#allocation8 + $0x1e48] sm:$0xff]  ;;  %v12598_v63 = vcombine.high %v2263_v51, %v2267_v54 }
 0x336   :  { %8242 = vmatpush2.bf16.msra.mxu1 %v12765_v27  ;;  %8202 = vmatprep.subr.bf16.mxu0 %v12630_v6  ;;  %v2395_v57 = vld [vmem:[#allocation8 + $0x1e68] sm:$0xff]  ;;  %v12597_v6 = vcombine.low %v2263_v51, %v2267_v54  ;;  %v1592_v51 = vld [vmem:[#allocation8 + $0x550] sm:$0xff] }
 0x337   :  { %8243 = vmatprep.subr.bf16.mxu1 %v12758_v7  ;;  %v12726_v17 = vcombine.high %v2391_v55, %v2395_v57  ;;  %v2255_v15 = vld [vmem:[#allocation8 + $0x1a08] sm:$0xff]  ;;  %v12725_v7 = vcombine.low %v2391_v55, %v2395_v57  ;;  %v1596_v54 = vld [vmem:[#allocation8 + $0x570] sm:$0xff] }
 0x338   :  { %v2259_v4 = vld [vmem:[#allocation8 + $0x1a28] sm:$0xff] }
 0x339   :  { %8203 = vmatpush2.bf16.msra.mxu0 %v12629_v24  ;;  %v2383_v5 = vld [vmem:[#allocation8 + $0x1e08] sm:$0xff]  ;;  %v12590_v16 = vcombine.high %v2255_v15, %v2259_v4  ;;  %v1608_v24 = vld [vmem:[#allocation8 + $0x5d0] sm:$0xff] }
 0x33a   :  { %8244 = vmatpush2.bf16.msra.mxu1 %v12757_v26  ;;  %8204 = vmatprep.subr.bf16.mxu0 %v12622_v9  ;;  %v2387_v27 = vld [vmem:[#allocation8 + $0x1e28] sm:$0xff]  ;;  %v1612_v26 = vld [vmem:[#allocation8 + $0x5f0] sm:$0xff]  ;;  %v12589_v9 = vcombine.low %v2255_v15, %v2259_v4 }
 0x33b   :  { %8245 = vmatprep.subr.bf16.mxu1 %v12750_v35  ;;  %v12718_v10 = vcombine.high %v2383_v5, %v2387_v27  ;;  %v12717_v35 = vcombine.low %v2383_v5, %v2387_v27  ;;  %v11944_v28 = vcombine.high %v1608_v24, %v1612_v26  ;;  %v11943_v39 = vcombine.low %v1608_v24, %v1612_v26 }
 0x33c   :  { %v11928_v27 = vcombine.high %v1592_v51, %v1596_v54 }
 0x33d   :  { %8205 = vmatpush2.bf16.msra.mxu0 %v12621_v53  ;;  %v13710_v53 = vld [vmem:[#allocation10] sm:$0xff] }
 0x33e   :  { %8246 = vmatpush2.bf16.msra.mxu1 %v12749_v37  ;;  %8206 = vmatprep.subr.bf16.mxu0 %v12614_v38  ;;  %v2459_v37 = vrot.slane %v13710_v53, %v14184_v19  ;;  %v11815_v38 = vcombine.low %v1480_v14, %v1484_v23  ;;  %v2463_v56 = vrot.slane %v13710_v53, %v14190_v21  ;;  %v1588_v14 = vld [vmem:[#allocation8 + $0x530] sm:$0xff] }
 0x33f   :  { %8247 = vmatprep.subr.bf16.mxu1 %v12742_v11  ;;  %v1600_v11 = vld [vmem:[#allocation8 + $0x590] sm:$0xff] }
 0x340   :  { %v1452_v53 = vld [vmem:[#allocation8 + $0xf0] sm:$0xff] }
 0x341   :  { %8207 = vmatpush2.bf16.msra.mxu0 %v12613_v42  ;;  %v1464_v42 = vld [vmem:[#allocation8 + $0x150] sm:$0xff] }
 0x342   :  { %8248 = vmatpush2.bf16.msra.mxu1 %v12741_v32  ;;  %8208 = vmatprep.subr.bf16.mxu0 %v12606_v49  ;;  %v1468_v32 = vld [vmem:[#allocation8 + $0x170] sm:$0xff] }
 0x343   :  { %8249 = vmatprep.subr.bf16.mxu1 %v12734_v50  ;;  %v11936_v50 = vcombine.high %v1600_v11, %v1604_v46  ;;  %v11799_v26 = vcombine.low %v1464_v42, %v1468_v32 }
 0x345   :  { %8209 = vmatpush2.bf16.msra.mxu0 %v12605_v58  ;;  %v11807_v58 = vcombine.low %v1472_v29, %v1476_v30  ;;  %v1448_v30 = vld [vmem:[#allocation8 + $0xd0] sm:$0xff] }
 0x346   :  { %8250 = vmatpush2.bf16.msra.mxu1 %v12733_v60  ;;  %8210 = vmatprep.subr.bf16.mxu0 %v12598_v63  ;;  %v11935_v63 = vcombine.low %v1600_v11, %v1604_v46 }
 0x347   :  { %8251 = vmatprep.subr.bf16.mxu1 %v12726_v17  ;;  %v11800_v17 = vcombine.high %v1464_v42, %v1468_v32  ;;  %v1444_v42 = vld [vmem:[#allocation8 + $0xb0] sm:$0xff] }
 0x348   :  { %v1568_v32 = vld [vmem:[#allocation8 + $0x490] sm:$0xff] }
 0x349   :  { %8211 = vmatpush2.bf16.msra.mxu0 %v12597_v6  ;;  %v1456_v6 = vld [vmem:[#allocation8 + $0x110] sm:$0xff] }
 0x34a   :  { %8252 = vmatpush2.bf16.msra.mxu1 %v12725_v7  ;;  %8212 = vmatprep.subr.bf16.mxu0 %v12590_v16  ;;  %v1460_v7 = vld [vmem:[#allocation8 + $0x130] sm:$0xff] }
 0x34b   :  { %8253 = vmatprep.subr.bf16.mxu1 %v12718_v10  ;;  %v1584_v10 = vld [vmem:[#allocation8 + $0x510] sm:$0xff]  ;;  %v11791_v11 = vcombine.low %v1456_v6, %v1460_v7 }
 0x34c   :  { %v11920_v29 = vcombine.high %v1584_v10, %v1588_v14  ;;  %v11919_v46 = vcombine.low %v1584_v10, %v1588_v14  ;;  %v1556_v10 = vld [vmem:[#allocation8 + $0x430] sm:$0xff] }
 0x34d   :  { %8213 = vmatpush2.bf16.msra.mxu0 %v12589_v9 }
 0x34e   :  { %8254 = vmatpush2.bf16.msra.mxu1 %v12717_v35  ;;  %8264 = vmatprep.subr.bf16.mxu0 %v11816_v31  ;;  %v11927_v35 = vcombine.low %v1592_v51, %v1596_v54  ;;  %v11792_v31 = vcombine.high %v1456_v6, %v1460_v7  ;;  %v1424_v6 = vld [vmem:[#allocation8 + $0x10] sm:$0xff] }
 0x34f   :  { %8305 = vmatprep.subr.bf16.mxu1 %v11944_v28  ;;  %v1428_v7 = vld [vmem:[#allocation8 + $0x30] sm:$0xff] }
 0x350   :  { %v7970_v49 = vpop.f32.mrf.mxu0  ;;  %8215 = vmatmul.mubr.bf16.vlgmr.msra.gmra.mxu0 %v14308_v1 }
 0x351   :  { %v7971_v55 = vadd.f32 %v7970_v49, %v2459_v37  ;;  %v8011_v57 = vpop.f32.mrf.mxu1  ;;  %8256 = vmatmul.mubr.bf16.vlgmr.msra.gmra.mxu1 %v14310_v3  ;;  %8265 = vmatpush1.bf16.msra.mxu0 %v11815_v38  ;;  %v1576_v37 = vld [vmem:[#allocation8 + $0x4d0] sm:$0xff] }
 0x352   :  { %8296 = vmatprep.mubr.bf16.mxu0 %v14202_v45  ;;  %8306 = vmatpush1.bf16.msra.mxu1 %v11943_v39  ;;  %v7972_v60 = vpop.f32.mrf.mxu0  ;;  %v1580_v38 = vld [vmem:[#allocation8 + $0x4f0] sm:$0xff]  ;;  %v11784_v39 = vcombine.high %v1448_v30, %v1452_v53 }
 0x353   :  { %v14356_v15 = vadd.f32 %v8011_v57, %v7971_v55  ;;  %8337 = vmatprep.mubr.bf16.mxu1 %v14208_v48  ;;  %v7973_v4 = vadd.f32 %v7972_v60, %v2463_v56  ;;  %v8013_v5 = vpop.f32.mrf.mxu1  ;;  %8266 = vmatprep.subr.bf16.mxu0 %v11808_v41  ;;  %v11912_v56 = vcombine.high %v1576_v37, %v1580_v38  ;;  %v1440_v41 = vld [vmem:[#allocation8 + $0x90] sm:$0xff] }
 0x354   :  { %v7974_v16 = vpop.f32.mrf.mxu0  ;;  %8307 = vmatprep.subr.bf16.mxu1 %v11936_v50  ;;  %v1572_v49 = vld [vmem:[#allocation8 + $0x4b0] sm:$0xff]  ;;  %v11783_v50 = vcombine.low %v1448_v30, %v1452_v53  ;;  %v11911_v51 = vcombine.low %v1576_v37, %v1580_v38  ;;  %v11776_v54 = vcombine.high %v1440_v41, %v1444_v42  ;;  %v11759_v30 = vcombine.low %v1424_v6, %v1428_v7 }
 0x355   :  { %v14359_v23 = vadd.f32 %v8013_v5, %v7973_v4  ;;  %v8015_v24 = vpop.f32.mrf.mxu1  ;;  %8267 = vmatpush1.bf16.msra.mxu0 %v11807_v58  ;;  %v11904_v55 = vcombine.high %v1568_v32, %v1572_v49  ;;  %v1432_v57 = vld [vmem:[#allocation8 + $0x50] sm:$0xff]  ;;  %v11903_v4 = vcombine.low %v1568_v32, %v1572_v49 }
 0x356   :  { %8308 = vmatpush1.bf16.msra.mxu1 %v11935_v63  ;;  %v7975_v9 = vpop.f32.mrf.mxu0  ;;  %8268 = vmatprep.subr.bf16.mxu0 %v11800_v17  ;;  %v1436_v58 = vld [vmem:[#allocation8 + $0x70] sm:$0xff]  ;;  %v11775_v17 = vcombine.low %v1440_v41, %v1444_v42 }
 0x357   :  { %v8016_v28 = vpop.f32.mrf.mxu1  ;;  %8309 = vmatprep.subr.bf16.mxu1 %v11928_v27  ;;  %v1560_v60 = vld [vmem:[#allocation8 + $0x450] sm:$0xff]  ;;  %v11768_v5 = vcombine.high %v1432_v57, %v1436_v58  ;;  %v11767_v14 = vcombine.low %v1432_v57, %v1436_v58 }
 0x358   :  { %v1564_v63 = vld [vmem:[#allocation8 + $0x470] sm:$0xff] }
 0x359   :  { %8269 = vmatpush1.bf16.msra.mxu0 %v11799_v26  ;;  %v11896_v27 = vcombine.high %v1560_v60, %v1564_v63  ;;  %v1552_v16 = vld [vmem:[#allocation8 + $0x410] sm:$0xff]  ;;  %v11895_v24 = vcombine.low %v1560_v60, %v1564_v63  ;;  %v11760_v26 = vcombine.high %v1424_v6, %v1428_v7 }
 0x35a   :  { %8310 = vmatpush1.bf16.msra.mxu1 %v11927_v35  ;;  %8270 = vmatprep.subr.bf16.mxu0 %v11792_v31  ;;  %v11888_v9 = vcombine.high %v1552_v16, %v1556_v10  ;;  %v1544_v35 = vld [vmem:[#allocation8 + $0x3d0] sm:$0xff]  ;;  %v11887_v53 = vcombine.low %v1552_v16, %v1556_v10 }
 0x35b   :  { %8311 = vmatprep.subr.bf16.mxu1 %v11920_v29  ;;  %v1548_v31 = vld [vmem:[#allocation8 + $0x3f0] sm:$0xff] }
 0x35c   :  { %v1672_v28 = vld [vmem:[#allocation8 + $0x7d0] sm:$0xff]  ;;  %v11880_v37 = vcombine.high %v1544_v35, %v1548_v31  ;;  %v11879_v41 = vcombine.low %v1544_v35, %v1548_v31 }
 0x35d   :  { %8271 = vmatpush1.bf16.msra.mxu0 %v11791_v11  ;;  %v1676_v29 = vld [vmem:[#allocation8 + $0x7f0] sm:$0xff] }
 0x35e   :  { %8312 = vmatpush1.bf16.msra.mxu1 %v11919_v46  ;;  %8272 = vmatprep.subr.bf16.mxu0 %v11784_v39  ;;  %v12008_v38 = vcombine.high %v1672_v28, %v1676_v29  ;;  %v1536_v11 = vld [vmem:[#allocation8 + $0x390] sm:$0xff]  ;;  %v12007_v42 = vcombine.low %v1672_v28, %v1676_v29 }
 0x35f   :  { %8313 = vmatprep.subr.bf16.mxu1 %v11912_v56  ;;  %v1540_v46 = vld [vmem:[#allocation8 + $0x3b0] sm:$0xff] }
 0x360   :  { %v1664_v39 = vld [vmem:[#allocation8 + $0x790] sm:$0xff]  ;;  %v11872_v32 = vcombine.high %v1536_v11, %v1540_v46  ;;  %v11871_v57 = vcombine.low %v1536_v11, %v1540_v46 }
 0x361   :  { %8273 = vmatpush1.bf16.msra.mxu0 %v11783_v50  ;;  %v1668_v56 = vld [vmem:[#allocation8 + $0x7b0] sm:$0xff] }
 0x362   :  { %8314 = vmatpush1.bf16.msra.mxu1 %v11911_v51  ;;  %8274 = vmatprep.subr.bf16.mxu0 %v11776_v54  ;;  %v12000_v49 = vcombine.high %v1664_v39, %v1668_v56  ;;  %v1528_v50 = vld [vmem:[#allocation8 + $0x350] sm:$0xff]  ;;  %v11999_v58 = vcombine.low %v1664_v39, %v1668_v56 }
 0x363   :  { %8315 = vmatprep.subr.bf16.mxu1 %v11904_v55  ;;  %v1532_v51 = vld [vmem:[#allocation8 + $0x370] sm:$0xff] }
 0x364   :  { %v1656_v54 = vld [vmem:[#allocation8 + $0x750] sm:$0xff]  ;;  %v11864_v60 = vcombine.high %v1528_v50, %v1532_v51  ;;  %v11863_v6 = vcombine.low %v1528_v50, %v1532_v51 }
 0x365   :  { %8275 = vmatpush1.bf16.msra.mxu0 %v11775_v17  ;;  %v1660_v55 = vld [vmem:[#allocation8 + $0x770] sm:$0xff] }
 0x366   :  { %8316 = vmatpush1.bf16.msra.mxu1 %v11903_v4  ;;  %8276 = vmatprep.subr.bf16.mxu0 %v11768_v5  ;;  %v11992_v63 = vcombine.high %v1656_v54, %v1660_v55  ;;  %v1520_v17 = vld [vmem:[#allocation8 + $0x310] sm:$0xff]  ;;  %v11991_v7 = vcombine.low %v1656_v54, %v1660_v55 }
 0x367   :  { %8317 = vmatprep.subr.bf16.mxu1 %v11896_v27  ;;  %v1524_v4 = vld [vmem:[#allocation8 + $0x330] sm:$0xff] }
 0x368   :  { %v1648_v5 = vld [vmem:[#allocation8 + $0x710] sm:$0xff]  ;;  %v11856_v16 = vcombine.high %v1520_v17, %v1524_v4  ;;  %v11855_v35 = vcombine.low %v1520_v17, %v1524_v4 }
 0x369   :  { %8277 = vmatpush1.bf16.msra.mxu0 %v11767_v14  ;;  %v1652_v27 = vld [vmem:[#allocation8 + $0x730] sm:$0xff] }
 0x36a   :  { %8318 = vmatpush1.bf16.msra.mxu1 %v11895_v24  ;;  %8278 = vmatprep.subr.bf16.mxu0 %v11760_v26  ;;  %v11984_v10 = vcombine.high %v1648_v5, %v1652_v27  ;;  %v1512_v14 = vld [vmem:[#allocation8 + $0x2d0] sm:$0xff]  ;;  %v11983_v31 = vcombine.low %v1648_v5, %v1652_v27 }
 0x36b   :  { %8319 = vmatprep.subr.bf16.mxu1 %v11888_v9  ;;  %v1516_v24 = vld [vmem:[#allocation8 + $0x2f0] sm:$0xff] }
 0x36c   :  { %v1640_v26 = vld [vmem:[#allocation8 + $0x6d0] sm:$0xff]  ;;  %v11848_v28 = vcombine.high %v1512_v14, %v1516_v24  ;;  %v11847_v11 = vcombine.low %v1512_v14, %v1516_v24 }
 0x36d   :  { %8279 = vmatpush1.bf16.msra.mxu0 %v11759_v30  ;;  %v1644_v9 = vld [vmem:[#allocation8 + $0x6f0] sm:$0xff] }
 0x36e   :  { %8320 = vmatpush1.bf16.msra.mxu1 %v11887_v53  ;;  %8280 = vmatprep.subr.bf16.mxu0 %v11880_v37  ;;  %v11976_v29 = vcombine.high %v1640_v26, %v1644_v9  ;;  %v1504_v30 = vld [vmem:[#allocation8 + $0x290] sm:$0xff]  ;;  %v11975_v46 = vcombine.low %v1640_v26, %v1644_v9 }
 0x36f   :  { %8321 = vmatprep.subr.bf16.mxu1 %v12008_v38  ;;  %v1508_v53 = vld [vmem:[#allocation8 + $0x2b0] sm:$0xff] }
 0x370   :  { %v1632_v37 = vld [vmem:[#allocation8 + $0x690] sm:$0xff]  ;;  %v11840_v39 = vcombine.high %v1504_v30, %v1508_v53  ;;  %v11839_v50 = vcombine.low %v1504_v30, %v1508_v53 }
 0x371   :  { %8281 = vmatpush2.bf16.msra.mxu0 %v11879_v41  ;;  %v1636_v38 = vld [vmem:[#allocation8 + $0x6b0] sm:$0xff] }
 0x372   :  { %8322 = vmatpush2.bf16.msra.mxu1 %v12007_v42  ;;  %8282 = vmatprep.subr.bf16.mxu0 %v11872_v32  ;;  %v11968_v56 = vcombine.high %v1632_v37, %v1636_v38  ;;  %v1496_v41 = vld [vmem:[#allocation8 + $0x250] sm:$0xff]  ;;  %v11967_v51 = vcombine.low %v1632_v37, %v1636_v38 }
 0x373   :  { %8323 = vmatprep.subr.bf16.mxu1 %v12000_v49  ;;  %v1500_v42 = vld [vmem:[#allocation8 + $0x270] sm:$0xff] }
 0x374   :  { %v1624_v32 = vld [vmem:[#allocation8 + $0x650] sm:$0xff]  ;;  %v11832_v54 = vcombine.high %v1496_v41, %v1500_v42  ;;  %v11831_v17 = vcombine.low %v1496_v41, %v1500_v42 }
 0x375   :  { %8283 = vmatpush2.bf16.msra.mxu0 %v11871_v57  ;;  %v1628_v49 = vld [vmem:[#allocation8 + $0x670] sm:$0xff] }
 0x376   :  { %8324 = vmatpush2.bf16.msra.mxu1 %v11999_v58  ;;  %8284 = vmatprep.subr.bf16.mxu0 %v11864_v60  ;;  %v11960_v55 = vcombine.high %v1624_v32, %v1628_v49  ;;  %v1488_v57 = vld [vmem:[#allocation8 + $0x210] sm:$0xff]  ;;  %v11959_v4 = vcombine.low %v1624_v32, %v1628_v49 }
 0x377   :  { %8325 = vmatprep.subr.bf16.mxu1 %v11992_v63  ;;  %v1492_v58 = vld [vmem:[#allocation8 + $0x230] sm:$0xff] }
 0x378   :  { %v1616_v60 = vld [vmem:[#allocation8 + $0x610] sm:$0xff]  ;;  %v11824_v5 = vcombine.high %v1488_v57, %v1492_v58  ;;  %v11823_v14 = vcombine.low %v1488_v57, %v1492_v58 }
 0x379   :  { %8285 = vmatpush2.bf16.msra.mxu0 %v11863_v6  ;;  %v1620_v63 = vld [vmem:[#allocation8 + $0x630] sm:$0xff] }
 0x37a   :  { %8326 = vmatpush2.bf16.msra.mxu1 %v11991_v7  ;;  %8286 = vmatprep.subr.bf16.mxu0 %v11856_v16  ;;  %v11952_v27 = vcombine.high %v1616_v60, %v1620_v63  ;;  %v1736_v6 = vld [vmem:[#allocation8 + $0x9d0] sm:$0xff]  ;;  %v11951_v24 = vcombine.low %v1616_v60, %v1620_v63 }
 0x37b   :  { %8327 = vmatprep.subr.bf16.mxu1 %v11984_v10  ;;  %v1740_v7 = vld [vmem:[#allocation8 + $0x9f0] sm:$0xff] }
 0x37c   :  { %v1864_v16 = vld [vmem:[#allocation8 + $0xdd0] sm:$0xff]  ;;  %v12072_v26 = vcombine.high %v1736_v6, %v1740_v7 }
 0x37d   :  { %8287 = vmatpush2.bf16.msra.mxu0 %v11855_v35  ;;  %v1868_v10 = vld [vmem:[#allocation8 + $0xdf0] sm:$0xff] }
 0x37e   :  { %8328 = vmatpush2.bf16.msra.mxu1 %v11983_v31  ;;  %8288 = vmatprep.subr.bf16.mxu0 %v11848_v28  ;;  %v12200_v9 = vcombine.high %v1864_v16, %v1868_v10  ;;  %v1728_v35 = vld [vmem:[#allocation8 + $0x990] sm:$0xff]  ;;  %v12071_v28 = vcombine.low %v1736_v6, %v1740_v7  ;;  %v12199_v53 = vcombine.low %v1864_v16, %v1868_v10 }
 0x37f   :  { %8329 = vmatprep.subr.bf16.mxu1 %v11976_v29  ;;  %v1732_v31 = vld [vmem:[#allocation8 + $0x9b0] sm:$0xff] }
 0x380   :  { %v1856_v29 = vld [vmem:[#allocation8 + $0xd90] sm:$0xff]  ;;  %v12064_v37 = vcombine.high %v1728_v35, %v1732_v31  ;;  %v12063_v49 = vcombine.low %v1728_v35, %v1732_v31 }
 0x381   :  { %8289 = vmatpush2.bf16.msra.mxu0 %v11847_v11  ;;  %v1860_v30 = vld [vmem:[#allocation8 + $0xdb0] sm:$0xff] }
 0x382   :  { %8330 = vmatpush2.bf16.msra.mxu1 %v11975_v46  ;;  %8290 = vmatprep.subr.bf16.mxu0 %v11840_v39  ;;  %v1720_v38 = vld [vmem:[#allocation8 + $0x950] sm:$0xff]  ;;  %v12192_v39 = vcombine.high %v1856_v29, %v1860_v30 }
 0x383   :  { %8331 = vmatprep.subr.bf16.mxu1 %v11968_v56  ;;  %v1724_v11 = vld [vmem:[#allocation8 + $0x970] sm:$0xff] }
 0x384   :  { %v1848_v56 = vld [vmem:[#allocation8 + $0xd50] sm:$0xff]  ;;  %v12055_v7 = vcombine.low %v1720_v38, %v1724_v11 }
 0x385   :  { %8291 = vmatpush2.bf16.msra.mxu0 %v11839_v50  ;;  %v1852_v41 = vld [vmem:[#allocation8 + $0xd70] sm:$0xff] }
 0x386   :  { %8332 = vmatpush2.bf16.msra.mxu1 %v11967_v51  ;;  %8292 = vmatprep.subr.bf16.mxu0 %v11832_v54  ;;  %v12191_v51 = vcombine.low %v1856_v29, %v1860_v30  ;;  %v12056_v54 = vcombine.high %v1720_v38, %v1724_v11  ;;  %v1712_v60 = vld [vmem:[#allocation8 + $0x910] sm:$0xff]  ;;  %v12183_v10 = vcombine.low %v1848_v56, %v1852_v41 }
 0x387   :  { %8333 = vmatprep.subr.bf16.mxu1 %v11960_v55  ;;  %v1716_v63 = vld [vmem:[#allocation8 + $0x930] sm:$0xff] }
 0x388   :  { %v1832_v35 = vld [vmem:[#allocation8 + $0xcd0] sm:$0xff] }
 0x389   :  { %8293 = vmatpush2.bf16.msra.mxu0 %v11831_v17  ;;  %v1836_v31 = vld [vmem:[#allocation8 + $0xcf0] sm:$0xff] }
 0x38a   :  { %8334 = vmatpush2.bf16.msra.mxu1 %v11959_v4  ;;  %8294 = vmatprep.subr.bf16.mxu0 %v11824_v5  ;;  %v1840_v4 = vld [vmem:[#allocation8 + $0xd10] sm:$0xff] }
 0x38b   :  { %8335 = vmatprep.subr.bf16.mxu1 %v11952_v27  ;;  %v1844_v5 = vld [vmem:[#allocation8 + $0xd30] sm:$0xff] }
 0x38c   :  { %v12175_v29 = vcombine.low %v1840_v4, %v1844_v5  ;;  %v1700_v38 = vld [vmem:[#allocation8 + $0x8b0] sm:$0xff] }
 0x38d   :  { %8295 = vmatpush2.bf16.msra.mxu0 %v11823_v14  ;;  %v12048_v14 = vcombine.high %v1712_v60, %v1716_v63  ;;  %v1824_v11 = vld [vmem:[#allocation8 + $0xc90] sm:$0xff] }
 0x38e   :  { %8336 = vmatpush2.bf16.msra.mxu1 %v11951_v24  ;;  %8346 = vmatprep.subr.bf16.mxu0 %v12072_v26  ;;  %v12176_v24 = vcombine.high %v1840_v4, %v1844_v5  ;;  %v1704_v26 = vld [vmem:[#allocation8 + $0x8d0] sm:$0xff] }
 0x38f   :  { %8387 = vmatprep.subr.bf16.mxu1 %v12200_v9  ;;  %v1708_v9 = vld [vmem:[#allocation8 + $0x8f0] sm:$0xff] }
 0x390   :  { %v8052_v46 = vpop.f32.mrf.mxu0  ;;  %8297 = vmatmul.mubr.bf16.vlgmr.msra.gmra.mxu0 %v14206_v47  ;;  %v12040_v30 = vcombine.high %v1704_v26, %v1708_v9  ;;  %v1812_v4 = vld [vmem:[#allocation8 + $0xc30] sm:$0xff] }
 0x391   :  { %v8053_v42 = vadd.f32 %v8052_v46, %v14356_v15  ;;  %v8093_v32 = vpop.f32.mrf.mxu1  ;;  %8338 = vmatmul.mubr.bf16.vlgmr.msra.gmra.mxu1 %v14200_v44  ;;  %8347 = vmatpush1.bf16.msra.mxu0 %v12071_v28  ;;  %v12184_v15 = vcombine.high %v1848_v56, %v1852_v41  ;;  %v12047_v28 = vcombine.low %v1712_v60, %v1716_v63  ;;  %v1828_v46 = vld [vmem:[#allocation8 + $0xcb0] sm:$0xff] }
 0x392   :  { %8378 = vmatprep.mubr.bf16.mxu0 %v14229_v12  ;;  %8388 = vmatpush1.bf16.msra.mxu1 %v12199_v53  ;;  %v8054_v50 = vpop.f32.mrf.mxu0  ;;  %v12168_v53 = vcombine.high %v1832_v35, %v1836_v31  ;;  %v12167_v56 = vcombine.low %v1832_v35, %v1836_v31  ;;  %v1680_v60 = vld [vmem:[#allocation8 + $0x810] sm:$0xff] }
 0x393   :  { %v14365_v55 = vadd.f32 %v8093_v32, %v8053_v42  ;;  %8419 = vmatprep.mubr.bf16.mxu1 %v14231_v22  ;;  %v8055_v57 = vadd.f32 %v8054_v50, %v14359_v23  ;;  %v8095_v58 = vpop.f32.mrf.mxu1  ;;  %8348 = vmatprep.subr.bf16.mxu0 %v12064_v37  ;;  %v1696_v37 = vld [vmem:[#allocation8 + $0x890] sm:$0xff]  ;;  %v12160_v42 = vcombine.high %v1824_v11, %v1828_v46 }
 0x394   :  { %v8056_v17 = vpop.f32.mrf.mxu0  ;;  %8389 = vmatprep.subr.bf16.mxu1 %v12192_v39  ;;  %v12039_v39 = vcombine.low %v1704_v26, %v1708_v9  ;;  %v12032_v41 = vcombine.high %v1696_v37, %v1700_v38  ;;  %v1688_v32 = vld [vmem:[#allocation8 + $0x850] sm:$0xff] }
 0x395   :  { %v14369_v27 = vadd.f32 %v8095_v58, %v8055_v57  ;;  %v8097_v6 = vpop.f32.mrf.mxu1  ;;  %8349 = vmatpush1.bf16.msra.mxu0 %v12063_v49  ;;  %v1692_v49 = vld [vmem:[#allocation8 + $0x870] sm:$0xff]  ;;  %v12159_v57 = vcombine.low %v1824_v11, %v1828_v46 }
 0x396   :  { %8390 = vmatpush1.bf16.msra.mxu1 %v12191_v51  ;;  %v8057_v16 = vpop.f32.mrf.mxu0  ;;  %8350 = vmatprep.subr.bf16.mxu0 %v12056_v54  ;;  %v1816_v50 = vld [vmem:[#allocation8 + $0xc50] sm:$0xff]  ;;  %v12031_v54 = vcombine.low %v1696_v37, %v1700_v38  ;;  %v12024_v58 = vcombine.high %v1688_v32, %v1692_v49  ;;  %v12023_v5 = vcombine.low %v1688_v32, %v1692_v49 }
 0x397   :  { %v8098_v23 = vpop.f32.mrf.mxu1  ;;  %8391 = vmatprep.subr.bf16.mxu1 %v12184_v15  ;;  %v1820_v51 = vld [vmem:[#allocation8 + $0xc70] sm:$0xff] }
 0x398   :  { %v12152_v15 = vcombine.high %v1816_v50, %v1820_v51  ;;  %v1684_v63 = vld [vmem:[#allocation8 + $0x830] sm:$0xff]  ;;  %v12151_v6 = vcombine.low %v1816_v50, %v1820_v51 }
 0x399   :  { %8351 = vmatpush1.bf16.msra.mxu0 %v12055_v7  ;;  %v1808_v17 = vld [vmem:[#allocation8 + $0xc10] sm:$0xff]  ;;  %v12016_v7 = vcombine.high %v1680_v60, %v1684_v63  ;;  %v12015_v26 = vcombine.low %v1680_v60, %v1684_v63 }
 0x39a   :  { %8392 = vmatpush1.bf16.msra.mxu1 %v12183_v10  ;;  %8352 = vmatprep.subr.bf16.mxu0 %v12048_v14  ;;  %v12144_v16 = vcombine.high %v1808_v17, %v1812_v4  ;;  %v1800_v10 = vld [vmem:[#allocation8 + $0xbd0] sm:$0xff]  ;;  %v12143_v9 = vcombine.low %v1808_v17, %v1812_v4 }
 0x39b   :  { %8393 = vmatprep.subr.bf16.mxu1 %v12176_v24  ;;  %v1804_v14 = vld [vmem:[#allocation8 + $0xbf0] sm:$0xff] }
 0x39c   :  { %v1928_v23 = vld [vmem:[#allocation8 + $0xfd0] sm:$0xff]  ;;  %v12136_v35 = vcombine.high %v1800_v10, %v1804_v14  ;;  %v12135_v37 = vcombine.low %v1800_v10, %v1804_v14 }
 0x39d   :  { %8353 = vmatpush1.bf16.msra.mxu0 %v12047_v28  ;;  %v1932_v24 = vld [vmem:[#allocation8 + $0xff0] sm:$0xff] }
 0x39e   :  { %8394 = vmatpush1.bf16.msra.mxu1 %v12175_v29  ;;  %8354 = vmatprep.subr.bf16.mxu0 %v12040_v30  ;;  %v12264_v31 = vcombine.high %v1928_v23, %v1932_v24  ;;  %v1792_v28 = vld [vmem:[#allocation8 + $0xb90] sm:$0xff]  ;;  %v12263_v38 = vcombine.low %v1928_v23, %v1932_v24 }
 0x39f   :  { %8395 = vmatprep.subr.bf16.mxu1 %v12168_v53  ;;  %v1796_v29 = vld [vmem:[#allocation8 + $0xbb0] sm:$0xff] }
 0x3a0   :  { %v1920_v30 = vld [vmem:[#allocation8 + $0xf90] sm:$0xff]  ;;  %v12128_v11 = vcombine.high %v1792_v28, %v1796_v29  ;;  %v12127_v32 = vcombine.low %v1792_v28, %v1796_v29 }
 0x3a1   :  { %8355 = vmatpush1.bf16.msra.mxu0 %v12039_v39  ;;  %v1924_v53 = vld [vmem:[#allocation8 + $0xfb0] sm:$0xff] }
 0x3a2   :  { %8396 = vmatpush1.bf16.msra.mxu1 %v12167_v56  ;;  %8356 = vmatprep.subr.bf16.mxu0 %v12032_v41  ;;  %v12256_v46 = vcombine.high %v1920_v30, %v1924_v53  ;;  %v1784_v39 = vld [vmem:[#allocation8 + $0xb50] sm:$0xff]  ;;  %v12255_v49 = vcombine.low %v1920_v30, %v1924_v53 }
 0x3a3   :  { %8397 = vmatprep.subr.bf16.mxu1 %v12160_v42  ;;  %v1788_v56 = vld [vmem:[#allocation8 + $0xb70] sm:$0xff] }
 0x3a4   :  { %v1912_v41 = vld [vmem:[#allocation8 + $0xf50] sm:$0xff]  ;;  %v12120_v50 = vcombine.high %v1784_v39, %v1788_v56  ;;  %v12119_v60 = vcombine.low %v1784_v39, %v1788_v56 }
 0x3a5   :  { %8357 = vmatpush1.bf16.msra.mxu0 %v12031_v54  ;;  %v1916_v42 = vld [vmem:[#allocation8 + $0xf70] sm:$0xff] }
 0x3a6   :  { %8398 = vmatpush1.bf16.msra.mxu1 %v12159_v57  ;;  %8358 = vmatprep.subr.bf16.mxu0 %v12024_v58  ;;  %v12248_v51 = vcombine.high %v1912_v41, %v1916_v42  ;;  %v1776_v54 = vld [vmem:[#allocation8 + $0xb10] sm:$0xff]  ;;  %v12247_v63 = vcombine.low %v1912_v41, %v1916_v42 }
 0x3a7   :  { %8399 = vmatprep.subr.bf16.mxu1 %v12152_v15  ;;  %v1780_v57 = vld [vmem:[#allocation8 + $0xb30] sm:$0xff] }
 0x3a8   :  { %v1904_v58 = vld [vmem:[#allocation8 + $0xf10] sm:$0xff]  ;;  %v12112_v17 = vcombine.high %v1776_v54, %v1780_v57  ;;  %v12111_v10 = vcombine.low %v1776_v54, %v1780_v57 }
 0x3a9   :  { %8359 = vmatpush1.bf16.msra.mxu0 %v12023_v5  ;;  %v1908_v15 = vld [vmem:[#allocation8 + $0xf30] sm:$0xff] }
 0x3aa   :  { %8400 = vmatpush1.bf16.msra.mxu1 %v12151_v6  ;;  %8360 = vmatprep.subr.bf16.mxu0 %v12016_v7  ;;  %v12240_v4 = vcombine.high %v1904_v58, %v1908_v15  ;;  %v1768_v5 = vld [vmem:[#allocation8 + $0xad0] sm:$0xff]  ;;  %v12239_v14 = vcombine.low %v1904_v58, %v1908_v15 }
 0x3ab   :  { %8401 = vmatprep.subr.bf16.mxu1 %v12144_v16  ;;  %v1772_v6 = vld [vmem:[#allocation8 + $0xaf0] sm:$0xff] }
 0x3ac   :  { %v1896_v7 = vld [vmem:[#allocation8 + $0xed0] sm:$0xff]  ;;  %v12104_v23 = vcombine.high %v1768_v5, %v1772_v6  ;;  %v12103_v28 = vcombine.low %v1768_v5, %v1772_v6 }
 0x3ad   :  { %8361 = vmatpush1.bf16.msra.mxu0 %v12015_v26  ;;  %v1900_v16 = vld [vmem:[#allocation8 + $0xef0] sm:$0xff] }
 0x3ae   :  { %8402 = vmatpush1.bf16.msra.mxu1 %v12143_v9  ;;  %8362 = vmatprep.subr.bf16.mxu0 %v12136_v35  ;;  %v12232_v24 = vcombine.high %v1896_v7, %v1900_v16  ;;  %v1760_v26 = vld [vmem:[#allocation8 + $0xa90] sm:$0xff]  ;;  %v12231_v29 = vcombine.low %v1896_v7, %v1900_v16 }
 0x3af   :  { %8403 = vmatprep.subr.bf16.mxu1 %v12264_v31  ;;  %v1764_v9 = vld [vmem:[#allocation8 + $0xab0] sm:$0xff] }
 0x3b0   :  { %v1888_v35 = vld [vmem:[#allocation8 + $0xe90] sm:$0xff]  ;;  %v12096_v30 = vcombine.high %v1760_v26, %v1764_v9  ;;  %v12095_v39 = vcombine.low %v1760_v26, %v1764_v9 }
 0x3b1   :  { %8363 = vmatpush2.bf16.msra.mxu0 %v12135_v37  ;;  %v1892_v31 = vld [vmem:[#allocation8 + $0xeb0] sm:$0xff] }
 0x3b2   :  { %8404 = vmatpush2.bf16.msra.mxu1 %v12263_v38  ;;  %8364 = vmatprep.subr.bf16.mxu0 %v12128_v11  ;;  %v12224_v53 = vcombine.high %v1888_v35, %v1892_v31  ;;  %v1752_v37 = vld [vmem:[#allocation8 + $0xa50] sm:$0xff]  ;;  %v12223_v56 = vcombine.low %v1888_v35, %v1892_v31 }
 0x3b3   :  { %8405 = vmatprep.subr.bf16.mxu1 %v12256_v46  ;;  %v1756_v38 = vld [vmem:[#allocation8 + $0xa70] sm:$0xff] }
 0x3b4   :  { %v1880_v11 = vld [vmem:[#allocation8 + $0xe50] sm:$0xff]  ;;  %v12088_v41 = vcombine.high %v1752_v37, %v1756_v38  ;;  %v12087_v54 = vcombine.low %v1752_v37, %v1756_v38 }
 0x3b5   :  { %8365 = vmatpush2.bf16.msra.mxu0 %v12127_v32  ;;  %v1884_v46 = vld [vmem:[#allocation8 + $0xe70] sm:$0xff] }
 0x3b6   :  { %8406 = vmatpush2.bf16.msra.mxu1 %v12255_v49  ;;  %8366 = vmatprep.subr.bf16.mxu0 %v12120_v50  ;;  %v12216_v42 = vcombine.high %v1880_v11, %v1884_v46  ;;  %v1744_v32 = vld [vmem:[#allocation8 + $0xa10] sm:$0xff]  ;;  %v12215_v57 = vcombine.low %v1880_v11, %v1884_v46 }
 0x3b7   :  { %8407 = vmatprep.subr.bf16.mxu1 %v12248_v51  ;;  %v1748_v49 = vld [vmem:[#allocation8 + $0xa30] sm:$0xff] }
 0x3b8   :  { %v1872_v50 = vld [vmem:[#allocation8 + $0xe10] sm:$0xff]  ;;  %v12080_v58 = vcombine.high %v1744_v32, %v1748_v49  ;;  %v12079_v5 = vcombine.low %v1744_v32, %v1748_v49 }
 0x3b9   :  { %8367 = vmatpush2.bf16.msra.mxu0 %v12119_v60  ;;  %v1876_v51 = vld [vmem:[#allocation8 + $0xe30] sm:$0xff] }
 0x3ba   :  { %8408 = vmatpush2.bf16.msra.mxu1 %v12247_v63  ;;  %8368 = vmatprep.subr.bf16.mxu0 %v12112_v17  ;;  %v12208_v15 = vcombine.high %v1872_v50, %v1876_v51  ;;  %v1992_v60 = vld [vmem:[#allocation8 + $0x11d0] sm:$0xff]  ;;  %v12207_v6 = vcombine.low %v1872_v50, %v1876_v51 }
 0x3bb   :  { %8409 = vmatprep.subr.bf16.mxu1 %v12240_v4  ;;  %v1996_v63 = vld [vmem:[#allocation8 + $0x11f0] sm:$0xff] }
 0x3bc   :  { %v2120_v17 = vld [vmem:[#allocation8 + $0x15d0] sm:$0xff]  ;;  %v12328_v7 = vcombine.high %v1992_v60, %v1996_v63 }
 0x3bd   :  { %8369 = vmatpush2.bf16.msra.mxu0 %v12111_v10  ;;  %v2124_v4 = vld [vmem:[#allocation8 + $0x15f0] sm:$0xff] }
 0x3be   :  { %8410 = vmatpush2.bf16.msra.mxu1 %v12239_v14  ;;  %8370 = vmatprep.subr.bf16.mxu0 %v12104_v23  ;;  %v12456_v16 = vcombine.high %v2120_v17, %v2124_v4  ;;  %v1984_v10 = vld [vmem:[#allocation8 + $0x1190] sm:$0xff]  ;;  %v12327_v23 = vcombine.low %v1992_v60, %v1996_v63  ;;  %v12455_v9 = vcombine.low %v2120_v17, %v2124_v4 }
 0x3bf   :  { %8411 = vmatprep.subr.bf16.mxu1 %v12232_v24  ;;  %v1988_v14 = vld [vmem:[#allocation8 + $0x11b0] sm:$0xff] }
 0x3c0   :  { %v2112_v24 = vld [vmem:[#allocation8 + $0x1590] sm:$0xff]  ;;  %v12320_v35 = vcombine.high %v1984_v10, %v1988_v14  ;;  %v12319_v46 = vcombine.low %v1984_v10, %v1988_v14 }
 0x3c1   :  { %8371 = vmatpush2.bf16.msra.mxu0 %v12103_v28  ;;  %v2116_v26 = vld [vmem:[#allocation8 + $0x15b0] sm:$0xff] }
 0x3c2   :  { %8412 = vmatpush2.bf16.msra.mxu1 %v12231_v29  ;;  %8372 = vmatprep.subr.bf16.mxu0 %v12096_v30  ;;  %v1976_v31 = vld [vmem:[#allocation8 + $0x1150] sm:$0xff]  ;;  %v12448_v30 = vcombine.high %v2112_v24, %v2116_v26 }
 0x3c3   :  { %8413 = vmatprep.subr.bf16.mxu1 %v12224_v53  ;;  %v1980_v28 = vld [vmem:[#allocation8 + $0x1170] sm:$0xff] }
 0x3c4   :  { %v2104_v53 = vld [vmem:[#allocation8 + $0x1550] sm:$0xff]  ;;  %v12311_v63 = vcombine.low %v1976_v31, %v1980_v28 }
 0x3c5   :  { %8373 = vmatpush2.bf16.msra.mxu0 %v12095_v39  ;;  %v2108_v37 = vld [vmem:[#allocation8 + $0x1570] sm:$0xff] }
 0x3c6   :  { %8414 = vmatpush2.bf16.msra.mxu1 %v12223_v56  ;;  %8374 = vmatprep.subr.bf16.mxu0 %v12088_v41  ;;  %v12447_v56 = vcombine.low %v2112_v24, %v2116_v26  ;;  %v12312_v41 = vcombine.high %v1976_v31, %v1980_v28  ;;  %v1968_v50 = vld [vmem:[#allocation8 + $0x1110] sm:$0xff]  ;;  %v12439_v4 = vcombine.low %v2104_v53, %v2108_v37 }
 0x3c7   :  { %8415 = vmatprep.subr.bf16.mxu1 %v12216_v42  ;;  %v1972_v51 = vld [vmem:[#allocation8 + $0x1130] sm:$0xff] }
 0x3c8   :  { %v2088_v10 = vld [vmem:[#allocation8 + $0x14d0] sm:$0xff] }
 0x3c9   :  { %8375 = vmatpush2.bf16.msra.mxu0 %v12087_v54  ;;  %v2092_v14 = vld [vmem:[#allocation8 + $0x14f0] sm:$0xff] }
 0x3ca   :  { %8416 = vmatpush2.bf16.msra.mxu1 %v12215_v57  ;;  %8376 = vmatprep.subr.bf16.mxu0 %v12080_v58  ;;  %v2096_v57 = vld [vmem:[#allocation8 + $0x1510] sm:$0xff] }
 0x3cb   :  { %8417 = vmatprep.subr.bf16.mxu1 %v12208_v15  ;;  %v2100_v58 = vld [vmem:[#allocation8 + $0x1530] sm:$0xff] }
 0x3cc   :  { %v12431_v24 = vcombine.low %v2096_v57, %v2100_v58  ;;  %v1956_v31 = vld [vmem:[#allocation8 + $0x10b0] sm:$0xff] }
 0x3cd   :  { %8377 = vmatpush2.bf16.msra.mxu0 %v12079_v5  ;;  %v12304_v5 = vcombine.high %v1968_v50, %v1972_v51  ;;  %v2080_v28 = vld [vmem:[#allocation8 + $0x1490] sm:$0xff] }
 0x3ce   :  { %8418 = vmatpush2.bf16.msra.mxu1 %v12207_v6  ;;  %8428 = vmatprep.subr.bf16.mxu0 %v12328_v7  ;;  %v12432_v6 = vcombine.high %v2096_v57, %v2100_v58  ;;  %v1960_v7 = vld [vmem:[#allocation8 + $0x10d0] sm:$0xff] }
 0x3cf   :  { %8469 = vmatprep.subr.bf16.mxu1 %v12456_v16  ;;  %v1964_v16 = vld [vmem:[#allocation8 + $0x10f0] sm:$0xff] }
 0x3d0   :  { %v8134_v29 = vpop.f32.mrf.mxu0  ;;  %8379 = vmatmul.mubr.bf16.vlgmr.msra.gmra.mxu0 %v14259_v2  ;;  %v12296_v26 = vcombine.high %v1960_v7, %v1964_v16  ;;  %v2068_v57 = vld [vmem:[#allocation8 + $0x1430] sm:$0xff] }
 0x3d1   :  { %v8135_v38 = vadd.f32 %v8134_v29, %v14365_v55  ;;  %v8175_v11 = vpop.f32.mrf.mxu1  ;;  %8420 = vmatmul.mubr.bf16.vlgmr.msra.gmra.mxu1 %v14257_v62  ;;  %8429 = vmatpush1.bf16.msra.mxu0 %v12327_v23  ;;  %v12440_v55 = vcombine.high %v2104_v53, %v2108_v37  ;;  %v12303_v23 = vcombine.low %v1968_v50, %v1972_v51  ;;  %v2084_v29 = vld [vmem:[#allocation8 + $0x14b0] sm:$0xff] }
 0x3d2   :  { %8460 = vmatprep.mubr.bf16.mxu0 %v14261_v8  ;;  %8470 = vmatpush1.bf16.msra.mxu1 %v12455_v9  ;;  %v8136_v39 = vpop.f32.mrf.mxu0  ;;  %v12424_v9 = vcombine.high %v2088_v10, %v2092_v14  ;;  %v12423_v53 = vcombine.low %v2088_v10, %v2092_v14  ;;  %v1936_v50 = vld [vmem:[#allocation8 + $0x1010] sm:$0xff] }
 0x3d3   :  { %v14375_v42 = vadd.f32 %v8175_v11, %v8135_v38  ;;  %8501 = vmatprep.mubr.bf16.mxu1 %v14264_v13  ;;  %v8137_v32 = vadd.f32 %v8136_v39, %v14369_v27  ;;  %v8177_v49 = vpop.f32.mrf.mxu1  ;;  %8430 = vmatprep.subr.bf16.mxu0 %v12320_v35  ;;  %v1952_v35 = vld [vmem:[#allocation8 + $0x1090] sm:$0xff]  ;;  %v12416_v38 = vcombine.high %v2080_v28, %v2084_v29 }
 0x3d4   :  { %v8138_v54 = vpop.f32.mrf.mxu0  ;;  %8471 = vmatprep.subr.bf16.mxu1 %v12448_v30  ;;  %v12295_v30 = vcombine.low %v1960_v7, %v1964_v16  ;;  %v12288_v37 = vcombine.high %v1952_v35, %v1956_v31  ;;  %v1944_v11 = vld [vmem:[#allocation8 + $0x1050] sm:$0xff] }
 0x3d5   :  { %v14379_v15 = vadd.f32 %v8177_v49, %v8137_v32  ;;  %v8179_v60 = vpop.f32.mrf.mxu1  ;;  %8431 = vmatpush1.bf16.msra.mxu0 %v12319_v46  ;;  %v1948_v46 = vld [vmem:[#allocation8 + $0x1070] sm:$0xff]  ;;  %v12415_v32 = vcombine.low %v2080_v28, %v2084_v29 }
 0x3d6   :  { %8472 = vmatpush1.bf16.msra.mxu1 %v12447_v56  ;;  %v8139_v17 = vpop.f32.mrf.mxu0  ;;  %8432 = vmatprep.subr.bf16.mxu0 %v12312_v41  ;;  %v2072_v39 = vld [vmem:[#allocation8 + $0x1450] sm:$0xff]  ;;  %v12287_v41 = vcombine.low %v1952_v35, %v1956_v31  ;;  %v12280_v49 = vcombine.high %v1944_v11, %v1948_v46  ;;  %v12279_v58 = vcombine.low %v1944_v11, %v1948_v46 }
 0x3d7   :  { %v8180_v27 = vpop.f32.mrf.mxu1  ;;  %8473 = vmatprep.subr.bf16.mxu1 %v12440_v55  ;;  %v2076_v56 = vld [vmem:[#allocation8 + $0x1470] sm:$0xff] }
 0x3d8   :  { %v12408_v55 = vcombine.high %v2072_v39, %v2076_v56  ;;  %v1940_v51 = vld [vmem:[#allocation8 + $0x1030] sm:$0xff]  ;;  %v12407_v60 = vcombine.low %v2072_v39, %v2076_v56 }
 0x3d9   :  { %8433 = vmatpush1.bf16.msra.mxu0 %v12311_v63  ;;  %v2064_v54 = vld [vmem:[#allocation8 + $0x1410] sm:$0xff]  ;;  %v12272_v63 = vcombine.high %v1936_v50, %v1940_v51  ;;  %v12271_v7 = vcombine.low %v1936_v50, %v1940_v51 }
 0x3da   :  { %8474 = vmatpush1.bf16.msra.mxu1 %v12439_v4  ;;  %8434 = vmatprep.subr.bf16.mxu0 %v12304_v5  ;;  %v12400_v17 = vcombine.high %v2064_v54, %v2068_v57  ;;  %v2056_v4 = vld [vmem:[#allocation8 + $0x13d0] sm:$0xff]  ;;  %v12399_v16 = vcombine.low %v2064_v54, %v2068_v57 }
 0x3db   :  { %8475 = vmatprep.subr.bf16.mxu1 %v12432_v6  ;;  %v2060_v5 = vld [vmem:[#allocation8 + $0x13f0] sm:$0xff] }
 0x3dc   :  { %v2184_v27 = vld [vmem:[#allocation8 + $0x17d0] sm:$0xff]  ;;  %v12392_v10 = vcombine.high %v2056_v4, %v2060_v5  ;;  %v12391_v35 = vcombine.low %v2056_v4, %v2060_v5 }
 0x3dd   :  { %8435 = vmatpush1.bf16.msra.mxu0 %v12303_v23  ;;  %v2188_v6 = vld [vmem:[#allocation8 + $0x17f0] sm:$0xff] }
 0x3de   :  { %8476 = vmatpush1.bf16.msra.mxu1 %v12431_v24  ;;  %8436 = vmatprep.subr.bf16.mxu0 %v12296_v26  ;;  %v12520_v14 = vcombine.high %v2184_v27, %v2188_v6  ;;  %v2048_v23 = vld [vmem:[#allocation8 + $0x1390] sm:$0xff]  ;;  %v12519_v31 = vcombine.low %v2184_v27, %v2188_v6 }
 0x3df   :  { %8477 = vmatprep.subr.bf16.mxu1 %v12424_v9  ;;  %v2052_v24 = vld [vmem:[#allocation8 + $0x13b0] sm:$0xff] }
 0x3e0   :  { %v2176_v26 = vld [vmem:[#allocation8 + $0x1790] sm:$0xff]  ;;  %v12384_v28 = vcombine.high %v2048_v23, %v2052_v24  ;;  %v12383_v11 = vcombine.low %v2048_v23, %v2052_v24 }
 0x3e1   :  { %8437 = vmatpush1.bf16.msra.mxu0 %v12295_v30  ;;  %v2180_v9 = vld [vmem:[#allocation8 + $0x17b0] sm:$0xff] }
 0x3e2   :  { %8478 = vmatpush1.bf16.msra.mxu1 %v12423_v53  ;;  %8438 = vmatprep.subr.bf16.mxu0 %v12288_v37  ;;  %v12512_v29 = vcombine.high %v2176_v26, %v2180_v9  ;;  %v2040_v30 = vld [vmem:[#allocation8 + $0x1350] sm:$0xff]  ;;  %v12511_v46 = vcombine.low %v2176_v26, %v2180_v9 }
 0x3e3   :  { %8479 = vmatprep.subr.bf16.mxu1 %v12416_v38  ;;  %v2044_v53 = vld [vmem:[#allocation8 + $0x1370] sm:$0xff] }
 0x3e4   :  { %v2168_v37 = vld [vmem:[#allocation8 + $0x1750] sm:$0xff]  ;;  %v12376_v39 = vcombine.high %v2040_v30, %v2044_v53  ;;  %v12375_v50 = vcombine.low %v2040_v30, %v2044_v53 }
 0x3e5   :  { %8439 = vmatpush1.bf16.msra.mxu0 %v12287_v41  ;;  %v2172_v38 = vld [vmem:[#allocation8 + $0x1770] sm:$0xff] }
 0x3e6   :  { %8480 = vmatpush1.bf16.msra.mxu1 %v12415_v32  ;;  %8440 = vmatprep.subr.bf16.mxu0 %v12280_v49  ;;  %v12504_v56 = vcombine.high %v2168_v37, %v2172_v38  ;;  %v2032_v41 = vld [vmem:[#allocation8 + $0x1310] sm:$0xff]  ;;  %v12503_v51 = vcombine.low %v2168_v37, %v2172_v38 }
 0x3e7   :  { %8481 = vmatprep.subr.bf16.mxu1 %v12408_v55  ;;  %v2036_v32 = vld [vmem:[#allocation8 + $0x1330] sm:$0xff] }
 0x3e8   :  { %v2160_v49 = vld [vmem:[#allocation8 + $0x1710] sm:$0xff]  ;;  %v12368_v54 = vcombine.high %v2032_v41, %v2036_v32  ;;  %v12367_v4 = vcombine.low %v2032_v41, %v2036_v32 }
 0x3e9   :  { %8441 = vmatpush1.bf16.msra.mxu0 %v12279_v58  ;;  %v2164_v55 = vld [vmem:[#allocation8 + $0x1730] sm:$0xff] }
 0x3ea   :  { %8482 = vmatpush1.bf16.msra.mxu1 %v12407_v60  ;;  %8442 = vmatprep.subr.bf16.mxu0 %v12272_v63  ;;  %v12496_v57 = vcombine.high %v2160_v49, %v2164_v55  ;;  %v2024_v58 = vld [vmem:[#allocation8 + $0x12d0] sm:$0xff]  ;;  %v12495_v5 = vcombine.low %v2160_v49, %v2164_v55 }
 0x3eb   :  { %8483 = vmatprep.subr.bf16.mxu1 %v12400_v17  ;;  %v2028_v60 = vld [vmem:[#allocation8 + $0x12f0] sm:$0xff] }
 0x3ec   :  { %v2152_v63 = vld [vmem:[#allocation8 + $0x16d0] sm:$0xff]  ;;  %v12360_v27 = vcombine.high %v2024_v58, %v2028_v60  ;;  %v12359_v23 = vcombine.low %v2024_v58, %v2028_v60 }
 0x3ed   :  { %8443 = vmatpush1.bf16.msra.mxu0 %v12271_v7  ;;  %v2156_v17 = vld [vmem:[#allocation8 + $0x16f0] sm:$0xff] }
 0x3ee   :  { %8484 = vmatpush1.bf16.msra.mxu1 %v12399_v16  ;;  %8444 = vmatprep.subr.bf16.mxu0 %v12392_v10  ;;  %v12488_v6 = vcombine.high %v2152_v63, %v2156_v17  ;;  %v2016_v7 = vld [vmem:[#allocation8 + $0x1290] sm:$0xff]  ;;  %v12487_v24 = vcombine.low %v2152_v63, %v2156_v17 }
 0x3ef   :  { %8485 = vmatprep.subr.bf16.mxu1 %v12520_v14  ;;  %v2020_v16 = vld [vmem:[#allocation8 + $0x12b0] sm:$0xff] }
 0x3f0   :  { %v2144_v10 = vld [vmem:[#allocation8 + $0x1690] sm:$0xff]  ;;  %v12352_v26 = vcombine.high %v2016_v7, %v2020_v16  ;;  %v12351_v30 = vcombine.low %v2016_v7, %v2020_v16 }
 0x3f1   :  { %8445 = vmatpush2.bf16.msra.mxu0 %v12391_v35  ;;  %v2148_v14 = vld [vmem:[#allocation8 + $0x16b0] sm:$0xff] }
 0x3f2   :  { %8486 = vmatpush2.bf16.msra.mxu1 %v12519_v31  ;;  %8446 = vmatprep.subr.bf16.mxu0 %v12384_v28  ;;  %v12480_v9 = vcombine.high %v2144_v10, %v2148_v14  ;;  %v2008_v35 = vld [vmem:[#allocation8 + $0x1250] sm:$0xff]  ;;  %v12479_v53 = vcombine.low %v2144_v10, %v2148_v14 }
 0x3f3   :  { %8487 = vmatprep.subr.bf16.mxu1 %v12512_v29  ;;  %v2012_v31 = vld [vmem:[#allocation8 + $0x1270] sm:$0xff] }
 0x3f4   :  { %v2136_v28 = vld [vmem:[#allocation8 + $0x1650] sm:$0xff]  ;;  %v12344_v37 = vcombine.high %v2008_v35, %v2012_v31  ;;  %v12343_v41 = vcombine.low %v2008_v35, %v2012_v31 }
 0x3f5   :  { %8447 = vmatpush2.bf16.msra.mxu0 %v12383_v11  ;;  %v2140_v29 = vld [vmem:[#allocation8 + $0x1670] sm:$0xff] }
 0x3f6   :  { %8488 = vmatpush2.bf16.msra.mxu1 %v12511_v46  ;;  %8448 = vmatprep.subr.bf16.mxu0 %v12376_v39  ;;  %v12472_v38 = vcombine.high %v2136_v28, %v2140_v29  ;;  %v2000_v11 = vld [vmem:[#allocation8 + $0x1210] sm:$0xff]  ;;  %v12471_v32 = vcombine.low %v2136_v28, %v2140_v29 }
 0x3f7   :  { %8489 = vmatprep.subr.bf16.mxu1 %v12504_v56  ;;  %v2004_v46 = vld [vmem:[#allocation8 + $0x1230] sm:$0xff] }
 0x3f8   :  { %v2128_v39 = vld [vmem:[#allocation8 + $0x1610] sm:$0xff]  ;;  %v12336_v49 = vcombine.high %v2000_v11, %v2004_v46  ;;  %v12335_v58 = vcombine.low %v2000_v11, %v2004_v46 }
 0x3f9   :  { %8449 = vmatpush2.bf16.msra.mxu0 %v12375_v50  ;;  %v2132_v56 = vld [vmem:[#allocation8 + $0x1630] sm:$0xff] }
 0x3fa   :  { %8490 = vmatpush2.bf16.msra.mxu1 %v12503_v51  ;;  %8450 = vmatprep.subr.bf16.mxu0 %v12368_v54  ;;  %v12464_v55 = vcombine.high %v2128_v39, %v2132_v56  ;;  %v2248_v50 = vld [vmem:[#allocation8 + $0x19d0] sm:$0xff]  ;;  %v12463_v60 = vcombine.low %v2128_v39, %v2132_v56 }
 0x3fb   :  { %8491 = vmatprep.subr.bf16.mxu1 %v12496_v57  ;;  %v2252_v51 = vld [vmem:[#allocation8 + $0x19f0] sm:$0xff] }
 0x3fc   :  { %v2376_v54 = vld [vmem:[#allocation8 + $0x1dd0] sm:$0xff]  ;;  %v12584_v63 = vcombine.high %v2248_v50, %v2252_v51 }
 0x3fd   :  { %8451 = vmatpush2.bf16.msra.mxu0 %v12367_v4  ;;  %v2380_v57 = vld [vmem:[#allocation8 + $0x1df0] sm:$0xff] }
 0x3fe   :  { %8492 = vmatpush2.bf16.msra.mxu1 %v12495_v5  ;;  %8452 = vmatprep.subr.bf16.mxu0 %v12360_v27  ;;  %v12712_v17 = vcombine.high %v2376_v54, %v2380_v57  ;;  %v2240_v4 = vld [vmem:[#allocation8 + $0x1990] sm:$0xff]  ;;  %v12583_v27 = vcombine.low %v2248_v50, %v2252_v51  ;;  %v12711_v16 = vcombine.low %v2376_v54, %v2380_v57 }
 0x3ff   :  { %8493 = vmatprep.subr.bf16.mxu1 %v12488_v6  ;;  %v2244_v5 = vld [vmem:[#allocation8 + $0x19b0] sm:$0xff] }
 0x400   :  { %v2368_v6 = vld [vmem:[#allocation8 + $0x1d90] sm:$0xff]  ;;  %v12576_v10 = vcombine.high %v2240_v4, %v2244_v5  ;;  %v12575_v29 = vcombine.low %v2240_v4, %v2244_v5 }
 0x401   :  { %8453 = vmatpush2.bf16.msra.mxu0 %v12359_v23  ;;  %v2372_v7 = vld [vmem:[#allocation8 + $0x1db0] sm:$0xff] }
 0x402   :  { %8494 = vmatpush2.bf16.msra.mxu1 %v12487_v24  ;;  %8454 = vmatprep.subr.bf16.mxu0 %v12352_v26  ;;  %v2232_v14 = vld [vmem:[#allocation8 + $0x1950] sm:$0xff]  ;;  %v12704_v26 = vcombine.high %v2368_v6, %v2372_v7 }
 0x403   :  { %8495 = vmatprep.subr.bf16.mxu1 %v12480_v9  ;;  %v2236_v23 = vld [vmem:[#allocation8 + $0x1970] sm:$0xff] }
 0x404   :  { %v2360_v9 = vld [vmem:[#allocation8 + $0x1d50] sm:$0xff]  ;;  %v12567_v51 = vcombine.low %v2232_v14, %v2236_v23 }
 0x405   :  { %8455 = vmatpush2.bf16.msra.mxu0 %v12351_v30  ;;  %v2364_v35 = vld [vmem:[#allocation8 + $0x1d70] sm:$0xff] }
 0x406   :  { %8496 = vmatpush2.bf16.msra.mxu1 %v12479_v53  ;;  %8456 = vmatprep.subr.bf16.mxu0 %v12344_v37  ;;  %v12703_v53 = vcombine.low %v2368_v6, %v2372_v7  ;;  %v12568_v37 = vcombine.high %v2232_v14, %v2236_v23  ;;  %v2224_v39 = vld [vmem:[#allocation8 + $0x1910] sm:$0xff]  ;;  %v12695_v57 = vcombine.low %v2360_v9, %v2364_v35 }
 0x407   :  { %8497 = vmatprep.subr.bf16.mxu1 %v12472_v38  ;;  %v2228_v56 = vld [vmem:[#allocation8 + $0x1930] sm:$0xff] }
 0x408   :  { %v2344_v4 = vld [vmem:[#allocation8 + $0x1cd0] sm:$0xff] }
 0x409   :  { %8457 = vmatpush2.bf16.msra.mxu0 %v12343_v41  ;;  %v2348_v5 = vld [vmem:[#allocation8 + $0x1cf0] sm:$0xff] }
 0x40a   :  { %8498 = vmatpush2.bf16.msra.mxu1 %v12471_v32  ;;  %8458 = vmatprep.subr.bf16.mxu0 %v12336_v49  ;;  %v2352_v32 = vld [vmem:[#allocation8 + $0x1d10] sm:$0xff] }
 0x40b   :  { %8499 = vmatprep.subr.bf16.mxu1 %v12464_v55  ;;  %v2356_v49 = vld [vmem:[#allocation8 + $0x1d30] sm:$0xff] }
 0x40c   :  { %v12687_v6 = vcombine.low %v2352_v32, %v2356_v49  ;;  %v2212_v14 = vld [vmem:[#allocation8 + $0x18b0] sm:$0xff] }
 0x40d   :  { %8459 = vmatpush2.bf16.msra.mxu0 %v12335_v58  ;;  %v12560_v58 = vcombine.high %v2224_v39, %v2228_v56  ;;  %v2336_v23 = vld [vmem:[#allocation8 + $0x1c90] sm:$0xff] }
 0x40e   :  { %8500 = vmatpush2.bf16.msra.mxu1 %v12463_v60  ;;  %8510 = vmatprep.subr.bf16.mxu0 %v12584_v63  ;;  %v12688_v60 = vcombine.high %v2352_v32, %v2356_v49  ;;  %v2216_v63 = vld [vmem:[#allocation8 + $0x18d0] sm:$0xff] }
 0x40f   :  { %8551 = vmatprep.subr.bf16.mxu1 %v12712_v17  ;;  %v2220_v17 = vld [vmem:[#allocation8 + $0x18f0] sm:$0xff] }
 0x410   :  { %v8216_v24 = vpop.f32.mrf.mxu0  ;;  %8461 = vmatmul.mubr.bf16.vlgmr.msra.gmra.mxu0 %v14293_v40  ;;  %v12552_v7 = vcombine.high %v2216_v63, %v2220_v17  ;;  %v2324_v32 = vld [vmem:[#allocation8 + $0x1c30] sm:$0xff] }
 0x411   :  { %v8217_v31 = vadd.f32 %v8216_v24, %v14375_v42  ;;  %v8257_v28 = vpop.f32.mrf.mxu1  ;;  %8502 = vmatmul.mubr.bf16.vlgmr.msra.gmra.mxu1 %v14295_v43  ;;  %8511 = vmatpush1.bf16.msra.mxu0 %v12583_v27  ;;  %v12696_v42 = vcombine.high %v2360_v9, %v2364_v35  ;;  %v12559_v27 = vcombine.low %v2224_v39, %v2228_v56  ;;  %v2340_v24 = vld [vmem:[#allocation8 + $0x1cb0] sm:$0xff] }
 0x412   :  { %8542 = vmatprep.mubr.bf16.mxu0 %v14297_v0  ;;  %8552 = vmatpush1.bf16.msra.mxu1 %v12711_v16  ;;  %v8218_v30 = vpop.f32.mrf.mxu0  ;;  %v12680_v16 = vcombine.high %v2344_v4, %v2348_v5  ;;  %v12679_v9 = vcombine.low %v2344_v4, %v2348_v5  ;;  %v2192_v39 = vld [vmem:[#allocation8 + $0x1810] sm:$0xff] }
 0x413   :  { %v14385_v38 = vadd.f32 %v8257_v28, %v8217_v31  ;;  %8583 = vmatprep.mubr.bf16.mxu1 %v14299_v52  ;;  %v8219_v11 = vadd.f32 %v8218_v30, %v14379_v15  ;;  %v8259_v46 = vpop.f32.mrf.mxu1  ;;  %8512 = vmatprep.subr.bf16.mxu0 %v12576_v10  ;;  %v2208_v10 = vld [vmem:[#allocation8 + $0x1890] sm:$0xff]  ;;  %v12672_v31 = vcombine.high %v2336_v23, %v2340_v24 }
 0x414   :  { %v8220_v41 = vpop.f32.mrf.mxu0  ;;  %8553 = vmatprep.subr.bf16.mxu1 %v12704_v26  ;;  %v12551_v26 = vcombine.low %v2216_v63, %v2220_v17  ;;  %v12544_v35 = vcombine.high %v2208_v10, %v2212_v14  ;;  %v2200_v28 = vld [vmem:[#allocation8 + $0x1850] sm:$0xff] }
 0x415   :  { %v14389_v55 = vadd.f32 %v8259_v46, %v8219_v11  ;;  %v8261_v50 = vpop.f32.mrf.mxu1  ;;  %8513 = vmatpush1.bf16.msra.mxu0 %v12575_v29  ;;  %v2204_v29 = vld [vmem:[#allocation8 + $0x1870] sm:$0xff]  ;;  %v12671_v11 = vcombine.low %v2336_v23, %v2340_v24 }
 0x416   :  { %8554 = vmatpush1.bf16.msra.mxu1 %v12703_v53  ;;  %v8221_v54 = vpop.f32.mrf.mxu0  ;;  %8514 = vmatprep.subr.bf16.mxu0 %v12568_v37  ;;  %v2328_v30 = vld [vmem:[#allocation8 + $0x1c50] sm:$0xff]  ;;  %v12543_v37 = vcombine.low %v2208_v10, %v2212_v14  ;;  %v12536_v46 = vcombine.high %v2200_v28, %v2204_v29  ;;  %v12535_v49 = vcombine.low %v2200_v28, %v2204_v29 }
 0x417   :  { %v8262_v15 = vpop.f32.mrf.mxu1  ;;  %8555 = vmatprep.subr.bf16.mxu1 %v12696_v42  ;;  %v2332_v53 = vld [vmem:[#allocation8 + $0x1c70] sm:$0xff] }
 0x418   :  { %v12664_v42 = vcombine.high %v2328_v30, %v2332_v53  ;;  %v2196_v56 = vld [vmem:[#allocation8 + $0x1830] sm:$0xff]  ;;  %v12663_v50 = vcombine.low %v2328_v30, %v2332_v53 }
 0x419   :  { %8515 = vmatpush1.bf16.msra.mxu0 %v12567_v51  ;;  %v2320_v41 = vld [vmem:[#allocation8 + $0x1c10] sm:$0xff]  ;;  %v12528_v51 = vcombine.high %v2192_v39, %v2196_v56  ;;  %v12527_v63 = vcombine.low %v2192_v39, %v2196_v56 }
 0x41a   :  { %8556 = vmatpush1.bf16.msra.mxu1 %v12695_v57  ;;  %8516 = vmatprep.subr.bf16.mxu0 %v12560_v58  ;;  %v12656_v54 = vcombine.high %v2320_v41, %v2324_v32  ;;  %v2312_v57 = vld [vmem:[#allocation8 + $0x1bd0] sm:$0xff]  ;;  %v12655_v17 = vcombine.low %v2320_v41, %v2324_v32 }
 0x41b   :  { %8557 = vmatprep.subr.bf16.mxu1 %v12688_v60  ;;  %v2316_v58 = vld [vmem:[#allocation8 + $0x1bf0] sm:$0xff] }
 0x41c   :  { %v2440_v15 = vld [vmem:[#allocation8 + $0x1fd0] sm:$0xff]  ;;  %v12648_v4 = vcombine.high %v2312_v57, %v2316_v58  ;;  %v12647_v10 = vcombine.low %v2312_v57, %v2316_v58 }
 0x41d   :  { %8517 = vmatpush1.bf16.msra.mxu0 %v12559_v27  ;;  %v2444_v60 = vld [vmem:[#allocation8 + $0x1ff0] sm:$0xff] }
 0x41e   :  { %8558 = vmatpush1.bf16.msra.mxu1 %v12687_v6  ;;  %8518 = vmatprep.subr.bf16.mxu0 %v12552_v7  ;;  %v12776_v5 = vcombine.high %v2440_v15, %v2444_v60  ;;  %v2304_v27 = vld [vmem:[#allocation8 + $0x1b90] sm:$0xff]  ;;  %v12775_v14 = vcombine.low %v2440_v15, %v2444_v60 }
 0x41f   :  { %8559 = vmatprep.subr.bf16.mxu1 %v12680_v16  ;;  %v2308_v6 = vld [vmem:[#allocation8 + $0x1bb0] sm:$0xff] }
 0x420   :  { %v2432_v7 = vld [vmem:[#allocation8 + $0x1f90] sm:$0xff]  ;;  %v12640_v23 = vcombine.high %v2304_v27, %v2308_v6  ;;  %v12639_v28 = vcombine.low %v2304_v27, %v2308_v6 }
 0x421   :  { %8519 = vmatpush1.bf16.msra.mxu0 %v12551_v26  ;;  %v2436_v16 = vld [vmem:[#allocation8 + $0x1fb0] sm:$0xff] }
 0x422   :  { %8560 = vmatpush1.bf16.msra.mxu1 %v12679_v9  ;;  %8520 = vmatprep.subr.bf16.mxu0 %v12544_v35  ;;  %v12768_v24 = vcombine.high %v2432_v7, %v2436_v16  ;;  %v2296_v26 = vld [vmem:[#allocation8 + $0x1b50] sm:$0xff]  ;;  %v12767_v29 = vcombine.low %v2432_v7, %v2436_v16 }
 0x423   :  { %8561 = vmatprep.subr.bf16.mxu1 %v12672_v31  ;;  %v2300_v9 = vld [vmem:[#allocation8 + $0x1b70] sm:$0xff] }
 0x424   :  { %v2424_v35 = vld [vmem:[#allocation8 + $0x1f50] sm:$0xff]  ;;  %v12632_v30 = vcombine.high %v2296_v26, %v2300_v9  ;;  %v12631_v39 = vcombine.low %v2296_v26, %v2300_v9 }
 0x425   :  { %8521 = vmatpush1.bf16.msra.mxu0 %v12543_v37  ;;  %v2428_v31 = vld [vmem:[#allocation8 + $0x1f70] sm:$0xff] }
 0x426   :  { %8562 = vmatpush1.bf16.msra.mxu1 %v12671_v11  ;;  %8522 = vmatprep.subr.bf16.mxu0 %v12536_v46  ;;  %v12760_v53 = vcombine.high %v2424_v35, %v2428_v31  ;;  %v2288_v37 = vld [vmem:[#allocation8 + $0x1b10] sm:$0xff]  ;;  %v12759_v56 = vcombine.low %v2424_v35, %v2428_v31 }
 0x427   :  { %8563 = vmatprep.subr.bf16.mxu1 %v12664_v42  ;;  %v2292_v11 = vld [vmem:[#allocation8 + $0x1b30] sm:$0xff] }
 0x428   :  { %v2416_v46 = vld [vmem:[#allocation8 + $0x1f10] sm:$0xff]  ;;  %v12624_v41 = vcombine.high %v2288_v37, %v2292_v11  ;;  %v12623_v57 = vcombine.low %v2288_v37, %v2292_v11 }
 0x429   :  { %8523 = vmatpush1.bf16.msra.mxu0 %v12535_v49  ;;  %v2420_v42 = vld [vmem:[#allocation8 + $0x1f30] sm:$0xff] }
 0x42a   :  { %8564 = vmatpush1.bf16.msra.mxu1 %v12663_v50  ;;  %8524 = vmatprep.subr.bf16.mxu0 %v12528_v51  ;;  %v12752_v32 = vcombine.high %v2416_v46, %v2420_v42  ;;  %v2280_v49 = vld [vmem:[#allocation8 + $0x1ad0] sm:$0xff]  ;;  %v12751_v58 = vcombine.low %v2416_v46, %v2420_v42 }
 0x42b   :  { %8565 = vmatprep.subr.bf16.mxu1 %v12656_v54  ;;  %v2284_v50 = vld [vmem:[#allocation8 + $0x1af0] sm:$0xff] }
 0x42c   :  { %v2408_v51 = vld [vmem:[#allocation8 + $0x1ed0] sm:$0xff]  ;;  %v12616_v15 = vcombine.high %v2280_v49, %v2284_v50  ;;  %v12615_v27 = vcombine.low %v2280_v49, %v2284_v50 }
 0x42d   :  { %8525 = vmatpush1.bf16.msra.mxu0 %v12527_v63  ;;  %v2412_v54 = vld [vmem:[#allocation8 + $0x1ef0] sm:$0xff] }
 0x42e   :  { %8566 = vmatpush1.bf16.msra.mxu1 %v12655_v17  ;;  %8526 = vmatprep.subr.bf16.mxu0 %v12648_v4  ;;  %v12744_v60 = vcombine.high %v2408_v51, %v2412_v54  ;;  %v2272_v63 = vld [vmem:[#allocation8 + $0x1a90] sm:$0xff]  ;;  %v12743_v6 = vcombine.low %v2408_v51, %v2412_v54 }
 0x42f   :  { %8567 = vmatprep.subr.bf16.mxu1 %v12776_v5  ;;  %v2276_v17 = vld [vmem:[#allocation8 + $0x1ab0] sm:$0xff] }
 0x430   :  { %v2400_v4 = vld [vmem:[#allocation8 + $0x1e90] sm:$0xff]  ;;  %v12608_v7 = vcombine.high %v2272_v63, %v2276_v17  ;;  %v12607_v26 = vcombine.low %v2272_v63, %v2276_v17  ;;  %v1601_v17 = vld [vmem:[#allocation8 + $0x598] sm:$0xff] }
 0x431   :  { %8527 = vmatpush2.bf16.msra.mxu0 %v12647_v10  ;;  %v2404_v5 = vld [vmem:[#allocation8 + $0x1eb0] sm:$0xff] }
 0x432   :  { %8568 = vmatpush2.bf16.msra.mxu1 %v12775_v14  ;;  %8528 = vmatprep.subr.bf16.mxu0 %v12640_v23  ;;  %v12736_v16 = vcombine.high %v2400_v4, %v2404_v5  ;;  %v2264_v10 = vld [vmem:[#allocation8 + $0x1a50] sm:$0xff]  ;;  %v12735_v9 = vcombine.low %v2400_v4, %v2404_v5  ;;  %v1605_v4 = vld [vmem:[#allocation8 + $0x5b8] sm:$0xff] }
 0x433   :  { %8569 = vmatprep.subr.bf16.mxu1 %v12768_v24  ;;  %v2268_v14 = vld [vmem:[#allocation8 + $0x1a70] sm:$0xff] }
 0x434   :  { %v2392_v23 = vld [vmem:[#allocation8 + $0x1e50] sm:$0xff]  ;;  %v12600_v35 = vcombine.high %v2264_v10, %v2268_v14  ;;  %v12599_v37 = vcombine.low %v2264_v10, %v2268_v14  ;;  %v11938_v14 = vcombine.high %v1601_v17, %v1605_v4 }
 0x435   :  { %8529 = vmatpush2.bf16.msra.mxu0 %v12639_v28  ;;  %v2396_v24 = vld [vmem:[#allocation8 + $0x1e70] sm:$0xff] }
 0x436   :  { %8570 = vmatpush2.bf16.msra.mxu1 %v12767_v29  ;;  %8530 = vmatprep.subr.bf16.mxu0 %v12632_v30  ;;  %v12728_v31 = vcombine.high %v2392_v23, %v2396_v24  ;;  %v2256_v28 = vld [vmem:[#allocation8 + $0x1a10] sm:$0xff]  ;;  %v12727_v11 = vcombine.low %v2392_v23, %v2396_v24  ;;  %v1593_v23 = vld [vmem:[#allocation8 + $0x558] sm:$0xff] }
 0x437   :  { %8571 = vmatprep.subr.bf16.mxu1 %v12760_v53  ;;  %v2260_v29 = vld [vmem:[#allocation8 + $0x1a30] sm:$0xff]  ;;  %v1597_v24 = vld [vmem:[#allocation8 + $0x578] sm:$0xff] }
 0x438   :  { %v2384_v30 = vld [vmem:[#allocation8 + $0x1e10] sm:$0xff]  ;;  %v12592_v46 = vcombine.high %v2256_v28, %v2260_v29  ;;  %v12591_v49 = vcombine.low %v2256_v28, %v2260_v29 }
 0x439   :  { %8531 = vmatpush2.bf16.msra.mxu0 %v12631_v39  ;;  %v2388_v53 = vld [vmem:[#allocation8 + $0x1e30] sm:$0xff]  ;;  %v1481_v39 = vld [vmem:[#allocation8 + $0x1d8] sm:$0xff] }
 0x43a   :  { %8572 = vmatpush2.bf16.msra.mxu1 %v12759_v56  ;;  %8532 = vmatprep.subr.bf16.mxu0 %v12624_v41  ;;  %v12720_v42 = vcombine.high %v2384_v30, %v2388_v53  ;;  %v1485_v56 = vld [vmem:[#allocation8 + $0x1f8] sm:$0xff]  ;;  %v12719_v50 = vcombine.low %v2384_v30, %v2388_v53  ;;  %v11930_v53 = vcombine.high %v1593_v23, %v1597_v24 }
 0x43b   :  { %8573 = vmatprep.subr.bf16.mxu1 %v12752_v32  ;;  %v1609_v41 = vld [vmem:[#allocation8 + $0x5d8] sm:$0xff]  ;;  %v11818_v51 = vcombine.high %v1481_v39, %v1485_v56  ;;  %v11817_v63 = vcombine.low %v1481_v39, %v1485_v56 }
 0x43c   :  { %v1613_v32 = vld [vmem:[#allocation8 + $0x5f8] sm:$0xff] }
 0x43d   :  { %8533 = vmatpush2.bf16.msra.mxu0 %v12623_v57  ;;  %v11946_v54 = vcombine.high %v1609_v41, %v1613_v32  ;;  %v1473_v57 = vld [vmem:[#allocation8 + $0x198] sm:$0xff]  ;;  %v11945_v5 = vcombine.low %v1609_v41, %v1613_v32 }
 0x43e   :  { %8574 = vmatpush2.bf16.msra.mxu1 %v12751_v58  ;;  %8534 = vmatprep.subr.bf16.mxu0 %v12616_v15  ;;  %v1477_v58 = vld [vmem:[#allocation8 + $0x1b8] sm:$0xff]  ;;  %v13711_v15 = vld [vmem:[#allocation10] sm:$0xff] }
 0x43f   :  { %8575 = vmatprep.subr.bf16.mxu1 %v12744_v60  ;;  %v2467_v60 = vrot.slane %v13711_v15, %v14239_v61  ;;  %v1589_v39 = vld [vmem:[#allocation8 + $0x538] sm:$0xff] }
 0x441   :  { %8535 = vmatpush2.bf16.msra.mxu0 %v12615_v27  ;;  %v2471_v27 = vrot.slane %v13711_v15, %v14216_v33  ;;  %v11937_v33 = vcombine.low %v1601_v17, %v1605_v4  ;;  %v1581_v15 = vld [vmem:[#allocation8 + $0x4f8] sm:$0xff] }
 0x442   :  { %8576 = vmatpush2.bf16.msra.mxu1 %v12743_v6  ;;  %8536 = vmatprep.subr.bf16.mxu0 %v12608_v7  ;;  %v11810_v6 = vcombine.high %v1473_v57, %v1477_v58  ;;  %v1465_v7 = vld [vmem:[#allocation8 + $0x158] sm:$0xff] }
 0x443   :  { %8577 = vmatprep.subr.bf16.mxu1 %v12736_v16  ;;  %v1469_v16 = vld [vmem:[#allocation8 + $0x178] sm:$0xff] }
 0x444   :  { %v11801_v41 = vcombine.low %v1465_v7, %v1469_v16 }
 0x445   :  { %8537 = vmatpush2.bf16.msra.mxu0 %v12607_v26 }
 0x446   :  { %8578 = vmatpush2.bf16.msra.mxu1 %v12735_v9  ;;  %8538 = vmatprep.subr.bf16.mxu0 %v12600_v35  ;;  %v11809_v9 = vcombine.low %v1473_v57, %v1477_v58  ;;  %v1453_v57 = vld [vmem:[#allocation8 + $0xf8] sm:$0xff] }
 0x447   :  { %8579 = vmatprep.subr.bf16.mxu1 %v12728_v31  ;;  %v11802_v31 = vcombine.high %v1465_v7, %v1469_v16  ;;  %v1577_v58 = vld [vmem:[#allocation8 + $0x4d8] sm:$0xff] }
 0x448   :  { %v11914_v4 = vcombine.high %v1577_v58, %v1581_v15  ;;  %v1573_v7 = vld [vmem:[#allocation8 + $0x4b8] sm:$0xff] }
 0x449   :  { %8539 = vmatpush2.bf16.msra.mxu0 %v12599_v37  ;;  %v1457_v37 = vld [vmem:[#allocation8 + $0x118] sm:$0xff] }
 0x44a   :  { %8580 = vmatpush2.bf16.msra.mxu1 %v12727_v11  ;;  %8540 = vmatprep.subr.bf16.mxu0 %v12592_v46  ;;  %v1461_v11 = vld [vmem:[#allocation8 + $0x138] sm:$0xff] }
 0x44b   :  { %8581 = vmatprep.subr.bf16.mxu1 %v12720_v42  ;;  %v1585_v42 = vld [vmem:[#allocation8 + $0x518] sm:$0xff] }
 0x44d   :  { %8541 = vmatpush2.bf16.msra.mxu0 %v12591_v49  ;;  %v11929_v49 = vcombine.low %v1593_v23, %v1597_v24  ;;  %v1433_v24 = vld [vmem:[#allocation8 + $0x58] sm:$0xff] }
 0x44e   :  { %8582 = vmatpush2.bf16.msra.mxu1 %v12719_v50  ;;  %8592 = vmatprep.subr.bf16.mxu0 %v11818_v51  ;;  %v11922_v51 = vcombine.high %v1585_v42, %v1589_v39 }
 0x44f   :  { %8633 = vmatprep.subr.bf16.mxu1 %v11946_v54  ;;  %v1449_v54 = vld [vmem:[#allocation8 + $0xd8] sm:$0xff] }
 0x450   :  { %v8298_v10 = vpop.f32.mrf.mxu0  ;;  %8543 = vmatmul.mubr.bf16.vlgmr.msra.gmra.mxu0 %v14308_v1  ;;  %v11786_v17 = vcombine.high %v1449_v54, %v1453_v57  ;;  %v11785_v16 = vcombine.low %v1449_v54, %v1453_v57 }
 0x451   :  { %v8299_v26 = vadd.f32 %v8298_v10, %v2467_v60  ;;  %v8339_v61 = vpop.f32.mrf.mxu1  ;;  %8584 = vmatmul.mubr.bf16.vlgmr.msra.gmra.mxu1 %v14310_v3  ;;  %8593 = vmatpush1.bf16.msra.mxu0 %v11817_v63  ;;  %v11793_v60 = vcombine.low %v1457_v37, %v1461_v11  ;;  %v11921_v63 = vcombine.low %v1585_v42, %v1589_v39 }
 0x452   :  { %8624 = vmatprep.mubr.bf16.mxu0 %v14202_v45  ;;  %8634 = vmatpush1.bf16.msra.mxu1 %v11945_v5  ;;  %v8300_v35 = vpop.f32.mrf.mxu0  ;;  %v1441_v5 = vld [vmem:[#allocation8 + $0x98] sm:$0xff]  ;;  %v11913_v10 = vcombine.low %v1577_v58, %v1581_v15 }
 0x453   :  { %v14396_v28 = vadd.f32 %v8339_v61, %v8299_v26  ;;  %8665 = vmatprep.mubr.bf16.mxu1 %v14208_v48  ;;  %v8301_v29 = vadd.f32 %v8300_v35, %v2471_v27  ;;  %v8341_v30 = vpop.f32.mrf.mxu1  ;;  %8594 = vmatprep.subr.bf16.mxu0 %v11810_v6  ;;  %v11794_v48 = vcombine.high %v1457_v37, %v1461_v11  ;;  %v1445_v27 = vld [vmem:[#allocation8 + $0xb8] sm:$0xff] }
 0x454   :  { %v8302_v46 = vpop.f32.mrf.mxu0  ;;  %8635 = vmatprep.subr.bf16.mxu1 %v11938_v14  ;;  %v1569_v6 = vld [vmem:[#allocation8 + $0x498] sm:$0xff]  ;;  %v11778_v14 = vcombine.high %v1441_v5, %v1445_v27  ;;  %v11777_v35 = vcombine.low %v1441_v5, %v1445_v27 }
 0x455   :  { %v14399_v56 = vadd.f32 %v8341_v30, %v8301_v29  ;;  %v8343_v45 = vpop.f32.mrf.mxu1  ;;  %8595 = vmatpush1.bf16.msra.mxu0 %v11809_v9  ;;  %v11906_v23 = vcombine.high %v1569_v6, %v1573_v7  ;;  %v1437_v26 = vld [vmem:[#allocation8 + $0x78] sm:$0xff] }
 0x456   :  { %8636 = vmatpush1.bf16.msra.mxu1 %v11937_v33  ;;  %v8303_v32 = vpop.f32.mrf.mxu0  ;;  %8596 = vmatprep.subr.bf16.mxu0 %v11802_v31  ;;  %v1561_v61 = vld [vmem:[#allocation8 + $0x458] sm:$0xff]  ;;  %v11905_v33 = vcombine.low %v1569_v6, %v1573_v7  ;;  %v11770_v31 = vcombine.high %v1433_v24, %v1437_v26  ;;  %v11769_v46 = vcombine.low %v1433_v24, %v1437_v26 }
 0x457   :  { %v8344_v50 = vpop.f32.mrf.mxu1  ;;  %8637 = vmatprep.subr.bf16.mxu1 %v11930_v53  ;;  %v1565_v9 = vld [vmem:[#allocation8 + $0x478] sm:$0xff] }
 0x458   :  { %v11898_v29 = vcombine.high %v1561_v61, %v1565_v9  ;;  %v1425_v30 = vld [vmem:[#allocation8 + $0x18] sm:$0xff]  ;;  %v11897_v42 = vcombine.low %v1561_v61, %v1565_v9 }
 0x459   :  { %8597 = vmatpush1.bf16.msra.mxu0 %v11801_v41  ;;  %v1429_v53 = vld [vmem:[#allocation8 + $0x38] sm:$0xff] }
 0x45a   :  { %8638 = vmatpush1.bf16.msra.mxu1 %v11929_v49  ;;  %8598 = vmatprep.subr.bf16.mxu0 %v11794_v48  ;;  %v1553_v37 = vld [vmem:[#allocation8 + $0x418] sm:$0xff]  ;;  %v11762_v39 = vcombine.high %v1425_v30, %v1429_v53  ;;  %v11761_v50 = vcombine.low %v1425_v30, %v1429_v53 }
 0x45b   :  { %8639 = vmatprep.subr.bf16.mxu1 %v11922_v51  ;;  %v1557_v11 = vld [vmem:[#allocation8 + $0x438] sm:$0xff] }
 0x45c   :  { %v11890_v45 = vcombine.high %v1553_v37, %v1557_v11  ;;  %v1545_v41 = vld [vmem:[#allocation8 + $0x3d8] sm:$0xff]  ;;  %v11889_v51 = vcombine.low %v1553_v37, %v1557_v11 }
 0x45d   :  { %8599 = vmatpush1.bf16.msra.mxu0 %v11793_v60  ;;  %v1549_v32 = vld [vmem:[#allocation8 + $0x3f8] sm:$0xff] }
 0x45e   :  { %8640 = vmatpush1.bf16.msra.mxu1 %v11921_v63  ;;  %8600 = vmatprep.subr.bf16.mxu0 %v11786_v17  ;;  %v1673_v49 = vld [vmem:[#allocation8 + $0x7d8] sm:$0xff]  ;;  %v11882_v54 = vcombine.high %v1545_v41, %v1549_v32  ;;  %v11881_v17 = vcombine.low %v1545_v41, %v1549_v32 }
 0x45f   :  { %8641 = vmatprep.subr.bf16.mxu1 %v11914_v4  ;;  %v1677_v48 = vld [vmem:[#allocation8 + $0x7f8] sm:$0xff] }
 0x460   :  { %v12010_v57 = vcombine.high %v1673_v49, %v1677_v48  ;;  %v1537_v58 = vld [vmem:[#allocation8 + $0x398] sm:$0xff]  ;;  %v12009_v4 = vcombine.low %v1673_v49, %v1677_v48 }
 0x461   :  { %8601 = vmatpush1.bf16.msra.mxu0 %v11785_v16  ;;  %v1541_v15 = vld [vmem:[#allocation8 + $0x3b8] sm:$0xff] }
 0x462   :  { %8642 = vmatpush1.bf16.msra.mxu1 %v11913_v10  ;;  %8602 = vmatprep.subr.bf16.mxu0 %v11778_v14  ;;  %v1665_v60 = vld [vmem:[#allocation8 + $0x798] sm:$0xff]  ;;  %v11874_v5 = vcombine.high %v1537_v58, %v1541_v15  ;;  %v11873_v14 = vcombine.low %v1537_v58, %v1541_v15 }
 0x463   :  { %8643 = vmatprep.subr.bf16.mxu1 %v11906_v23  ;;  %v1669_v63 = vld [vmem:[#allocation8 + $0x7b8] sm:$0xff] }
 0x464   :  { %v12002_v27 = vcombine.high %v1665_v60, %v1669_v63  ;;  %v1529_v6 = vld [vmem:[#allocation8 + $0x358] sm:$0xff]  ;;  %v12001_v23 = vcombine.low %v1665_v60, %v1669_v63 }
 0x465   :  { %8603 = vmatpush1.bf16.msra.mxu0 %v11777_v35  ;;  %v1533_v7 = vld [vmem:[#allocation8 + $0x378] sm:$0xff] }
 0x466   :  { %8644 = vmatpush1.bf16.msra.mxu1 %v11905_v33  ;;  %8604 = vmatprep.subr.bf16.mxu0 %v11770_v31  ;;  %v1657_v16 = vld [vmem:[#allocation8 + $0x758] sm:$0xff]  ;;  %v11866_v24 = vcombine.high %v1529_v6, %v1533_v7  ;;  %v11865_v31 = vcombine.low %v1529_v6, %v1533_v7 }
 0x467   :  { %8645 = vmatprep.subr.bf16.mxu1 %v11898_v29  ;;  %v1661_v10 = vld [vmem:[#allocation8 + $0x778] sm:$0xff] }
 0x468   :  { %v11994_v26 = vcombine.high %v1657_v16, %v1661_v10  ;;  %v1521_v61 = vld [vmem:[#allocation8 + $0x318] sm:$0xff]  ;;  %v11993_v29 = vcombine.low %v1657_v16, %v1661_v10 }
 0x469   :  { %8605 = vmatpush1.bf16.msra.mxu0 %v11769_v46  ;;  %v1525_v9 = vld [vmem:[#allocation8 + $0x338] sm:$0xff] }
 0x46a   :  { %8646 = vmatpush1.bf16.msra.mxu1 %v11897_v42  ;;  %8606 = vmatprep.subr.bf16.mxu0 %v11762_v39  ;;  %v1649_v35 = vld [vmem:[#allocation8 + $0x718] sm:$0xff]  ;;  %v11858_v30 = vcombine.high %v1521_v61, %v1525_v9  ;;  %v11857_v39 = vcombine.low %v1521_v61, %v1525_v9 }
 0x46b   :  { %8647 = vmatprep.subr.bf16.mxu1 %v11890_v45  ;;  %v1653_v33 = vld [vmem:[#allocation8 + $0x738] sm:$0xff] }
 0x46c   :  { %v11986_v53 = vcombine.high %v1649_v35, %v1653_v33  ;;  %v1513_v37 = vld [vmem:[#allocation8 + $0x2d8] sm:$0xff]  ;;  %v11985_v45 = vcombine.low %v1649_v35, %v1653_v33 }
 0x46d   :  { %8607 = vmatpush1.bf16.msra.mxu0 %v11761_v50  ;;  %v1517_v11 = vld [vmem:[#allocation8 + $0x2f8] sm:$0xff] }
 0x46e   :  { %8648 = vmatpush1.bf16.msra.mxu1 %v11889_v51  ;;  %8608 = vmatprep.subr.bf16.mxu0 %v11882_v54  ;;  %v1641_v46 = vld [vmem:[#allocation8 + $0x6d8] sm:$0xff]  ;;  %v11850_v41 = vcombine.high %v1513_v37, %v1517_v11  ;;  %v11849_v54 = vcombine.low %v1513_v37, %v1517_v11 }
 0x46f   :  { %8649 = vmatprep.subr.bf16.mxu1 %v12010_v57  ;;  %v1645_v42 = vld [vmem:[#allocation8 + $0x6f8] sm:$0xff] }
 0x470   :  { %v11978_v32 = vcombine.high %v1641_v46, %v1645_v42  ;;  %v1505_v49 = vld [vmem:[#allocation8 + $0x298] sm:$0xff]  ;;  %v11977_v57 = vcombine.low %v1641_v46, %v1645_v42 }
 0x471   :  { %8609 = vmatpush2.bf16.msra.mxu0 %v11881_v17  ;;  %v1509_v48 = vld [vmem:[#allocation8 + $0x2b8] sm:$0xff] }
 0x472   :  { %8650 = vmatpush2.bf16.msra.mxu1 %v12009_v4  ;;  %8610 = vmatprep.subr.bf16.mxu0 %v11874_v5  ;;  %v1633_v50 = vld [vmem:[#allocation8 + $0x698] sm:$0xff]  ;;  %v11842_v58 = vcombine.high %v1505_v49, %v1509_v48  ;;  %v11841_v5 = vcombine.low %v1505_v49, %v1509_v48 }
 0x473   :  { %8651 = vmatprep.subr.bf16.mxu1 %v12002_v27  ;;  %v1637_v51 = vld [vmem:[#allocation8 + $0x6b8] sm:$0xff] }
 0x474   :  { %v11970_v15 = vcombine.high %v1633_v50, %v1637_v51  ;;  %v1497_v60 = vld [vmem:[#allocation8 + $0x258] sm:$0xff]  ;;  %v11969_v27 = vcombine.low %v1633_v50, %v1637_v51 }
 0x475   :  { %8611 = vmatpush2.bf16.msra.mxu0 %v11873_v14  ;;  %v1501_v63 = vld [vmem:[#allocation8 + $0x278] sm:$0xff] }
 0x476   :  { %8652 = vmatpush2.bf16.msra.mxu1 %v12001_v23  ;;  %8612 = vmatprep.subr.bf16.mxu0 %v11866_v24  ;;  %v1625_v17 = vld [vmem:[#allocation8 + $0x658] sm:$0xff]  ;;  %v11834_v6 = vcombine.high %v1497_v60, %v1501_v63  ;;  %v11833_v24 = vcombine.low %v1497_v60, %v1501_v63 }
 0x477   :  { %8653 = vmatprep.subr.bf16.mxu1 %v11994_v26  ;;  %v1629_v4 = vld [vmem:[#allocation8 + $0x678] sm:$0xff] }
 0x478   :  { %v11962_v7 = vcombine.high %v1625_v17, %v1629_v4  ;;  %v1489_v16 = vld [vmem:[#allocation8 + $0x218] sm:$0xff]  ;;  %v11961_v26 = vcombine.low %v1625_v17, %v1629_v4 }
 0x479   :  { %8613 = vmatpush2.bf16.msra.mxu0 %v11865_v31  ;;  %v1493_v10 = vld [vmem:[#allocation8 + $0x238] sm:$0xff] }
 0x47a   :  { %8654 = vmatpush2.bf16.msra.mxu1 %v11993_v29  ;;  %8614 = vmatprep.subr.bf16.mxu0 %v11858_v30  ;;  %v1617_v14 = vld [vmem:[#allocation8 + $0x618] sm:$0xff]  ;;  %v11826_v61 = vcombine.high %v1489_v16, %v1493_v10  ;;  %v11825_v30 = vcombine.low %v1489_v16, %v1493_v10 }
 0x47b   :  { %8655 = vmatprep.subr.bf16.mxu1 %v11986_v53  ;;  %v1621_v23 = vld [vmem:[#allocation8 + $0x638] sm:$0xff] }
 0x47c   :  { %v11954_v9 = vcombine.high %v1617_v14, %v1621_v23  ;;  %v1737_v35 = vld [vmem:[#allocation8 + $0x9d8] sm:$0xff]  ;;  %v11953_v53 = vcombine.low %v1617_v14, %v1621_v23 }
 0x47d   :  { %8615 = vmatpush2.bf16.msra.mxu0 %v11857_v39  ;;  %v1741_v33 = vld [vmem:[#allocation8 + $0x9f8] sm:$0xff] }
 0x47e   :  { %8656 = vmatpush2.bf16.msra.mxu1 %v11985_v45  ;;  %8616 = vmatprep.subr.bf16.mxu0 %v11850_v41  ;;  %v1865_v31 = vld [vmem:[#allocation8 + $0xdd8] sm:$0xff]  ;;  %v12074_v37 = vcombine.high %v1737_v35, %v1741_v33  ;;  %v12073_v39 = vcombine.low %v1737_v35, %v1741_v33 }
 0x47f   :  { %8657 = vmatprep.subr.bf16.mxu1 %v11978_v32  ;;  %v1869_v29 = vld [vmem:[#allocation8 + $0xdf8] sm:$0xff] }
 0x480   :  { %v12202_v11 = vcombine.high %v1865_v31, %v1869_v29  ;;  %v1729_v46 = vld [vmem:[#allocation8 + $0x998] sm:$0xff]  ;;  %v12201_v32 = vcombine.low %v1865_v31, %v1869_v29 }
 0x481   :  { %8617 = vmatpush2.bf16.msra.mxu0 %v11849_v54  ;;  %v1733_v42 = vld [vmem:[#allocation8 + $0x9b8] sm:$0xff] }
 0x482   :  { %8658 = vmatpush2.bf16.msra.mxu1 %v11977_v57  ;;  %8618 = vmatprep.subr.bf16.mxu0 %v11842_v58  ;;  %v1857_v45 = vld [vmem:[#allocation8 + $0xd98] sm:$0xff]  ;;  %v12066_v49 = vcombine.high %v1729_v46, %v1733_v42  ;;  %v12065_v63 = vcombine.low %v1729_v46, %v1733_v42 }
 0x483   :  { %8659 = vmatprep.subr.bf16.mxu1 %v11970_v15  ;;  %v1861_v41 = vld [vmem:[#allocation8 + $0xdb8] sm:$0xff] }
 0x484   :  { %v1721_v48 = vld [vmem:[#allocation8 + $0x958] sm:$0xff]  ;;  %v12194_v54 = vcombine.high %v1857_v45, %v1861_v41  ;;  %v12193_v4 = vcombine.low %v1857_v45, %v1861_v41 }
 0x485   :  { %8619 = vmatpush2.bf16.msra.mxu0 %v11841_v5  ;;  %v1725_v50 = vld [vmem:[#allocation8 + $0x978] sm:$0xff] }
 0x486   :  { %8660 = vmatpush2.bf16.msra.mxu1 %v11969_v27  ;;  %8620 = vmatprep.subr.bf16.mxu0 %v11834_v6  ;;  %v1849_v57 = vld [vmem:[#allocation8 + $0xd58] sm:$0xff]  ;;  %v12058_v5 = vcombine.high %v1721_v48, %v1725_v50 }
 0x487   :  { %8661 = vmatprep.subr.bf16.mxu1 %v11962_v7  ;;  %v1853_v58 = vld [vmem:[#allocation8 + $0xd78] sm:$0xff] }
 0x488   :  { %v1713_v7 = vld [vmem:[#allocation8 + $0x918] sm:$0xff] }
 0x489   :  { %8621 = vmatpush2.bf16.msra.mxu0 %v11833_v24  ;;  %v1717_v16 = vld [vmem:[#allocation8 + $0x938] sm:$0xff]  ;;  %v12057_v24 = vcombine.low %v1721_v48, %v1725_v50 }
 0x48a   :  { %8662 = vmatpush2.bf16.msra.mxu1 %v11961_v26  ;;  %8622 = vmatprep.subr.bf16.mxu0 %v11826_v61  ;;  %v1841_v10 = vld [vmem:[#allocation8 + $0xd18] sm:$0xff]  ;;  %v12050_v61 = vcombine.high %v1713_v7, %v1717_v16 }
 0x48b   :  { %8663 = vmatprep.subr.bf16.mxu1 %v11954_v9  ;;  %v1845_v14 = vld [vmem:[#allocation8 + $0xd38] sm:$0xff] }
 0x48c   :  { %v12178_v9 = vcombine.high %v1841_v10, %v1845_v14  ;;  %v1705_v35 = vld [vmem:[#allocation8 + $0x8d8] sm:$0xff] }
 0x48d   :  { %8623 = vmatpush2.bf16.msra.mxu0 %v11825_v30  ;;  %v1709_v33 = vld [vmem:[#allocation8 + $0x8f8] sm:$0xff]  ;;  %v12049_v30 = vcombine.low %v1713_v7, %v1717_v16 }
 0x48e   :  { %8664 = vmatpush2.bf16.msra.mxu1 %v11953_v53  ;;  %8674 = vmatprep.subr.bf16.mxu0 %v12074_v37  ;;  %v1833_v31 = vld [vmem:[#allocation8 + $0xcd8] sm:$0xff]  ;;  %v12177_v53 = vcombine.low %v1841_v10, %v1845_v14  ;;  %v12042_v37 = vcombine.high %v1705_v35, %v1709_v33  ;;  %v12041_v41 = vcombine.low %v1705_v35, %v1709_v33 }
 0x48f   :  { %8715 = vmatprep.subr.bf16.mxu1 %v12202_v11  ;;  %v1837_v29 = vld [vmem:[#allocation8 + $0xcf8] sm:$0xff] }
 0x490   :  { %v8380_v51 = vpop.f32.mrf.mxu0  ;;  %8625 = vmatmul.mubr.bf16.vlgmr.msra.gmra.mxu0 %v14206_v47  ;;  %v12170_v11 = vcombine.high %v1833_v31, %v1837_v29  ;;  %v1697_v46 = vld [vmem:[#allocation8 + $0x898] sm:$0xff] }
 0x491   :  { %v8381_v15 = vadd.f32 %v8380_v51, %v14396_v28  ;;  %v8421_v60 = vpop.f32.mrf.mxu1  ;;  %8666 = vmatmul.mubr.bf16.vlgmr.msra.gmra.mxu1 %v14200_v44  ;;  %8675 = vmatpush1.bf16.msra.mxu0 %v12073_v39  ;;  %v12186_v28 = vcombine.high %v1849_v57, %v1853_v58  ;;  %v1701_v42 = vld [vmem:[#allocation8 + $0x8b8] sm:$0xff] }
 0x492   :  { %8706 = vmatprep.mubr.bf16.mxu0 %v14229_v12  ;;  %8716 = vmatpush1.bf16.msra.mxu1 %v12201_v32  ;;  %v8382_v17 = vpop.f32.mrf.mxu0  ;;  %v1825_v39 = vld [vmem:[#allocation8 + $0xc98] sm:$0xff]  ;;  %v12169_v32 = vcombine.low %v1833_v31, %v1837_v29 }
 0x493   :  { %v14405_v27 = vadd.f32 %v8421_v60, %v8381_v15  ;;  %8747 = vmatprep.mubr.bf16.mxu1 %v14231_v22  ;;  %v8383_v47 = vadd.f32 %v8382_v17, %v14399_v56  ;;  %v8423_v6 = vpop.f32.mrf.mxu1  ;;  %8676 = vmatprep.subr.bf16.mxu0 %v12066_v49  ;;  %v12185_v22 = vcombine.low %v1849_v57, %v1853_v58  ;;  %v1829_v45 = vld [vmem:[#allocation8 + $0xcb8] sm:$0xff] }
 0x494   :  { %v8384_v44 = vpop.f32.mrf.mxu0  ;;  %8717 = vmatprep.subr.bf16.mxu1 %v12194_v54  ;;  %v12034_v49 = vcombine.high %v1697_v46, %v1701_v42  ;;  %v12162_v48 = vcombine.high %v1825_v39, %v1829_v45  ;;  %v1689_v50 = vld [vmem:[#allocation8 + $0x858] sm:$0xff]  ;;  %v12033_v58 = vcombine.low %v1697_v46, %v1701_v42  ;;  %v12161_v15 = vcombine.low %v1825_v39, %v1829_v45 }
 0x495   :  { %v14409_v12 = vadd.f32 %v8423_v6, %v8383_v47  ;;  %v8425_v23 = vpop.f32.mrf.mxu1  ;;  %8677 = vmatpush1.bf16.msra.mxu0 %v12065_v63  ;;  %v1693_v51 = vld [vmem:[#allocation8 + $0x878] sm:$0xff] }
 0x496   :  { %8718 = vmatpush1.bf16.msra.mxu1 %v12193_v4  ;;  %v8385_v26 = vpop.f32.mrf.mxu0  ;;  %8678 = vmatprep.subr.bf16.mxu0 %v12058_v5  ;;  %v1817_v54 = vld [vmem:[#allocation8 + $0xc58] sm:$0xff]  ;;  %v12026_v60 = vcombine.high %v1689_v50, %v1693_v51  ;;  %v12025_v6 = vcombine.low %v1689_v50, %v1693_v51 }
 0x497   :  { %v8426_v56 = vpop.f32.mrf.mxu1  ;;  %8719 = vmatprep.subr.bf16.mxu1 %v12186_v28  ;;  %v1821_v57 = vld [vmem:[#allocation8 + $0xc78] sm:$0xff] }
 0x498   :  { %v12154_v63 = vcombine.high %v1817_v54, %v1821_v57  ;;  %v1681_v17 = vld [vmem:[#allocation8 + $0x818] sm:$0xff]  ;;  %v12153_v28 = vcombine.low %v1817_v54, %v1821_v57 }
 0x499   :  { %8679 = vmatpush1.bf16.msra.mxu0 %v12057_v24  ;;  %v1685_v4 = vld [vmem:[#allocation8 + $0x838] sm:$0xff] }
 0x49a   :  { %8720 = vmatpush1.bf16.msra.mxu1 %v12185_v22  ;;  %8680 = vmatprep.subr.bf16.mxu0 %v12050_v61  ;;  %v1809_v5 = vld [vmem:[#allocation8 + $0xc18] sm:$0xff]  ;;  %v12018_v7 = vcombine.high %v1681_v17, %v1685_v4  ;;  %v12017_v24 = vcombine.low %v1681_v17, %v1685_v4 }
 0x49b   :  { %8721 = vmatprep.subr.bf16.mxu1 %v12178_v9  ;;  %v1813_v47 = vld [vmem:[#allocation8 + $0xc38] sm:$0xff] }
 0x49c   :  { %v12146_v16 = vcombine.high %v1809_v5, %v1813_v47  ;;  %v1801_v44 = vld [vmem:[#allocation8 + $0xbd8] sm:$0xff]  ;;  %v12145_v26 = vcombine.low %v1809_v5, %v1813_v47 }
 0x49d   :  { %8681 = vmatpush1.bf16.msra.mxu0 %v12049_v30  ;;  %v1805_v10 = vld [vmem:[#allocation8 + $0xbf8] sm:$0xff] }
 0x49e   :  { %8722 = vmatpush1.bf16.msra.mxu1 %v12177_v53  ;;  %8682 = vmatprep.subr.bf16.mxu0 %v12042_v37  ;;  %v1929_v14 = vld [vmem:[#allocation8 + $0xfd8] sm:$0xff]  ;;  %v12138_v22 = vcombine.high %v1801_v44, %v1805_v10  ;;  %v12137_v31 = vcombine.low %v1801_v44, %v1805_v10 }
 0x49f   :  { %8723 = vmatprep.subr.bf16.mxu1 %v12170_v11  ;;  %v1933_v23 = vld [vmem:[#allocation8 + $0xff8] sm:$0xff] }
 0x4a0   :  { %v12266_v61 = vcombine.high %v1929_v14, %v1933_v23  ;;  %v1793_v56 = vld [vmem:[#allocation8 + $0xb98] sm:$0xff]  ;;  %v12265_v29 = vcombine.low %v1929_v14, %v1933_v23 }
 0x4a1   :  { %8683 = vmatpush1.bf16.msra.mxu0 %v12041_v41  ;;  %v1797_v9 = vld [vmem:[#allocation8 + $0xbb8] sm:$0xff] }
 0x4a2   :  { %8724 = vmatpush1.bf16.msra.mxu1 %v12169_v32  ;;  %8684 = vmatprep.subr.bf16.mxu0 %v12034_v49  ;;  %v1921_v35 = vld [vmem:[#allocation8 + $0xf98] sm:$0xff]  ;;  %v12130_v30 = vcombine.high %v1793_v56, %v1797_v9  ;;  %v12129_v39 = vcombine.low %v1793_v56, %v1797_v9 }
 0x4a3   :  { %8725 = vmatprep.subr.bf16.mxu1 %v12162_v48  ;;  %v1925_v33 = vld [vmem:[#allocation8 + $0xfb8] sm:$0xff] }
 0x4a4   :  { %v12258_v53 = vcombine.high %v1921_v35, %v1925_v33  ;;  %v1785_v37 = vld [vmem:[#allocation8 + $0xb58] sm:$0xff]  ;;  %v12257_v45 = vcombine.low %v1921_v35, %v1925_v33 }
 0x4a5   :  { %8685 = vmatpush1.bf16.msra.mxu0 %v12033_v58  ;;  %v1789_v11 = vld [vmem:[#allocation8 + $0xb78] sm:$0xff] }
 0x4a6   :  { %8726 = vmatpush1.bf16.msra.mxu1 %v12161_v15  ;;  %8686 = vmatprep.subr.bf16.mxu0 %v12026_v60  ;;  %v1913_v46 = vld [vmem:[#allocation8 + $0xf58] sm:$0xff]  ;;  %v12122_v41 = vcombine.high %v1785_v37, %v1789_v11  ;;  %v12121_v54 = vcombine.low %v1785_v37, %v1789_v11 }
 0x4a7   :  { %8727 = vmatprep.subr.bf16.mxu1 %v12154_v63  ;;  %v1917_v42 = vld [vmem:[#allocation8 + $0xf78] sm:$0xff] }
 0x4a8   :  { %v12250_v32 = vcombine.high %v1913_v46, %v1917_v42  ;;  %v1777_v49 = vld [vmem:[#allocation8 + $0xb18] sm:$0xff]  ;;  %v12249_v57 = vcombine.low %v1913_v46, %v1917_v42 }
 0x4a9   :  { %8687 = vmatpush1.bf16.msra.mxu0 %v12025_v6  ;;  %v1781_v48 = vld [vmem:[#allocation8 + $0xb38] sm:$0xff] }
 0x4aa   :  { %8728 = vmatpush1.bf16.msra.mxu1 %v12153_v28  ;;  %8688 = vmatprep.subr.bf16.mxu0 %v12018_v7  ;;  %v1905_v50 = vld [vmem:[#allocation8 + $0xf18] sm:$0xff]  ;;  %v12114_v58 = vcombine.high %v1777_v49, %v1781_v48  ;;  %v12113_v5 = vcombine.low %v1777_v49, %v1781_v48 }
 0x4ab   :  { %8729 = vmatprep.subr.bf16.mxu1 %v12146_v16  ;;  %v1909_v51 = vld [vmem:[#allocation8 + $0xf38] sm:$0xff] }
 0x4ac   :  { %v12242_v15 = vcombine.high %v1905_v50, %v1909_v51  ;;  %v1769_v60 = vld [vmem:[#allocation8 + $0xad8] sm:$0xff]  ;;  %v12241_v47 = vcombine.low %v1905_v50, %v1909_v51 }
 0x4ad   :  { %8689 = vmatpush1.bf16.msra.mxu0 %v12017_v24  ;;  %v1773_v63 = vld [vmem:[#allocation8 + $0xaf8] sm:$0xff] }
 0x4ae   :  { %8730 = vmatpush1.bf16.msra.mxu1 %v12145_v26  ;;  %8690 = vmatprep.subr.bf16.mxu0 %v12138_v22  ;;  %v1897_v17 = vld [vmem:[#allocation8 + $0xed8] sm:$0xff]  ;;  %v12106_v6 = vcombine.high %v1769_v60, %v1773_v63  ;;  %v12105_v14 = vcombine.low %v1769_v60, %v1773_v63 }
 0x4af   :  { %8731 = vmatprep.subr.bf16.mxu1 %v12266_v61  ;;  %v1901_v4 = vld [vmem:[#allocation8 + $0xef8] sm:$0xff] }
 0x4b0   :  { %v12234_v28 = vcombine.high %v1897_v17, %v1901_v4  ;;  %v1761_v7 = vld [vmem:[#allocation8 + $0xa98] sm:$0xff]  ;;  %v12233_v23 = vcombine.low %v1897_v17, %v1901_v4 }
 0x4b1   :  { %8691 = vmatpush2.bf16.msra.mxu0 %v12137_v31  ;;  %v1765_v16 = vld [vmem:[#allocation8 + $0xab8] sm:$0xff] }
 0x4b2   :  { %8732 = vmatpush2.bf16.msra.mxu1 %v12265_v29  ;;  %8692 = vmatprep.subr.bf16.mxu0 %v12130_v30  ;;  %v1889_v44 = vld [vmem:[#allocation8 + $0xe98] sm:$0xff]  ;;  %v12098_v24 = vcombine.high %v1761_v7, %v1765_v16  ;;  %v12097_v35 = vcombine.low %v1761_v7, %v1765_v16 }
 0x4b3   :  { %8733 = vmatprep.subr.bf16.mxu1 %v12258_v53  ;;  %v1893_v10 = vld [vmem:[#allocation8 + $0xeb8] sm:$0xff] }
 0x4b4   :  { %v12226_v26 = vcombine.high %v1889_v44, %v1893_v10  ;;  %v1753_v22 = vld [vmem:[#allocation8 + $0xa58] sm:$0xff]  ;;  %v12225_v33 = vcombine.low %v1889_v44, %v1893_v10 }
 0x4b5   :  { %8693 = vmatpush2.bf16.msra.mxu0 %v12129_v39  ;;  %v1757_v61 = vld [vmem:[#allocation8 + $0xa78] sm:$0xff] }
 0x4b6   :  { %8734 = vmatpush2.bf16.msra.mxu1 %v12257_v45  ;;  %8694 = vmatprep.subr.bf16.mxu0 %v12122_v41  ;;  %v1881_v56 = vld [vmem:[#allocation8 + $0xe58] sm:$0xff]  ;;  %v12090_v31 = vcombine.high %v1753_v22, %v1757_v61  ;;  %v12089_v46 = vcombine.low %v1753_v22, %v1757_v61 }
 0x4b7   :  { %8735 = vmatprep.subr.bf16.mxu1 %v12250_v32  ;;  %v1885_v9 = vld [vmem:[#allocation8 + $0xe78] sm:$0xff] }
 0x4b8   :  { %v12218_v29 = vcombine.high %v1881_v56, %v1885_v9  ;;  %v1745_v30 = vld [vmem:[#allocation8 + $0xa18] sm:$0xff]  ;;  %v12217_v42 = vcombine.low %v1881_v56, %v1885_v9 }
 0x4b9   :  { %8695 = vmatpush2.bf16.msra.mxu0 %v12121_v54  ;;  %v1749_v53 = vld [vmem:[#allocation8 + $0xa38] sm:$0xff] }
 0x4ba   :  { %8736 = vmatpush2.bf16.msra.mxu1 %v12249_v57  ;;  %8696 = vmatprep.subr.bf16.mxu0 %v12114_v58  ;;  %v1873_v37 = vld [vmem:[#allocation8 + $0xe18] sm:$0xff]  ;;  %v12082_v39 = vcombine.high %v1745_v30, %v1749_v53  ;;  %v12081_v50 = vcombine.low %v1745_v30, %v1749_v53 }
 0x4bb   :  { %8737 = vmatprep.subr.bf16.mxu1 %v12242_v15  ;;  %v1877_v11 = vld [vmem:[#allocation8 + $0xe38] sm:$0xff] }
 0x4bc   :  { %v12210_v45 = vcombine.high %v1873_v37, %v1877_v11  ;;  %v1993_v41 = vld [vmem:[#allocation8 + $0x11d8] sm:$0xff]  ;;  %v12209_v51 = vcombine.low %v1873_v37, %v1877_v11 }
 0x4bd   :  { %8697 = vmatpush2.bf16.msra.mxu0 %v12113_v5  ;;  %v1997_v32 = vld [vmem:[#allocation8 + $0x11f8] sm:$0xff] }
 0x4be   :  { %8738 = vmatpush2.bf16.msra.mxu1 %v12241_v47  ;;  %8698 = vmatprep.subr.bf16.mxu0 %v12106_v6  ;;  %v2121_v49 = vld [vmem:[#allocation8 + $0x15d8] sm:$0xff]  ;;  %v12330_v54 = vcombine.high %v1993_v41, %v1997_v32  ;;  %v12329_v60 = vcombine.low %v1993_v41, %v1997_v32 }
 0x4bf   :  { %8739 = vmatprep.subr.bf16.mxu1 %v12234_v28  ;;  %v2125_v48 = vld [vmem:[#allocation8 + $0x15f8] sm:$0xff] }
 0x4c0   :  { %v12458_v57 = vcombine.high %v2121_v49, %v2125_v48  ;;  %v1985_v58 = vld [vmem:[#allocation8 + $0x1198] sm:$0xff]  ;;  %v12457_v4 = vcombine.low %v2121_v49, %v2125_v48 }
 0x4c1   :  { %8699 = vmatpush2.bf16.msra.mxu0 %v12105_v14  ;;  %v1989_v15 = vld [vmem:[#allocation8 + $0x11b8] sm:$0xff] }
 0x4c2   :  { %8740 = vmatpush2.bf16.msra.mxu1 %v12233_v23  ;;  %8700 = vmatprep.subr.bf16.mxu0 %v12098_v24  ;;  %v2113_v63 = vld [vmem:[#allocation8 + $0x1598] sm:$0xff]  ;;  %v12322_v5 = vcombine.high %v1985_v58, %v1989_v15  ;;  %v12321_v23 = vcombine.low %v1985_v58, %v1989_v15 }
 0x4c3   :  { %8741 = vmatprep.subr.bf16.mxu1 %v12226_v26  ;;  %v2117_v17 = vld [vmem:[#allocation8 + $0x15b8] sm:$0xff] }
 0x4c4   :  { %v1977_v47 = vld [vmem:[#allocation8 + $0x1158] sm:$0xff]  ;;  %v12450_v7 = vcombine.high %v2113_v63, %v2117_v17  ;;  %v12449_v26 = vcombine.low %v2113_v63, %v2117_v17 }
 0x4c5   :  { %8701 = vmatpush2.bf16.msra.mxu0 %v12097_v35  ;;  %v1981_v6 = vld [vmem:[#allocation8 + $0x1178] sm:$0xff] }
 0x4c6   :  { %8742 = vmatpush2.bf16.msra.mxu1 %v12225_v33  ;;  %8702 = vmatprep.subr.bf16.mxu0 %v12090_v31  ;;  %v2105_v16 = vld [vmem:[#allocation8 + $0x1558] sm:$0xff]  ;;  %v12314_v22 = vcombine.high %v1977_v47, %v1981_v6  ;;  %v12313_v30 = vcombine.low %v1977_v47, %v1981_v6 }
 0x4c7   :  { %8743 = vmatprep.subr.bf16.mxu1 %v12218_v29  ;;  %v2109_v44 = vld [vmem:[#allocation8 + $0x1578] sm:$0xff] }
 0x4c8   :  { %v1969_v9 = vld [vmem:[#allocation8 + $0x1118] sm:$0xff] }
 0x4c9   :  { %8703 = vmatpush2.bf16.msra.mxu0 %v12089_v46  ;;  %v1973_v35 = vld [vmem:[#allocation8 + $0x1138] sm:$0xff] }
 0x4ca   :  { %8744 = vmatpush2.bf16.msra.mxu1 %v12217_v42  ;;  %8704 = vmatprep.subr.bf16.mxu0 %v12082_v39  ;;  %v2097_v33 = vld [vmem:[#allocation8 + $0x1518] sm:$0xff]  ;;  %v12306_v37 = vcombine.high %v1969_v9, %v1973_v35  ;;  %v12305_v41 = vcombine.low %v1969_v9, %v1973_v35 }
 0x4cb   :  { %8745 = vmatprep.subr.bf16.mxu1 %v12210_v45  ;;  %v2101_v31 = vld [vmem:[#allocation8 + $0x1538] sm:$0xff] }
 0x4cc   :  { %v12434_v11 = vcombine.high %v2097_v33, %v2101_v31  ;;  %v1961_v46 = vld [vmem:[#allocation8 + $0x10d8] sm:$0xff]  ;;  %v12433_v32 = vcombine.low %v2097_v33, %v2101_v31 }
 0x4cd   :  { %8705 = vmatpush2.bf16.msra.mxu0 %v12081_v50  ;;  %v1965_v42 = vld [vmem:[#allocation8 + $0x10f8] sm:$0xff] }
 0x4ce   :  { %8746 = vmatpush2.bf16.msra.mxu1 %v12209_v51  ;;  %8756 = vmatprep.subr.bf16.mxu0 %v12330_v54  ;;  %v2089_v39 = vld [vmem:[#allocation8 + $0x14d8] sm:$0xff]  ;;  %v12298_v49 = vcombine.high %v1961_v46, %v1965_v42  ;;  %v12297_v58 = vcombine.low %v1961_v46, %v1965_v42 }
 0x4cf   :  { %8797 = vmatprep.subr.bf16.mxu1 %v12458_v57  ;;  %v2093_v45 = vld [vmem:[#allocation8 + $0x14f8] sm:$0xff] }
 0x4d0   :  { %v8462_v28 = vpop.f32.mrf.mxu0  ;;  %8707 = vmatmul.mubr.bf16.vlgmr.msra.gmra.mxu0 %v14259_v2  ;;  %v12426_v48 = vcombine.high %v2089_v39, %v2093_v45  ;;  %v1953_v50 = vld [vmem:[#allocation8 + $0x1098] sm:$0xff]  ;;  %v12425_v15 = vcombine.low %v2089_v39, %v2093_v45 }
 0x4d1   :  { %v8463_v10 = vadd.f32 %v8462_v28, %v14405_v27  ;;  %v8503_v14 = vpop.f32.mrf.mxu1  ;;  %8748 = vmatmul.mubr.bf16.vlgmr.msra.gmra.mxu1 %v14257_v62  ;;  %8757 = vmatpush1.bf16.msra.mxu0 %v12329_v60  ;;  %v12442_v27 = vcombine.high %v2105_v16, %v2109_v44  ;;  %v1957_v51 = vld [vmem:[#allocation8 + $0x10b8] sm:$0xff] }
 0x4d2   :  { %8788 = vmatprep.mubr.bf16.mxu0 %v14261_v8  ;;  %8798 = vmatpush1.bf16.msra.mxu1 %v12457_v4  ;;  %v8464_v24 = vpop.f32.mrf.mxu0  ;;  %v2081_v54 = vld [vmem:[#allocation8 + $0x1498] sm:$0xff]  ;;  %v12290_v60 = vcombine.high %v1953_v50, %v1957_v51  ;;  %v12289_v6 = vcombine.low %v1953_v50, %v1957_v51 }
 0x4d3   :  { %v14415_v61 = vadd.f32 %v8503_v14, %v8463_v10  ;;  %8829 = vmatprep.mubr.bf16.mxu1 %v14264_v13  ;;  %v8465_v2 = vadd.f32 %v8464_v24, %v14409_v12  ;;  %v8505_v56 = vpop.f32.mrf.mxu1  ;;  %8758 = vmatprep.subr.bf16.mxu0 %v12322_v5  ;;  %v12441_v13 = vcombine.low %v2105_v16, %v2109_v44  ;;  %v2085_v57 = vld [vmem:[#allocation8 + $0x14b8] sm:$0xff] }
 0x4d4   :  { %v8466_v62 = vpop.f32.mrf.mxu0  ;;  %8799 = vmatprep.subr.bf16.mxu1 %v12450_v7  ;;  %v12418_v63 = vcombine.high %v2081_v54, %v2085_v57  ;;  %v1945_v17 = vld [vmem:[#allocation8 + $0x1058] sm:$0xff]  ;;  %v12417_v28 = vcombine.low %v2081_v54, %v2085_v57 }
 0x4d5   :  { %v14419_v8 = vadd.f32 %v8505_v56, %v8465_v2  ;;  %v8507_v29 = vpop.f32.mrf.mxu1  ;;  %8759 = vmatpush1.bf16.msra.mxu0 %v12321_v23  ;;  %v1949_v4 = vld [vmem:[#allocation8 + $0x1078] sm:$0xff] }
 0x4d6   :  { %8800 = vmatpush1.bf16.msra.mxu1 %v12449_v26  ;;  %v8467_v53 = vpop.f32.mrf.mxu0  ;;  %8760 = vmatprep.subr.bf16.mxu0 %v12314_v22  ;;  %v2073_v5 = vld [vmem:[#allocation8 + $0x1458] sm:$0xff]  ;;  %v12282_v7 = vcombine.high %v1945_v17, %v1949_v4  ;;  %v12281_v24 = vcombine.low %v1945_v17, %v1949_v4 }
 0x4d7   :  { %v8508_v12 = vpop.f32.mrf.mxu1  ;;  %8801 = vmatprep.subr.bf16.mxu1 %v12442_v27  ;;  %v2077_v47 = vld [vmem:[#allocation8 + $0x1478] sm:$0xff] }
 0x4d8   :  { %v12410_v16 = vcombine.high %v2073_v5, %v2077_v47  ;;  %v1937_v44 = vld [vmem:[#allocation8 + $0x1018] sm:$0xff]  ;;  %v12409_v26 = vcombine.low %v2073_v5, %v2077_v47 }
 0x4d9   :  { %8761 = vmatpush1.bf16.msra.mxu0 %v12313_v30  ;;  %v1941_v10 = vld [vmem:[#allocation8 + $0x1038] sm:$0xff] }
 0x4da   :  { %8802 = vmatpush1.bf16.msra.mxu1 %v12441_v13  ;;  %8762 = vmatprep.subr.bf16.mxu0 %v12306_v37  ;;  %v2065_v14 = vld [vmem:[#allocation8 + $0x1418] sm:$0xff]  ;;  %v12274_v22 = vcombine.high %v1937_v44, %v1941_v10  ;;  %v12273_v62 = vcombine.low %v1937_v44, %v1941_v10 }
 0x4db   :  { %8803 = vmatprep.subr.bf16.mxu1 %v12434_v11  ;;  %v2069_v23 = vld [vmem:[#allocation8 + $0x1438] sm:$0xff] }
 0x4dc   :  { %v12402_v2 = vcombine.high %v2065_v14, %v2069_v23  ;;  %v2057_v56 = vld [vmem:[#allocation8 + $0x13d8] sm:$0xff]  ;;  %v12401_v33 = vcombine.low %v2065_v14, %v2069_v23 }
 0x4dd   :  { %8763 = vmatpush1.bf16.msra.mxu0 %v12305_v41  ;;  %v2061_v27 = vld [vmem:[#allocation8 + $0x13f8] sm:$0xff] }
 0x4de   :  { %8804 = vmatpush1.bf16.msra.mxu1 %v12433_v32  ;;  %8764 = vmatprep.subr.bf16.mxu0 %v12298_v49  ;;  %v2185_v9 = vld [vmem:[#allocation8 + $0x17d8] sm:$0xff]  ;;  %v12394_v31 = vcombine.high %v2057_v56, %v2061_v27  ;;  %v12393_v12 = vcombine.low %v2057_v56, %v2061_v27 }
 0x4df   :  { %8805 = vmatprep.subr.bf16.mxu1 %v12426_v48  ;;  %v2189_v35 = vld [vmem:[#allocation8 + $0x17f8] sm:$0xff] }
 0x4e0   :  { %v12522_v29 = vcombine.high %v2185_v9, %v2189_v35  ;;  %v2049_v30 = vld [vmem:[#allocation8 + $0x1398] sm:$0xff]  ;;  %v12521_v11 = vcombine.low %v2185_v9, %v2189_v35 }
 0x4e1   :  { %8765 = vmatpush1.bf16.msra.mxu0 %v12297_v58  ;;  %v2053_v53 = vld [vmem:[#allocation8 + $0x13b8] sm:$0xff] }
 0x4e2   :  { %8806 = vmatpush1.bf16.msra.mxu1 %v12425_v15  ;;  %8766 = vmatprep.subr.bf16.mxu0 %v12290_v60  ;;  %v2177_v13 = vld [vmem:[#allocation8 + $0x1798] sm:$0xff]  ;;  %v12386_v46 = vcombine.high %v2049_v30, %v2053_v53  ;;  %v12385_v49 = vcombine.low %v2049_v30, %v2053_v53 }
 0x4e3   :  { %8807 = vmatprep.subr.bf16.mxu1 %v12418_v63  ;;  %v2181_v37 = vld [vmem:[#allocation8 + $0x17b8] sm:$0xff] }
 0x4e4   :  { %v12514_v42 = vcombine.high %v2177_v13, %v2181_v37  ;;  %v2041_v39 = vld [vmem:[#allocation8 + $0x1358] sm:$0xff]  ;;  %v12513_v48 = vcombine.low %v2177_v13, %v2181_v37 }
 0x4e5   :  { %8767 = vmatpush1.bf16.msra.mxu0 %v12289_v6  ;;  %v2045_v45 = vld [vmem:[#allocation8 + $0x1378] sm:$0xff] }
 0x4e6   :  { %8808 = vmatpush1.bf16.msra.mxu1 %v12417_v28  ;;  %8768 = vmatprep.subr.bf16.mxu0 %v12282_v7  ;;  %v2169_v41 = vld [vmem:[#allocation8 + $0x1758] sm:$0xff]  ;;  %v12378_v50 = vcombine.high %v2041_v39, %v2045_v45  ;;  %v12377_v60 = vcombine.low %v2041_v39, %v2045_v45 }
 0x4e7   :  { %8809 = vmatprep.subr.bf16.mxu1 %v12410_v16  ;;  %v2173_v32 = vld [vmem:[#allocation8 + $0x1778] sm:$0xff] }
 0x4e8   :  { %v12506_v51 = vcombine.high %v2169_v41, %v2173_v32  ;;  %v2033_v54 = vld [vmem:[#allocation8 + $0x1318] sm:$0xff]  ;;  %v12505_v63 = vcombine.low %v2169_v41, %v2173_v32 }
 0x4e9   :  { %8769 = vmatpush1.bf16.msra.mxu0 %v12281_v24  ;;  %v2037_v57 = vld [vmem:[#allocation8 + $0x1338] sm:$0xff] }
 0x4ea   :  { %8810 = vmatpush1.bf16.msra.mxu1 %v12409_v26  ;;  %8770 = vmatprep.subr.bf16.mxu0 %v12274_v22  ;;  %v2161_v58 = vld [vmem:[#allocation8 + $0x1718] sm:$0xff]  ;;  %v12370_v17 = vcombine.high %v2033_v54, %v2037_v57  ;;  %v12369_v7 = vcombine.low %v2033_v54, %v2037_v57 }
 0x4eb   :  { %8811 = vmatprep.subr.bf16.mxu1 %v12402_v2  ;;  %v2165_v15 = vld [vmem:[#allocation8 + $0x1738] sm:$0xff] }
 0x4ec   :  { %v12498_v4 = vcombine.high %v2161_v58, %v2165_v15  ;;  %v2025_v5 = vld [vmem:[#allocation8 + $0x12d8] sm:$0xff]  ;;  %v12497_v16 = vcombine.low %v2161_v58, %v2165_v15 }
 0x4ed   :  { %8771 = vmatpush1.bf16.msra.mxu0 %v12273_v62  ;;  %v2029_v47 = vld [vmem:[#allocation8 + $0x12f8] sm:$0xff] }
 0x4ee   :  { %8812 = vmatpush1.bf16.msra.mxu1 %v12401_v33  ;;  %8772 = vmatprep.subr.bf16.mxu0 %v12394_v31  ;;  %v2153_v6 = vld [vmem:[#allocation8 + $0x16d8] sm:$0xff]  ;;  %v12362_v44 = vcombine.high %v2025_v5, %v2029_v47  ;;  %v12361_v22 = vcombine.low %v2025_v5, %v2029_v47 }
 0x4ef   :  { %8813 = vmatprep.subr.bf16.mxu1 %v12522_v29  ;;  %v2157_v28 = vld [vmem:[#allocation8 + $0x16f8] sm:$0xff] }
 0x4f0   :  { %v12490_v10 = vcombine.high %v2153_v6, %v2157_v28  ;;  %v2017_v14 = vld [vmem:[#allocation8 + $0x1298] sm:$0xff]  ;;  %v12489_v2 = vcombine.low %v2153_v6, %v2157_v28 }
 0x4f1   :  { %8773 = vmatpush2.bf16.msra.mxu0 %v12393_v12  ;;  %v2021_v23 = vld [vmem:[#allocation8 + $0x12b8] sm:$0xff] }
 0x4f2   :  { %8814 = vmatpush2.bf16.msra.mxu1 %v12521_v11  ;;  %8774 = vmatprep.subr.bf16.mxu0 %v12386_v46  ;;  %v2145_v24 = vld [vmem:[#allocation8 + $0x1698] sm:$0xff]  ;;  %v12354_v56 = vcombine.high %v2017_v14, %v2021_v23  ;;  %v12353_v31 = vcombine.low %v2017_v14, %v2021_v23 }
 0x4f3   :  { %8815 = vmatprep.subr.bf16.mxu1 %v12514_v42  ;;  %v2149_v26 = vld [vmem:[#allocation8 + $0x16b8] sm:$0xff] }
 0x4f4   :  { %v12482_v27 = vcombine.high %v2145_v24, %v2149_v26  ;;  %v2009_v9 = vld [vmem:[#allocation8 + $0x1258] sm:$0xff]  ;;  %v12481_v29 = vcombine.low %v2145_v24, %v2149_v26 }
 0x4f5   :  { %8775 = vmatpush2.bf16.msra.mxu0 %v12385_v49  ;;  %v2013_v35 = vld [vmem:[#allocation8 + $0x1278] sm:$0xff] }
 0x4f6   :  { %8816 = vmatpush2.bf16.msra.mxu1 %v12513_v48  ;;  %8776 = vmatprep.subr.bf16.mxu0 %v12378_v50  ;;  %v2137_v62 = vld [vmem:[#allocation8 + $0x1658] sm:$0xff]  ;;  %v12346_v30 = vcombine.high %v2009_v9, %v2013_v35  ;;  %v12345_v46 = vcombine.low %v2009_v9, %v2013_v35 }
 0x4f7   :  { %8817 = vmatprep.subr.bf16.mxu1 %v12506_v51  ;;  %v2141_v33 = vld [vmem:[#allocation8 + $0x1678] sm:$0xff] }
 0x4f8   :  { %v12474_v53 = vcombine.high %v2137_v62, %v2141_v33  ;;  %v2001_v13 = vld [vmem:[#allocation8 + $0x1218] sm:$0xff]  ;;  %v12473_v42 = vcombine.low %v2137_v62, %v2141_v33 }
 0x4f9   :  { %8777 = vmatpush2.bf16.msra.mxu0 %v12377_v60  ;;  %v2005_v37 = vld [vmem:[#allocation8 + $0x1238] sm:$0xff] }
 0x4fa   :  { %8818 = vmatpush2.bf16.msra.mxu1 %v12505_v63  ;;  %8778 = vmatprep.subr.bf16.mxu0 %v12370_v17  ;;  %v2129_v12 = vld [vmem:[#allocation8 + $0x1618] sm:$0xff]  ;;  %v12338_v39 = vcombine.high %v2001_v13, %v2005_v37  ;;  %v12337_v50 = vcombine.low %v2001_v13, %v2005_v37 }
 0x4fb   :  { %8819 = vmatprep.subr.bf16.mxu1 %v12498_v4  ;;  %v2133_v11 = vld [vmem:[#allocation8 + $0x1638] sm:$0xff] }
 0x4fc   :  { %v12466_v45 = vcombine.high %v2129_v12, %v2133_v11  ;;  %v2249_v41 = vld [vmem:[#allocation8 + $0x19d8] sm:$0xff]  ;;  %v12465_v51 = vcombine.low %v2129_v12, %v2133_v11 }
 0x4fd   :  { %8779 = vmatpush2.bf16.msra.mxu0 %v12369_v7  ;;  %v2253_v32 = vld [vmem:[#allocation8 + $0x19f8] sm:$0xff] }
 0x4fe   :  { %8820 = vmatpush2.bf16.msra.mxu1 %v12497_v16  ;;  %8780 = vmatprep.subr.bf16.mxu0 %v12362_v44  ;;  %v2377_v49 = vld [vmem:[#allocation8 + $0x1dd8] sm:$0xff]  ;;  %v12586_v54 = vcombine.high %v2249_v41, %v2253_v32  ;;  %v12585_v60 = vcombine.low %v2249_v41, %v2253_v32 }
 0x4ff   :  { %8821 = vmatprep.subr.bf16.mxu1 %v12490_v10  ;;  %v2381_v48 = vld [vmem:[#allocation8 + $0x1df8] sm:$0xff] }
 0x500   :  { %v12714_v57 = vcombine.high %v2377_v49, %v2381_v48  ;;  %v2241_v58 = vld [vmem:[#allocation8 + $0x1998] sm:$0xff]  ;;  %v12713_v4 = vcombine.low %v2377_v49, %v2381_v48 }
 0x501   :  { %8781 = vmatpush2.bf16.msra.mxu0 %v12361_v22  ;;  %v2245_v15 = vld [vmem:[#allocation8 + $0x19b8] sm:$0xff] }
 0x502   :  { %8822 = vmatpush2.bf16.msra.mxu1 %v12489_v2  ;;  %8782 = vmatprep.subr.bf16.mxu0 %v12354_v56  ;;  %v2369_v63 = vld [vmem:[#allocation8 + $0x1d98] sm:$0xff]  ;;  %v12578_v5 = vcombine.high %v2241_v58, %v2245_v15  ;;  %v12577_v23 = vcombine.low %v2241_v58, %v2245_v15 }
 0x503   :  { %8823 = vmatprep.subr.bf16.mxu1 %v12482_v27  ;;  %v2373_v17 = vld [vmem:[#allocation8 + $0x1db8] sm:$0xff] }
 0x504   :  { %v2233_v47 = vld [vmem:[#allocation8 + $0x1958] sm:$0xff]  ;;  %v12706_v7 = vcombine.high %v2369_v63, %v2373_v17  ;;  %v12705_v26 = vcombine.low %v2369_v63, %v2373_v17 }
 0x505   :  { %8783 = vmatpush2.bf16.msra.mxu0 %v12353_v31  ;;  %v2237_v6 = vld [vmem:[#allocation8 + $0x1978] sm:$0xff] }
 0x506   :  { %8824 = vmatpush2.bf16.msra.mxu1 %v12481_v29  ;;  %8784 = vmatprep.subr.bf16.mxu0 %v12346_v30  ;;  %v2361_v16 = vld [vmem:[#allocation8 + $0x1d58] sm:$0xff]  ;;  %v12570_v22 = vcombine.high %v2233_v47, %v2237_v6  ;;  %v12569_v31 = vcombine.low %v2233_v47, %v2237_v6 }
 0x507   :  { %8825 = vmatprep.subr.bf16.mxu1 %v12474_v53  ;;  %v2365_v44 = vld [vmem:[#allocation8 + $0x1d78] sm:$0xff] }
 0x508   :  { %v2225_v27 = vld [vmem:[#allocation8 + $0x1918] sm:$0xff] }
 0x509   :  { %8785 = vmatpush2.bf16.msra.mxu0 %v12345_v46  ;;  %v2229_v9 = vld [vmem:[#allocation8 + $0x1938] sm:$0xff] }
 0x50a   :  { %8826 = vmatpush2.bf16.msra.mxu1 %v12473_v42  ;;  %8786 = vmatprep.subr.bf16.mxu0 %v12338_v39  ;;  %v2353_v35 = vld [vmem:[#allocation8 + $0x1d18] sm:$0xff]  ;;  %v12562_v30 = vcombine.high %v2225_v27, %v2229_v9  ;;  %v12561_v46 = vcombine.low %v2225_v27, %v2229_v9 }
 0x50b   :  { %8827 = vmatprep.subr.bf16.mxu1 %v12466_v45  ;;  %v2357_v62 = vld [vmem:[#allocation8 + $0x1d38] sm:$0xff] }
 0x50c   :  { %v12690_v53 = vcombine.high %v2353_v35, %v2357_v62  ;;  %v2217_v13 = vld [vmem:[#allocation8 + $0x18d8] sm:$0xff]  ;;  %v12689_v42 = vcombine.low %v2353_v35, %v2357_v62 }
 0x50d   :  { %8787 = vmatpush2.bf16.msra.mxu0 %v12337_v50  ;;  %v2221_v37 = vld [vmem:[#allocation8 + $0x18f8] sm:$0xff] }
 0x50e   :  { %8828 = vmatpush2.bf16.msra.mxu1 %v12465_v51  ;;  %8838 = vmatprep.subr.bf16.mxu0 %v12586_v54  ;;  %v2345_v12 = vld [vmem:[#allocation8 + $0x1cd8] sm:$0xff]  ;;  %v12554_v39 = vcombine.high %v2217_v13, %v2221_v37  ;;  %v12553_v50 = vcombine.low %v2217_v13, %v2221_v37 }
 0x50f   :  { %8879 = vmatprep.subr.bf16.mxu1 %v12714_v57  ;;  %v2349_v11 = vld [vmem:[#allocation8 + $0x1cf8] sm:$0xff] }
 0x510   :  { %v8544_v28 = vpop.f32.mrf.mxu0  ;;  %8789 = vmatmul.mubr.bf16.vlgmr.msra.gmra.mxu0 %v14293_v40  ;;  %v12682_v45 = vcombine.high %v2345_v12, %v2349_v11  ;;  %v2209_v41 = vld [vmem:[#allocation8 + $0x1898] sm:$0xff]  ;;  %v12681_v51 = vcombine.low %v2345_v12, %v2349_v11 }
 0x511   :  { %v8545_v10 = vadd.f32 %v8544_v28, %v14415_v61  ;;  %v8585_v14 = vpop.f32.mrf.mxu1  ;;  %8830 = vmatmul.mubr.bf16.vlgmr.msra.gmra.mxu1 %v14295_v43  ;;  %8839 = vmatpush1.bf16.msra.mxu0 %v12585_v60  ;;  %v12698_v61 = vcombine.high %v2361_v16, %v2365_v44  ;;  %v2213_v32 = vld [vmem:[#allocation8 + $0x18b8] sm:$0xff] }
 0x512   :  { %8870 = vmatprep.mubr.bf16.mxu0 %v14297_v0  ;;  %8880 = vmatpush1.bf16.msra.mxu1 %v12713_v4  ;;  %v8546_v24 = vpop.f32.mrf.mxu0  ;;  %v2337_v49 = vld [vmem:[#allocation8 + $0x1c98] sm:$0xff]  ;;  %v12546_v54 = vcombine.high %v2209_v41, %v2213_v32  ;;  %v12545_v17 = vcombine.low %v2209_v41, %v2213_v32 }
 0x513   :  { %v14425_v2 = vadd.f32 %v8585_v14, %v8545_v10  ;;  %8911 = vmatprep.mubr.bf16.mxu1 %v14299_v52  ;;  %v8547_v40 = vadd.f32 %v8546_v24, %v14419_v8  ;;  %v8587_v56 = vpop.f32.mrf.mxu1  ;;  %8840 = vmatprep.subr.bf16.mxu0 %v12578_v5  ;;  %v12697_v52 = vcombine.low %v2361_v16, %v2365_v44  ;;  %v2341_v48 = vld [vmem:[#allocation8 + $0x1cb8] sm:$0xff] }
 0x514   :  { %v8548_v43 = vpop.f32.mrf.mxu0  ;;  %8881 = vmatprep.subr.bf16.mxu1 %v12706_v7  ;;  %v12674_v57 = vcombine.high %v2337_v49, %v2341_v48  ;;  %v2201_v58 = vld [vmem:[#allocation8 + $0x1858] sm:$0xff]  ;;  %v12673_v4 = vcombine.low %v2337_v49, %v2341_v48 }
 0x515   :  { %v14429_v0 = vadd.f32 %v8587_v56, %v8547_v40  ;;  %v8589_v33 = vpop.f32.mrf.mxu1  ;;  %8841 = vmatpush1.bf16.msra.mxu0 %v12577_v23  ;;  %v2205_v15 = vld [vmem:[#allocation8 + $0x1878] sm:$0xff] }
 0x516   :  { %8882 = vmatpush1.bf16.msra.mxu1 %v12705_v26  ;;  %v8549_v29 = vpop.f32.mrf.mxu0  ;;  %8842 = vmatprep.subr.bf16.mxu0 %v12570_v22  ;;  %v2329_v60 = vld [vmem:[#allocation8 + $0x1c58] sm:$0xff]  ;;  %v12538_v5 = vcombine.high %v2201_v58, %v2205_v15  ;;  %v12537_v44 = vcombine.low %v2201_v58, %v2205_v15 }
 0x517   :  { %v8590_v8 = vpop.f32.mrf.mxu1  ;;  %8883 = vmatprep.subr.bf16.mxu1 %v12698_v61  ;;  %v2333_v63 = vld [vmem:[#allocation8 + $0x1c78] sm:$0xff] }
 0x518   :  { %v12666_v47 = vcombine.high %v2329_v60, %v2333_v63  ;;  %v2193_v6 = vld [vmem:[#allocation8 + $0x1818] sm:$0xff]  ;;  %v12665_v10 = vcombine.low %v2329_v60, %v2333_v63 }
 0x519   :  { %8843 = vmatpush1.bf16.msra.mxu0 %v12569_v31  ;;  %v2197_v28 = vld [vmem:[#allocation8 + $0x1838] sm:$0xff] }
 0x51a   :  { %8884 = vmatpush1.bf16.msra.mxu1 %v12697_v52  ;;  %8844 = vmatprep.subr.bf16.mxu0 %v12562_v30  ;;  %v2321_v7 = vld [vmem:[#allocation8 + $0x1c18] sm:$0xff]  ;;  %v12530_v14 = vcombine.high %v2193_v6, %v2197_v28  ;;  %v12529_v56 = vcombine.low %v2193_v6, %v2197_v28 }
 0x51b   :  { %8885 = vmatprep.subr.bf16.mxu1 %v12690_v53  ;;  %v2325_v16 = vld [vmem:[#allocation8 + $0x1c38] sm:$0xff] }
 0x51c   :  { %v12658_v23 = vcombine.high %v2321_v7, %v2325_v16  ;;  %v2313_v24 = vld [vmem:[#allocation8 + $0x1bd8] sm:$0xff]  ;;  %v12657_v61 = vcombine.low %v2321_v7, %v2325_v16 }
 0x51d   :  { %8845 = vmatpush1.bf16.msra.mxu0 %v12561_v46  ;;  %v2317_v26 = vld [vmem:[#allocation8 + $0x1bf8] sm:$0xff] }
 0x51e   :  { %8886 = vmatpush1.bf16.msra.mxu1 %v12689_v42  ;;  %8846 = vmatprep.subr.bf16.mxu0 %v12554_v39  ;;  %v2441_v22 = vld [vmem:[#allocation8 + $0x1fd8] sm:$0xff]  ;;  %v12650_v27 = vcombine.high %v2313_v24, %v2317_v26  ;;  %v12649_v31 = vcombine.low %v2313_v24, %v2317_v26 }
 0x51f   :  { %8887 = vmatprep.subr.bf16.mxu1 %v12682_v45  ;;  %v2445_v40 = vld [vmem:[#allocation8 + $0x1ff8] sm:$0xff] }
 0x520   :  { %v12778_v9 = vcombine.high %v2441_v22, %v2445_v40  ;;  %v2305_v43 = vld [vmem:[#allocation8 + $0x1b98] sm:$0xff]  ;;  %v12777_v29 = vcombine.low %v2441_v22, %v2445_v40 }
 0x521   :  { %8847 = vmatpush1.bf16.msra.mxu0 %v12553_v50  ;;  %v2309_v35 = vld [vmem:[#allocation8 + $0x1bb8] sm:$0xff] }
 0x522   :  { %8888 = vmatpush1.bf16.msra.mxu1 %v12681_v51  ;;  %8848 = vmatprep.subr.bf16.mxu0 %v12546_v54  ;;  %v2433_v62 = vld [vmem:[#allocation8 + $0x1f98] sm:$0xff]  ;;  %v12642_v52 = vcombine.high %v2305_v43, %v2309_v35  ;;  %v12641_v12 = vcombine.low %v2305_v43, %v2309_v35 }
 0x523   :  { %8889 = vmatprep.subr.bf16.mxu1 %v12674_v57  ;;  %v2437_v33 = vld [vmem:[#allocation8 + $0x1fb8] sm:$0xff] }
 0x524   :  { %v12770_v30 = vcombine.high %v2433_v62, %v2437_v33  ;;  %v2297_v8 = vld [vmem:[#allocation8 + $0x1b58] sm:$0xff]  ;;  %v12769_v11 = vcombine.low %v2433_v62, %v2437_v33 }
 0x525   :  { %8849 = vmatpush1.bf16.msra.mxu0 %v12545_v17  ;;  %v2301_v53 = vld [vmem:[#allocation8 + $0x1b78] sm:$0xff] }
 0x526   :  { %8890 = vmatpush1.bf16.msra.mxu1 %v12673_v4  ;;  %8850 = vmatprep.subr.bf16.mxu0 %v12538_v5  ;;  %v2425_v13 = vld [vmem:[#allocation8 + $0x1f58] sm:$0xff]  ;;  %v12634_v46 = vcombine.high %v2297_v8, %v2301_v53  ;;  %v12633_v49 = vcombine.low %v2297_v8, %v2301_v53 }
 0x527   :  { %8891 = vmatprep.subr.bf16.mxu1 %v12666_v47  ;;  %v2429_v37 = vld [vmem:[#allocation8 + $0x1f78] sm:$0xff] }
 0x528   :  { %v12762_v42 = vcombine.high %v2425_v13, %v2429_v37  ;;  %v2289_v39 = vld [vmem:[#allocation8 + $0x1b18] sm:$0xff]  ;;  %v12761_v48 = vcombine.low %v2425_v13, %v2429_v37  ;;  %v8921_v13 = vmax.f32 %v14349_v34, 0.0  ;;  %v8923_v37 = vmax.f32 %v14389_v55, 0.0 }
 0x529   :  { %8851 = vmatpush1.bf16.msra.mxu0 %v12537_v44  ;;  %v2293_v45 = vld [vmem:[#allocation8 + $0x1b38] sm:$0xff] }
 0x52a   :  { %8892 = vmatpush1.bf16.msra.mxu1 %v12665_v10  ;;  %8852 = vmatprep.subr.bf16.mxu0 %v12530_v14  ;;  %v2417_v41 = vld [vmem:[#allocation8 + $0x1f18] sm:$0xff]  ;;  %v12626_v50 = vcombine.high %v2289_v39, %v2293_v45  ;;  %v12625_v60 = vcombine.low %v2289_v39, %v2293_v45 }
 0x52b   :  { %8893 = vmatprep.subr.bf16.mxu1 %v12658_v23  ;;  %v2421_v32 = vld [vmem:[#allocation8 + $0x1f38] sm:$0xff] }
 0x52c   :  { %v12754_v51 = vcombine.high %v2417_v41, %v2421_v32  ;;  %v2281_v54 = vld [vmem:[#allocation8 + $0x1ad8] sm:$0xff]  ;;  %v12753_v63 = vcombine.low %v2417_v41, %v2421_v32  ;;  %v14435_v41 = vpack.c.bf16 %v8921_v13, %v8921_v13 }
 0x52d   :  { %8853 = vmatpush1.bf16.msra.mxu0 %v12529_v56  ;;  %v2285_v57 = vld [vmem:[#allocation8 + $0x1af8] sm:$0xff] }
 0x52e   :  { %8894 = vmatpush1.bf16.msra.mxu1 %v12657_v61  ;;  %8854 = vmatprep.subr.bf16.mxu0 %v12650_v27  ;;  %v2409_v58 = vld [vmem:[#allocation8 + $0x1ed8] sm:$0xff]  ;;  %v12618_v17 = vcombine.high %v2281_v54, %v2285_v57  ;;  %v12617_v7 = vcombine.low %v2281_v54, %v2285_v57 }
 0x52f   :  { %8895 = vmatprep.subr.bf16.mxu1 %v12778_v9  ;;  %v2413_v15 = vld [vmem:[#allocation8 + $0x1ef8] sm:$0xff] }
 0x530   :  { %v12746_v4 = vcombine.high %v2409_v58, %v2413_v15  ;;  %v2273_v5 = vld [vmem:[#allocation8 + $0x1a98] sm:$0xff]  ;;  %v12745_v16 = vcombine.low %v2409_v58, %v2413_v15 }
 0x531   :  { %8855 = vmatpush2.bf16.msra.mxu0 %v12649_v31  ;;  %v2277_v47 = vld [vmem:[#allocation8 + $0x1ab8] sm:$0xff] }
 0x532   :  { %8896 = vmatpush2.bf16.msra.mxu1 %v12777_v29  ;;  %8856 = vmatprep.subr.bf16.mxu0 %v12642_v52  ;;  %v2401_v6 = vld [vmem:[#allocation8 + $0x1e98] sm:$0xff]  ;;  %v12610_v44 = vcombine.high %v2273_v5, %v2277_v47  ;;  %v12609_v22 = vcombine.low %v2273_v5, %v2277_v47 }
 0x533   :  { %8897 = vmatprep.subr.bf16.mxu1 %v12770_v30  ;;  %v2405_v28 = vld [vmem:[#allocation8 + $0x1eb8] sm:$0xff] }
 0x534   :  { %v12738_v10 = vcombine.high %v2401_v6, %v2405_v28  ;;  %v2265_v14 = vld [vmem:[#allocation8 + $0x1a58] sm:$0xff]  ;;  %v12737_v40 = vcombine.low %v2401_v6, %v2405_v28 }
 0x535   :  { %8857 = vmatpush2.bf16.msra.mxu0 %v12641_v12  ;;  %v2269_v23 = vld [vmem:[#allocation8 + $0x1a78] sm:$0xff]  ;;  %v13712_v12 = vld [vmem:[#allocation10] sm:$0xff] }
 0x536   :  { %8898 = vmatpush2.bf16.msra.mxu1 %v12769_v11  ;;  %8858 = vmatprep.subr.bf16.mxu0 %v12634_v46  ;;  %v2393_v24 = vld [vmem:[#allocation8 + $0x1e58] sm:$0xff]  ;;  %v12602_v56 = vcombine.high %v2265_v14, %v2269_v23  ;;  %v12601_v62 = vcombine.low %v2265_v14, %v2269_v23  ;;  %v2475_v11 = vrot.slane %v13712_v12, %v14236_v59 }
 0x537   :  { %8899 = vmatprep.subr.bf16.mxu1 %v12762_v42  ;;  %v2397_v26 = vld [vmem:[#allocation8 + $0x1e78] sm:$0xff]  ;;  %v2479_v39 = vrot.slane %v13712_v12, %v14219_v36 }
 0x538   :  { %v12730_v61 = vcombine.high %v2393_v24, %v2397_v26  ;;  %v2257_v27 = vld [vmem:[#allocation8 + $0x1a18] sm:$0xff]  ;;  %v12729_v33 = vcombine.low %v2393_v24, %v2397_v26 }
 0x539   :  { %8859 = vmatpush2.bf16.msra.mxu0 %v12633_v49  ;;  %v2261_v9 = vld [vmem:[#allocation8 + $0x1a38] sm:$0xff]  ;;  %v14438_v49 = vpack.c.bf16 %v8923_v37, %v8923_v37 }
 0x53a   :  { %8900 = vmatpush2.bf16.msra.mxu1 %v12761_v48  ;;  %8860 = vmatprep.subr.bf16.mxu0 %v12626_v50  ;;  %v2385_v43 = vld [vmem:[#allocation8 + $0x1e18] sm:$0xff]  ;;  %v12594_v31 = vcombine.high %v2257_v27, %v2261_v9  ;;  %v12593_v52 = vcombine.low %v2257_v27, %v2261_v9 }
 0x53b   :  { %8901 = vmatprep.subr.bf16.mxu1 %v12754_v51  ;;  %v2389_v35 = vld [vmem:[#allocation8 + $0x1e38] sm:$0xff] }
 0x53c   :  { %v12722_v29 = vcombine.high %v2385_v43, %v2389_v35  ;;  %v12721_v30 = vcombine.low %v2385_v43, %v2389_v35  ;;  %v13204_v8 = vld [vmem:[#allocation11 + $0xe4] ss:$16 sps:$4 sm:$0xff]   ;;  %v13202_v46 = vld [vmem:[#allocation11 + $0xe0] ss:$16 sps:$4 sm:$0xff]  }
 0x53d   :  { %8861 = vmatpush2.bf16.msra.mxu0 %v12625_v60  ;;  %v13207_v53 = vld [vmem:[#allocation11 + $0x2e4] ss:$16 sps:$4 sm:$0xff]   ;;  %v13205_v42 = vld [vmem:[#allocation11 + $0x2e0] ss:$16 sps:$4 sm:$0xff]  }
 0x53e   :  { %8902 = vmatpush2.bf16.msra.mxu1 %v12753_v63  ;;  %8862 = vmatprep.subr.bf16.mxu0 %v12618_v17  ;;  %v13210_v45 = vld [vmem:[#allocation11 + $0xc4] ss:$16 sps:$4 sm:$0xff]   ;;  %v13208_v59 = vld [vmem:[#allocation11 + $0xc0] ss:$16 sps:$4 sm:$0xff]  }
 0x53f   :  { %8903 = vmatprep.subr.bf16.mxu1 %v12746_v4  ;;  %v13213_v34 = vld [vmem:[#allocation11 + $0x2c4] ss:$16 sps:$4 sm:$0xff]   ;;  %v13211_v36 = vld [vmem:[#allocation11 + $0x2c0] ss:$16 sps:$4 sm:$0xff]  }
 0x540   :  { %v13216_v51 = vld [vmem:[#allocation11 + $0xa4] ss:$16 sps:$4 sm:$0xff]   ;;  %v13214_v63 = vld [vmem:[#allocation11 + $0xa0] ss:$16 sps:$4 sm:$0xff]  }
 0x541   :  { %8863 = vmatpush2.bf16.msra.mxu0 %v12617_v7  ;;  %v13219_v58 = vld [vmem:[#allocation11 + $0x2a4] ss:$16 sps:$4 sm:$0xff]   ;;  %v13217_v4 = vld [vmem:[#allocation11 + $0x2a0] ss:$16 sps:$4 sm:$0xff]  }
 0x542   :  { %8904 = vmatpush2.bf16.msra.mxu1 %v12745_v16  ;;  %8864 = vmatprep.subr.bf16.mxu0 %v12610_v44  ;;  %v13222_v5 = vld [vmem:[#allocation11 + $0x84] ss:$16 sps:$4 sm:$0xff]   ;;  %v13220_v28 = vld [vmem:[#allocation11 + $0x80] ss:$16 sps:$4 sm:$0xff]  }
 0x543   :  { %8905 = vmatprep.subr.bf16.mxu1 %v12738_v10  ;;  %v13225_v6 = vld [vmem:[#allocation11 + $0x284] ss:$16 sps:$4 sm:$0xff]   ;;  %v13223_v7 = vld [vmem:[#allocation11 + $0x280] ss:$16 sps:$4 sm:$0xff]  }
 0x544   :  { %v13228_v16 = vld [vmem:[#allocation11 + $0x64] ss:$16 sps:$4 sm:$0xff]   ;;  %v13226_v10 = vld [vmem:[#allocation11 + $0x60] ss:$16 sps:$4 sm:$0xff]  }
 0x545   :  { %8865 = vmatpush2.bf16.msra.mxu0 %v12609_v22  ;;  %v13231_v44 = vld [vmem:[#allocation11 + $0x264] ss:$16 sps:$4 sm:$0xff]   ;;  %v13229_v14 = vld [vmem:[#allocation11 + $0x260] ss:$16 sps:$4 sm:$0xff]  }
 0x546   :  { %8906 = vmatpush2.bf16.msra.mxu1 %v12737_v40  ;;  %8866 = vmatprep.subr.bf16.mxu0 %v12602_v56  ;;  %v13234_v23 = vld [vmem:[#allocation11 + $0x44] ss:$16 sps:$4 sm:$0xff]   ;;  %v13232_v26 = vld [vmem:[#allocation11 + $0x40] ss:$16 sps:$4 sm:$0xff]  }
 0x547   :  { %8907 = vmatprep.subr.bf16.mxu1 %v12730_v61  ;;  %v13237_v24 = vld [vmem:[#allocation11 + $0x244] ss:$16 sps:$4 sm:$0xff]   ;;  %v13235_v22 = vld [vmem:[#allocation11 + $0x240] ss:$16 sps:$4 sm:$0xff]  }
 0x548   :  { %v13240_v40 = vld [vmem:[#allocation11 + $0x24] ss:$16 sps:$4 sm:$0xff]   ;;  %v13238_v61 = vld [vmem:[#allocation11 + $0x20] ss:$16 sps:$4 sm:$0xff]  }
 0x549   :  { %8867 = vmatpush2.bf16.msra.mxu0 %v12601_v62  ;;  %v13243_v56 = vld [vmem:[#allocation11 + $0x224] ss:$16 sps:$4 sm:$0xff]   ;;  %v13241_v27 = vld [vmem:[#allocation11 + $0x220] ss:$16 sps:$4 sm:$0xff]  }
 0x54a   :  { %8908 = vmatpush2.bf16.msra.mxu1 %v12729_v33  ;;  %8868 = vmatprep.subr.bf16.mxu0 %v12594_v31  ;;  %v13246_v9 = vld [vmem:[#allocation11 + $0x4] ss:$16 sps:$4 sm:$0xff]   ;;  %v13244_v35 = vld [vmem:[#allocation11] ss:$16 sps:$4 sm:$0xff]  }
 0x54b   :  { %8909 = vmatprep.subr.bf16.mxu1 %v12722_v29  ;;  %v13249_v43 = vld [vmem:[#allocation11 + $0x204] ss:$16 sps:$4 sm:$0xff]   ;;  %v13247_v62 = vld [vmem:[#allocation11 + $0x200] ss:$16 sps:$4 sm:$0xff]  }
 0x54c   :  { %v13252_v33 = vld [vmem:[#allocation11 + $0x1e4] ss:$16 sps:$4 sm:$0xff]   ;;  %v13250_v29 = vld [vmem:[#allocation11 + $0x1e0] ss:$16 sps:$4 sm:$0xff]  }
 0x54d   :  { %8869 = vmatpush2.bf16.msra.mxu0 %v12593_v52  ;;  %v13255_v31 = vld [vmem:[#allocation11 + $0x3e4] ss:$16 sps:$4 sm:$0xff]   ;;  %v13253_v52 = vld [vmem:[#allocation11 + $0x3e0] ss:$16 sps:$4 sm:$0xff]  }
 0x54e   :  { %8910 = vmatpush2.bf16.msra.mxu1 %v12721_v30  ;;  %10494 = vmatprep.subr.bf16.mxu0 %v13204_v8  ;;  %v13258_v30 = vld [vmem:[#allocation11 + $0x1c4] ss:$16 sps:$4 sm:$0xff]   ;;  %v13259_v13 = vld [vmem:[#allocation11 + $0x3c0] ss:$16 sps:$4 sm:$0xff]  }
 0x54f   :  { %10535 = vmatprep.subr.bf16.mxu1 %v13207_v53  ;;  %v13261_v8 = vld [vmem:[#allocation11 + $0x3c4] ss:$16 sps:$4 sm:$0xff]   ;;  %v13256_v53 = vld [vmem:[#allocation11 + $0x1c0] ss:$16 sps:$4 sm:$0xff]  }
 0x550   :  { %v8626_v32 = vpop.f32.mrf.mxu0  ;;  %8871 = vmatmul.mubr.bf16.vlgmr.msra.gmra.mxu0 %v14308_v1  ;;  %v13264_v37 = vld [vmem:[#allocation11 + $0x1a4] ss:$16 sps:$4 sm:$0xff]  }
 0x551   :  { %v8627_v55 = vadd.f32 %v8626_v32, %v2475_v11  ;;  %v8667_v48 = vpop.f32.mrf.mxu1  ;;  %8912 = vmatmul.mubr.bf16.vlgmr.msra.gmra.mxu1 %v14310_v3  ;;  %10495 = vmatpush1.bf16.msra.mxu0 %v13202_v46  ;;  %v13267_v12 = vld [vmem:[#allocation11 + $0x3a4] ss:$16 sps:$4 sm:$0xff]   ;;  %v13262_v11 = vld [vmem:[#allocation11 + $0x1a0] ss:$16 sps:$4 sm:$0xff]  }
 0x552   :  { %10526 = vmatprep.mubr.bf16.mxu0 %v14435_v41  ;;  %10536 = vmatpush1.bf16.msra.mxu1 %v13205_v42  ;;  %v8628_v50 = vpop.f32.mrf.mxu0  ;;  %v13265_v46 = vld [vmem:[#allocation11 + $0x3a0] ss:$16 sps:$4 sm:$0xff]   ;;  %v13270_v42 = vld [vmem:[#allocation11 + $0x184] ss:$16 sps:$4 sm:$0xff]  }
 0x553   :  { %v14442_v54 = vadd.f32 %v8667_v48, %v8627_v55  ;;  %10567 = vmatprep.mubr.bf16.mxu1 %v14438_v49  ;;  %v8629_v1 = vadd.f32 %v8628_v50, %v2479_v39  ;;  %v8669_v57 = vpop.f32.mrf.mxu1  ;;  %10496 = vmatprep.subr.bf16.mxu0 %v13210_v45  ;;  %v13273_v39 = vld [vmem:[#allocation11 + $0x384] ss:$16 sps:$4 sm:$0xff]   ;;  %v13268_v45 = vld [vmem:[#allocation11 + $0x180] ss:$16 sps:$4 sm:$0xff]  }
 0x554   :  { %v8630_v15 = vpop.f32.mrf.mxu0  ;;  %10537 = vmatprep.subr.bf16.mxu1 %v13213_v34  ;;  %v13271_v32 = vld [vmem:[#allocation11 + $0x380] ss:$16 sps:$4 sm:$0xff]   ;;  %v13276_v34 = vld [vmem:[#allocation11 + $0x164] ss:$16 sps:$4 sm:$0xff]  }
 0x555   :  { %v14445_v60 = vadd.f32 %v8669_v57, %v8629_v1  ;;  %v8671_v3 = vpop.f32.mrf.mxu1  ;;  %10497 = vmatpush1.bf16.msra.mxu0 %v13208_v59  ;;  %v13279_v55 = vld [vmem:[#allocation11 + $0x364] ss:$16 sps:$4 sm:$0xff]   ;;  %v13274_v48 = vld [vmem:[#allocation11 + $0x160] ss:$16 sps:$4 sm:$0xff]  }
 0x556   :  { %10538 = vmatpush1.bf16.msra.mxu1 %v13211_v36  ;;  %v8631_v17 = vpop.f32.mrf.mxu0  ;;  %10498 = vmatprep.subr.bf16.mxu0 %v13216_v51  ;;  %v13277_v59 = vld [vmem:[#allocation11 + $0x360] ss:$16 sps:$4 sm:$0xff]   ;;  %v13282_v50 = vld [vmem:[#allocation11 + $0x144] ss:$16 sps:$4 sm:$0xff]  }
 0x557   :  { %v8672_v47 = vpop.f32.mrf.mxu1  ;;  %10539 = vmatprep.subr.bf16.mxu1 %v13219_v58  ;;  %v13285_v36 = vld [vmem:[#allocation11 + $0x344] ss:$16 sps:$4 sm:$0xff]   ;;  %v13280_v51 = vld [vmem:[#allocation11 + $0x140] ss:$16 sps:$4 sm:$0xff]  }
 0x558   :  { %v13283_v1 = vld [vmem:[#allocation11 + $0x340] ss:$16 sps:$4 sm:$0xff]   ;;  %v13288_v57 = vld [vmem:[#allocation11 + $0x124] ss:$16 sps:$4 sm:$0xff]  }
 0x559   :  { %10499 = vmatpush1.bf16.msra.mxu0 %v13214_v63  ;;  %v13291_v58 = vld [vmem:[#allocation11 + $0x324] ss:$16 sps:$4 sm:$0xff]   ;;  %v13286_v15 = vld [vmem:[#allocation11 + $0x120] ss:$16 sps:$4 sm:$0xff]  }
 0x55a   :  { %10540 = vmatpush1.bf16.msra.mxu1 %v13217_v4  ;;  %10500 = vmatprep.subr.bf16.mxu0 %v13222_v5  ;;  %v13289_v3 = vld [vmem:[#allocation11 + $0x320] ss:$16 sps:$4 sm:$0xff]   ;;  %v13294_v63 = vld [vmem:[#allocation11 + $0x104] ss:$16 sps:$4 sm:$0xff]   ;;  %v8920_v5 = vmax.f32 %v14345_v25, 0.0 }
 0x55b   :  { %10541 = vmatprep.subr.bf16.mxu1 %v13225_v6  ;;  %v13297_v17 = vld [vmem:[#allocation11 + $0x304] ss:$16 sps:$4 sm:$0xff]   ;;  %v13292_v4 = vld [vmem:[#allocation11 + $0x100] ss:$16 sps:$4 sm:$0xff]  }
 0x55c   :  { %v13295_v47 = vld [vmem:[#allocation11 + $0x300] ss:$16 sps:$4 sm:$0xff]   ;;  %v13300_v6 = vld [vmem:[#allocation11 + $0x4e4] ss:$16 sps:$4 sm:$0xff]  }
 0x55d   :  { %10501 = vmatpush1.bf16.msra.mxu0 %v13220_v28  ;;  %v8922_v28 = vmax.f32 %v14385_v38, 0.0  ;;  %v13355_v25 = vld [vmem:[#allocation11 + $0x6e0] ss:$16 sps:$4 sm:$0xff]   ;;  %v13363_v38 = vld [vmem:[#allocation11 + $0x6c4] ss:$16 sps:$4 sm:$0xff]  }
 0x55e   :  { %10542 = vmatpush1.bf16.msra.mxu1 %v13223_v7  ;;  %10502 = vmatprep.subr.bf16.mxu0 %v13228_v16  ;;  %v13357_v7 = vld [vmem:[#allocation11 + $0x6e4] ss:$16 sps:$4 sm:$0xff]   ;;  %v8925_v16 = vmax.f32 %v14429_v0, 0.0 }
 0x55f   :  { %10543 = vmatprep.subr.bf16.mxu1 %v13231_v44  ;;  %v13298_v44 = vld [vmem:[#allocation11 + $0x4e0] ss:$16 sps:$4 sm:$0xff]  }
 0x561   :  { %10503 = vmatpush1.bf16.msra.mxu0 %v13226_v10  ;;  %v14450_v10 = vpack.c.bf16 %v8920_v5, %v8920_v5  ;;  %v13325_v5 = vld [vmem:[#allocation11 + $0x5c0] ss:$16 sps:$4 sm:$0xff]  }
 0x562   :  { %10544 = vmatpush1.bf16.msra.mxu1 %v13229_v14  ;;  %10504 = vmatprep.subr.bf16.mxu0 %v13234_v23  ;;  %v13303_v14 = vld [vmem:[#allocation11 + $0x4c4] ss:$16 sps:$4 sm:$0xff]   ;;  %v14452_v23 = vpack.c.bf16 %v8922_v28, %v8922_v28 }
 0x563   :  { %10545 = vmatprep.subr.bf16.mxu1 %v13237_v24  ;;  %v14454_v24 = vpack.c.bf16 %v8925_v16, %v8925_v16  ;;  %v13417_v28 = vld [vmem:[#allocation11 + $0x7a4] ss:$16 sps:$4 sm:$0xff]  }
 0x564   :  { %v13333_v16 = vld [vmem:[#allocation11 + $0x584] ss:$16 sps:$4 sm:$0xff]  }
 0x565   :  { %10505 = vmatpush1.bf16.msra.mxu0 %v13232_v26 }
 0x566   :  { %10546 = vmatpush1.bf16.msra.mxu1 %v13235_v22  ;;  %10506 = vmatprep.subr.bf16.mxu0 %v13240_v40  ;;  %v13301_v40 = vld [vmem:[#allocation11 + $0x4c0] ss:$16 sps:$4 sm:$0xff]  }
 0x567   :  { %10547 = vmatprep.subr.bf16.mxu1 %v13243_v56 }
 0x569   :  { %10507 = vmatpush1.bf16.msra.mxu0 %v13238_v61  ;;  %v13306_v61 = vld [vmem:[#allocation11 + $0x4a4] ss:$16 sps:$4 sm:$0xff]  }
 0x56a   :  { %10548 = vmatpush1.bf16.msra.mxu1 %v13241_v27  ;;  %10508 = vmatprep.subr.bf16.mxu0 %v13246_v9 }
 0x56b   :  { %10549 = vmatprep.subr.bf16.mxu1 %v13249_v43 }
 0x56d   :  { %10509 = vmatpush1.bf16.msra.mxu0 %v13244_v35  ;;  %v13361_v35 = vld [vmem:[#allocation11 + $0x6c0] ss:$16 sps:$4 sm:$0xff]  }
 0x56e   :  { %10550 = vmatpush1.bf16.msra.mxu1 %v13247_v62  ;;  %10510 = vmatprep.subr.bf16.mxu0 %v13252_v33 }
 0x56f   :  { %10551 = vmatprep.subr.bf16.mxu1 %v13255_v31 }
 0x571   :  { %10511 = vmatpush2.bf16.msra.mxu0 %v13250_v29  ;;  %v13304_v29 = vld [vmem:[#allocation11 + $0x4a0] ss:$16 sps:$4 sm:$0xff]  }
 0x572   :  { %10552 = vmatpush2.bf16.msra.mxu1 %v13253_v52  ;;  %10512 = vmatprep.subr.bf16.mxu0 %v13258_v30  ;;  %v13309_v30 = vld [vmem:[#allocation11 + $0x484] ss:$16 sps:$4 sm:$0xff]  }
 0x573   :  { %10553 = vmatprep.subr.bf16.mxu1 %v13261_v8 }
 0x575   :  { %10513 = vmatpush2.bf16.msra.mxu0 %v13256_v53  ;;  %v13367_v53 = vld [vmem:[#allocation11 + $0x6a0] ss:$16 sps:$4 sm:$0xff]  }
 0x576   :  { %10554 = vmatpush2.bf16.msra.mxu1 %v13259_v13  ;;  %10514 = vmatprep.subr.bf16.mxu0 %v13264_v37  ;;  %v13375_v13 = vld [vmem:[#allocation11 + $0x684] ss:$16 sps:$4 sm:$0xff]  }
 0x577   :  { %10555 = vmatprep.subr.bf16.mxu1 %v13267_v12  ;;  %v13312_v37 = vld [vmem:[#allocation11 + $0x464] ss:$16 sps:$4 sm:$0xff]   ;;  %v13373_v12 = vld [vmem:[#allocation11 + $0x680] ss:$16 sps:$4 sm:$0xff]  }
 0x579   :  { %10515 = vmatpush2.bf16.msra.mxu0 %v13262_v11  ;;  %v13381_v11 = vld [vmem:[#allocation11 + $0x664] ss:$16 sps:$4 sm:$0xff]  }
 0x57a   :  { %10556 = vmatpush2.bf16.msra.mxu1 %v13265_v46  ;;  %10516 = vmatprep.subr.bf16.mxu0 %v13270_v42  ;;  %v13310_v46 = vld [vmem:[#allocation11 + $0x460] ss:$16 sps:$4 sm:$0xff]   ;;  %v13315_v42 = vld [vmem:[#allocation11 + $0x444] ss:$16 sps:$4 sm:$0xff]  }
 0x57b   :  { %10557 = vmatprep.subr.bf16.mxu1 %v13273_v39  ;;  %v13379_v39 = vld [vmem:[#allocation11 + $0x660] ss:$16 sps:$4 sm:$0xff]  }
 0x57d   :  { %10517 = vmatpush2.bf16.msra.mxu0 %v13268_v45  ;;  %v13387_v45 = vld [vmem:[#allocation11 + $0x644] ss:$16 sps:$4 sm:$0xff]  }
 0x57e   :  { %10558 = vmatpush2.bf16.msra.mxu1 %v13271_v32  ;;  %10518 = vmatprep.subr.bf16.mxu0 %v13276_v34  ;;  %v13313_v32 = vld [vmem:[#allocation11 + $0x440] ss:$16 sps:$4 sm:$0xff]   ;;  %v13318_v34 = vld [vmem:[#allocation11 + $0x424] ss:$16 sps:$4 sm:$0xff]  }
 0x57f   :  { %10559 = vmatprep.subr.bf16.mxu1 %v13279_v55  ;;  %v13385_v55 = vld [vmem:[#allocation11 + $0x640] ss:$16 sps:$4 sm:$0xff]  }
 0x581   :  { %10519 = vmatpush2.bf16.msra.mxu0 %v13274_v48  ;;  %v13393_v48 = vld [vmem:[#allocation11 + $0x624] ss:$16 sps:$4 sm:$0xff]  }
 0x582   :  { %10560 = vmatpush2.bf16.msra.mxu1 %v13277_v59  ;;  %10520 = vmatprep.subr.bf16.mxu0 %v13282_v50  ;;  %v13316_v59 = vld [vmem:[#allocation11 + $0x420] ss:$16 sps:$4 sm:$0xff]   ;;  %v13321_v50 = vld [vmem:[#allocation11 + $0x404] ss:$16 sps:$4 sm:$0xff]  }
 0x583   :  { %10561 = vmatprep.subr.bf16.mxu1 %v13285_v36  ;;  %v13391_v36 = vld [vmem:[#allocation11 + $0x620] ss:$16 sps:$4 sm:$0xff]  }
 0x585   :  { %10521 = vmatpush2.bf16.msra.mxu0 %v13280_v51  ;;  %v13399_v51 = vld [vmem:[#allocation11 + $0x604] ss:$16 sps:$4 sm:$0xff]  }
 0x586   :  { %10562 = vmatpush2.bf16.msra.mxu1 %v13283_v1  ;;  %10522 = vmatprep.subr.bf16.mxu0 %v13288_v57  ;;  %v13319_v1 = vld [vmem:[#allocation11 + $0x400] ss:$16 sps:$4 sm:$0xff]   ;;  %v13324_v57 = vld [vmem:[#allocation11 + $0x5e4] ss:$16 sps:$4 sm:$0xff]  }
 0x587   :  { %10563 = vmatprep.subr.bf16.mxu1 %v13291_v58  ;;  %v13397_v58 = vld [vmem:[#allocation11 + $0x600] ss:$16 sps:$4 sm:$0xff]  }
 0x589   :  { %10523 = vmatpush2.bf16.msra.mxu0 %v13286_v15  ;;  %v13405_v15 = vld [vmem:[#allocation11 + $0x7e4] ss:$16 sps:$4 sm:$0xff]  }
 0x58a   :  { %10564 = vmatpush2.bf16.msra.mxu1 %v13289_v3  ;;  %10524 = vmatprep.subr.bf16.mxu0 %v13294_v63  ;;  %v13322_v3 = vld [vmem:[#allocation11 + $0x5e0] ss:$16 sps:$4 sm:$0xff]   ;;  %v13327_v63 = vld [vmem:[#allocation11 + $0x5c4] ss:$16 sps:$4 sm:$0xff]  }
 0x58b   :  { %10565 = vmatprep.subr.bf16.mxu1 %v13297_v17  ;;  %v13403_v17 = vld [vmem:[#allocation11 + $0x7e0] ss:$16 sps:$4 sm:$0xff]  }
 0x58d   :  { %10525 = vmatpush2.bf16.msra.mxu0 %v13292_v4  ;;  %v13411_v4 = vld [vmem:[#allocation11 + $0x7c4] ss:$16 sps:$4 sm:$0xff]  }
 0x58e   :  { %10566 = vmatpush2.bf16.msra.mxu1 %v13295_v47  ;;  %10576 = vmatprep.subr.bf16.mxu0 %v13300_v6  ;;  %v13330_v47 = vld [vmem:[#allocation11 + $0x5a4] ss:$16 sps:$4 sm:$0xff]   ;;  %v13409_v6 = vld [vmem:[#allocation11 + $0x7c0] ss:$16 sps:$4 sm:$0xff]  }
 0x58f   :  { %10617 = vmatprep.subr.bf16.mxu1 %v13357_v7  ;;  %v13328_v7 = vld [vmem:[#allocation11 + $0x5a0] ss:$16 sps:$4 sm:$0xff]  }
 0x590   :  { %v8708_v26 = vpop.f32.mrf.mxu0  ;;  %10527 = vmatmul.mubr.bf16.vlgmr.msra.gmra.mxu0 %v14450_v10 }
 0x591   :  { %v8709_v22 = vadd.f32 %v8708_v26, %v14442_v54  ;;  %v8749_v0 = vpop.f32.mrf.mxu1  ;;  %10568 = vmatmul.mubr.bf16.vlgmr.msra.gmra.mxu1 %v14452_v23  ;;  %10577 = vmatpush1.bf16.msra.mxu0 %v13298_v44  ;;  %v13369_v54 = vld [vmem:[#allocation11 + $0x6a4] ss:$16 sps:$4 sm:$0xff]   ;;  %v13415_v44 = vld [vmem:[#allocation11 + $0x7a0] ss:$16 sps:$4 sm:$0xff]  }
 0x592   :  { %10608 = vmatprep.mubr.bf16.mxu0 %v14454_v24  ;;  %v8710_v56 = vpop.f32.mrf.mxu0  ;;  %10578 = vmatprep.subr.bf16.mxu0 %v13303_v14  ;;  %v13423_v14 = vld [vmem:[#allocation11 + $0x784] ss:$16 sps:$4 sm:$0xff]  }
 0x593   :  { %v14460_v27 = vadd.f32 %v8749_v0, %v8709_v22  ;;  %v8711_v9 = vadd.f32 %v8710_v56, %v14445_v60  ;;  %v8751_v43 = vpop.f32.mrf.mxu1  ;;  %10618 = vmatpush1.bf16.msra.mxu1 %v13355_v25  ;;  %v13307_v60 = vld [vmem:[#allocation11 + $0x480] ss:$16 sps:$4 sm:$0xff]   ;;  %v13336_v26 = vld [vmem:[#allocation11 + $0x564] ss:$16 sps:$4 sm:$0xff]  }
 0x594   :  { %v8712_v62 = vpop.f32.mrf.mxu0  ;;  %10619 = vmatprep.subr.bf16.mxu1 %v13363_v38  ;;  %v13331_v25 = vld [vmem:[#allocation11 + $0x580] ss:$16 sps:$4 sm:$0xff]   ;;  %v13429_v22 = vld [vmem:[#allocation11 + $0x764] ss:$16 sps:$4 sm:$0xff]  }
 0x595   :  { %v14463_v33 = vadd.f32 %v8751_v43, %v8711_v9  ;;  %v8753_v31 = vpop.f32.mrf.mxu1  ;;  %10579 = vmatpush1.bf16.msra.mxu0 %v13301_v40  ;;  %v13421_v38 = vld [vmem:[#allocation11 + $0x780] ss:$16 sps:$4 sm:$0xff]   ;;  %v13339_v40 = vld [vmem:[#allocation11 + $0x544] ss:$16 sps:$4 sm:$0xff]  }
 0x596   :  { %v8713_v52 = vpop.f32.mrf.mxu0  ;;  %10580 = vmatprep.subr.bf16.mxu0 %v13306_v61  ;;  %v13334_v0 = vld [vmem:[#allocation11 + $0x560] ss:$16 sps:$4 sm:$0xff]   ;;  %v13435_v61 = vld [vmem:[#allocation11 + $0x744] ss:$16 sps:$4 sm:$0xff]  }
 0x597   :  { %v8754_v8 = vpop.f32.mrf.mxu1  ;;  %10620 = vmatpush1.bf16.msra.mxu1 %v13361_v35  ;;  %v13427_v56 = vld [vmem:[#allocation11 + $0x760] ss:$16 sps:$4 sm:$0xff]   ;;  %v13342_v43 = vld [vmem:[#allocation11 + $0x524] ss:$16 sps:$4 sm:$0xff]  }
 0x598   :  { %10621 = vmatprep.subr.bf16.mxu1 %v13369_v54  ;;  %v13337_v9 = vld [vmem:[#allocation11 + $0x540] ss:$16 sps:$4 sm:$0xff]   ;;  %v13441_v62 = vld [vmem:[#allocation11 + $0x724] ss:$16 sps:$4 sm:$0xff]   ;;  %v8924_v8 = vmax.f32 %v14425_v2, 0.0 }
 0x599   :  { %10581 = vmatpush1.bf16.msra.mxu0 %v13304_v29  ;;  %v13433_v35 = vld [vmem:[#allocation11 + $0x740] ss:$16 sps:$4 sm:$0xff]   ;;  %v13345_v31 = vld [vmem:[#allocation11 + $0x504] ss:$16 sps:$4 sm:$0xff]  }
 0x59a   :  { %10582 = vmatprep.subr.bf16.mxu0 %v13309_v30  ;;  %v13340_v54 = vld [vmem:[#allocation11 + $0x520] ss:$16 sps:$4 sm:$0xff]   ;;  %v13447_v52 = vld [vmem:[#allocation11 + $0x704] ss:$16 sps:$4 sm:$0xff]  }
 0x59b   :  { %10622 = vmatpush1.bf16.msra.mxu1 %v13367_v53  ;;  %v13439_v29 = vld [vmem:[#allocation11 + $0x720] ss:$16 sps:$4 sm:$0xff]   ;;  %v13348_v53 = vld [vmem:[#allocation11 + $0xec] ss:$16 sps:$4 sm:$0xff]  }
 0x59c   :  { %10623 = vmatprep.subr.bf16.mxu1 %v13375_v13  ;;  %v13343_v30 = vld [vmem:[#allocation11 + $0x500] ss:$16 sps:$4 sm:$0xff]  }
 0x59d   :  { %10583 = vmatpush1.bf16.msra.mxu0 %v13307_v60  ;;  %v13445_v13 = vld [vmem:[#allocation11 + $0x700] ss:$16 sps:$4 sm:$0xff]   ;;  %v13453_v60 = vld [vmem:[#allocation11 + $0x2ec] ss:$16 sps:$4 sm:$0xff]  }
 0x59e   :  { %10584 = vmatprep.subr.bf16.mxu0 %v13312_v37  ;;  %v13346_v37 = vld [vmem:[#allocation11 + $0xe8] ss:$16 sps:$4 sm:$0xff]  }
 0x59f   :  { %10624 = vmatpush1.bf16.msra.mxu1 %v13373_v12  ;;  %v14466_v12 = vpack.c.bf16 %v8924_v8, %v8924_v8 }
 0x5a0   :  { %10625 = vmatprep.subr.bf16.mxu1 %v13381_v11  ;;  %v13351_v11 = vld [vmem:[#allocation11 + $0xcc] ss:$16 sps:$4 sm:$0xff]  }
 0x5a1   :  { %10585 = vmatpush1.bf16.msra.mxu0 %v13310_v46 }
 0x5a2   :  { %10586 = vmatprep.subr.bf16.mxu0 %v13315_v42 }
 0x5a3   :  { %10626 = vmatpush1.bf16.msra.mxu1 %v13379_v39  ;;  %v13349_v39 = vld [vmem:[#allocation11 + $0xc8] ss:$16 sps:$4 sm:$0xff]  }
 0x5a4   :  { %10627 = vmatprep.subr.bf16.mxu1 %v13387_v45 }
 0x5a5   :  { %10587 = vmatpush1.bf16.msra.mxu0 %v13313_v32  ;;  %v13354_v32 = vld [vmem:[#allocation11 + $0xac] ss:$16 sps:$4 sm:$0xff]  }
 0x5a6   :  { %10588 = vmatprep.subr.bf16.mxu0 %v13318_v34 }
 0x5a7   :  { %10628 = vmatpush1.bf16.msra.mxu1 %v13385_v55 }
 0x5a8   :  { %10629 = vmatprep.subr.bf16.mxu1 %v13393_v48 }
 0x5a9   :  { %10589 = vmatpush1.bf16.msra.mxu0 %v13316_v59 }
 0x5aa   :  { %10590 = vmatprep.subr.bf16.mxu0 %v13321_v50  ;;  %v13352_v50 = vld [vmem:[#allocation11 + $0xa8] ss:$16 sps:$4 sm:$0xff]  }
 0x5ab   :  { %10630 = vmatpush1.bf16.msra.mxu1 %v13391_v36 }
 0x5ac   :  { %10631 = vmatprep.subr.bf16.mxu1 %v13399_v51 }
 0x5ad   :  { %10591 = vmatpush1.bf16.msra.mxu0 %v13319_v1  ;;  %v13358_v1 = vld [vmem:[#allocation11 + $0x88] ss:$16 sps:$4 sm:$0xff]  }
 0x5ae   :  { %10592 = vmatprep.subr.bf16.mxu0 %v13324_v57  ;;  %v13364_v57 = vld [vmem:[#allocation11 + $0x68] ss:$16 sps:$4 sm:$0xff]  }
 0x5af   :  { %10632 = vmatpush1.bf16.msra.mxu1 %v13397_v58  ;;  %v13372_v58 = vld [vmem:[#allocation11 + $0x4c] ss:$16 sps:$4 sm:$0xff]  }
 0x5b0   :  { %10633 = vmatprep.subr.bf16.mxu1 %v13405_v15  ;;  %v13370_v15 = vld [vmem:[#allocation11 + $0x48] ss:$16 sps:$4 sm:$0xff]  }
 0x5b1   :  { %10593 = vmatpush2.bf16.msra.mxu0 %v13322_v3  ;;  %v13378_v3 = vld [vmem:[#allocation11 + $0x2c] ss:$16 sps:$4 sm:$0xff]  }
 0x5b2   :  { %10594 = vmatprep.subr.bf16.mxu0 %v13327_v63  ;;  %v13376_v63 = vld [vmem:[#allocation11 + $0x28] ss:$16 sps:$4 sm:$0xff]  }
 0x5b3   :  { %10634 = vmatpush2.bf16.msra.mxu1 %v13403_v17  ;;  %v13384_v17 = vld [vmem:[#allocation11 + $0xc] ss:$16 sps:$4 sm:$0xff]  }
 0x5b4   :  { %10635 = vmatprep.subr.bf16.mxu1 %v13411_v4  ;;  %v13382_v4 = vld [vmem:[#allocation11 + $0x8] ss:$16 sps:$4 sm:$0xff]  }
 0x5b5   :  { %10595 = vmatpush2.bf16.msra.mxu0 %v13325_v5  ;;  %v13390_v5 = vld [vmem:[#allocation11 + $0x1ec] ss:$16 sps:$4 sm:$0xff]  }
 0x5b6   :  { %10596 = vmatprep.subr.bf16.mxu0 %v13330_v47  ;;  %v13388_v47 = vld [vmem:[#allocation11 + $0x1e8] ss:$16 sps:$4 sm:$0xff]  }
 0x5b7   :  { %10636 = vmatpush2.bf16.msra.mxu1 %v13409_v6  ;;  %v13396_v6 = vld [vmem:[#allocation11 + $0x1cc] ss:$16 sps:$4 sm:$0xff]  }
 0x5b8   :  { %10637 = vmatprep.subr.bf16.mxu1 %v13417_v28  ;;  %v13394_v28 = vld [vmem:[#allocation11 + $0x1c8] ss:$16 sps:$4 sm:$0xff]  }
 0x5b9   :  { %10597 = vmatpush2.bf16.msra.mxu0 %v13328_v7  ;;  %v13402_v7 = vld [vmem:[#allocation11 + $0x1ac] ss:$16 sps:$4 sm:$0xff]  }
 0x5ba   :  { %10598 = vmatprep.subr.bf16.mxu0 %v13333_v16  ;;  %v13400_v16 = vld [vmem:[#allocation11 + $0x1a8] ss:$16 sps:$4 sm:$0xff]  }
 0x5bb   :  { %10638 = vmatpush2.bf16.msra.mxu1 %v13415_v44  ;;  %v13408_v44 = vld [vmem:[#allocation11 + $0x18c] ss:$16 sps:$4 sm:$0xff]  }
 0x5bc   :  { %10639 = vmatprep.subr.bf16.mxu1 %v13423_v14  ;;  %v13406_v14 = vld [vmem:[#allocation11 + $0x188] ss:$16 sps:$4 sm:$0xff]  }
 0x5bd   :  { %10599 = vmatpush2.bf16.msra.mxu0 %v13331_v25  ;;  %v13414_v25 = vld [vmem:[#allocation11 + $0x16c] ss:$16 sps:$4 sm:$0xff]  }
 0x5be   :  { %10600 = vmatprep.subr.bf16.mxu0 %v13336_v26  ;;  %v13412_v26 = vld [vmem:[#allocation11 + $0x168] ss:$16 sps:$4 sm:$0xff]  }
 0x5bf   :  { %10640 = vmatpush2.bf16.msra.mxu1 %v13421_v38  ;;  %v13420_v38 = vld [vmem:[#allocation11 + $0x14c] ss:$16 sps:$4 sm:$0xff]  }
 0x5c0   :  { %10641 = vmatprep.subr.bf16.mxu1 %v13429_v22  ;;  %v13418_v22 = vld [vmem:[#allocation11 + $0x148] ss:$16 sps:$4 sm:$0xff]  }
 0x5c1   :  { %10601 = vmatpush2.bf16.msra.mxu0 %v13334_v0  ;;  %v13426_v0 = vld [vmem:[#allocation11 + $0x12c] ss:$16 sps:$4 sm:$0xff]  }
 0x5c2   :  { %10602 = vmatprep.subr.bf16.mxu0 %v13339_v40  ;;  %v13424_v40 = vld [vmem:[#allocation11 + $0x128] ss:$16 sps:$4 sm:$0xff]  }
 0x5c3   :  { %10642 = vmatpush2.bf16.msra.mxu1 %v13427_v56  ;;  %v13432_v56 = vld [vmem:[#allocation11 + $0x10c] ss:$16 sps:$4 sm:$0xff]  }
 0x5c4   :  { %10643 = vmatprep.subr.bf16.mxu1 %v13435_v61  ;;  %v13430_v61 = vld [vmem:[#allocation11 + $0x108] ss:$16 sps:$4 sm:$0xff]  }
 0x5c5   :  { %10603 = vmatpush2.bf16.msra.mxu0 %v13337_v9  ;;  %v13438_v9 = vld [vmem:[#allocation11 + $0x4ec] ss:$16 sps:$4 sm:$0xff]  }
 0x5c6   :  { %10604 = vmatprep.subr.bf16.mxu0 %v13342_v43 }
 0x5c7   :  { %10644 = vmatpush2.bf16.msra.mxu1 %v13433_v35  ;;  %v13436_v35 = vld [vmem:[#allocation11 + $0x4e8] ss:$16 sps:$4 sm:$0xff]  }
 0x5c8   :  { %10645 = vmatprep.subr.bf16.mxu1 %v13441_v62  ;;  %v13444_v62 = vld [vmem:[#allocation11 + $0x4cc] ss:$16 sps:$4 sm:$0xff]  }
 0x5c9   :  { %10605 = vmatpush2.bf16.msra.mxu0 %v13340_v54 }
 0x5ca   :  { %10606 = vmatprep.subr.bf16.mxu0 %v13345_v31 }
 0x5cb   :  { %10646 = vmatpush2.bf16.msra.mxu1 %v13439_v29 }
 0x5cc   :  { %10647 = vmatprep.subr.bf16.mxu1 %v13447_v52 }
 0x5cd   :  { %10607 = vmatpush2.bf16.msra.mxu0 %v13343_v30  ;;  %v13442_v30 = vld [vmem:[#allocation11 + $0x4c8] ss:$16 sps:$4 sm:$0xff]  }
 0x5ce   :  { %10658 = vmatprep.subr.bf16.mxu0 %v13348_v53  ;;  %v13450_v53 = vld [vmem:[#allocation11 + $0x4ac] ss:$16 sps:$4 sm:$0xff]  }
 0x5cf   :  { %10648 = vmatpush2.bf16.msra.mxu1 %v13445_v13 }
 0x5d0   :  { %v8790_v46 = vpop.f32.mrf.mxu0  ;;  %10609 = vmatmul.mubr.bf16.vlgmr.msra.gmra.mxu0 %v14466_v12  ;;  %10699 = vmatprep.subr.bf16.mxu1 %v13453_v60 }
 0x5d1   :  { %v8791_v42 = vadd.f32 %v8790_v46, %v14460_v27  ;;  %v8831_v2 = vpop.f32.mrf.mxu1  ;;  %10659 = vmatpush1.bf16.msra.mxu0 %v13346_v37  ;;  %10690 = vmatprep.mubr.bf16.mxu0 %v14435_v41  ;;  %v13360_v27 = vld [vmem:[#allocation11 + $0x8c] ss:$16 sps:$4 sm:$0xff]  }
 0x5d2   :  { %v14471_v45 = vpop.f32.mrf.mxu0  ;;  %10660 = vmatprep.subr.bf16.mxu0 %v13351_v11  ;;  %v13366_v41 = vld [vmem:[#allocation11 + $0x6c] ss:$16 sps:$4 sm:$0xff]  }
 0x5d3   :  { %v14473_v34 = vadd.f32 %v8831_v2, %v8791_v42  ;;  %v14475_v55 = vpop.f32.mrf.mxu1  ;;  %v8793_v43 = vadd.f32 %v14471_v45, %v14463_v33 }
 0x5d4   :  { %v8794_v48 = vpop.f32.mrf.mxu0 }
 0x5d5   :  { %v8835_v59 = vpop.f32.mrf.mxu1  ;;  %10661 = vmatpush1.bf16.msra.mxu0 %v13349_v39  ;;  %v8834_v31 = vadd.f32 %v14475_v55, %v8793_v43  ;;  %v13456_v39 = vld [vmem:[#allocation11 + $0x48c] ss:$16 sps:$4 sm:$0xff]   ;;  %v13454_v48 = vld [vmem:[#allocation11 + $0x488] ss:$16 sps:$4 sm:$0xff]  }
 0x5d6   :  { %v8795_v36 = vpop.f32.mrf.mxu0  ;;  %10662 = vmatprep.subr.bf16.mxu0 %v13354_v32  ;;  %v13459_v59 = vld [vmem:[#allocation11 + $0x2cc] ss:$16 sps:$4 sm:$0xff]  }
 0x5d7   :  { %v8836_v51 = vpop.f32.mrf.mxu1  ;;  %v13457_v36 = vld [vmem:[#allocation11 + $0x2c8] ss:$16 sps:$4 sm:$0xff]   ;;  %v13507_v43 = vld [vmem:[#allocation11 + $0x3cc] ss:$16 sps:$4 sm:$0xff]  }
 0x5d8   :  { %v13465_v51 = vld [vmem:[#allocation11 + $0x2ac] ss:$16 sps:$4 sm:$0xff]  }
 0x5d9   :  { %10663 = vmatpush1.bf16.msra.mxu0 %v13352_v50  ;;  %v13462_v50 = vld [vmem:[#allocation11 + $0x46c] ss:$16 sps:$4 sm:$0xff]  }
 0x5da   :  { %10664 = vmatprep.subr.bf16.mxu0 %v13360_v27  ;;  %v13460_v27 = vld [vmem:[#allocation11 + $0x468] ss:$16 sps:$4 sm:$0xff]  }
 0x5dd   :  { %10665 = vmatpush1.bf16.msra.mxu0 %v13358_v1  ;;  %v13468_v1 = vld [vmem:[#allocation11 + $0x44c] ss:$16 sps:$4 sm:$0xff]  }
 0x5de   :  { %10666 = vmatprep.subr.bf16.mxu0 %v13366_v41  ;;  %v13463_v41 = vld [vmem:[#allocation11 + $0x2a8] ss:$16 sps:$4 sm:$0xff]  }
 0x5e1   :  { %10667 = vmatpush1.bf16.msra.mxu0 %v13364_v57  ;;  %v13466_v57 = vld [vmem:[#allocation11 + $0x448] ss:$16 sps:$4 sm:$0xff]  }
 0x5e2   :  { %10668 = vmatprep.subr.bf16.mxu0 %v13372_v58  ;;  %v13471_v58 = vld [vmem:[#allocation11 + $0x28c] ss:$16 sps:$4 sm:$0xff]  }
 0x5e5   :  { %10669 = vmatpush1.bf16.msra.mxu0 %v13370_v15  ;;  %v13474_v15 = vld [vmem:[#allocation11 + $0x42c] ss:$16 sps:$4 sm:$0xff]  }
 0x5e6   :  { %10670 = vmatprep.subr.bf16.mxu0 %v13378_v3  ;;  %v13469_v3 = vld [vmem:[#allocation11 + $0x288] ss:$16 sps:$4 sm:$0xff]  }
 0x5e9   :  { %10671 = vmatpush1.bf16.msra.mxu0 %v13376_v63  ;;  %v13477_v63 = vld [vmem:[#allocation11 + $0x26c] ss:$16 sps:$4 sm:$0xff]  }
 0x5ea   :  { %10672 = vmatprep.subr.bf16.mxu0 %v13384_v17  ;;  %v13480_v17 = vld [vmem:[#allocation11 + $0x40c] ss:$16 sps:$4 sm:$0xff]  }
 0x5ed   :  { %10673 = vmatpush1.bf16.msra.mxu0 %v13382_v4  ;;  %v13475_v4 = vld [vmem:[#allocation11 + $0x268] ss:$16 sps:$4 sm:$0xff]  }
 0x5ee   :  { %10674 = vmatprep.subr.bf16.mxu0 %v13390_v5  ;;  %v13478_v5 = vld [vmem:[#allocation11 + $0x408] ss:$16 sps:$4 sm:$0xff]  }
 0x5f1   :  { %10675 = vmatpush2.bf16.msra.mxu0 %v13388_v47  ;;  %v13483_v47 = vld [vmem:[#allocation11 + $0x24c] ss:$16 sps:$4 sm:$0xff]  }
 0x5f2   :  { %10676 = vmatprep.subr.bf16.mxu0 %v13396_v6  ;;  %v13486_v6 = vld [vmem:[#allocation11 + $0x5ec] ss:$16 sps:$4 sm:$0xff]  }
 0x5f5   :  { %10677 = vmatpush2.bf16.msra.mxu0 %v13394_v28  ;;  %v13481_v28 = vld [vmem:[#allocation11 + $0x248] ss:$16 sps:$4 sm:$0xff]  }
 0x5f6   :  { %10678 = vmatprep.subr.bf16.mxu0 %v13402_v7  ;;  %v13484_v7 = vld [vmem:[#allocation11 + $0x5e8] ss:$16 sps:$4 sm:$0xff]  }
 0x5f9   :  { %10679 = vmatpush2.bf16.msra.mxu0 %v13400_v16  ;;  %v13489_v16 = vld [vmem:[#allocation11 + $0x22c] ss:$16 sps:$4 sm:$0xff]  }
 0x5fa   :  { %10680 = vmatprep.subr.bf16.mxu0 %v13408_v44  ;;  %v13492_v44 = vld [vmem:[#allocation11 + $0x5cc] ss:$16 sps:$4 sm:$0xff]  }
 0x5fd   :  { %10681 = vmatpush2.bf16.msra.mxu0 %v13406_v14  ;;  %v13487_v14 = vld [vmem:[#allocation11 + $0x228] ss:$16 sps:$4 sm:$0xff]  }
 0x5fe   :  { %10682 = vmatprep.subr.bf16.mxu0 %v13414_v25  ;;  %v13490_v25 = vld [vmem:[#allocation11 + $0x5c8] ss:$16 sps:$4 sm:$0xff]  }
 0x601   :  { %10683 = vmatpush2.bf16.msra.mxu0 %v13412_v26  ;;  %v13495_v26 = vld [vmem:[#allocation11 + $0x20c] ss:$16 sps:$4 sm:$0xff]  }
 0x602   :  { %10684 = vmatprep.subr.bf16.mxu0 %v13420_v38  ;;  %v13498_v38 = vld [vmem:[#allocation11 + $0x5ac] ss:$16 sps:$4 sm:$0xff]  }
 0x605   :  { %10685 = vmatpush2.bf16.msra.mxu0 %v13418_v22  ;;  %v13493_v22 = vld [vmem:[#allocation11 + $0x208] ss:$16 sps:$4 sm:$0xff]  }
 0x606   :  { %10686 = vmatprep.subr.bf16.mxu0 %v13426_v0  ;;  %v13496_v0 = vld [vmem:[#allocation11 + $0x5a8] ss:$16 sps:$4 sm:$0xff]  }
 0x609   :  { %10687 = vmatpush2.bf16.msra.mxu0 %v13424_v40  ;;  %v13501_v40 = vld [vmem:[#allocation11 + $0x3ec] ss:$16 sps:$4 sm:$0xff]  }
 0x60a   :  { %10688 = vmatprep.subr.bf16.mxu0 %v13432_v56  ;;  %v13504_v56 = vld [vmem:[#allocation11 + $0x58c] ss:$16 sps:$4 sm:$0xff]  }
 0x60d   :  { %10689 = vmatpush2.bf16.msra.mxu0 %v13430_v61  ;;  %v13499_v61 = vld [vmem:[#allocation11 + $0x3e8] ss:$16 sps:$4 sm:$0xff]  }
 0x60e   :  { %10740 = vmatprep.subr.bf16.mxu0 %v13438_v9  ;;  %v13502_v9 = vld [vmem:[#allocation11 + $0x588] ss:$16 sps:$4 sm:$0xff]  }
 0x610   :  { %v8872_v54 = vpop.f32.mrf.mxu0  ;;  %10691 = vmatmul.mubr.bf16.vlgmr.msra.gmra.mxu0 %v14450_v10  ;;  %v13448_v10 = vld [vmem:[#allocation11 + $0x4a8] ss:$16 sps:$4 sm:$0xff]  }
 0x611   :  { %v8873_v29 = vadd.f32 %v8872_v54, %v14473_v34  ;;  %v8913_v52 = vpop.f32.mrf.mxu1  ;;  %10741 = vmatpush1.bf16.msra.mxu0 %v13436_v35  ;;  %10772 = vmatprep.mubr.bf16.mxu0 %v14454_v24  ;;  %v13451_v24 = vld [vmem:[#allocation11 + $0x2e8] ss:$16 sps:$4 sm:$0xff]   ;;  %v13510_v35 = vld [vmem:[#allocation11 + $0x56c] ss:$16 sps:$4 sm:$0xff]  }
 0x612   :  { %v8874_v8 = vpop.f32.mrf.mxu0  ;;  %10742 = vmatprep.subr.bf16.mxu0 %v13444_v62  ;;  %v13505_v62 = vld [vmem:[#allocation11 + $0x3c8] ss:$16 sps:$4 sm:$0xff]  }
 0x613   :  { %v8914_v33 = vadd.f32 %v8913_v52, %v8873_v29  ;;  %v8875_v13 = vadd.f32 %v8874_v8, %v8834_v31  ;;  %v8915_v60 = vpop.f32.mrf.mxu1  ;;  %v13508_v54 = vld [vmem:[#allocation11 + $0x568] ss:$16 sps:$4 sm:$0xff]   ;;  %v13513_v31 = vld [vmem:[#allocation11 + $0x3ac] ss:$16 sps:$4 sm:$0xff]  }
 0x614   :  { %v8876_v37 = vpop.f32.mrf.mxu0  ;;  %v13516_v29 = vld [vmem:[#allocation11 + $0x54c] ss:$16 sps:$4 sm:$0xff]   ;;  %v13511_v52 = vld [vmem:[#allocation11 + $0x3a8] ss:$16 sps:$4 sm:$0xff]  }
 0x615   :  { %v8916_v11 = vadd.f32 %v8915_v60, %v8875_v13  ;;  %v8917_v46 = vpop.f32.mrf.mxu1  ;;  %10743 = vmatpush1.bf16.msra.mxu0 %v13442_v30  ;;  %v8926_v42 = vmax.f32 %v8914_v33, 0.0  ;;  %v13514_v30 = vld [vmem:[#allocation11 + $0x548] ss:$16 sps:$4 sm:$0xff]   ;;  %v13519_v8 = vld [vmem:[#allocation11 + $0x38c] ss:$16 sps:$4 sm:$0xff]  }
 0x616   :  { %v8877_v2 = vpop.f32.mrf.mxu0  ;;  %10744 = vmatprep.subr.bf16.mxu0 %v13450_v53  ;;  %v13522_v53 = vld [vmem:[#allocation11 + $0x52c] ss:$16 sps:$4 sm:$0xff]   ;;  %v13517_v33 = vld [vmem:[#allocation11 + $0x388] ss:$16 sps:$4 sm:$0xff]  }
 0x617   :  { %v8927_v45 = vmax.f32 %v8916_v11, 0.0  ;;  %v8918_v32 = vpop.f32.mrf.mxu1  ;;  %v14485_v55 = vpack.c.bf16 %v8926_v42, %v8926_v42  ;;  %v13520_v13 = vld [vmem:[#allocation11 + $0x528] ss:$16 sps:$4 sm:$0xff]   ;;  %v13525_v60 = vld [vmem:[#allocation11 + $0x36c] ss:$16 sps:$4 sm:$0xff]  }
 0x618   :  { %v13528_v37 = vld [vmem:[#allocation11 + $0x50c] ss:$16 sps:$4 sm:$0xff]   ;;  %v13523_v11 = vld [vmem:[#allocation11 + $0x368] ss:$16 sps:$4 sm:$0xff]   ;;  %v14490_v42 = vld [vmem:[#allocation13] sm:$0xf] }
 0x619   :  { %v14483_v34 = vpack.c.bf16 %v8927_v45, %v8927_v45  ;;  %10745 = vmatpush1.bf16.msra.mxu0 %v13448_v10  ;;  %v13526_v46 = vld [vmem:[#allocation11 + $0x508] ss:$16 sps:$4 sm:$0xff]   ;;  %v13531_v10 = vld [vmem:[#allocation11 + $0x34c] ss:$16 sps:$4 sm:$0xff]   ;;  %v9197_v45 = vrot.slane %v14490_v42, %v14181_v18 }
 0x61a   :  { %10746 = vmatprep.subr.bf16.mxu0 %v13456_v39  ;;  %v13588_v2 = vld [vmem:[#allocation14 + $0x74] ss:$8 sps:$4 sm:$0xff]   ;;  %v13534_v32 = vld [vmem:[#allocation11 + $0x32c] ss:$16 sps:$4 sm:$0xff]  }
 0x61b   :  { %10649 = vmatprep.mubr.bf16.mxu1 %v14483_v34  ;;  %v13529_v39 = vld [vmem:[#allocation11 + $0x348] ss:$16 sps:$4 sm:$0xff]  }
 0x61c   :  { %10650 = vmatmul.mubr.bf16.vlgmr.msra.gmra.mxu1 %v14485_v55 }
 0x61d   :  { %10700 = vmatpush1.bf16.msra.mxu1 %v13451_v24  ;;  %10731 = vmatprep.mubr.bf16.mxu1 %v14438_v49  ;;  %v13472_v49 = vld [vmem:[#allocation11 + $0x428] ss:$16 sps:$4 sm:$0xff]   ;;  %v13586_v24 = vld [vmem:[#allocation14 + $0x70] ss:$8 sps:$4 sm:$0xff]  }
 0x61e   :  { %10747 = vmatpush1.bf16.msra.mxu0 %v13454_v48  ;;  %10701 = vmatprep.subr.bf16.mxu1 %v13459_v59  ;;  %v9201_v48 = vrot.slane %v14490_v42, %v14187_v20  ;;  %v13591_v59 = vld [vmem:[#allocation14 + $0x64] ss:$8 sps:$4 sm:$0xff]  }
 0x61f   :  { %10748 = vmatprep.subr.bf16.mxu0 %v13462_v50 }
 0x621   :  { %10702 = vmatpush1.bf16.msra.mxu1 %v13457_v36 }
 0x622   :  { %10749 = vmatpush1.bf16.msra.mxu0 %v13460_v27  ;;  %10703 = vmatprep.subr.bf16.mxu1 %v13465_v51  ;;  %v13532_v51 = vld [vmem:[#allocation11 + $0x328] ss:$16 sps:$4 sm:$0xff]  }
 0x623   :  { %10750 = vmatprep.subr.bf16.mxu0 %v13468_v1 }
 0x625   :  { %10704 = vmatpush1.bf16.msra.mxu1 %v13463_v41  ;;  %v13537_v41 = vld [vmem:[#allocation11 + $0x30c] ss:$16 sps:$4 sm:$0xff]  }
 0x626   :  { %10751 = vmatpush1.bf16.msra.mxu0 %v13466_v57  ;;  %10705 = vmatprep.subr.bf16.mxu1 %v13471_v58  ;;  %v13589_v57 = vld [vmem:[#allocation14 + $0x60] ss:$8 sps:$4 sm:$0xff]  }
 0x627   :  { %10752 = vmatprep.subr.bf16.mxu0 %v13474_v15 }
 0x629   :  { %10706 = vmatpush1.bf16.msra.mxu1 %v13469_v3 }
 0x62a   :  { %10753 = vmatpush1.bf16.msra.mxu0 %v13472_v49  ;;  %10707 = vmatprep.subr.bf16.mxu1 %v13477_v63  ;;  %v13594_v49 = vld [vmem:[#allocation14 + $0x54] ss:$8 sps:$4 sm:$0xff]  }
 0x62b   :  { %10754 = vmatprep.subr.bf16.mxu0 %v13480_v17 }
 0x62d   :  { %10708 = vmatpush1.bf16.msra.mxu1 %v13475_v4 }
 0x62e   :  { %10755 = vmatpush1.bf16.msra.mxu0 %v13478_v5  ;;  %10709 = vmatprep.subr.bf16.mxu1 %v13483_v47  ;;  %v13535_v5 = vld [vmem:[#allocation11 + $0x308] ss:$16 sps:$4 sm:$0xff]  }
 0x62f   :  { %10756 = vmatprep.subr.bf16.mxu0 %v13486_v6  ;;  %v13592_v6 = vld [vmem:[#allocation14 + $0x50] ss:$8 sps:$4 sm:$0xff]  }
 0x631   :  { %10710 = vmatpush1.bf16.msra.mxu1 %v13481_v28 }
 0x632   :  { %10757 = vmatpush2.bf16.msra.mxu0 %v13484_v7  ;;  %10711 = vmatprep.subr.bf16.mxu1 %v13489_v16  ;;  %v13597_v7 = vld [vmem:[#allocation14 + $0x44] ss:$8 sps:$4 sm:$0xff]  }
 0x633   :  { %10758 = vmatprep.subr.bf16.mxu0 %v13492_v44  ;;  %v13538_v16 = vld [vmem:[#allocation11 + $0x6e8] ss:$16 sps:$4 sm:$0xff]   ;;  %v13543_v44 = vld [vmem:[#allocation11 + $0x6cc] ss:$16 sps:$4 sm:$0xff]  }
 0x635   :  { %10712 = vmatpush1.bf16.msra.mxu1 %v13487_v14  ;;  %v13595_v14 = vld [vmem:[#allocation14 + $0x40] ss:$8 sps:$4 sm:$0xff]  }
 0x636   :  { %10759 = vmatpush2.bf16.msra.mxu0 %v13490_v25  ;;  %10713 = vmatprep.subr.bf16.mxu1 %v13495_v26  ;;  %v13600_v25 = vld [vmem:[#allocation14 + $0x34] ss:$8 sps:$4 sm:$0xff]  }
 0x637   :  { %10760 = vmatprep.subr.bf16.mxu0 %v13498_v38  ;;  %v13541_v26 = vld [vmem:[#allocation11 + $0x6c8] ss:$16 sps:$4 sm:$0xff]   ;;  %v13546_v38 = vld [vmem:[#allocation11 + $0x6ac] ss:$16 sps:$4 sm:$0xff]  }
 0x639   :  { %10714 = vmatpush1.bf16.msra.mxu1 %v13493_v22  ;;  %v13598_v22 = vld [vmem:[#allocation14 + $0x30] ss:$8 sps:$4 sm:$0xff]  }
 0x63a   :  { %10761 = vmatpush2.bf16.msra.mxu0 %v13496_v0  ;;  %10715 = vmatprep.subr.bf16.mxu1 %v13501_v40  ;;  %v13603_v0 = vld [vmem:[#allocation14 + $0x24] ss:$8 sps:$4 sm:$0xff]  }
 0x63b   :  { %10762 = vmatprep.subr.bf16.mxu0 %v13504_v56  ;;  %v13544_v40 = vld [vmem:[#allocation11 + $0x6a8] ss:$16 sps:$4 sm:$0xff]   ;;  %v13549_v56 = vld [vmem:[#allocation11 + $0x68c] ss:$16 sps:$4 sm:$0xff]  }
 0x63d   :  { %10716 = vmatpush2.bf16.msra.mxu1 %v13499_v61  ;;  %v13601_v61 = vld [vmem:[#allocation14 + $0x20] ss:$8 sps:$4 sm:$0xff]  }
 0x63e   :  { %10763 = vmatpush2.bf16.msra.mxu0 %v13502_v9  ;;  %10717 = vmatprep.subr.bf16.mxu1 %v13507_v43  ;;  %v13606_v9 = vld [vmem:[#allocation14 + $0x14] ss:$8 sps:$4 sm:$0xff]   ;;  %v13552_v43 = vld [vmem:[#allocation11 + $0x66c] ss:$16 sps:$4 sm:$0xff]  }
 0x63f   :  { %10764 = vmatprep.subr.bf16.mxu0 %v13510_v35  ;;  %v13609_v35 = vld [vmem:[#allocation14 + $0x4] ss:$8 sps:$4 sm:$0xff]  }
 0x641   :  { %10718 = vmatpush2.bf16.msra.mxu1 %v13505_v62  ;;  %v13550_v62 = vld [vmem:[#allocation11 + $0x668] ss:$16 sps:$4 sm:$0xff]  }
 0x642   :  { %10765 = vmatpush2.bf16.msra.mxu0 %v13508_v54  ;;  %10719 = vmatprep.subr.bf16.mxu1 %v13513_v31  ;;  %v13555_v54 = vld [vmem:[#allocation11 + $0x64c] ss:$16 sps:$4 sm:$0xff]  }
 0x643   :  { %10766 = vmatprep.subr.bf16.mxu0 %v13516_v29  ;;  %v13607_v31 = vld [vmem:[#allocation14] ss:$8 sps:$4 sm:$0xff]   ;;  %v13612_v29 = vld [vmem:[#allocation14 + $0xf4] ss:$8 sps:$4 sm:$0xff]  }
 0x645   :  { %10720 = vmatpush2.bf16.msra.mxu1 %v13511_v52  ;;  %v13553_v52 = vld [vmem:[#allocation11 + $0x648] ss:$16 sps:$4 sm:$0xff]  }
 0x646   :  { %10767 = vmatpush2.bf16.msra.mxu0 %v13514_v30  ;;  %10721 = vmatprep.subr.bf16.mxu1 %v13519_v8  ;;  %v13558_v30 = vld [vmem:[#allocation11 + $0x62c] ss:$16 sps:$4 sm:$0xff]  }
 0x647   :  { %10768 = vmatprep.subr.bf16.mxu0 %v13522_v53  ;;  %v13610_v8 = vld [vmem:[#allocation14 + $0xf0] ss:$8 sps:$4 sm:$0xff]   ;;  %v13615_v53 = vld [vmem:[#allocation14 + $0xe4] ss:$8 sps:$4 sm:$0xff]  }
 0x649   :  { %10722 = vmatpush2.bf16.msra.mxu1 %v13517_v33  ;;  %v13556_v33 = vld [vmem:[#allocation11 + $0x628] ss:$16 sps:$4 sm:$0xff]  }
 0x64a   :  { %10769 = vmatpush2.bf16.msra.mxu0 %v13520_v13  ;;  %10723 = vmatprep.subr.bf16.mxu1 %v13525_v60  ;;  %v13561_v13 = vld [vmem:[#allocation11 + $0x60c] ss:$16 sps:$4 sm:$0xff]  }
 0x64b   :  { %10770 = vmatprep.subr.bf16.mxu0 %v13528_v37  ;;  %v13613_v60 = vld [vmem:[#allocation14 + $0xe0] ss:$8 sps:$4 sm:$0xff]   ;;  %v13618_v37 = vld [vmem:[#allocation14 + $0xd4] ss:$8 sps:$4 sm:$0xff]  }
 0x64d   :  { %10724 = vmatpush2.bf16.msra.mxu1 %v13523_v11  ;;  %v13559_v11 = vld [vmem:[#allocation11 + $0x608] ss:$16 sps:$4 sm:$0xff]  }
 0x64e   :  { %10771 = vmatpush2.bf16.msra.mxu0 %v13526_v46  ;;  %10725 = vmatprep.subr.bf16.mxu1 %v13531_v10  ;;  %v13564_v46 = vld [vmem:[#allocation11 + $0x7ec] ss:$16 sps:$4 sm:$0xff]  }
 0x64f   :  { %11226 = vmatprep.subr.bf16.mxu0 %v13588_v2  ;;  %v13616_v10 = vld [vmem:[#allocation14 + $0xd0] ss:$8 sps:$4 sm:$0xff]   ;;  %v13621_v2 = vld [vmem:[#allocation14 + $0xc4] ss:$8 sps:$4 sm:$0xff]  }
 0x650   :  { %v10528_v50 = vpop.f32.mrf.mxu0 }
 0x651   :  { %v10529_v36 = vadd.f32 %v10528_v50, %v9197_v45  ;;  %v10569_v27 = vpop.f32.mrf.mxu1  ;;  %10726 = vmatpush2.bf16.msra.mxu1 %v13529_v39  ;;  %10773 = vmatmul.mubr.bf16.vlgmr.msra.gmra.mxu0 %v14466_v12  ;;  %v13540_v12 = vld [vmem:[#allocation11 + $0x6ec] ss:$16 sps:$4 sm:$0xff]   ;;  %v13562_v39 = vld [vmem:[#allocation11 + $0x7e8] ss:$16 sps:$4 sm:$0xff]  }
 0x652   :  { %v10530_v1 = vpop.f32.mrf.mxu0  ;;  %10727 = vmatprep.subr.bf16.mxu1 %v13534_v32  ;;  %11227 = vmatpush1.bf16.msra.mxu0 %v13586_v24  ;;  %v13567_v45 = vld [vmem:[#allocation11 + $0x7cc] ss:$16 sps:$4 sm:$0xff]   ;;  %v13624_v24 = vld [vmem:[#allocation14 + $0xb4] ss:$8 sps:$4 sm:$0xff]  }
 0x653   :  { %v14497_v58 = vadd.f32 %v10569_v27, %v10529_v36  ;;  %v10531_v15 = vadd.f32 %v10530_v1, %v9201_v48  ;;  %v10571_v3 = vpop.f32.mrf.mxu1  ;;  %11228 = vmatprep.subr.bf16.mxu0 %v13591_v59  ;;  %v13619_v32 = vld [vmem:[#allocation14 + $0xc0] ss:$8 sps:$4 sm:$0xff]   ;;  %v13565_v48 = vld [vmem:[#allocation11 + $0x7c8] ss:$16 sps:$4 sm:$0xff]   ;;  %v13622_v50 = vld [vmem:[#allocation14 + $0xb0] ss:$8 sps:$4 sm:$0xff]  }
 0x654   :  { %v10532_v63 = vpop.f32.mrf.mxu0  ;;  %v13570_v59 = vld [vmem:[#allocation11 + $0x7ac] ss:$16 sps:$4 sm:$0xff]   ;;  %v13627_v36 = vld [vmem:[#allocation14 + $0xa4] ss:$8 sps:$4 sm:$0xff]  }
 0x655   :  { %v14499_v17 = vadd.f32 %v10571_v3, %v10531_v15  ;;  %v10573_v4 = vpop.f32.mrf.mxu1  ;;  %10728 = vmatpush2.bf16.msra.mxu1 %v13532_v51  ;;  %v13568_v27 = vld [vmem:[#allocation11 + $0x7a8] ss:$16 sps:$4 sm:$0xff]   ;;  %v13573_v51 = vld [vmem:[#allocation11 + $0x78c] ss:$16 sps:$4 sm:$0xff]  }
 0x656   :  { %v10533_v47 = vpop.f32.mrf.mxu0  ;;  %10729 = vmatprep.subr.bf16.mxu1 %v13537_v41  ;;  %11229 = vmatpush1.bf16.msra.mxu0 %v13589_v57  ;;  %v13625_v1 = vld [vmem:[#allocation14 + $0xa0] ss:$8 sps:$4 sm:$0xff]   ;;  %v13630_v41 = vld [vmem:[#allocation14 + $0x94] ss:$8 sps:$4 sm:$0xff]   ;;  %v13628_v3 = vld [vmem:[#allocation14 + $0x90] ss:$8 sps:$4 sm:$0xff]  }
 0x657   :  { %v10574_v28 = vpop.f32.mrf.mxu1  ;;  %11230 = vmatprep.subr.bf16.mxu0 %v13594_v49  ;;  %v13571_v57 = vld [vmem:[#allocation11 + $0x788] ss:$16 sps:$4 sm:$0xff]   ;;  %v13576_v15 = vld [vmem:[#allocation11 + $0x76c] ss:$16 sps:$4 sm:$0xff]  }
 0x658   :  { %v13633_v49 = vld [vmem:[#allocation14 + $0x84] ss:$8 sps:$4 sm:$0xff]   ;;  %v13579_v4 = vld [vmem:[#allocation11 + $0x74c] ss:$16 sps:$4 sm:$0xff]  }
 0x659   :  { %10730 = vmatpush2.bf16.msra.mxu1 %v13535_v5  ;;  %v13574_v63 = vld [vmem:[#allocation11 + $0x768] ss:$16 sps:$4 sm:$0xff]   ;;  %v13631_v5 = vld [vmem:[#allocation14 + $0x80] ss:$8 sps:$4 sm:$0xff]  }
 0x65a   :  { %10781 = vmatprep.subr.bf16.mxu1 %v13540_v12  ;;  %11231 = vmatpush1.bf16.msra.mxu0 %v13592_v6  ;;  %v13577_v47 = vld [vmem:[#allocation11 + $0x748] ss:$16 sps:$4 sm:$0xff]   ;;  %v13582_v12 = vld [vmem:[#allocation11 + $0x72c] ss:$16 sps:$4 sm:$0xff]  }
 0x65b   :  { %11232 = vmatprep.subr.bf16.mxu0 %v13597_v7  ;;  %v13580_v7 = vld [vmem:[#allocation11 + $0x728] ss:$16 sps:$4 sm:$0xff]  }
 0x65c   :  { %10732 = vmatmul.mubr.bf16.vlgmr.msra.gmra.mxu1 %v14452_v23  ;;  %v13547_v23 = vld [vmem:[#allocation11 + $0x688] ss:$16 sps:$4 sm:$0xff]  }
 0x65d   :  { %10782 = vmatpush1.bf16.msra.mxu1 %v13538_v16  ;;  %10813 = vmatprep.mubr.bf16.mxu1 %v14483_v34  ;;  %v13604_v34 = vld [vmem:[#allocation14 + $0x10] ss:$8 sps:$4 sm:$0xff]  }
 0x65e   :  { %10783 = vmatprep.subr.bf16.mxu1 %v13543_v44  ;;  %11233 = vmatpush1.bf16.msra.mxu0 %v13595_v14  ;;  %v13585_v44 = vld [vmem:[#allocation11 + $0x70c] ss:$16 sps:$4 sm:$0xff]  }
 0x65f   :  { %11234 = vmatprep.subr.bf16.mxu0 %v13600_v25 }
 0x661   :  { %10784 = vmatpush1.bf16.msra.mxu1 %v13541_v26  ;;  %v13583_v26 = vld [vmem:[#allocation11 + $0x708] ss:$16 sps:$4 sm:$0xff]  }
 0x662   :  { %10785 = vmatprep.subr.bf16.mxu1 %v13546_v38  ;;  %11235 = vmatpush1.bf16.msra.mxu0 %v13598_v22  ;;  %v13634_v22 = vld [vmem:[#allocation14 + $0x170] ss:$8 sps:$4 sm:$0xff]  }
 0x663   :  { %11236 = vmatprep.subr.bf16.mxu0 %v13603_v0  ;;  %v13636_v0 = vld [vmem:[#allocation14 + $0x174] ss:$8 sps:$4 sm:$0xff]  }
 0x665   :  { %10786 = vmatpush1.bf16.msra.mxu1 %v13544_v40  ;;  %v13637_v40 = vld [vmem:[#allocation14 + $0x160] ss:$8 sps:$4 sm:$0xff]  }
 0x666   :  { %10787 = vmatprep.subr.bf16.mxu1 %v13549_v56  ;;  %11237 = vmatpush1.bf16.msra.mxu0 %v13601_v61  ;;  %v13642_v56 = vld [vmem:[#allocation14 + $0x154] ss:$8 sps:$4 sm:$0xff]   ;;  %v13640_v61 = vld [vmem:[#allocation14 + $0x150] ss:$8 sps:$4 sm:$0xff]  }
 0x667   :  { %11238 = vmatprep.subr.bf16.mxu0 %v13606_v9  ;;  %v13643_v9 = vld [vmem:[#allocation14 + $0x140] ss:$8 sps:$4 sm:$0xff]  }
 0x669   :  { %10788 = vmatpush1.bf16.msra.mxu1 %v13547_v23  ;;  %v13648_v23 = vld [vmem:[#allocation14 + $0x134] ss:$8 sps:$4 sm:$0xff]  }
 0x66a   :  { %10789 = vmatprep.subr.bf16.mxu1 %v13552_v43  ;;  %11239 = vmatpush1.bf16.msra.mxu0 %v13604_v34  ;;  %v13646_v43 = vld [vmem:[#allocation14 + $0x130] ss:$8 sps:$4 sm:$0xff]   ;;  %v13649_v34 = vld [vmem:[#allocation14 + $0x120] ss:$8 sps:$4 sm:$0xff]  }
 0x66b   :  { %11240 = vmatprep.subr.bf16.mxu0 %v13609_v35  ;;  %v13654_v35 = vld [vmem:[#allocation14 + $0x114] ss:$8 sps:$4 sm:$0xff]  }
 0x66d   :  { %10790 = vmatpush1.bf16.msra.mxu1 %v13550_v62  ;;  %v13652_v62 = vld [vmem:[#allocation14 + $0x110] ss:$8 sps:$4 sm:$0xff]  }
 0x66e   :  { %10791 = vmatprep.subr.bf16.mxu1 %v13555_v54  ;;  %11241 = vmatpush1.bf16.msra.mxu0 %v13607_v31  ;;  %v13657_v54 = vld [vmem:[#allocation14 + $0x104] ss:$8 sps:$4 sm:$0xff]   ;;  %v13655_v31 = vld [vmem:[#allocation14 + $0x100] ss:$8 sps:$4 sm:$0xff]  }
 0x66f   :  { %11242 = vmatprep.subr.bf16.mxu0 %v13612_v29  ;;  %v13660_v29 = vld [vmem:[#allocation14 + $0x1f4] ss:$8 sps:$4 sm:$0xff]  }
 0x671   :  { %10792 = vmatpush1.bf16.msra.mxu1 %v13553_v52  ;;  %v13658_v52 = vld [vmem:[#allocation14 + $0x1f0] ss:$8 sps:$4 sm:$0xff]  }
 0x672   :  { %10793 = vmatprep.subr.bf16.mxu1 %v13558_v30  ;;  %11243 = vmatpush2.bf16.msra.mxu0 %v13610_v8  ;;  %v13663_v30 = vld [vmem:[#allocation14 + $0x1e4] ss:$8 sps:$4 sm:$0xff]   ;;  %v13661_v8 = vld [vmem:[#allocation14 + $0x1e0] ss:$8 sps:$4 sm:$0xff]  }
 0x673   :  { %11244 = vmatprep.subr.bf16.mxu0 %v13615_v53  ;;  %v13666_v53 = vld [vmem:[#allocation14 + $0x1d4] ss:$8 sps:$4 sm:$0xff]  }
 0x675   :  { %10794 = vmatpush1.bf16.msra.mxu1 %v13556_v33  ;;  %v13664_v33 = vld [vmem:[#allocation14 + $0x1d0] ss:$8 sps:$4 sm:$0xff]  }
 0x676   :  { %10795 = vmatprep.subr.bf16.mxu1 %v13561_v13  ;;  %11245 = vmatpush2.bf16.msra.mxu0 %v13613_v60  ;;  %v13669_v13 = vld [vmem:[#allocation14 + $0x1c4] ss:$8 sps:$4 sm:$0xff]   ;;  %v13667_v60 = vld [vmem:[#allocation14 + $0x1c0] ss:$8 sps:$4 sm:$0xff]  }
 0x677   :  { %11246 = vmatprep.subr.bf16.mxu0 %v13618_v37  ;;  %v13672_v37 = vld [vmem:[#allocation14 + $0x1b4] ss:$8 sps:$4 sm:$0xff]  }
 0x679   :  { %10796 = vmatpush1.bf16.msra.mxu1 %v13559_v11 }
 0x67a   :  { %10797 = vmatprep.subr.bf16.mxu1 %v13564_v46  ;;  %11247 = vmatpush2.bf16.msra.mxu0 %v13616_v10  ;;  %v13670_v46 = vld [vmem:[#allocation14 + $0x1b0] ss:$8 sps:$4 sm:$0xff]  }
 0x67b   :  { %11248 = vmatprep.subr.bf16.mxu0 %v13621_v2  ;;  %v13675_v2 = vld [vmem:[#allocation14 + $0x1a4] ss:$8 sps:$4 sm:$0xff]  }
 0x67d   :  { %10798 = vmatpush2.bf16.msra.mxu1 %v13562_v39 }
 0x67e   :  { %10799 = vmatprep.subr.bf16.mxu1 %v13567_v45  ;;  %11249 = vmatpush2.bf16.msra.mxu0 %v13619_v32  ;;  %v13673_v45 = vld [vmem:[#allocation14 + $0x1a0] ss:$8 sps:$4 sm:$0xff]  }
 0x67f   :  { %11250 = vmatprep.subr.bf16.mxu0 %v13624_v24 }
 0x681   :  { %10800 = vmatpush2.bf16.msra.mxu1 %v13565_v48 }
 0x682   :  { %10801 = vmatprep.subr.bf16.mxu1 %v13570_v59  ;;  %11251 = vmatpush2.bf16.msra.mxu0 %v13622_v50  ;;  %v13678_v59 = vld [vmem:[#allocation14 + $0x194] ss:$8 sps:$4 sm:$0xff]  }
 0x683   :  { %11252 = vmatprep.subr.bf16.mxu0 %v13627_v36  ;;  %v13676_v36 = vld [vmem:[#allocation14 + $0x190] ss:$8 sps:$4 sm:$0xff]  }
 0x685   :  { %10802 = vmatpush2.bf16.msra.mxu1 %v13568_v27 }
 0x686   :  { %10803 = vmatprep.subr.bf16.mxu1 %v13573_v51  ;;  %11253 = vmatpush2.bf16.msra.mxu0 %v13625_v1 }
 0x687   :  { %11254 = vmatprep.subr.bf16.mxu0 %v13630_v41 }
 0x689   :  { %10804 = vmatpush2.bf16.msra.mxu1 %v13571_v57  ;;  %v13681_v57 = vld [vmem:[#allocation14 + $0x184] ss:$8 sps:$4 sm:$0xff]  }
 0x68a   :  { %10805 = vmatprep.subr.bf16.mxu1 %v13576_v15  ;;  %11255 = vmatpush2.bf16.msra.mxu0 %v13628_v3  ;;  %v13679_v3 = vld [vmem:[#allocation14 + $0x180] ss:$8 sps:$4 sm:$0xff]  }
 0x68b   :  { %11256 = vmatprep.subr.bf16.mxu0 %v13633_v49 }
 0x68d   :  { %10806 = vmatpush2.bf16.msra.mxu1 %v13574_v63 }
 0x68e   :  { %10807 = vmatprep.subr.bf16.mxu1 %v13579_v4  ;;  %11257 = vmatpush2.bf16.msra.mxu0 %v13631_v5 }
 0x690   :  { %v10610_v6 = vpop.f32.mrf.mxu0 }
 0x691   :  { %v14504_v28 = vadd.f32 %v10610_v6, %v14497_v58  ;;  %10808 = vmatpush2.bf16.msra.mxu1 %v13577_v47  ;;  %v13639_v58 = vld [vmem:[#allocation14 + $0x164] ss:$8 sps:$4 sm:$0xff]  }
 0x692   :  { %v10612_v16 = vpop.f32.mrf.mxu0  ;;  %10809 = vmatprep.subr.bf16.mxu1 %v13582_v12  ;;  %v9205_v12 = vrot.slane %v14490_v42, %v14184_v19  ;;  %v13685_v19 = vld [vmem:[#allocation17 + $0x30] sm:$0xff]  }
 0x693   :  { %v14507_v14 = vadd.f32 %v10612_v16, %v14499_v17  ;;  %v13645_v17 = vld [vmem:[#allocation14 + $0x144] ss:$8 sps:$4 sm:$0xff]  }
 0x694   :  { %v10614_v25 = vpop.f32.mrf.mxu0 }
 0x695   :  { %10810 = vmatpush2.bf16.msra.mxu1 %v13580_v7 }
 0x696   :  { %v10615_v38 = vpop.f32.mrf.mxu0  ;;  %10811 = vmatprep.subr.bf16.mxu1 %v13585_v44 }
 0x699   :  { %10812 = vmatpush2.bf16.msra.mxu1 %v13583_v26 }
 0x69a   :  { %11267 = vmatprep.subr.bf16.mxu1 %v13636_v0 }
 0x69c   :  { %10814 = vmatmul.mubr.bf16.vlgmr.msra.gmra.mxu1 %v14485_v55  ;;  %v13651_v55 = vld [vmem:[#allocation14 + $0x124] ss:$8 sps:$4 sm:$0xff]  }
 0x69d   :  { %11268 = vmatpush1.bf16.msra.mxu1 %v13634_v22 }
 0x69e   :  { %11269 = vmatprep.subr.bf16.mxu1 %v13639_v58 }
 0x6a1   :  { %11270 = vmatpush1.bf16.msra.mxu1 %v13637_v40  ;;  %v13682_v40 = vld [vmem:[#allocation17 + $0x78] sm:$0xff]  }
 0x6a2   :  { %11271 = vmatprep.subr.bf16.mxu1 %v13642_v56  ;;  %v13683_v56 = vld [vmem:[#allocation17 + $0x38] sm:$0xff]   ;;  %13125 = vmatprep.subr.bf16.mxu0 %v13682_v40 }
 0x6a5   :  { %11272 = vmatpush1.bf16.msra.mxu1 %v13640_v61  ;;  %v13684_v61 = vld [vmem:[#allocation17 + $0x70] sm:$0xff]  }
 0x6a6   :  { %11273 = vmatprep.subr.bf16.mxu1 %v13645_v17  ;;  %v13686_v17 = vld [vmem:[#allocation17 + $0x68] sm:$0xff]  }
 0x6a9   :  { %11274 = vmatpush1.bf16.msra.mxu1 %v13643_v9  ;;  %v13689_v9 = vld [vmem:[#allocation17 + $0x20] sm:$0xff]  }
 0x6aa   :  { %11275 = vmatprep.subr.bf16.mxu1 %v13648_v23  ;;  %v13690_v23 = vld [vmem:[#allocation17 + $0x58] sm:$0xff]  }
 0x6ad   :  { %11276 = vmatpush1.bf16.msra.mxu1 %v13646_v43  ;;  %v13691_v43 = vld [vmem:[#allocation17 + $0x18] sm:$0xff]  }
 0x6ae   :  { %11277 = vmatprep.subr.bf16.mxu1 %v13651_v55  ;;  %v13692_v55 = vld [vmem:[#allocation17 + $0x50] sm:$0xff]  }
 0x6b1   :  { %11278 = vmatpush1.bf16.msra.mxu1 %v13649_v34  ;;  %v13693_v34 = vld [vmem:[#allocation17 + $0x10] sm:$0xff]  }
 0x6b2   :  { %11279 = vmatprep.subr.bf16.mxu1 %v13654_v35 }
 0x6b5   :  { %11280 = vmatpush1.bf16.msra.mxu1 %v13652_v62 }
 0x6b6   :  { %11281 = vmatprep.subr.bf16.mxu1 %v13657_v54 }
 0x6b9   :  { %11282 = vmatpush1.bf16.msra.mxu1 %v13655_v31 }
 0x6ba   :  { %11283 = vmatprep.subr.bf16.mxu1 %v13660_v29 }
 0x6bd   :  { %11284 = vmatpush2.bf16.msra.mxu1 %v13658_v52 }
 0x6be   :  { %11285 = vmatprep.subr.bf16.mxu1 %v13663_v30 }
 0x6c1   :  { %11286 = vmatpush2.bf16.msra.mxu1 %v13661_v8 }
 0x6c2   :  { %11287 = vmatprep.subr.bf16.mxu1 %v13666_v53 }
 0x6c5   :  { %11288 = vmatpush2.bf16.msra.mxu1 %v13664_v33 }
 0x6c6   :  { %11289 = vmatprep.subr.bf16.mxu1 %v13669_v13 }
 0x6c9   :  { %11290 = vmatpush2.bf16.msra.mxu1 %v13667_v60  ;;  %v13694_v60 = vld [vmem:[#allocation17 + $0x48] sm:$0xff]  }
 0x6ca   :  { %11291 = vmatprep.subr.bf16.mxu1 %v13672_v37 }
 0x6cd   :  { %11292 = vmatpush2.bf16.msra.mxu1 %v13670_v46 }
 0x6ce   :  { %11293 = vmatprep.subr.bf16.mxu1 %v13675_v2 }
 0x6d0   :  { %v10692_v11 = vpop.f32.mrf.mxu0 }
 0x6d1   :  { %11294 = vmatpush2.bf16.msra.mxu1 %v13673_v45  ;;  %v10693_v7 = vadd.f32 %v10692_v11, %v9205_v12  ;;  %v13695_v11 = vld [vmem:[#allocation17 + $0x8] sm:$0xff]   ;;  %v13698_v45 = vld [vmem:[#allocation20 + $0x38] sm:$0xff]  }
 0x6d2   :  { %v10694_v10 = vpop.f32.mrf.mxu0  ;;  %11295 = vmatprep.subr.bf16.mxu1 %v13678_v59  ;;  %v13701_v59 = vld [vmem:[#allocation20 + $0x20] sm:$0xff]  }
 0x6d4   :  { %v10696_v39 = vpop.f32.mrf.mxu0 }
 0x6d5   :  { %11296 = vmatpush2.bf16.msra.mxu1 %v13676_v36  ;;  %v13697_v39 = vld [vmem:[#allocation17] sm:$0xff]   ;;  %v10894_v36 = vld [vmem:[#allocation16] sm:$0x3] }
 0x6d6   :  { %v10697_v32 = vpop.f32.mrf.mxu0  ;;  %11297 = vmatprep.subr.bf16.mxu1 %v13681_v57 }
 0x6d7   :  { %v14032_v32 = vmov 0.0  }
 0x6d9   :  { %11298 = vmatpush2.bf16.msra.mxu1 %v13679_v3 }
 0x6da   :  { %13156 = vmatprep.subr.bf16.mxu1 %v14032_v32 }
 0x6dc   :  { %v10651_v24 = vpop.f32.mrf.mxu1 }
 0x6dd   :  { %v10652_v48 = vadd.f32 %v10651_v24, %v14504_v28  ;;  %v9209_v28 = vrot.slane %v14490_v42, %v14190_v21  ;;  %v13687_v21 = vld [vmem:[#allocation17 + $0x28] sm:$0xff]   ;;  %v13688_v42 = vld [vmem:[#allocation17 + $0x60] sm:$0xff]   ;;  %v13699_v24 = vld [vmem:[#allocation20 + $0x30] sm:$0xff]  }
 0x6de   :  { %v10653_v50 = vpop.f32.mrf.mxu1 }
 0x6df   :  { %v10654_v27 = vadd.f32 %v10653_v50, %v14507_v14  ;;  %v10822_v51 = vmax.f32 %v10652_v48, 0.0  ;;  %v10695_v44 = vadd.f32 %v10694_v10, %v9209_v28  ;;  %v13696_v10 = vld [vmem:[#allocation17 + $0x40] sm:$0xff]   ;;  %v13700_v48 = vld [vmem:[#allocation20 + $0x28] sm:$0xff]   ;;  %v13703_v28 = vld [vmem:[#allocation20 + $0x10] sm:$0xff]  }
 0x6e0   :  { %v10655_v1 = vpop.f32.mrf.mxu1  ;;  %v13702_v50 = vld [vmem:[#allocation20 + $0x18] sm:$0xff]  }
 0x6e1   :  { %v10823_v41 = vmax.f32 %v10654_v27, 0.0  ;;  %v10826_v63 = vpack.c.bf16 %v10822_v51, %v10822_v51  ;;  %v10899_v27 = vrot.slane %v10894_v36, %v14181_v18  ;;  %v10903_v51 = vrot.slane %v10894_v36, %v14187_v20  ;;  %v13704_v18 = vld [vmem:[#allocation20 + $0x8] sm:$0xff]   ;;  %v13705_v20 = vld [vmem:[#allocation20] sm:$0xff]  }
 0x6e2   :  { %v10656_v15 = vpop.f32.mrf.mxu1 }
 0x6e3   :  { %v10827_v49 = vpack.c.bf16 %v10823_v41, %v10823_v41 }
 0x6e5   :  { %11258 = vmatprep.mubr.bf16.mxu0 %v10827_v49 }
 0x6e6   :  { %11259 = vmatmul.mubr.bf16.vlgmr.msra.gmra.mxu0 %v10826_v63 }
 0x6e7   :  { %13126 = vmatpush3.bf16.msra.mxu0 %v13683_v56 }
 0x6e8   :  { %13127 = vmatprep.subr.bf16.mxu0 %v13684_v61 }
 0x6eb   :  { %13128 = vmatpush3.bf16.msra.mxu0 %v13685_v19 }
 0x6ec   :  { %13129 = vmatprep.subr.bf16.mxu0 %v13686_v17 }
 0x6ef   :  { %13130 = vmatpush3.bf16.msra.mxu0 %v13687_v21 }
 0x6f0   :  { %13131 = vmatprep.subr.bf16.mxu0 %v13688_v42 }
 0x6f3   :  { %13132 = vmatpush3.bf16.msra.mxu0 %v13689_v9 }
 0x6f4   :  { %13133 = vmatprep.subr.bf16.mxu0 %v13690_v23 }
 0x6f7   :  { %13134 = vmatpush3.bf16.msra.mxu0 %v13691_v43 }
 0x6f8   :  { %13135 = vmatprep.subr.bf16.mxu0 %v13692_v55 }
 0x6fb   :  { %13136 = vmatpush3.bf16.msra.mxu0 %v13693_v34 }
 0x6fc   :  { %13137 = vmatprep.subr.bf16.mxu0 %v13694_v60 }
 0x6ff   :  { %13138 = vmatpush3.bf16.msra.mxu0 %v13695_v11 }
 0x700   :  { %13139 = vmatprep.subr.bf16.mxu0 %v13696_v10 }
 0x703   :  { %13140 = vmatpush3.bf16.msra.mxu0 %v13697_v39 }
 0x711   :  { %v10774_v4 = vpop.f32.mrf.mxu0 }
 0x713   :  { %v10776_v5 = vpop.f32.mrf.mxu0 }
 0x715   :  { %v10778_v47 = vpop.f32.mrf.mxu0 }
 0x717   :  { %v10779_v6 = vpop.f32.mrf.mxu0 }
 0x71c   :  { %v10733_v16 = vpop.f32.mrf.mxu1 }
 0x71d   :  { %v10734_v14 = vadd.f32 %v10733_v16, %v10693_v7  ;;  %v13099_v16 = vld [vmem:[#allocation19] ss:$0 sm:$0xff] }
 0x71e   :  { %v10735_v25 = vpop.f32.mrf.mxu1 }
 0x71f   :  { %v10736_v26 = vadd.f32 %v10735_v25, %v10695_v44  ;;  %v10775_v38 = vadd.f32 %v10774_v4, %v10734_v14 }
 0x720   :  { %v10737_v22 = vpop.f32.mrf.mxu1 }
 0x721   :  { %v10777_v0 = vadd.f32 %v10776_v5, %v10736_v26 }
 0x722   :  { %v10738_v58 = vpop.f32.mrf.mxu1 }
 0x723   :  { %v13116_v58 = vld [vmem:[#allocation22] ss:$0 sm:$0xff] }
 0x75c   :  { %v10815_v35 = vpop.f32.mrf.mxu1 }
 0x75d   :  { %v10816_v62 = vadd.f32 %v10815_v35, %v10775_v38 }
 0x75e   :  { %v10817_v54 = vpop.f32.mrf.mxu1 }
 0x75f   :  { %v10818_v31 = vadd.f32 %v10817_v54, %v10777_v0  ;;  %v10824_v29 = vmax.f32 %v10816_v62, 0.0 }
 0x760   :  { %v10819_v52 = vpop.f32.mrf.mxu1 }
 0x761   :  { %v10825_v30 = vmax.f32 %v10818_v31, 0.0  ;;  %v10828_v33 = vpack.c.bf16 %v10824_v29, %v10824_v29 }
 0x762   :  { %v10820_v8 = vpop.f32.mrf.mxu1 }
 0x763   :  { %v10829_v53 = vpack.c.bf16 %v10825_v30, %v10825_v30 }
 0x765   :  { %11299 = vmatprep.mubr.bf16.mxu1 %v10829_v53 }
 0x766   :  { %11300 = vmatmul.mubr.bf16.vlgmr.msra.gmra.mxu1 %v10828_v33 }
 0x767   :  { %13157 = vmatpush3.bf16.msra.mxu1 %v13698_v45  ;;  %13172 = vmatprep.mubr.msk.bf16.mxu1 %vm14033_vm0, %v14032_v32 }
 0x768   :  { %13158 = vmatprep.subr.bf16.mxu1 %v14032_v32 }
 0x76b   :  { %13159 = vmatpush3.bf16.msra.mxu1 %v13699_v24 }
 0x76c   :  { %13160 = vmatprep.subr.bf16.mxu1 %v14032_v32 }
 0x76f   :  { %13161 = vmatpush3.bf16.msra.mxu1 %v13700_v48 }
 0x770   :  { %13162 = vmatprep.subr.bf16.mxu1 %v14032_v32 }
 0x773   :  { %13163 = vmatpush3.bf16.msra.mxu1 %v13701_v59 }
 0x774   :  { %13164 = vmatprep.subr.bf16.mxu1 %v14032_v32 }
 0x777   :  { %13165 = vmatpush3.bf16.msra.mxu1 %v13702_v50 }
 0x778   :  { %13166 = vmatprep.subr.bf16.mxu1 %v14032_v32 }
 0x77b   :  { %13167 = vmatpush3.bf16.msra.mxu1 %v13703_v28 }
 0x77c   :  { %13168 = vmatprep.subr.bf16.mxu1 %v14032_v32 }
 0x77f   :  { %13169 = vmatpush3.bf16.msra.mxu1 %v13704_v18 }
 0x780   :  { %13170 = vmatprep.subr.bf16.mxu1 %v14032_v32 }
 0x783   :  { %13171 = vmatpush3.bf16.msra.mxu1 %v13705_v20 }
 0x7a6   :  { %v11260_v13 = vpop.f32.mrf.mxu0 }
 0x7a7   :  { %v11261_v1 = vadd.f32 %v11260_v13, %v10899_v27 }
 0x7a8   :  { %v11262_v37 = vpop.f32.mrf.mxu0 }
 0x7a9   :  { %v11263_v57 = vadd.f32 %v11262_v37, %v10903_v51 }
 0x7aa   :  { %v11264_v46 = vpop.f32.mrf.mxu0 }
 0x7ac   :  { %v11265_v2 = vpop.f32.mrf.mxu0 }
 0x826   :  { %v11301_v41 = vpop.f32.mrf.mxu1 }
 0x827   :  { %v11302_v15 = vadd.f32 %v11301_v41, %v11261_v1 }
 0x828   :  { %v11303_v3 = vpop.f32.mrf.mxu1 }
 0x829   :  { %v11304_v49 = vadd.f32 %v11303_v3, %v11263_v57  ;;  %v11308_v63 = vmax.f32 %v11302_v15, 0.0 }
 0x82a   :  { %v11305_v4 = vpop.f32.mrf.mxu1 }
 0x82b   :  { %v11309_v5 = vmax.f32 %v11304_v49, 0.0  ;;  %v11310_v6 = vpack.c.bf16 %v11308_v63, %v11308_v63 }
 0x82c   :  { %v11306_v47 = vpop.f32.mrf.mxu1 }
 0x82d   :  { %v11311_v12 = vpack.c.bf16 %v11309_v5, %v11309_v5 }
 0x82f   :  { %11479 = vmatprep.mubr.bf16.mxu0 %v11311_v12 }
 0x830   :  { %11480 = vmatmul.mubr.bf16.vlgmr.msra.gmra.mxu0 %v11310_v6 }
 0x8f0   :  { %v13141_v7 = vpop.f32.mrf.mxu0 }
 0x8f2   :  { %v13142_v44 = vpop.f32.mrf.mxu0 }
 0x8f3   :  { %v13143_v14 = vadd.f32 %v13142_v44, %v13141_v7 }
 0x8f4   :  { %v13144_v25 = vpop.f32.mrf.mxu0 }
 0x8f5   :  { %v11482_v26 = vadd.f32 %v13143_v14, %v13099_v16 }
 0x8f6   :  { %v13145_v38 = vpop.f32.mrf.mxu0 }
 0x8f7   :  { %v11487_v22 = vmax.f32 %v11482_v26, 0.0 }
 0x8f9   :  { %v11488_v0 = vpack.c.bf16 %v11487_v22, %v11487_v22 }
 0x8fb   :  { %13173 = vmatmul.mubr.bf16.vlgmr.msra.gmra.mxu1 %v11488_v0 }
 0x9bb   :  { %v11594_v40 = vpop.f32.mrf.mxu1 }
 0x9bc   :  { %v11595_v56 = vadd.f32 %v13116_v58, %v11594_v40 }
 0x9bd   :  { %v13174_v61 = vpop.f32.mrf.mxu1 }
 0x9be   :  { %v11600_v19 = vsub.f32 0.0, %v11595_v56 }
 0x9bf   :  { %v11597_v17 = vpop.f32.mrf.mxu1 }
 0x9c0   :  { %v11601_v21 = vmul.f32 1.442695, %v11600_v19 }
 0x9c1   :  { %v13175_v42 = vpop.f32.mrf.mxu1 }
 0x9c2   :  { %13706 = vpow2.f32 %v11601_v21 }
 0x9cf   :  { %v13707_v9 = vpop.eup %13706 }
 0x9d0   :  { %v11603_v23 = vadd.f32 1.0, %v13707_v9 }
 0x9d2   :  { %13708 = vrcp.f32 %v11603_v23 }
 0x9df   :  { %v13709_v43 = vpop.eup %13708 }
 0x9e0   :  { %11605 = vst [vmem:[#allocation23] sm:$0xff] %v13709_v43 }
 0x9e1   :  { %13984 = shalt.err (!%p13981_p13)
}
 0x9e2   :  { %11615 = dma.vmem_to_hbm [thread:$0]  %s11613_s12, 128, %s14534_s13, [#allocation4]  }
 0x9e3   :  { %14007 = dma.done.wait [#allocation4], 128  }
 0x9e4   :  { %14008 = vsyncadd [#allocation4], 4294967168 }
 0x9e5   :  { %11619 = vsyncpa [#allocation3], 1 }
 0x9e6   :  { %11620 = vsyncpa [#allocation6], 1 }
 0x9e7   :  { %11621 = vsyncpa [#allocation9], 1 }
 0x9e8   :  { %11622 = vsyncpa [#allocation12], 1 }
 0x9e9   :  { %11623 = vsyncpa [#allocation15], 1 }
 0x9ea   :  { %11624 = vsyncpa [#allocation18], 1 }
 0x9eb   :  { %11625 = vsyncpa [#allocation21], 1 }
 0x9ec   :  { %11626 = vsyncpa [#allocation4], 1 }

</bundles_post_ra>
